<compile_context>
chip_gen: v6e
topology: v6e:2x2x1
jax: 0.10.0
libtpu: 0.0.40
codegen_flags: <defaults>
</compile_context>

<pallas_src>
import functools
import math

import jax
import jax.numpy as jnp
from jax import lax
from jax.experimental import pallas as pl
from jax.experimental.pallas import tpu as pltpu

EMB_DIMS = 64
BN_EPS = 1e-5
CONV_OUT = (64, 64, 64, 128, EMB_DIMS)   # output channels of the 5 pointnet convs
C_MAX = max(CONV_OUT)                    # 128: row count of the packed const buffer

# MLP-head dims (emb_dims=64 -> 128 / 32 / 16 / 8)
H_IN = 2 * EMB_DIMS
H1, H2, H3 = EMB_DIMS // 2, EMB_DIMS // 4, EMB_DIMS // 8
HW_OFF1 = H_IN                    # 128: start of w2
HW_OFF2 = HW_OFF1 + H1            # 160: start of w3
HW_OFF3 = HW_OFF2 + H2            # 176: start of wr
HW_OFF4 = HW_OFF3 + H3            # 184: start of wt
HW_END = HW_OFF4 + H3             # 192
HW_WIDTH = 256                    # lane-padded packed head-weight width

# conv2..5 packed into one bf16 buffer: (row_offset, c_out, c_in) per layer
WP_LAYOUT = ((0, 64, 64), (64, 64, 64), (128, 128, 64), (256, EMB_DIMS, 128))
WP_ROWS = 320


def _full_spec(shape):
    nd = len(shape)
    return pl.BlockSpec(shape, lambda i, _n=nd: (0,) * _n)


def _vmem_limit_bytes():
    cap = 128 * 1024 * 1024
    try:
        info = pltpu.get_tpu_info()
        cap = int(getattr(info, "vmem_capacity_bytes", cap) or cap)
    except Exception:
        pass
    # 48 MiB is fine on v5e/v6e (128 MiB physical); on v7x (64 MiB) leave DMA headroom.
    return max(16 * 1024 * 1024, min(48 * 1024 * 1024, int(0.6 * cap)))


_COMPILER_PARAMS = pltpu.CompilerParams(
    dimension_semantics=("arbitrary",),
    vmem_limit_bytes=_vmem_limit_bytes(),
)


# --------------------------------------------------------------------------- #
# Shared PointNet trunk (used by both kernels)
# --------------------------------------------------------------------------- #
def _pointnet_trunk(x0, x1, x2, wp, cp, inv_l):
    """conv1 on the VPU, conv2..5 on the MXU (bf16 operands, f32 accumulate),
    single-pass training-mode BatchNorm + ReLU after every layer.

    x0/x1/x2: (1, L) f32 channel rows of the (possibly transformed) point cloud.
    wp: (320, 128) bf16 packed conv2..5 weights.  cp: (128, 13) f32 packed
    gamma/beta pairs (cols 0..9) + conv1 weight (cols 10..12).
    Returns the (EMB_DIMS, L) f32 embedding (pre-pooling)."""

    def bn_relu(y, layer, c_out, out_dtype):
        g = cp[0:c_out, 2 * layer:2 * layer + 1]
        b = cp[0:c_out, 2 * layer + 1:2 * layer + 2]
        mean = jnp.sum(y, axis=1, keepdims=True) * inv_l
        ex2 = jnp.sum(y * y, axis=1, keepdims=True) * inv_l
        var = jnp.maximum(ex2 - mean * mean, 0.0)        # biased variance (train mode)
        scale = g * lax.rsqrt(var + BN_EPS)
        shift = b - mean * scale
        # bf16 cast fused with the ReLU write for layers that feed the MXU.
        return jnp.maximum(y * scale + shift, 0.0).astype(out_dtype)

    # conv1 (K=3): three VPU broadcast-FMAs (MXU would be ~2% utilized at K=3).
    y = (cp[0:CONV_OUT[0], 10:11] * x0
         + cp[0:CONV_OUT[0], 11:12] * x1
         + cp[0:CONV_OUT[0], 12:13] * x2)                # (64, L) f32
    h = bn_relu(y, 0, CONV_OUT[0], jnp.bfloat16)

    # conv2..5: bf16 MXU matmuls out of the packed weight buffer.
    for layer, (r0, c_out, c_in) in enumerate(WP_LAYOUT, start=1):
        w = wp[r0:r0 + c_out, 0:c_in]                    # bf16 (c_out, c_in)
        y = jnp.dot(w, h, preferred_element_type=jnp.float32)
        out_dt = jnp.bfloat16 if layer < 4 else jnp.float32
        h = bn_relu(y, layer, c_out, out_dt)
    return h                                             # (EMB_DIMS, L) f32


# --------------------------------------------------------------------------- #
# Kernel 1: tgt embedding (trunk + fused max-pool + identity-pointer x2)
# --------------------------------------------------------------------------- #
def pointnet_pool_kernel(x_ref, wp_ref, cp_ref, feat_ref, *, batch, npts):
    inv_l = 1.0 / float(batch * npts)
    x = x_ref[...]                                       # (3, B*N) f32
    h = _pointnet_trunk(x[0:1, :], x[1:2, :], x[2:3, :],
                        wp_ref[...], cp_ref[...], inv_l)
    # Direct per-cloud column stores (no width-1 concatenates). npts % 128 == 0.
    for b in range(batch):
        col = jnp.max(h[:, b * npts:(b + 1) * npts], axis=1, keepdims=True)
        feat_ref[:, b:b + 1] = 2.0 * col                 # identity-pointer residual (x2)


# --------------------------------------------------------------------------- #
# Kernel 2: one fused DCP refinement iteration
#   rigid transform of the ORIGINAL src by the cumulative pose (lane-expanded
#   coefficients -> pure VPU FMAs), PointNet trunk, max-pool (+x2), MLP head.
# --------------------------------------------------------------------------- #
def dcp_iter_kernel(rl_ref, tl_ref, x_ref, wp_ref, cp_ref, tgt_ref, hw_ref, hv_ref,
                    rot_ref, trans_ref, hcat_scr, *, batch, npts):
    inv_l = 1.0 / float(batch * npts)
    inv_b = 1.0 / float(batch)

    # ---- prologue: x' = R_cum @ x + t_cum, per-lane coefficients -------------
    x = x_ref[...]                                       # (3, L) original src
    rl = rl_ref[...]                                     # (9, L) lane-expanded R rows
    tl = tl_ref[...]                                     # (3, L) lane-expanded t
    x0, x1, x2 = x[0:1, :], x[1:2, :], x[2:3, :]
    xt0 = rl[0:1] * x0 + rl[1:2] * x1 + rl[2:3] * x2 + tl[0:1]
    xt1 = rl[3:4] * x0 + rl[4:5] * x1 + rl[5:6] * x2 + tl[1:2]
    xt2 = rl[6:7] * x0 + rl[7:8] * x1 + rl[8:9] * x2 + tl[2:3]

    h = _pointnet_trunk(xt0, xt1, xt2, wp_ref[...], cp_ref[...], inv_l)

    # ---- pooled features assembled with direct stores (no concatenates) -------
    for b in range(batch):
        col = jnp.max(h[:, b * npts:(b + 1) * npts], axis=1, keepdims=True)
        hcat_scr[0:EMB_DIMS, b:b + 1] = 2.0 * col        # src pooled (x2 residual)
    hcat_scr[EMB_DIMS:2 * EMB_DIMS, :] = tgt_ref[...]    # tgt pooled (already x2)
    hcat = hcat_scr[...]                                 # (2*EMB, B) f32

    # ---- fused MLP head (f32 matmuls; BN over the B batch columns) -----------
    hw = hw_ref[...]                                     # (32, 256) packed weights
    hv = hv_ref[...]                                     # (32, 11)  packed vectors

    def lin_bn_relu(hin, w, bias, g, beta):
        y = jnp.dot(w, hin, preferred_element_type=jnp.float32) + bias
        mean = jnp.sum(y, axis=1, keepdims=True) * inv_b
        ex2 = jnp.sum(y * y, axis=1, keepdims=True) * inv_b
        var = jnp.maximum(ex2 - mean * mean, 0.0)
        scale = g * lax.rsqrt(var + BN_EPS)
        shift = beta - mean * scale
        return jnp.maximum(y * scale + shift, 0.0)

    h1 = lin_bn_relu(hcat, hw[0:H1, 0:H_IN],
                     hv[0:H1, 0:1], hv[0:H1, 1:2], hv[0:H1, 2:3])
    h2 = lin_bn_relu(h1, hw[0:H2, HW_OFF1:HW_OFF2],
                     hv[0:H2, 3:4], hv[0:H2, 4:5], hv[0:H2, 5:6])
    h3 = lin_bn_relu(h2, hw[0:H3, HW_OFF2:HW_OFF3],
                     hv[0:H3, 6:7], hv[0:H3, 7:8], hv[0:H3, 8:9])

    rot = (jnp.dot(hw[0:4, HW_OFF3:HW_OFF4], h3, preferred_element_type=jnp.float32)
           + hv[0:4, 9:10])                              # (4, B)
    norm = jnp.sqrt(jnp.sum(rot * rot, axis=0, keepdims=True))
    rot_ref[...] = rot / jnp.maximum(norm, 1e-12)        # eps-clamped unit quaternion
    trans_ref[...] = (jnp.dot(hw[0:3, HW_OFF4:HW_END], h3,
                              preferred_element_type=jnp.float32)
                      + hv[0:3, 10:11])                  # (3, B)


# --------------------------------------------------------------------------- #
# pallas_call wrappers
# --------------------------------------------------------------------------- #
def pointnet_pooled(x_flat, pp, batch, npts):
    # x_flat: (3, B*N) f32  ->  (EMB_DIMS, B) pooled (and x2) features
    args = (x_flat, pp["wp"], pp["cp"])
    kernel = functools.partial(pointnet_pool_kernel, batch=batch, npts=npts)
    return pl.pallas_call(
        kernel,
        grid=(1,),
        in_specs=[_full_spec(a.shape) for a in args],
        out_specs=_full_spec((EMB_DIMS, batch)),
        out_shape=jax.ShapeDtypeStruct((EMB_DIMS, batch), jnp.float32),
        compiler_params=_COMPILER_PARAMS,
    )(*args)


def dcp_iteration(r_lane, t_lane, x_flat, tgt_feat, pp, batch, npts):
    # One fused refinement iteration; returns rot quaternion (B,4) and trans (B,3).
    args = (r_lane, t_lane, x_flat, pp["wp"], pp["cp"], tgt_feat, pp["hw"], pp["hv"])
    kernel = functools.partial(dcp_iter_kernel, batch=batch, npts=npts)
    rot, trans = pl.pallas_call(
        kernel,
        grid=(1,),
        in_specs=[_full_spec(a.shape) for a in args],
        out_specs=(_full_spec((4, batch)), _full_spec((3, batch))),
        out_shape=(jax.ShapeDtypeStruct((4, batch), jnp.float32),
                   jax.ShapeDtypeStruct((3, batch), jnp.float32)),
        scratch_shapes=[pltpu.VMEM((2 * EMB_DIMS, batch), jnp.float32)],
        compiler_params=_COMPILER_PARAMS,
    )(*args)
    return rot.T, trans.T


# --------------------------------------------------------------------------- #
# Glue (plain JAX): quat2mat, 3x3 pose composition, DCP outer loop
# --------------------------------------------------------------------------- #
def quat2mat(quat):
    # TODO(synk): quat2mat is referenced but not defined in the provided snippet; standard DCP impl used.
    x, y, z, w = quat[:, 0], quat[:, 1], quat[:, 2], quat[:, 3]
    B = quat.shape[0]
    w2, x2, y2, z2 = w * w, x * x, y * y, z * z
    wx, wy, wz = w * x, w * y, w * z
    xy, xz, yz = x * y, x * z, y * z
    rot = jnp.stack([w2 + x2 - y2 - z2, 2 * xy - 2 * wz, 2 * wy + 2 * xz,
                     2 * wz + 2 * xy, w2 - x2 + y2 - z2, 2 * yz - 2 * wx,
                     2 * xz - 2 * wy, 2 * wx + 2 * yz, w2 - x2 - y2 + z2], axis=1)
    return rot.reshape(B, 3, 3)


@jax.jit
def dcp_forward(src, tgt, pp):
    # src, tgt: (B, 3, N) float32 (PyTorch NCW convention); pp: pre-packed params.
    B, _, N = src.shape
    assert N % 128 == 0, "npts must be a multiple of 128 (lane-aligned per-cloud blocks)"

    # NCW -> channel-major (3, B*N), done exactly once per tensor.
    src_flat = jnp.transpose(src, (1, 0, 2)).reshape(3, B * N)
    tgt_flat = jnp.transpose(tgt, (1, 0, 2)).reshape(3, B * N)

    # tgt never changes across refinement iterations -> embed it once (hoisted).
    tgt_feat = pointnet_pooled(tgt_flat, pp, B, N)       # (EMB, B), x2 residual fused

    eye = jnp.broadcast_to(jnp.eye(3, dtype=jnp.float32), (B, 3, 3))
    R_ab, R_ba = eye, eye
    t_ab = jnp.zeros((B, 3), jnp.float32)
    t_ba = jnp.zeros((B, 3), jnp.float32)

    for _ in range(3):
        # Lane-expanded cumulative pose: the kernel applies (R_ab, t_ab) to the ORIGINAL
        # src, equivalent to iteratively transforming src (up to f32 rounding).
        r_lane = jnp.broadcast_to(R_ab.reshape(B, 9).T[:, :, None],
                                  (9, B, N)).reshape(9, B * N)
        t_lane = jnp.broadcast_to(t_ab.T[:, :, None], (3, B, N)).reshape(3, B * N)

        rot_q, trans_i = dcp_iteration(r_lane, t_lane, src_flat, tgt_feat, pp, B, N)
        R_i = quat2mat(rot_q)                            # (B, 3, 3)

        # cycle == False branch
        R_i_T = jnp.transpose(R_i, (0, 2, 1))
        t_ba_i = -jnp.squeeze(jnp.matmul(R_i_T, trans_i[:, :, None]), -1)

        R_ab = jnp.matmul(R_i, R_ab)
        R_ba = jnp.matmul(R_i_T, R_ba)
        t_ab = jnp.squeeze(jnp.matmul(R_i, t_ab[:, :, None]), -1) + trans_i
        t_ba = jnp.squeeze(jnp.matmul(R_i_T, t_ba[:, :, None]), -1) + t_ba_i

    return R_ab, t_ab, R_ba, t_ba


# --------------------------------------------------------------------------- #
# Parameter init (PyTorch-style uniform) + one-time packing (hoisted out of jit)
# --------------------------------------------------------------------------- #
def init_dcp_params(key):
    keys = iter(jax.random.split(key, 64))

    def uni(shape, fan_in):
        bound = 1.0 / math.sqrt(float(fan_in))
        return jax.random.uniform(next(keys), shape, jnp.float32, -bound, bound)

    conv_dims = [(64, 3), (64, 64), (64, 64), (128, 64), (EMB_DIMS, 128)]
    emb = {
        "w": [uni((o, i), i) for o, i in conv_dims],
        "gamma": [jnp.ones((o, 1), jnp.float32) for o, _ in conv_dims],
        "beta": [jnp.zeros((o, 1), jnp.float32) for o, _ in conv_dims],
    }

    lin_dims = [(H1, H_IN), (H2, H1), (H3, H2)]
    head = {}
    for n, (o, i) in zip((1, 2, 3), lin_dims):
        head[f"w{n}"] = uni((o, i), i)
        head[f"b{n}"] = uni((o, 1), i)
        head[f"g{n}"] = jnp.ones((o, 1), jnp.float32)
        head[f"be{n}"] = jnp.zeros((o, 1), jnp.float32)
    head["wr"] = uni((4, H3), H3)
    head["br"] = uni((4, 1), H3)
    head["wt"] = uni((3, H3), H3)
    head["bt"] = uni((3, 1), H3)
    return {"emb": emb, "head": head}


def prepare_dcp_params(params):
    """One-time packing (runs once at setup, NOT inside the jitted forward):
       conv2..5 -> (320,128) bf16; conv1 + 5x(gamma,beta) -> (128,13) f32;
       the 16 MLP-head tensors -> (32,256) weights + (32,11) vectors."""
    emb, head = params["emb"], params["head"]

    wp = jnp.zeros((WP_ROWS, 128), jnp.bfloat16)
    for (r0, c_out, c_in), w in zip(WP_LAYOUT, emb["w"][1:]):
        wp = wp.at[r0:r0 + c_out, 0:c_in].set(w.astype(jnp.bfloat16))

    cp = jnp.zeros((C_MAX, 13), jnp.float32)
    for l, (g, b) in enumerate(zip(emb["gamma"], emb["beta"])):
        c = g.shape[0]
        cp = cp.at[0:c, 2 * l:2 * l + 1].set(g)
        cp = cp.at[0:c, 2 * l + 1:2 * l + 2].set(b)
    cp = cp.at[0:CONV_OUT[0], 10:13].set(emb["w"][0])    # conv1 weight (64, 3)

    hw = jnp.zeros((H1, HW_WIDTH), jnp.float32)
    hw = hw.at[0:H1, 0:H_IN].set(head["w1"])
    hw = hw.at[0:H2, HW_OFF1:HW_OFF2].set(head["w2"])
    hw = hw.at[0:H3, HW_OFF2:HW_OFF3].set(head["w3"])
    hw = hw.at[0:4, HW_OFF3:HW_OFF4].set(head["wr"])
    hw = hw.at[0:3, HW_OFF4:HW_END].set(head["wt"])

    hv = jnp.zeros((H1, 11), jnp.float32)
    for l, c in zip((1, 2, 3), (H1, H2, H3)):
        base = 3 * (l - 1)
        hv = hv.at[0:c, base + 0:base + 1].set(head[f"b{l}"])
        hv = hv.at[0:c, base + 1:base + 2].set(head[f"g{l}"])
        hv = hv.at[0:c, base + 2:base + 3].set(head[f"be{l}"])
    hv = hv.at[0:4, 9:10].set(head["br"])
    hv = hv.at[0:3, 10:11].set(head["bt"])

    return {"wp": wp, "cp": cp, "hw": hw, "hv": hv}


if __name__ == "__main__":
    key = jax.random.PRNGKey(0)
    k_src, k_tgt, k_par = jax.random.split(key, 3)

    B, N = 2, 128
    src = jax.random.normal(k_src, (B, 3, N), jnp.float32)   # PyTorch NCW layout
    tgt = jax.random.normal(k_tgt, (B, 3, N), jnp.float32)

    params = init_dcp_params(k_par)
    pp = prepare_dcp_params(params)     # param packing hoisted out of the forward

    R_ab, t_ab, R_ba, t_ba = dcp_forward(src, tgt, pp)
    jax.block_until_ready((R_ab, t_ab, R_ba, t_ba))

    assert R_ab.shape == (B, 3, 3) and t_ab.shape == (B, 3)
    assert R_ba.shape == (B, 3, 3) and t_ba.shape == (B, 3)
    assert bool(jnp.all(jnp.isfinite(R_ab))) and bool(jnp.all(jnp.isfinite(t_ab)))
    print("KERNEL_OK")
</pallas_src>

<mosaic_0001>
module attributes {stable_mosaic.version = 11 : i64} {
  func.func @pointnet_pool_kernel(%arg0: i32, %arg1: memref<3x256xf32, #tpu.memory_space<vmem>>, %arg2: memref<320x128xbf16, #tpu.memory_space<vmem>>, %arg3: memref<128x13xf32, #tpu.memory_space<vmem>>, %arg4: memref<64x2xf32, #tpu.memory_space<vmem>>) attributes {dimension_semantics = [#tpu.dimension_semantics<arbitrary>], iteration_bounds = array<i64: 1>, scalar_prefetch = 0 : i64, scratch_operands = 0 : i64, tpu.core_type = #tpu.core_type<tc>, window_params = [{pipeline_mode = #tpu.pipeline_mode<synchronous>, transform_indices = @transform_0, window_bounds = array<i64: 3, 256>}, {pipeline_mode = #tpu.pipeline_mode<synchronous>, transform_indices = @transform_1, window_bounds = array<i64: 320, 128>}, {pipeline_mode = #tpu.pipeline_mode<synchronous>, transform_indices = @transform_2, window_bounds = array<i64: 128, 13>}, {pipeline_mode = #tpu.pipeline_mode<synchronous>, transform_indices = @transform_3, window_bounds = array<i64: 64, 2>}]} {
    %c0 = arith.constant 0 : index
    %c0_0 = arith.constant 0 : index
    %0 = vector.load %arg1[%c0, %c0_0] : memref<3x256xf32, #tpu.memory_space<vmem>>, vector<3x256xf32>
    %1 = vector.extract_strided_slice %0 {offsets = [0, 0], sizes = [1, 256], strides = [1, 1]} : vector<3x256xf32> to vector<1x256xf32>
    %2 = vector.extract_strided_slice %0 {offsets = [1, 0], sizes = [1, 256], strides = [1, 1]} : vector<3x256xf32> to vector<1x256xf32>
    %3 = vector.extract_strided_slice %0 {offsets = [2, 0], sizes = [1, 256], strides = [1, 1]} : vector<3x256xf32> to vector<1x256xf32>
    %c0_1 = arith.constant 0 : index
    %c0_2 = arith.constant 0 : index
    %4 = vector.load %arg2[%c0_1, %c0_2] : memref<320x128xbf16, #tpu.memory_space<vmem>>, vector<320x128xbf16>
    %c0_3 = arith.constant 0 : index
    %c0_4 = arith.constant 0 : index
    %5 = vector.load %arg3[%c0_3, %c0_4] : memref<128x13xf32, #tpu.memory_space<vmem>>, vector<128x13xf32>
    %6 = vector.extract_strided_slice %5 {offsets = [0, 10], sizes = [64, 1], strides = [1, 1]} : vector<128x13xf32> to vector<64x1xf32>
    %7 = vector.broadcast %6 : vector<64x1xf32> to vector<64x256xf32>
    %8 = vector.broadcast %1 : vector<1x256xf32> to vector<64x256xf32>
    %9 = arith.mulf %7, %8 : vector<64x256xf32>
    %10 = vector.extract_strided_slice %5 {offsets = [0, 11], sizes = [64, 1], strides = [1, 1]} : vector<128x13xf32> to vector<64x1xf32>
    %11 = vector.broadcast %10 : vector<64x1xf32> to vector<64x256xf32>
    %12 = vector.broadcast %2 : vector<1x256xf32> to vector<64x256xf32>
    %13 = arith.mulf %11, %12 : vector<64x256xf32>
    %14 = arith.addf %9, %13 : vector<64x256xf32>
    %15 = vector.extract_strided_slice %5 {offsets = [0, 12], sizes = [64, 1], strides = [1, 1]} : vector<128x13xf32> to vector<64x1xf32>
    %16 = vector.broadcast %15 : vector<64x1xf32> to vector<64x256xf32>
    %17 = vector.broadcast %3 : vector<1x256xf32> to vector<64x256xf32>
    %18 = arith.mulf %16, %17 : vector<64x256xf32>
    %19 = arith.addf %14, %18 : vector<64x256xf32>
    %20 = vector.extract_strided_slice %5 {offsets = [0, 0], sizes = [64, 1], strides = [1, 1]} : vector<128x13xf32> to vector<64x1xf32>
    %21 = vector.extract_strided_slice %5 {offsets = [0, 1], sizes = [64, 1], strides = [1, 1]} : vector<128x13xf32> to vector<64x1xf32>
    %cst = arith.constant dense<0.000000e+00> : vector<64xf32>
    %22 = vector.multi_reduction <add>, %19, %cst [1] : vector<64x256xf32> to vector<64xf32>
    %23 = vector.shape_cast %22 : vector<64xf32> to vector<64x1xf32>
    %cst_5 = arith.constant 3.906250e-03 : f32
    %24 = vector.broadcast %cst_5 : f32 to vector<64x1xf32>
    %25 = arith.mulf %23, %24 : vector<64x1xf32>
    %26 = arith.mulf %19, %19 : vector<64x256xf32>
    %cst_6 = arith.constant dense<0.000000e+00> : vector<64xf32>
    %27 = vector.multi_reduction <add>, %26, %cst_6 [1] : vector<64x256xf32> to vector<64xf32>
    %28 = vector.shape_cast %27 : vector<64xf32> to vector<64x1xf32>
    %cst_7 = arith.constant 3.906250e-03 : f32
    %29 = vector.broadcast %cst_7 : f32 to vector<64x1xf32>
    %30 = arith.mulf %28, %29 : vector<64x1xf32>
    %31 = arith.mulf %25, %25 : vector<64x1xf32>
    %32 = arith.subf %30, %31 : vector<64x1xf32>
    %cst_8 = arith.constant 0.000000e+00 : f32
    %33 = vector.broadcast %cst_8 : f32 to vector<64x1xf32>
    %34 = arith.maximumf %32, %33 : vector<64x1xf32>
    %cst_9 = arith.constant 9.99999974E-6 : f32
    %35 = vector.broadcast %cst_9 : f32 to vector<64x1xf32>
    %36 = arith.addf %34, %35 : vector<64x1xf32>
    %37 = math.rsqrt %36 : vector<64x1xf32>
    %38 = arith.mulf %20, %37 : vector<64x1xf32>
    %39 = arith.mulf %25, %38 : vector<64x1xf32>
    %40 = arith.subf %21, %39 : vector<64x1xf32>
    %41 = vector.broadcast %38 : vector<64x1xf32> to vector<64x256xf32>
    %42 = arith.mulf %19, %41 : vector<64x256xf32>
    %43 = vector.broadcast %40 : vector<64x1xf32> to vector<64x256xf32>
    %44 = arith.addf %42, %43 : vector<64x256xf32>
    %cst_10 = arith.constant 0.000000e+00 : f32
    %45 = vector.broadcast %cst_10 : f32 to vector<64x256xf32>
    %46 = arith.maximumf %44, %45 : vector<64x256xf32>
    %47 = arith.truncf %46 : vector<64x256xf32> to vector<64x256xbf16>
    %48 = vector.extract_strided_slice %4 {offsets = [0, 0], sizes = [64, 64], strides = [1, 1]} : vector<320x128xbf16> to vector<64x64xbf16>
    %cst_11 = arith.constant dense<0.000000e+00> : vector<64x256xf32>
    %49 = tpu.matmul %48, %47, %cst_11 {dimension_numbers = #tpu.dot_dimension_numbers<[1], [0], [0], [1], [0, 0, 1, 1], [], []>} : vector<64x64xbf16>, vector<64x256xbf16>, vector<64x256xf32> -> vector<64x256xf32>
    %50 = vector.extract_strided_slice %5 {offsets = [0, 2], sizes = [64, 1], strides = [1, 1]} : vector<128x13xf32> to vector<64x1xf32>
    %51 = vector.extract_strided_slice %5 {offsets = [0, 3], sizes = [64, 1], strides = [1, 1]} : vector<128x13xf32> to vector<64x1xf32>
    %cst_12 = arith.constant dense<0.000000e+00> : vector<64xf32>
    %52 = vector.multi_reduction <add>, %49, %cst_12 [1] : vector<64x256xf32> to vector<64xf32>
    %53 = vector.shape_cast %52 : vector<64xf32> to vector<64x1xf32>
    %cst_13 = arith.constant 3.906250e-03 : f32
    %54 = vector.broadcast %cst_13 : f32 to vector<64x1xf32>
    %55 = arith.mulf %53, %54 : vector<64x1xf32>
    %56 = arith.mulf %49, %49 : vector<64x256xf32>
    %cst_14 = arith.constant dense<0.000000e+00> : vector<64xf32>
    %57 = vector.multi_reduction <add>, %56, %cst_14 [1] : vector<64x256xf32> to vector<64xf32>
    %58 = vector.shape_cast %57 : vector<64xf32> to vector<64x1xf32>
    %cst_15 = arith.constant 3.906250e-03 : f32
    %59 = vector.broadcast %cst_15 : f32 to vector<64x1xf32>
    %60 = arith.mulf %58, %59 : vector<64x1xf32>
    %61 = arith.mulf %55, %55 : vector<64x1xf32>
    %62 = arith.subf %60, %61 : vector<64x1xf32>
    %cst_16 = arith.constant 0.000000e+00 : f32
    %63 = vector.broadcast %cst_16 : f32 to vector<64x1xf32>
    %64 = arith.maximumf %62, %63 : vector<64x1xf32>
    %cst_17 = arith.constant 9.99999974E-6 : f32
    %65 = vector.broadcast %cst_17 : f32 to vector<64x1xf32>
    %66 = arith.addf %64, %65 : vector<64x1xf32>
    %67 = math.rsqrt %66 : vector<64x1xf32>
    %68 = arith.mulf %50, %67 : vector<64x1xf32>
    %69 = arith.mulf %55, %68 : vector<64x1xf32>
    %70 = arith.subf %51, %69 : vector<64x1xf32>
    %71 = vector.broadcast %68 : vector<64x1xf32> to vector<64x256xf32>
    %72 = arith.mulf %49, %71 : vector<64x256xf32>
    %73 = vector.broadcast %70 : vector<64x1xf32> to vector<64x256xf32>
    %74 = arith.addf %72, %73 : vector<64x256xf32>
    %cst_18 = arith.constant 0.000000e+00 : f32
    %75 = vector.broadcast %cst_18 : f32 to vector<64x256xf32>
    %76 = arith.maximumf %74, %75 : vector<64x256xf32>
    %77 = arith.truncf %76 : vector<64x256xf32> to vector<64x256xbf16>
    %78 = vector.extract_strided_slice %4 {offsets = [64, 0], sizes = [64, 64], strides = [1, 1]} : vector<320x128xbf16> to vector<64x64xbf16>
    %cst_19 = arith.constant dense<0.000000e+00> : vector<64x256xf32>
    %79 = tpu.matmul %78, %77, %cst_19 {dimension_numbers = #tpu.dot_dimension_numbers<[1], [0], [0], [1], [0, 0, 1, 1], [], []>} : vector<64x64xbf16>, vector<64x256xbf16>, vector<64x256xf32> -> vector<64x256xf32>
    %80 = vector.extract_strided_slice %5 {offsets = [0, 4], sizes = [64, 1], strides = [1, 1]} : vector<128x13xf32> to vector<64x1xf32>
    %81 = vector.extract_strided_slice %5 {offsets = [0, 5], sizes = [64, 1], strides = [1, 1]} : vector<128x13xf32> to vector<64x1xf32>
    %cst_20 = arith.constant dense<0.000000e+00> : vector<64xf32>
    %82 = vector.multi_reduction <add>, %79, %cst_20 [1] : vector<64x256xf32> to vector<64xf32>
    %83 = vector.shape_cast %82 : vector<64xf32> to vector<64x1xf32>
    %cst_21 = arith.constant 3.906250e-03 : f32
    %84 = vector.broadcast %cst_21 : f32 to vector<64x1xf32>
    %85 = arith.mulf %83, %84 : vector<64x1xf32>
    %86 = arith.mulf %79, %79 : vector<64x256xf32>
    %cst_22 = arith.constant dense<0.000000e+00> : vector<64xf32>
    %87 = vector.multi_reduction <add>, %86, %cst_22 [1] : vector<64x256xf32> to vector<64xf32>
    %88 = vector.shape_cast %87 : vector<64xf32> to vector<64x1xf32>
    %cst_23 = arith.constant 3.906250e-03 : f32
    %89 = vector.broadcast %cst_23 : f32 to vector<64x1xf32>
    %90 = arith.mulf %88, %89 : vector<64x1xf32>
    %91 = arith.mulf %85, %85 : vector<64x1xf32>
    %92 = arith.subf %90, %91 : vector<64x1xf32>
    %cst_24 = arith.constant 0.000000e+00 : f32
    %93 = vector.broadcast %cst_24 : f32 to vector<64x1xf32>
    %94 = arith.maximumf %92, %93 : vector<64x1xf32>
    %cst_25 = arith.constant 9.99999974E-6 : f32
    %95 = vector.broadcast %cst_25 : f32 to vector<64x1xf32>
    %96 = arith.addf %94, %95 : vector<64x1xf32>
    %97 = math.rsqrt %96 : vector<64x1xf32>
    %98 = arith.mulf %80, %97 : vector<64x1xf32>
    %99 = arith.mulf %85, %98 : vector<64x1xf32>
    %100 = arith.subf %81, %99 : vector<64x1xf32>
    %101 = vector.broadcast %98 : vector<64x1xf32> to vector<64x256xf32>
    %102 = arith.mulf %79, %101 : vector<64x256xf32>
    %103 = vector.broadcast %100 : vector<64x1xf32> to vector<64x256xf32>
    %104 = arith.addf %102, %103 : vector<64x256xf32>
    %cst_26 = arith.constant 0.000000e+00 : f32
    %105 = vector.broadcast %cst_26 : f32 to vector<64x256xf32>
    %106 = arith.maximumf %104, %105 : vector<64x256xf32>
    %107 = arith.truncf %106 : vector<64x256xf32> to vector<64x256xbf16>
    %108 = vector.extract_strided_slice %4 {offsets = [128, 0], sizes = [128, 64], strides = [1, 1]} : vector<320x128xbf16> to vector<128x64xbf16>
    %cst_27 = arith.constant dense<0.000000e+00> : vector<128x256xf32>
    %109 = tpu.matmul %108, %107, %cst_27 {dimension_numbers = #tpu.dot_dimension_numbers<[1], [0], [0], [1], [0, 0, 1, 1], [], []>} : vector<128x64xbf16>, vector<64x256xbf16>, vector<128x256xf32> -> vector<128x256xf32>
    %110 = vector.extract_strided_slice %5 {offsets = [0, 6], sizes = [128, 1], strides = [1, 1]} : vector<128x13xf32> to vector<128x1xf32>
    %111 = vector.extract_strided_slice %5 {offsets = [0, 7], sizes = [128, 1], strides = [1, 1]} : vector<128x13xf32> to vector<128x1xf32>
    %cst_28 = arith.constant dense<0.000000e+00> : vector<128xf32>
    %112 = vector.multi_reduction <add>, %109, %cst_28 [1] : vector<128x256xf32> to vector<128xf32>
    %113 = vector.shape_cast %112 : vector<128xf32> to vector<128x1xf32>
    %cst_29 = arith.constant 3.906250e-03 : f32
    %114 = vector.broadcast %cst_29 : f32 to vector<128x1xf32>
    %115 = arith.mulf %113, %114 : vector<128x1xf32>
    %116 = arith.mulf %109, %109 : vector<128x256xf32>
    %cst_30 = arith.constant dense<0.000000e+00> : vector<128xf32>
    %117 = vector.multi_reduction <add>, %116, %cst_30 [1] : vector<128x256xf32> to vector<128xf32>
    %118 = vector.shape_cast %117 : vector<128xf32> to vector<128x1xf32>
    %cst_31 = arith.constant 3.906250e-03 : f32
    %119 = vector.broadcast %cst_31 : f32 to vector<128x1xf32>
    %120 = arith.mulf %118, %119 : vector<128x1xf32>
    %121 = arith.mulf %115, %115 : vector<128x1xf32>
    %122 = arith.subf %120, %121 : vector<128x1xf32>
    %cst_32 = arith.constant 0.000000e+00 : f32
    %123 = vector.broadcast %cst_32 : f32 to vector<128x1xf32>
    %124 = arith.maximumf %122, %123 : vector<128x1xf32>
    %cst_33 = arith.constant 9.99999974E-6 : f32
    %125 = vector.broadcast %cst_33 : f32 to vector<128x1xf32>
    %126 = arith.addf %124, %125 : vector<128x1xf32>
    %127 = math.rsqrt %126 : vector<128x1xf32>
    %128 = arith.mulf %110, %127 : vector<128x1xf32>
    %129 = arith.mulf %115, %128 : vector<128x1xf32>
    %130 = arith.subf %111, %129 : vector<128x1xf32>
    %131 = vector.broadcast %128 : vector<128x1xf32> to vector<128x256xf32>
    %132 = arith.mulf %109, %131 : vector<128x256xf32>
    %133 = vector.broadcast %130 : vector<128x1xf32> to vector<128x256xf32>
    %134 = arith.addf %132, %133 : vector<128x256xf32>
    %cst_34 = arith.constant 0.000000e+00 : f32
    %135 = vector.broadcast %cst_34 : f32 to vector<128x256xf32>
    %136 = arith.maximumf %134, %135 : vector<128x256xf32>
    %137 = arith.truncf %136 : vector<128x256xf32> to vector<128x256xbf16>
    %138 = vector.extract_strided_slice %4 {offsets = [256, 0], sizes = [64, 128], strides = [1, 1]} : vector<320x128xbf16> to vector<64x128xbf16>
    %cst_35 = arith.constant dense<0.000000e+00> : vector<64x256xf32>
    %139 = tpu.matmul %138, %137, %cst_35 {dimension_numbers = #tpu.dot_dimension_numbers<[1], [0], [0], [1], [0, 0, 1, 1], [], []>} : vector<64x128xbf16>, vector<128x256xbf16>, vector<64x256xf32> -> vector<64x256xf32>
    %140 = vector.extract_strided_slice %5 {offsets = [0, 8], sizes = [64, 1], strides = [1, 1]} : vector<128x13xf32> to vector<64x1xf32>
    %141 = vector.extract_strided_slice %5 {offsets = [0, 9], sizes = [64, 1], strides = [1, 1]} : vector<128x13xf32> to vector<64x1xf32>
    %cst_36 = arith.constant dense<0.000000e+00> : vector<64xf32>
    %142 = vector.multi_reduction <add>, %139, %cst_36 [1] : vector<64x256xf32> to vector<64xf32>
    %143 = vector.shape_cast %142 : vector<64xf32> to vector<64x1xf32>
    %cst_37 = arith.constant 3.906250e-03 : f32
    %144 = vector.broadcast %cst_37 : f32 to vector<64x1xf32>
    %145 = arith.mulf %143, %144 : vector<64x1xf32>
    %146 = arith.mulf %139, %139 : vector<64x256xf32>
    %cst_38 = arith.constant dense<0.000000e+00> : vector<64xf32>
    %147 = vector.multi_reduction <add>, %146, %cst_38 [1] : vector<64x256xf32> to vector<64xf32>
    %148 = vector.shape_cast %147 : vector<64xf32> to vector<64x1xf32>
    %cst_39 = arith.constant 3.906250e-03 : f32
    %149 = vector.broadcast %cst_39 : f32 to vector<64x1xf32>
    %150 = arith.mulf %148, %149 : vector<64x1xf32>
    %151 = arith.mulf %145, %145 : vector<64x1xf32>
    %152 = arith.subf %150, %151 : vector<64x1xf32>
    %cst_40 = arith.constant 0.000000e+00 : f32
    %153 = vector.broadcast %cst_40 : f32 to vector<64x1xf32>
    %154 = arith.maximumf %152, %153 : vector<64x1xf32>
    %cst_41 = arith.constant 9.99999974E-6 : f32
    %155 = vector.broadcast %cst_41 : f32 to vector<64x1xf32>
    %156 = arith.addf %154, %155 : vector<64x1xf32>
    %157 = math.rsqrt %156 : vector<64x1xf32>
    %158 = arith.mulf %140, %157 : vector<64x1xf32>
    %159 = arith.mulf %145, %158 : vector<64x1xf32>
    %160 = arith.subf %141, %159 : vector<64x1xf32>
    %161 = vector.broadcast %158 : vector<64x1xf32> to vector<64x256xf32>
    %162 = arith.mulf %139, %161 : vector<64x256xf32>
    %163 = vector.broadcast %160 : vector<64x1xf32> to vector<64x256xf32>
    %164 = arith.addf %162, %163 : vector<64x256xf32>
    %cst_42 = arith.constant 0.000000e+00 : f32
    %165 = vector.broadcast %cst_42 : f32 to vector<64x256xf32>
    %166 = arith.maximumf %164, %165 : vector<64x256xf32>
    %167 = vector.extract_strided_slice %166 {offsets = [0, 0], sizes = [64, 128], strides = [1, 1]} : vector<64x256xf32> to vector<64x128xf32>
    %cst_43 = arith.constant dense<0xFF800000> : vector<64xf32>
    %168 = vector.multi_reduction <maximumf>, %167, %cst_43 [1] : vector<64x128xf32> to vector<64xf32>
    %169 = vector.shape_cast %168 : vector<64xf32> to vector<64x1xf32>
    %cst_44 = arith.constant 2.000000e+00 : f32
    %170 = vector.broadcast %cst_44 : f32 to vector<64x1xf32>
    %171 = arith.mulf %170, %169 : vector<64x1xf32>
    %c0_45 = arith.constant 0 : index
    %c0_46 = arith.constant 0 : index
    %172 = vector.load %arg4[%c0_45, %c0_46] : memref<64x2xf32, #tpu.memory_space<vmem>>, vector<64x1xf32>
    tpu.vector_store %arg4[%c0_45, %c0_46], %171 {strides = array<i32>} : memref<64x2xf32, #tpu.memory_space<vmem>>, vector<64x1xf32>,
    %173 = vector.extract_strided_slice %166 {offsets = [0, 128], sizes = [64, 128], strides = [1, 1]} : vector<64x256xf32> to vector<64x128xf32>
    %cst_47 = arith.constant dense<0xFF800000> : vector<64xf32>
    %174 = vector.multi_reduction <maximumf>, %173, %cst_47 [1] : vector<64x128xf32> to vector<64xf32>
    %175 = vector.shape_cast %174 : vector<64xf32> to vector<64x1xf32>
    %cst_48 = arith.constant 2.000000e+00 : f32
    %176 = vector.broadcast %cst_48 : f32 to vector<64x1xf32>
    %177 = arith.mulf %176, %175 : vector<64x1xf32>
    %c0_49 = arith.constant 0 : index
    %c1 = arith.constant 1 : index
    %178 = vector.load %arg4[%c0_49, %c1] : memref<64x2xf32, #tpu.memory_space<vmem>>, vector<64x1xf32>
    tpu.vector_store %arg4[%c0_49, %c1], %177 {strides = array<i32>} : memref<64x2xf32, #tpu.memory_space<vmem>>, vector<64x1xf32>,
    return
  }
  func.func @transform_0(%arg0: i32) -> (i32, i32) {
    %c0_i32 = arith.constant 0 : i32
    %c0_i32_0 = arith.constant 0 : i32
    %c0_i32_1 = arith.constant 0 : i32
    return %c0_i32, %c0_i32_0 : i32, i32
  }
  func.func @transform_1(%arg0: i32) -> (i32, i32) {
    %c0_i32 = arith.constant 0 : i32
    %c0_i32_0 = arith.constant 0 : i32
    %c0_i32_1 = arith.constant 0 : i32
    return %c0_i32, %c0_i32_0 : i32, i32
  }
  func.func @transform_2(%arg0: i32) -> (i32, i32) {
    %c0_i32 = arith.constant 0 : i32
    %c0_i32_0 = arith.constant 0 : i32
    %c0_i32_1 = arith.constant 0 : i32
    return %c0_i32, %c0_i32_0 : i32, i32
  }
  func.func @transform_3(%arg0: i32) -> (i32, i32) {
    %c0_i32 = arith.constant 0 : i32
    %c0_i32_0 = arith.constant 0 : i32
    %c0_i32_1 = arith.constant 0 : i32
    return %c0_i32, %c0_i32_0 : i32, i32
  }
}

module attributes {stable_mosaic.version = 11 : i64} {
  func.func @dcp_iter_kernel(%arg0: i32, %arg1: memref<9x256xf32, #tpu.memory_space<vmem>>, %arg2: memref<3x256xf32, #tpu.memory_space<vmem>>, %arg3: memref<3x256xf32, #tpu.memory_space<vmem>>, %arg4: memref<320x128xbf16, #tpu.memory_space<vmem>>, %arg5: memref<128x13xf32, #tpu.memory_space<vmem>>, %arg6: memref<64x2xf32, #tpu.memory_space<vmem>>, %arg7: memref<32x256xf32, #tpu.memory_space<vmem>>, %arg8: memref<32x11xf32, #tpu.memory_space<vmem>>, %arg9: memref<4x2xf32, #tpu.memory_space<vmem>>, %arg10: memref<3x2xf32, #tpu.memory_space<vmem>>, %arg11: memref<128x2xf32, #tpu.memory_space<vmem>>) attributes {dimension_semantics = [#tpu.dimension_semantics<arbitrary>], iteration_bounds = array<i64: 1>, scalar_prefetch = 0 : i64, scratch_operands = 1 : i64, tpu.core_type = #tpu.core_type<tc>, window_params = [{pipeline_mode = #tpu.pipeline_mode<synchronous>, transform_indices = @transform_0, window_bounds = array<i64: 9, 256>}, {pipeline_mode = #tpu.pipeline_mode<synchronous>, transform_indices = @transform_1, window_bounds = array<i64: 3, 256>}, {pipeline_mode = #tpu.pipeline_mode<synchronous>, transform_indices = @transform_2, window_bounds = array<i64: 3, 256>}, {pipeline_mode = #tpu.pipeline_mode<synchronous>, transform_indices = @transform_3, window_bounds = array<i64: 320, 128>}, {pipeline_mode = #tpu.pipeline_mode<synchronous>, transform_indices = @transform_4, window_bounds = array<i64: 128, 13>}, {pipeline_mode = #tpu.pipeline_mode<synchronous>, transform_indices = @transform_5, window_bounds = array<i64: 64, 2>}, {pipeline_mode = #tpu.pipeline_mode<synchronous>, transform_indices = @transform_6, window_bounds = array<i64: 32, 256>}, {pipeline_mode = #tpu.pipeline_mode<synchronous>, transform_indices = @transform_7, window_bounds = array<i64: 32, 11>}, {pipeline_mode = #tpu.pipeline_mode<synchronous>, transform_indices = @transform_8, window_bounds = array<i64: 4, 2>}, {pipeline_mode = #tpu.pipeline_mode<synchronous>, transform_indices = @transform_9, window_bounds = array<i64: 3, 2>}]} {
    %c0 = arith.constant 0 : index
    %c0_0 = arith.constant 0 : index
    %0 = vector.load %arg3[%c0, %c0_0] : memref<3x256xf32, #tpu.memory_space<vmem>>, vector<3x256xf32>
    %c0_1 = arith.constant 0 : index
    %c0_2 = arith.constant 0 : index
    %1 = vector.load %arg1[%c0_1, %c0_2] : memref<9x256xf32, #tpu.memory_space<vmem>>, vector<9x256xf32>
    %c0_3 = arith.constant 0 : index
    %c0_4 = arith.constant 0 : index
    %2 = vector.load %arg2[%c0_3, %c0_4] : memref<3x256xf32, #tpu.memory_space<vmem>>, vector<3x256xf32>
    %3 = vector.extract_strided_slice %0 {offsets = [0, 0], sizes = [1, 256], strides = [1, 1]} : vector<3x256xf32> to vector<1x256xf32>
    %4 = vector.extract_strided_slice %0 {offsets = [1, 0], sizes = [1, 256], strides = [1, 1]} : vector<3x256xf32> to vector<1x256xf32>
    %5 = vector.extract_strided_slice %0 {offsets = [2, 0], sizes = [1, 256], strides = [1, 1]} : vector<3x256xf32> to vector<1x256xf32>
    %6 = vector.extract_strided_slice %1 {offsets = [0, 0], sizes = [1, 256], strides = [1, 1]} : vector<9x256xf32> to vector<1x256xf32>
    %7 = arith.mulf %6, %3 : vector<1x256xf32>
    %8 = vector.extract_strided_slice %1 {offsets = [1, 0], sizes = [1, 256], strides = [1, 1]} : vector<9x256xf32> to vector<1x256xf32>
    %9 = arith.mulf %8, %4 : vector<1x256xf32>
    %10 = arith.addf %7, %9 : vector<1x256xf32>
    %11 = vector.extract_strided_slice %1 {offsets = [2, 0], sizes = [1, 256], strides = [1, 1]} : vector<9x256xf32> to vector<1x256xf32>
    %12 = arith.mulf %11, %5 : vector<1x256xf32>
    %13 = arith.addf %10, %12 : vector<1x256xf32>
    %14 = vector.extract_strided_slice %2 {offsets = [0, 0], sizes = [1, 256], strides = [1, 1]} : vector<3x256xf32> to vector<1x256xf32>
    %15 = arith.addf %13, %14 : vector<1x256xf32>
    %16 = vector.extract_strided_slice %1 {offsets = [3, 0], sizes = [1, 256], strides = [1, 1]} : vector<9x256xf32> to vector<1x256xf32>
    %17 = arith.mulf %16, %3 : vector<1x256xf32>
    %18 = vector.extract_strided_slice %1 {offsets = [4, 0], sizes = [1, 256], strides = [1, 1]} : vector<9x256xf32> to vector<1x256xf32>
    %19 = arith.mulf %18, %4 : vector<1x256xf32>
    %20 = arith.addf %17, %19 : vector<1x256xf32>
    %21 = vector.extract_strided_slice %1 {offsets = [5, 0], sizes = [1, 256], strides = [1, 1]} : vector<9x256xf32> to vector<1x256xf32>
    %22 = arith.mulf %21, %5 : vector<1x256xf32>
    %23 = arith.addf %20, %22 : vector<1x256xf32>
    %24 = vector.extract_strided_slice %2 {offsets = [1, 0], sizes = [1, 256], strides = [1, 1]} : vector<3x256xf32> to vector<1x256xf32>
    %25 = arith.addf %23, %24 : vector<1x256xf32>
    %26 = vector.extract_strided_slice %1 {offsets = [6, 0], sizes = [1, 256], strides = [1, 1]} : vector<9x256xf32> to vector<1x256xf32>
    %27 = arith.mulf %26, %3 : vector<1x256xf32>
    %28 = vector.extract_strided_slice %1 {offsets = [7, 0], sizes = [1, 256], strides = [1, 1]} : vector<9x256xf32> to vector<1x256xf32>
    %29 = arith.mulf %28, %4 : vector<1x256xf32>
    %30 = arith.addf %27, %29 : vector<1x256xf32>
    %31 = vector.extract_strided_slice %1 {offsets = [8, 0], sizes = [1, 256], strides = [1, 1]} : vector<9x256xf32> to vector<1x256xf32>
    %32 = arith.mulf %31, %5 : vector<1x256xf32>
    %33 = arith.addf %30, %32 : vector<1x256xf32>
    %34 = vector.extract_strided_slice %2 {offsets = [2, 0], sizes = [1, 256], strides = [1, 1]} : vector<3x256xf32> to vector<1x256xf32>
    %35 = arith.addf %33, %34 : vector<1x256xf32>
    %c0_5 = arith.constant 0 : index
    %c0_6 = arith.constant 0 : index
    %36 = vector.load %arg4[%c0_5, %c0_6] : memref<320x128xbf16, #tpu.memory_space<vmem>>, vector<320x128xbf16>
    %c0_7 = arith.constant 0 : index
    %c0_8 = arith.constant 0 : index
    %37 = vector.load %arg5[%c0_7, %c0_8] : memref<128x13xf32, #tpu.memory_space<vmem>>, vector<128x13xf32>
    %38 = vector.extract_strided_slice %37 {offsets = [0, 10], sizes = [64, 1], strides = [1, 1]} : vector<128x13xf32> to vector<64x1xf32>
    %39 = vector.broadcast %38 : vector<64x1xf32> to vector<64x256xf32>
    %40 = vector.broadcast %15 : vector<1x256xf32> to vector<64x256xf32>
    %41 = arith.mulf %39, %40 : vector<64x256xf32>
    %42 = vector.extract_strided_slice %37 {offsets = [0, 11], sizes = [64, 1], strides = [1, 1]} : vector<128x13xf32> to vector<64x1xf32>
    %43 = vector.broadcast %42 : vector<64x1xf32> to vector<64x256xf32>
    %44 = vector.broadcast %25 : vector<1x256xf32> to vector<64x256xf32>
    %45 = arith.mulf %43, %44 : vector<64x256xf32>
    %46 = arith.addf %41, %45 : vector<64x256xf32>
    %47 = vector.extract_strided_slice %37 {offsets = [0, 12], sizes = [64, 1], strides = [1, 1]} : vector<128x13xf32> to vector<64x1xf32>
    %48 = vector.broadcast %47 : vector<64x1xf32> to vector<64x256xf32>
    %49 = vector.broadcast %35 : vector<1x256xf32> to vector<64x256xf32>
    %50 = arith.mulf %48, %49 : vector<64x256xf32>
    %51 = arith.addf %46, %50 : vector<64x256xf32>
    %52 = vector.extract_strided_slice %37 {offsets = [0, 0], sizes = [64, 1], strides = [1, 1]} : vector<128x13xf32> to vector<64x1xf32>
    %53 = vector.extract_strided_slice %37 {offsets = [0, 1], sizes = [64, 1], strides = [1, 1]} : vector<128x13xf32> to vector<64x1xf32>
    %cst = arith.constant dense<0.000000e+00> : vector<64xf32>
    %54 = vector.multi_reduction <add>, %51, %cst [1] : vector<64x256xf32> to vector<64xf32>
    %55 = vector.shape_cast %54 : vector<64xf32> to vector<64x1xf32>
    %cst_9 = arith.constant 3.906250e-03 : f32
    %56 = vector.broadcast %cst_9 : f32 to vector<64x1xf32>
    %57 = arith.mulf %55, %56 : vector<64x1xf32>
    %58 = arith.mulf %51, %51 : vector<64x256xf32>
    %cst_10 = arith.constant dense<0.000000e+00> : vector<64xf32>
    %59 = vector.multi_reduction <add>, %58, %cst_10 [1] : vector<64x256xf32> to vector<64xf32>
    %60 = vector.shape_cast %59 : vector<64xf32> to vector<64x1xf32>
    %cst_11 = arith.constant 3.906250e-03 : f32
    %61 = vector.broadcast %cst_11 : f32 to vector<64x1xf32>
    %62 = arith.mulf %60, %61 : vector<64x1xf32>
    %63 = arith.mulf %57, %57 : vector<64x1xf32>
    %64 = arith.subf %62, %63 : vector<64x1xf32>
    %cst_12 = arith.constant 0.000000e+00 : f32
    %65 = vector.broadcast %cst_12 : f32 to vector<64x1xf32>
    %66 = arith.maximumf %64, %65 : vector<64x1xf32>
    %cst_13 = arith.constant 9.99999974E-6 : f32
    %67 = vector.broadcast %cst_13 : f32 to vector<64x1xf32>
    %68 = arith.addf %66, %67 : vector<64x1xf32>
    %69 = math.rsqrt %68 : vector<64x1xf32>
    %70 = arith.mulf %52, %69 : vector<64x1xf32>
    %71 = arith.mulf %57, %70 : vector<64x1xf32>
    %72 = arith.subf %53, %71 : vector<64x1xf32>
    %73 = vector.broadcast %70 : vector<64x1xf32> to vector<64x256xf32>
    %74 = arith.mulf %51, %73 : vector<64x256xf32>
    %75 = vector.broadcast %72 : vector<64x1xf32> to vector<64x256xf32>
    %76 = arith.addf %74, %75 : vector<64x256xf32>
    %cst_14 = arith.constant 0.000000e+00 : f32
    %77 = vector.broadcast %cst_14 : f32 to vector<64x256xf32>
    %78 = arith.maximumf %76, %77 : vector<64x256xf32>
    %79 = arith.truncf %78 : vector<64x256xf32> to vector<64x256xbf16>
    %80 = vector.extract_strided_slice %36 {offsets = [0, 0], sizes = [64, 64], strides = [1, 1]} : vector<320x128xbf16> to vector<64x64xbf16>
    %cst_15 = arith.constant dense<0.000000e+00> : vector<64x256xf32>
    %81 = tpu.matmul %80, %79, %cst_15 {dimension_numbers = #tpu.dot_dimension_numbers<[1], [0], [0], [1], [0, 0, 1, 1], [], []>} : vector<64x64xbf16>, vector<64x256xbf16>, vector<64x256xf32> -> vector<64x256xf32>
    %82 = vector.extract_strided_slice %37 {offsets = [0, 2], sizes = [64, 1], strides = [1, 1]} : vector<128x13xf32> to vector<64x1xf32>
    %83 = vector.extract_strided_slice %37 {offsets = [0, 3], sizes = [64, 1], strides = [1, 1]} : vector<128x13xf32> to vector<64x1xf32>
    %cst_16 = arith.constant dense<0.000000e+00> : vector<64xf32>
    %84 = vector.multi_reduction <add>, %81, %cst_16 [1] : vector<64x256xf32> to vector<64xf32>
    %85 = vector.shape_cast %84 : vector<64xf32> to vector<64x1xf32>
    %cst_17 = arith.constant 3.906250e-03 : f32
    %86 = vector.broadcast %cst_17 : f32 to vector<64x1xf32>
    %87 = arith.mulf %85, %86 : vector<64x1xf32>
    %88 = arith.mulf %81, %81 : vector<64x256xf32>
    %cst_18 = arith.constant dense<0.000000e+00> : vector<64xf32>
    %89 = vector.multi_reduction <add>, %88, %cst_18 [1] : vector<64x256xf32> to vector<64xf32>
    %90 = vector.shape_cast %89 : vector<64xf32> to vector<64x1xf32>
    %cst_19 = arith.constant 3.906250e-03 : f32
    %91 = vector.broadcast %cst_19 : f32 to vector<64x1xf32>
    %92 = arith.mulf %90, %91 : vector<64x1xf32>
    %93 = arith.mulf %87, %87 : vector<64x1xf32>
    %94 = arith.subf %92, %93 : vector<64x1xf32>
    %cst_20 = arith.constant 0.000000e+00 : f32
    %95 = vector.broadcast %cst_20 : f32 to vector<64x1xf32>
    %96 = arith.maximumf %94, %95 : vector<64x1xf32>
    %cst_21 = arith.constant 9.99999974E-6 : f32
    %97 = vector.broadcast %cst_21 : f32 to vector<64x1xf32>
    %98 = arith.addf %96, %97 : vector<64x1xf32>
    %99 = math.rsqrt %98 : vector<64x1xf32>
    %100 = arith.mulf %82, %99 : vector<64x1xf32>
    %101 = arith.mulf %87, %100 : vector<64x1xf32>
    %102 = arith.subf %83, %101 : vector<64x1xf32>
    %103 = vector.broadcast %100 : vector<64x1xf32> to vector<64x256xf32>
    %104 = arith.mulf %81, %103 : vector<64x256xf32>
    %105 = vector.broadcast %102 : vector<64x1xf32> to vector<64x256xf32>
    %106 = arith.addf %104, %105 : vector<64x256xf32>
    %cst_22 = arith.constant 0.000000e+00 : f32
    %107 = vector.broadcast %cst_22 : f32 to vector<64x256xf32>
    %108 = arith.maximumf %106, %107 : vector<64x256xf32>
    %109 = arith.truncf %108 : vector<64x256xf32> to vector<64x256xbf16>
    %110 = vector.extract_strided_slice %36 {offsets = [64, 0], sizes = [64, 64], strides = [1, 1]} : vector<320x128xbf16> to vector<64x64xbf16>
    %cst_23 = arith.constant dense<0.000000e+00> : vector<64x256xf32>
    %111 = tpu.matmul %110, %109, %cst_23 {dimension_numbers = #tpu.dot_dimension_numbers<[1], [0], [0], [1], [0, 0, 1, 1], [], []>} : vector<64x64xbf16>, vector<64x256xbf16>, vector<64x256xf32> -> vector<64x256xf32>
    %112 = vector.extract_strided_slice %37 {offsets = [0, 4], sizes = [64, 1], strides = [1, 1]} : vector<128x13xf32> to vector<64x1xf32>
    %113 = vector.extract_strided_slice %37 {offsets = [0, 5], sizes = [64, 1], strides = [1, 1]} : vector<128x13xf32> to vector<64x1xf32>
    %cst_24 = arith.constant dense<0.000000e+00> : vector<64xf32>
    %114 = vector.multi_reduction <add>, %111, %cst_24 [1] : vector<64x256xf32> to vector<64xf32>
    %115 = vector.shape_cast %114 : vector<64xf32> to vector<64x1xf32>
    %cst_25 = arith.constant 3.906250e-03 : f32
    %116 = vector.broadcast %cst_25 : f32 to vector<64x1xf32>
    %117 = arith.mulf %115, %116 : vector<64x1xf32>
    %118 = arith.mulf %111, %111 : vector<64x256xf32>
    %cst_26 = arith.constant dense<0.000000e+00> : vector<64xf32>
    %119 = vector.multi_reduction <add>, %118, %cst_26 [1] : vector<64x256xf32> to vector<64xf32>
    %120 = vector.shape_cast %119 : vector<64xf32> to vector<64x1xf32>
    %cst_27 = arith.constant 3.906250e-03 : f32
    %121 = vector.broadcast %cst_27 : f32 to vector<64x1xf32>
    %122 = arith.mulf %120, %121 : vector<64x1xf32>
    %123 = arith.mulf %117, %117 : vector<64x1xf32>
    %124 = arith.subf %122, %123 : vector<64x1xf32>
    %cst_28 = arith.constant 0.000000e+00 : f32
    %125 = vector.broadcast %cst_28 : f32 to vector<64x1xf32>
    %126 = arith.maximumf %124, %125 : vector<64x1xf32>
    %cst_29 = arith.constant 9.99999974E-6 : f32
    %127 = vector.broadcast %cst_29 : f32 to vector<64x1xf32>
    %128 = arith.addf %126, %127 : vector<64x1xf32>
    %129 = math.rsqrt %128 : vector<64x1xf32>
    %130 = arith.mulf %112, %129 : vector<64x1xf32>
    %131 = arith.mulf %117, %130 : vector<64x1xf32>
    %132 = arith.subf %113, %131 : vector<64x1xf32>
    %133 = vector.broadcast %130 : vector<64x1xf32> to vector<64x256xf32>
    %134 = arith.mulf %111, %133 : vector<64x256xf32>
    %135 = vector.broadcast %132 : vector<64x1xf32> to vector<64x256xf32>
    %136 = arith.addf %134, %135 : vector<64x256xf32>
    %cst_30 = arith.constant 0.000000e+00 : f32
    %137 = vector.broadcast %cst_30 : f32 to vector<64x256xf32>
    %138 = arith.maximumf %136, %137 : vector<64x256xf32>
    %139 = arith.truncf %138 : vector<64x256xf32> to vector<64x256xbf16>
    %140 = vector.extract_strided_slice %36 {offsets = [128, 0], sizes = [128, 64], strides = [1, 1]} : vector<320x128xbf16> to vector<128x64xbf16>
    %cst_31 = arith.constant dense<0.000000e+00> : vector<128x256xf32>
    %141 = tpu.matmul %140, %139, %cst_31 {dimension_numbers = #tpu.dot_dimension_numbers<[1], [0], [0], [1], [0, 0, 1, 1], [], []>} : vector<128x64xbf16>, vector<64x256xbf16>, vector<128x256xf32> -> vector<128x256xf32>
    %142 = vector.extract_strided_slice %37 {offsets = [0, 6], sizes = [128, 1], strides = [1, 1]} : vector<128x13xf32> to vector<128x1xf32>
    %143 = vector.extract_strided_slice %37 {offsets = [0, 7], sizes = [128, 1], strides = [1, 1]} : vector<128x13xf32> to vector<128x1xf32>
    %cst_32 = arith.constant dense<0.000000e+00> : vector<128xf32>
    %144 = vector.multi_reduction <add>, %141, %cst_32 [1] : vector<128x256xf32> to vector<128xf32>
    %145 = vector.shape_cast %144 : vector<128xf32> to vector<128x1xf32>
    %cst_33 = arith.constant 3.906250e-03 : f32
    %146 = vector.broadcast %cst_33 : f32 to vector<128x1xf32>
    %147 = arith.mulf %145, %146 : vector<128x1xf32>
    %148 = arith.mulf %141, %141 : vector<128x256xf32>
    %cst_34 = arith.constant dense<0.000000e+00> : vector<128xf32>
    %149 = vector.multi_reduction <add>, %148, %cst_34 [1] : vector<128x256xf32> to vector<128xf32>
    %150 = vector.shape_cast %149 : vector<128xf32> to vector<128x1xf32>
    %cst_35 = arith.constant 3.906250e-03 : f32
    %151 = vector.broadcast %cst_35 : f32 to vector<128x1xf32>
    %152 = arith.mulf %150, %151 : vector<128x1xf32>
    %153 = arith.mulf %147, %147 : vector<128x1xf32>
    %154 = arith.subf %152, %153 : vector<128x1xf32>
    %cst_36 = arith.constant 0.000000e+00 : f32
    %155 = vector.broadcast %cst_36 : f32 to vector<128x1xf32>
    %156 = arith.maximumf %154, %155 : vector<128x1xf32>
    %cst_37 = arith.constant 9.99999974E-6 : f32
    %157 = vector.broadcast %cst_37 : f32 to vector<128x1xf32>
    %158 = arith.addf %156, %157 : vector<128x1xf32>
    %159 = math.rsqrt %158 : vector<128x1xf32>
    %160 = arith.mulf %142, %159 : vector<128x1xf32>
    %161 = arith.mulf %147, %160 : vector<128x1xf32>
    %162 = arith.subf %143, %161 : vector<128x1xf32>
    %163 = vector.broadcast %160 : vector<128x1xf32> to vector<128x256xf32>
    %164 = arith.mulf %141, %163 : vector<128x256xf32>
    %165 = vector.broadcast %162 : vector<128x1xf32> to vector<128x256xf32>
    %166 = arith.addf %164, %165 : vector<128x256xf32>
    %cst_38 = arith.constant 0.000000e+00 : f32
    %167 = vector.broadcast %cst_38 : f32 to vector<128x256xf32>
    %168 = arith.maximumf %166, %167 : vector<128x256xf32>
    %169 = arith.truncf %168 : vector<128x256xf32> to vector<128x256xbf16>
    %170 = vector.extract_strided_slice %36 {offsets = [256, 0], sizes = [64, 128], strides = [1, 1]} : vector<320x128xbf16> to vector<64x128xbf16>
    %cst_39 = arith.constant dense<0.000000e+00> : vector<64x256xf32>
    %171 = tpu.matmul %170, %169, %cst_39 {dimension_numbers = #tpu.dot_dimension_numbers<[1], [0], [0], [1], [0, 0, 1, 1], [], []>} : vector<64x128xbf16>, vector<128x256xbf16>, vector<64x256xf32> -> vector<64x256xf32>
    %172 = vector.extract_strided_slice %37 {offsets = [0, 8], sizes = [64, 1], strides = [1, 1]} : vector<128x13xf32> to vector<64x1xf32>
    %173 = vector.extract_strided_slice %37 {offsets = [0, 9], sizes = [64, 1], strides = [1, 1]} : vector<128x13xf32> to vector<64x1xf32>
    %cst_40 = arith.constant dense<0.000000e+00> : vector<64xf32>
    %174 = vector.multi_reduction <add>, %171, %cst_40 [1] : vector<64x256xf32> to vector<64xf32>
    %175 = vector.shape_cast %174 : vector<64xf32> to vector<64x1xf32>
    %cst_41 = arith.constant 3.906250e-03 : f32
    %176 = vector.broadcast %cst_41 : f32 to vector<64x1xf32>
    %177 = arith.mulf %175, %176 : vector<64x1xf32>
    %178 = arith.mulf %171, %171 : vector<64x256xf32>
    %cst_42 = arith.constant dense<0.000000e+00> : vector<64xf32>
    %179 = vector.multi_reduction <add>, %178, %cst_42 [1] : vector<64x256xf32> to vector<64xf32>
    %180 = vector.shape_cast %179 : vector<64xf32> to vector<64x1xf32>
    %cst_43 = arith.constant 3.906250e-03 : f32
    %181 = vector.broadcast %cst_43 : f32 to vector<64x1xf32>
    %182 = arith.mulf %180, %181 : vector<64x1xf32>
    %183 = arith.mulf %177, %177 : vector<64x1xf32>
    %184 = arith.subf %182, %183 : vector<64x1xf32>
    %cst_44 = arith.constant 0.000000e+00 : f32
    %185 = vector.broadcast %cst_44 : f32 to vector<64x1xf32>
    %186 = arith.maximumf %184, %185 : vector<64x1xf32>
    %cst_45 = arith.constant 9.99999974E-6 : f32
    %187 = vector.broadcast %cst_45 : f32 to vector<64x1xf32>
    %188 = arith.addf %186, %187 : vector<64x1xf32>
    %189 = math.rsqrt %188 : vector<64x1xf32>
    %190 = arith.mulf %172, %189 : vector<64x1xf32>
    %191 = arith.mulf %177, %190 : vector<64x1xf32>
    %192 = arith.subf %173, %191 : vector<64x1xf32>
    %193 = vector.broadcast %190 : vector<64x1xf32> to vector<64x256xf32>
    %194 = arith.mulf %171, %193 : vector<64x256xf32>
    %195 = vector.broadcast %192 : vector<64x1xf32> to vector<64x256xf32>
    %196 = arith.addf %194, %195 : vector<64x256xf32>
    %cst_46 = arith.constant 0.000000e+00 : f32
    %197 = vector.broadcast %cst_46 : f32 to vector<64x256xf32>
    %198 = arith.maximumf %196, %197 : vector<64x256xf32>
    %199 = vector.extract_strided_slice %198 {offsets = [0, 0], sizes = [64, 128], strides = [1, 1]} : vector<64x256xf32> to vector<64x128xf32>
    %cst_47 = arith.constant dense<0xFF800000> : vector<64xf32>
    %200 = vector.multi_reduction <maximumf>, %199, %cst_47 [1] : vector<64x128xf32> to vector<64xf32>
    %201 = vector.shape_cast %200 : vector<64xf32> to vector<64x1xf32>
    %cst_48 = arith.constant 2.000000e+00 : f32
    %202 = vector.broadcast %cst_48 : f32 to vector<64x1xf32>
    %203 = arith.mulf %202, %201 : vector<64x1xf32>
    %c0_49 = arith.constant 0 : index
    %c0_50 = arith.constant 0 : index
    %204 = vector.load %arg11[%c0_49, %c0_50] : memref<128x2xf32, #tpu.memory_space<vmem>>, vector<64x1xf32>
    tpu.vector_store %arg11[%c0_49, %c0_50], %203 {strides = array<i32>} : memref<128x2xf32, #tpu.memory_space<vmem>>, vector<64x1xf32>,
    %205 = vector.extract_strided_slice %198 {offsets = [0, 128], sizes = [64, 128], strides = [1, 1]} : vector<64x256xf32> to vector<64x128xf32>
    %cst_51 = arith.constant dense<0xFF800000> : vector<64xf32>
    %206 = vector.multi_reduction <maximumf>, %205, %cst_51 [1] : vector<64x128xf32> to vector<64xf32>
    %207 = vector.shape_cast %206 : vector<64xf32> to vector<64x1xf32>
    %cst_52 = arith.constant 2.000000e+00 : f32
    %208 = vector.broadcast %cst_52 : f32 to vector<64x1xf32>
    %209 = arith.mulf %208, %207 : vector<64x1xf32>
    %c0_53 = arith.constant 0 : index
    %c1 = arith.constant 1 : index
    %210 = vector.load %arg11[%c0_53, %c1] : memref<128x2xf32, #tpu.memory_space<vmem>>, vector<64x1xf32>
    tpu.vector_store %arg11[%c0_53, %c1], %209 {strides = array<i32>} : memref<128x2xf32, #tpu.memory_space<vmem>>, vector<64x1xf32>,
    %c0_54 = arith.constant 0 : index
    %c0_55 = arith.constant 0 : index
    %211 = vector.load %arg6[%c0_54, %c0_55] : memref<64x2xf32, #tpu.memory_space<vmem>>, vector<64x2xf32>
    %c64 = arith.constant 64 : index
    %c0_56 = arith.constant 0 : index
    %212 = vector.load %arg11[%c64, %c0_56] : memref<128x2xf32, #tpu.memory_space<vmem>>, vector<64x2xf32>
    tpu.vector_store %arg11[%c64, %c0_56], %211 {strides = array<i32>} : memref<128x2xf32, #tpu.memory_space<vmem>>, vector<64x2xf32>,
    %c0_57 = arith.constant 0 : index
    %c0_58 = arith.constant 0 : index
    %213 = vector.load %arg11[%c0_57, %c0_58] : memref<128x2xf32, #tpu.memory_space<vmem>>, vector<128x2xf32>
    %c0_59 = arith.constant 0 : index
    %c0_60 = arith.constant 0 : index
    %214 = vector.load %arg7[%c0_59, %c0_60] : memref<32x256xf32, #tpu.memory_space<vmem>>, vector<32x256xf32>
    %c0_61 = arith.constant 0 : index
    %c0_62 = arith.constant 0 : index
    %215 = vector.load %arg8[%c0_61, %c0_62] : memref<32x11xf32, #tpu.memory_space<vmem>>, vector<32x11xf32>
    %216 = vector.extract_strided_slice %214 {offsets = [0, 0], sizes = [32, 128], strides = [1, 1]} : vector<32x256xf32> to vector<32x128xf32>
    %217 = vector.extract_strided_slice %215 {offsets = [0, 0], sizes = [32, 1], strides = [1, 1]} : vector<32x11xf32> to vector<32x1xf32>
    %218 = vector.extract_strided_slice %215 {offsets = [0, 1], sizes = [32, 1], strides = [1, 1]} : vector<32x11xf32> to vector<32x1xf32>
    %219 = vector.extract_strided_slice %215 {offsets = [0, 2], sizes = [32, 1], strides = [1, 1]} : vector<32x11xf32> to vector<32x1xf32>
    %cst_63 = arith.constant dense<0.000000e+00> : vector<32x2xf32>
    %220 = tpu.matmul %216, %213, %cst_63 {dimension_numbers = #tpu.dot_dimension_numbers<[1], [0], [0], [1], [0, 0, 1, 1], [], []>} : vector<32x128xf32>, vector<128x2xf32>, vector<32x2xf32> -> vector<32x2xf32>
    %221 = vector.broadcast %217 : vector<32x1xf32> to vector<32x2xf32>
    %222 = arith.addf %220, %221 : vector<32x2xf32>
    %cst_64 = arith.constant dense<0.000000e+00> : vector<32xf32>
    %223 = vector.multi_reduction <add>, %222, %cst_64 [1] : vector<32x2xf32> to vector<32xf32>
    %224 = vector.shape_cast %223 : vector<32xf32> to vector<32x1xf32>
    %cst_65 = arith.constant 5.000000e-01 : f32
    %225 = vector.broadcast %cst_65 : f32 to vector<32x1xf32>
    %226 = arith.mulf %224, %225 : vector<32x1xf32>
    %227 = arith.mulf %222, %222 : vector<32x2xf32>
    %cst_66 = arith.constant dense<0.000000e+00> : vector<32xf32>
    %228 = vector.multi_reduction <add>, %227, %cst_66 [1] : vector<32x2xf32> to vector<32xf32>
    %229 = vector.shape_cast %228 : vector<32xf32> to vector<32x1xf32>
    %cst_67 = arith.constant 5.000000e-01 : f32
    %230 = vector.broadcast %cst_67 : f32 to vector<32x1xf32>
    %231 = arith.mulf %229, %230 : vector<32x1xf32>
    %232 = arith.mulf %226, %226 : vector<32x1xf32>
    %233 = arith.subf %231, %232 : vector<32x1xf32>
    %cst_68 = arith.constant 0.000000e+00 : f32
    %234 = vector.broadcast %cst_68 : f32 to vector<32x1xf32>
    %235 = arith.maximumf %233, %234 : vector<32x1xf32>
    %cst_69 = arith.constant 9.99999974E-6 : f32
    %236 = vector.broadcast %cst_69 : f32 to vector<32x1xf32>
    %237 = arith.addf %235, %236 : vector<32x1xf32>
    %238 = math.rsqrt %237 : vector<32x1xf32>
    %239 = arith.mulf %218, %238 : vector<32x1xf32>
    %240 = arith.mulf %226, %239 : vector<32x1xf32>
    %241 = arith.subf %219, %240 : vector<32x1xf32>
    %242 = vector.broadcast %239 : vector<32x1xf32> to vector<32x2xf32>
    %243 = arith.mulf %222, %242 : vector<32x2xf32>
    %244 = vector.broadcast %241 : vector<32x1xf32> to vector<32x2xf32>
    %245 = arith.addf %243, %244 : vector<32x2xf32>
    %cst_70 = arith.constant 0.000000e+00 : f32
    %246 = vector.broadcast %cst_70 : f32 to vector<32x2xf32>
    %247 = arith.maximumf %245, %246 : vector<32x2xf32>
    %248 = vector.extract_strided_slice %214 {offsets = [0, 128], sizes = [16, 32], strides = [1, 1]} : vector<32x256xf32> to vector<16x32xf32>
    %249 = vector.extract_strided_slice %215 {offsets = [0, 3], sizes = [16, 1], strides = [1, 1]} : vector<32x11xf32> to vector<16x1xf32>
    %250 = vector.extract_strided_slice %215 {offsets = [0, 4], sizes = [16, 1], strides = [1, 1]} : vector<32x11xf32> to vector<16x1xf32>
    %251 = vector.extract_strided_slice %215 {offsets = [0, 5], sizes = [16, 1], strides = [1, 1]} : vector<32x11xf32> to vector<16x1xf32>
    %cst_71 = arith.constant dense<0.000000e+00> : vector<16x2xf32>
    %252 = tpu.matmul %248, %247, %cst_71 {dimension_numbers = #tpu.dot_dimension_numbers<[1], [0], [0], [1], [0, 0, 1, 1], [], []>} : vector<16x32xf32>, vector<32x2xf32>, vector<16x2xf32> -> vector<16x2xf32>
    %253 = vector.broadcast %249 : vector<16x1xf32> to vector<16x2xf32>
    %254 = arith.addf %252, %253 : vector<16x2xf32>
    %cst_72 = arith.constant dense<0.000000e+00> : vector<16xf32>
    %255 = vector.multi_reduction <add>, %254, %cst_72 [1] : vector<16x2xf32> to vector<16xf32>
    %256 = vector.shape_cast %255 : vector<16xf32> to vector<16x1xf32>
    %cst_73 = arith.constant 5.000000e-01 : f32
    %257 = vector.broadcast %cst_73 : f32 to vector<16x1xf32>
    %258 = arith.mulf %256, %257 : vector<16x1xf32>
    %259 = arith.mulf %254, %254 : vector<16x2xf32>
    %cst_74 = arith.constant dense<0.000000e+00> : vector<16xf32>
    %260 = vector.multi_reduction <add>, %259, %cst_74 [1] : vector<16x2xf32> to vector<16xf32>
    %261 = vector.shape_cast %260 : vector<16xf32> to vector<16x1xf32>
    %cst_75 = arith.constant 5.000000e-01 : f32
    %262 = vector.broadcast %cst_75 : f32 to vector<16x1xf32>
    %263 = arith.mulf %261, %262 : vector<16x1xf32>
    %264 = arith.mulf %258, %258 : vector<16x1xf32>
    %265 = arith.subf %263, %264 : vector<16x1xf32>
    %cst_76 = arith.constant 0.000000e+00 : f32
    %266 = vector.broadcast %cst_76 : f32 to vector<16x1xf32>
    %267 = arith.maximumf %265, %266 : vector<16x1xf32>
    %cst_77 = arith.constant 9.99999974E-6 : f32
    %268 = vector.broadcast %cst_77 : f32 to vector<16x1xf32>
    %269 = arith.addf %267, %268 : vector<16x1xf32>
    %270 = math.rsqrt %269 : vector<16x1xf32>
    %271 = arith.mulf %250, %270 : vector<16x1xf32>
    %272 = arith.mulf %258, %271 : vector<16x1xf32>
    %273 = arith.subf %251, %272 : vector<16x1xf32>
    %274 = vector.broadcast %271 : vector<16x1xf32> to vector<16x2xf32>
    %275 = arith.mulf %254, %274 : vector<16x2xf32>
    %276 = vector.broadcast %273 : vector<16x1xf32> to vector<16x2xf32>
    %277 = arith.addf %275, %276 : vector<16x2xf32>
    %cst_78 = arith.constant 0.000000e+00 : f32
    %278 = vector.broadcast %cst_78 : f32 to vector<16x2xf32>
    %279 = arith.maximumf %277, %278 : vector<16x2xf32>
    %280 = vector.extract_strided_slice %214 {offsets = [0, 160], sizes = [8, 16], strides = [1, 1]} : vector<32x256xf32> to vector<8x16xf32>
    %281 = vector.extract_strided_slice %215 {offsets = [0, 6], sizes = [8, 1], strides = [1, 1]} : vector<32x11xf32> to vector<8x1xf32>
    %282 = vector.extract_strided_slice %215 {offsets = [0, 7], sizes = [8, 1], strides = [1, 1]} : vector<32x11xf32> to vector<8x1xf32>
    %283 = vector.extract_strided_slice %215 {offsets = [0, 8], sizes = [8, 1], strides = [1, 1]} : vector<32x11xf32> to vector<8x1xf32>
    %cst_79 = arith.constant dense<0.000000e+00> : vector<8x2xf32>
    %284 = tpu.matmul %280, %279, %cst_79 {dimension_numbers = #tpu.dot_dimension_numbers<[1], [0], [0], [1], [0, 0, 1, 1], [], []>} : vector<8x16xf32>, vector<16x2xf32>, vector<8x2xf32> -> vector<8x2xf32>
    %285 = vector.broadcast %281 : vector<8x1xf32> to vector<8x2xf32>
    %286 = arith.addf %284, %285 : vector<8x2xf32>
    %cst_80 = arith.constant dense<0.000000e+00> : vector<8xf32>
    %287 = vector.multi_reduction <add>, %286, %cst_80 [1] : vector<8x2xf32> to vector<8xf32>
    %288 = vector.shape_cast %287 : vector<8xf32> to vector<8x1xf32>
    %cst_81 = arith.constant 5.000000e-01 : f32
    %289 = vector.broadcast %cst_81 : f32 to vector<8x1xf32>
    %290 = arith.mulf %288, %289 : vector<8x1xf32>
    %291 = arith.mulf %286, %286 : vector<8x2xf32>
    %cst_82 = arith.constant dense<0.000000e+00> : vector<8xf32>
    %292 = vector.multi_reduction <add>, %291, %cst_82 [1] : vector<8x2xf32> to vector<8xf32>
    %293 = vector.shape_cast %292 : vector<8xf32> to vector<8x1xf32>
    %cst_83 = arith.constant 5.000000e-01 : f32
    %294 = vector.broadcast %cst_83 : f32 to vector<8x1xf32>
    %295 = arith.mulf %293, %294 : vector<8x1xf32>
    %296 = arith.mulf %290, %290 : vector<8x1xf32>
    %297 = arith.subf %295, %296 : vector<8x1xf32>
    %cst_84 = arith.constant 0.000000e+00 : f32
    %298 = vector.broadcast %cst_84 : f32 to vector<8x1xf32>
    %299 = arith.maximumf %297, %298 : vector<8x1xf32>
    %cst_85 = arith.constant 9.99999974E-6 : f32
    %300 = vector.broadcast %cst_85 : f32 to vector<8x1xf32>
    %301 = arith.addf %299, %300 : vector<8x1xf32>
    %302 = math.rsqrt %301 : vector<8x1xf32>
    %303 = arith.mulf %282, %302 : vector<8x1xf32>
    %304 = arith.mulf %290, %303 : vector<8x1xf32>
    %305 = arith.subf %283, %304 : vector<8x1xf32>
    %306 = vector.broadcast %303 : vector<8x1xf32> to vector<8x2xf32>
    %307 = arith.mulf %286, %306 : vector<8x2xf32>
    %308 = vector.broadcast %305 : vector<8x1xf32> to vector<8x2xf32>
    %309 = arith.addf %307, %308 : vector<8x2xf32>
    %cst_86 = arith.constant 0.000000e+00 : f32
    %310 = vector.broadcast %cst_86 : f32 to vector<8x2xf32>
    %311 = arith.maximumf %309, %310 : vector<8x2xf32>
    %312 = vector.extract_strided_slice %214 {offsets = [0, 176], sizes = [4, 8], strides = [1, 1]} : vector<32x256xf32> to vector<4x8xf32>
    %cst_87 = arith.constant dense<0.000000e+00> : vector<4x2xf32>
    %313 = tpu.matmul %312, %311, %cst_87 {dimension_numbers = #tpu.dot_dimension_numbers<[1], [0], [0], [1], [0, 0, 1, 1], [], []>} : vector<4x8xf32>, vector<8x2xf32>, vector<4x2xf32> -> vector<4x2xf32>
    %314 = vector.extract_strided_slice %215 {offsets = [0, 9], sizes = [4, 1], strides = [1, 1]} : vector<32x11xf32> to vector<4x1xf32>
    %315 = vector.broadcast %314 : vector<4x1xf32> to vector<4x2xf32>
    %316 = arith.addf %313, %315 : vector<4x2xf32>
    %317 = arith.mulf %316, %316 : vector<4x2xf32>
    %cst_88 = arith.constant dense<0.000000e+00> : vector<2xf32>
    %318 = vector.multi_reduction <add>, %317, %cst_88 [0] : vector<4x2xf32> to vector<2xf32>
    %319 = vector.shape_cast %318 : vector<2xf32> to vector<1x2xf32>
    %320 = math.sqrt %319 : vector<1x2xf32>
    %cst_89 = arith.constant 9.99999996E-13 : f32
    %321 = vector.broadcast %cst_89 : f32 to vector<1x2xf32>
    %322 = arith.maximumf %320, %321 : vector<1x2xf32>
    %323 = vector.broadcast %322 : vector<1x2xf32> to vector<4x2xf32>
    %324 = arith.divf %316, %323 : vector<4x2xf32>
    %c0_90 = arith.constant 0 : index
    %c0_91 = arith.constant 0 : index
    %325 = vector.load %arg9[%c0_90, %c0_91] : memref<4x2xf32, #tpu.memory_space<vmem>>, vector<4x2xf32>
    tpu.vector_store %arg9[%c0_90, %c0_91], %324 {strides = array<i32>} : memref<4x2xf32, #tpu.memory_space<vmem>>, vector<4x2xf32>,
    %326 = vector.extract_strided_slice %214 {offsets = [0, 184], sizes = [3, 8], strides = [1, 1]} : vector<32x256xf32> to vector<3x8xf32>
    %cst_92 = arith.constant dense<0.000000e+00> : vector<3x2xf32>
    %327 = tpu.matmul %326, %311, %cst_92 {dimension_numbers = #tpu.dot_dimension_numbers<[1], [0], [0], [1], [0, 0, 1, 1], [], []>} : vector<3x8xf32>, vector<8x2xf32>, vector<3x2xf32> -> vector<3x2xf32>
    %328 = vector.extract_strided_slice %215 {offsets = [0, 10], sizes = [3, 1], strides = [1, 1]} : vector<32x11xf32> to vector<3x1xf32>
    %329 = vector.broadcast %328 : vector<3x1xf32> to vector<3x2xf32>
    %330 = arith.addf %327, %329 : vector<3x2xf32>
    %c0_93 = arith.constant 0 : index
    %c0_94 = arith.constant 0 : index
    %331 = vector.load %arg10[%c0_93, %c0_94] : memref<3x2xf32, #tpu.memory_space<vmem>>, vector<3x2xf32>
    tpu.vector_store %arg10[%c0_93, %c0_94], %330 {strides = array<i32>} : memref<3x2xf32, #tpu.memory_space<vmem>>, vector<3x2xf32>,
    return
  }
  func.func @transform_0(%arg0: i32) -> (i32, i32) {
    %c0_i32 = arith.constant 0 : i32
    %c0_i32_0 = arith.constant 0 : i32
    %c0_i32_1 = arith.constant 0 : i32
    return %c0_i32, %c0_i32_0 : i32, i32
  }
  func.func @transform_1(%arg0: i32) -> (i32, i32) {
    %c0_i32 = arith.constant 0 : i32
    %c0_i32_0 = arith.constant 0 : i32
    %c0_i32_1 = arith.constant 0 : i32
    return %c0_i32, %c0_i32_0 : i32, i32
  }
  func.func @transform_2(%arg0: i32) -> (i32, i32) {
    %c0_i32 = arith.constant 0 : i32
    %c0_i32_0 = arith.constant 0 : i32
    %c0_i32_1 = arith.constant 0 : i32
    return %c0_i32, %c0_i32_0 : i32, i32
  }
  func.func @transform_3(%arg0: i32) -> (i32, i32) {
    %c0_i32 = arith.constant 0 : i32
    %c0_i32_0 = arith.constant 0 : i32
    %c0_i32_1 = arith.constant 0 : i32
    return %c0_i32, %c0_i32_0 : i32, i32
  }
  func.func @transform_4(%arg0: i32) -> (i32, i32) {
    %c0_i32 = arith.constant 0 : i32
    %c0_i32_0 = arith.constant 0 : i32
    %c0_i32_1 = arith.constant 0 : i32
    return %c0_i32, %c0_i32_0 : i32, i32
  }
  func.func @transform_5(%arg0: i32) -> (i32, i32) {
    %c0_i32 = arith.constant 0 : i32
    %c0_i32_0 = arith.constant 0 : i32
    %c0_i32_1 = arith.constant 0 : i32
    return %c0_i32, %c0_i32_0 : i32, i32
  }
  func.func @transform_6(%arg0: i32) -> (i32, i32) {
    %c0_i32 = arith.constant 0 : i32
    %c0_i32_0 = arith.constant 0 : i32
    %c0_i32_1 = arith.constant 0 : i32
    return %c0_i32, %c0_i32_0 : i32, i32
  }
  func.func @transform_7(%arg0: i32) -> (i32, i32) {
    %c0_i32 = arith.constant 0 : i32
    %c0_i32_0 = arith.constant 0 : i32
    %c0_i32_1 = arith.constant 0 : i32
    return %c0_i32, %c0_i32_0 : i32, i32
  }
  func.func @transform_8(%arg0: i32) -> (i32, i32) {
    %c0_i32 = arith.constant 0 : i32
    %c0_i32_0 = arith.constant 0 : i32
    %c0_i32_1 = arith.constant 0 : i32
    return %c0_i32, %c0_i32_0 : i32, i32
  }
  func.func @transform_9(%arg0: i32) -> (i32, i32) {
    %c0_i32 = arith.constant 0 : i32
    %c0_i32_0 = arith.constant 0 : i32
    %c0_i32_1 = arith.constant 0 : i32
    return %c0_i32, %c0_i32_0 : i32, i32
  }
}

</mosaic_0001>

<bundles_post_ra>
// kernel: dcp_forward.4
= control target key start
LH: loop header
LB: loop body
LE: loop exit
PB: predicated region body
PF: predicated region fallthrough
CT: control target
= control target key end

     0   :  { %v2972_v0 = vmov 11   ;;  %v2973_v1 = vmov 10   ;;  %v2974_v5 = vmov 12   ;;  %v113_v11 = vlaneseq  ;;  %s4405_s2 = inlined_call_operand.vmem [shape: f32[128,13], index: 2, kind: input, shape index: {}]   ;;  %s4406_s0 = inlined_call_operand.vmem [shape: f32[3,256], index: 0, kind: input, shape index: {}]   ;;  %s4407_s1 = inlined_call_operand.vmem [shape: bf16[320,128], index: 1, kind: input, shape index: {}]   ;;  %s4408_s3 = inlined_call_operand.vmem [shape: f32[64,2], index: 3, kind: output, shape index: {}]  }
   0x1   :  { %2789 = vset.pattern.permute.xlu1 %v2972_v0  ;;  %2788 = vset.pattern.permute.xlu0 %v2973_v1  ;;  %v3009_v2 = vld [vmem:[%s4405_s2 + $0x30] sm:$0xff]  ;;  %v3016_v3 = vld [vmem:[%s4405_s2 + $0x38] sm:$0xff]  ;;  %v3023_v4 = vld [vmem:[%s4405_s2 + $0x28] sm:$0xff]  ;;  %vm643_vm0 = vcmask 523264   ;;  %vm2684_vm1 = vcmask 7168   ;;  %vm2717_vm2 = vcmask 15368  }
   0x2   :  { %172 = vperm.xlu1 %2789, %v3009_v2   ;;  %104 = vperm.xlu0 %2788, %v3009_v2   ;;  %v3030_v6 = vld [vmem:[%s4405_s2 + $0x18] sm:$0xff]  ;;  %v3035_v7 = vld [vmem:[%s4405_s2 + $0x20] sm:$0xff]  ;;  %v3041_v8 = vld [vmem:[%s4405_s2 + $0x8] sm:$0xff]  ;;  %v114_v12 = vshrl.u32 %v113_v11, 7 }
   0x3   :  { %v3053_v9 = vld [vmem:[%s4405_s2 + $0x10] sm:$0xff]  ;;  %v3059_v10 = vld [vmem:[%s4405_s2] sm:$0xff] }
   0x4   :  { %v181_v13 = vsub.s32 1, %v114_v12  ;;  %v185_v14 = vsub.s32 5, %v114_v12  ;;  %v115_v15 = vsub.s32 0, %v114_v12  ;;  %v119_v16 = vsub.s32 4, %v114_v12  ;;  %v15_v17 = vld [vmem:[%s4406_s0] sm:$0x77] }
   0x5   :  { %v263_v18 = vsub.s32 2, %v114_v12  ;;  %v267_v19 = vsub.s32 6, %v114_v12  ;;  %s2976_s0 = smov 1  }
   0x6   :  { %176 = vperm.xlu1 %2789, %v3016_v3   ;;  %109 = vperm.xlu0 %2788, %v3016_v3   ;;  %v182_v21 = vrot.slane %v15_v17, %v181_v13  ;;  %v186_v22 = vrot.slane %v15_v17, %v185_v14  ;;  %v116_v24 = vrot.slane %v15_v17, %v115_v15 }
   0x7   :  { %v120_v25 = vrot.slane %v15_v17, %v119_v16  ;;  %v264_v26 = vrot.slane %v15_v17, %v263_v18  ;;  %v268_v27 = vrot.slane %v15_v17, %v267_v19 }
   0x8   :  { %v3073_v28 = vrot.slane %v182_v21, %v181_v13  ;;  %v3075_v29 = vrot.slane %v186_v22, %v181_v13  ;;  %v3077_v30 = vrot.slane %v116_v24, %v115_v15 }
   0x9   :  { %v3079_v31 = vrot.slane %v120_v25, %v115_v15  ;;  %v3081_v34 = vrot.slane %v264_v26, %v263_v18  ;;  %v3083_v35 = vrot.slane %v268_v27, %v263_v18 }
   0xa   :  { %2790 = vset.pattern.permute.xlu1 %v2974_v5  ;;  %99 = vperm.xlu0 %2788, %v3023_v4  }
   0xb   :  { %258 = vperm.xlu1 %2790, %v3016_v3  }
   0xe   :  { %89 = vperm.xlu0 %2788, %v3030_v6  }
   0xf   :  { %2791 = vset.pattern.permute.xlu1 %v2973_v1 }
  0x10   :  { %94 = vperm.xlu1 %2791, %v3035_v7  }
  0x12   :  { %79 = vperm.xlu0 %2788, %v3041_v8  }
  0x14   :  { %2792 = vset.pattern.permute.xlu1 %v2972_v0 }
  0x15   :  { %164 = vperm.xlu1 %2792, %v3035_v7  }
  0x16   :  { %2798 = vset.pattern.permute.xlu0 %v2974_v5 }
  0x17   :  { %254 = vperm.xlu0 %2798, %v3009_v2  }
  0x19   :  { %168 = vperm.xlu1 %2792, %v3023_v4  }
  0x1b   :  { %246 = vperm.xlu0 %2798, %v3035_v7  }
  0x1d   :  { %2793 = vset.pattern.permute.xlu1 %v2974_v5 }
  0x1e   :  { %250 = vperm.xlu1 %2793, %v3023_v4  }
  0x1f   :  { %238 = vperm.xlu0 %2798, %v3053_v9  }
  0x22   :  { %2794 = vset.pattern.permute.xlu1 %v2973_v1 }
  0x23   :  { %84 = vperm.xlu1 %2794, %v3053_v9   ;;  %230 = vperm.xlu0 %2798, %v3059_v10  }
  0x27   :  { %2795 = vset.pattern.permute.xlu1 %v2972_v0 }
  0x28   :  { %156 = vperm.xlu1 %2795, %v3053_v9  }
  0x2c   :  { %160 = vperm.xlu1 %2795, %v3030_v6  }
  0x30   :  { %2796 = vset.pattern.permute.xlu1 %v2974_v5 }
  0x31   :  { %242 = vperm.xlu1 %2796, %v3030_v6  }
  0x35   :  { %2797 = vset.pattern.permute.xlu1 %v2973_v1 }
  0x36   :  { %74 = vperm.xlu1 %2797, %v3059_v10  }
  0x3a   :  { %2799 = vset.pattern.permute.xlu1 %v2972_v0 }
  0x3b   :  { %148 = vperm.xlu1 %2799, %v3059_v10  }
  0x3f   :  { %152 = vperm.xlu1 %2799, %v3041_v8  }
  0x43   :  { %2800 = vset.pattern.permute.xlu1 %v2974_v5 }
  0x44   :  { %234 = vperm.xlu1 %2800, %v3041_v8  }
  0x7d   :  { %v173_v20 = vpop.permute.xlu1 %172  ;;  %v105_v23 = vpop.permute.xlu0 %104 }
  0x7e   :  { %v209_v52 = vmul.f32 %v3073_v28, %v173_v20  ;;  %v210_v53 = vmul.f32 %v3075_v29, %v173_v20  ;;  %v143_v54 = vmul.f32 %v3077_v30, %v105_v23  ;;  %v144_v55 = vmul.f32 %v3079_v31, %v105_v23 }
  0x80   :  { %v225_v57 = vadd.f32 %v209_v52, %v143_v54  ;;  %v226_v58 = vadd.f32 %v210_v53, %v144_v55 }
  0x81   :  { %v177_v32 = vpop.permute.xlu1 %176  ;;  %v110_v33 = vpop.permute.xlu0 %109 }
  0x82   :  { %v211_v36 = vmul.f32 %v3073_v28, %v177_v32  ;;  %v212_v37 = vmul.f32 %v3075_v29, %v177_v32  ;;  %v145_v38 = vmul.f32 %v3077_v30, %v110_v33  ;;  %v146_v39 = vmul.f32 %v3079_v31, %v110_v33 }
  0x84   :  { %v227_v42 = vadd.f32 %v211_v36, %v145_v38  ;;  %v228_v43 = vadd.f32 %v212_v37, %v146_v39 }
  0x85   :  { %v100_v40 = vpop.permute.xlu0 %99 }
  0x86   :  { %v259_v41 = vpop.permute.xlu1 %258  ;;  %v141_v13 = vmul.f32 %v3077_v30, %v100_v40  ;;  %v142_v14 = vmul.f32 %v3079_v31, %v100_v40 }
  0x87   :  { %v293_v44 = vmul.f32 %v3081_v34, %v259_v41  ;;  %v294_v45 = vmul.f32 %v3083_v35, %v259_v41 }
  0x89   :  { %v3091_v46 = vadd.f32 %v293_v44, %v227_v42  ;;  %v3093_v47 = vadd.f32 %v294_v45, %v228_v43  ;;  %v3095_v48 = vpop.permute.xlu0 %89 }
  0x8b   :  { %v95_v49 = vpop.permute.xlu1 %94  ;;  %v332_v50 = vadd.f32 %v3093_v47, %v3091_v46 }
  0x8c   :  { %v139_v1 = vmul.f32 %v3077_v30, %v95_v49  ;;  %v140_v5 = vmul.f32 %v3079_v31, %v95_v49 }
  0x8d   :  { %333 = vadd.xlane.f32.xlu0 %v332_v50  ;;  %v3099_v51 = vpop.permute.xlu0 %79 }
  0x90   :  { %v165_v56 = vpop.permute.xlu1 %164 }
  0x91   :  { %v205_v60 = vmul.f32 %v3073_v28, %v165_v56  ;;  %v206_v61 = vmul.f32 %v3075_v29, %v165_v56 }
  0x92   :  { %v255_v59 = vpop.permute.xlu0 %254 }
  0x93   :  { %v291_v62 = vmul.f32 %v3081_v34, %v255_v59  ;;  %v292_v63 = vmul.f32 %v3083_v35, %v255_v59  ;;  %v221_v18 = vadd.f32 %v205_v60, %v139_v1  ;;  %v222_v19 = vadd.f32 %v206_v61, %v140_v5 }
  0x94   :  { %v169_v0 = vpop.permute.xlu1 %168  ;;  %v137_v61 = vmul.f32 %v3077_v30, %v3095_v48 }
  0x95   :  { %v3111_v11 = vadd.f32 %v291_v62, %v225_v57  ;;  %v3113_v12 = vadd.f32 %v292_v63, %v226_v58  ;;  %v207_v15 = vmul.f32 %v3073_v28, %v169_v0  ;;  %v208_v16 = vmul.f32 %v3075_v29, %v169_v0 }
  0x96   :  { %v247_v17 = vpop.permute.xlu0 %246  ;;  %v138_v62 = vmul.f32 %v3079_v31, %v3095_v48 }
  0x97   :  { %v287_v20 = vmul.f32 %v3081_v34, %v247_v17  ;;  %v288_v21 = vmul.f32 %v3083_v35, %v247_v17  ;;  %v329_v22 = vadd.f32 %v3113_v12, %v3111_v11  ;;  %v223_v26 = vadd.f32 %v207_v15, %v141_v13 }
  0x98   :  { %v224_v27 = vadd.f32 %v208_v16, %v142_v14 }
  0x99   :  { %v3123_v23 = vadd.f32 %v287_v20, %v221_v18  ;;  %v3125_v24 = vadd.f32 %v288_v21, %v222_v19  ;;  %v251_v25 = vpop.permute.xlu1 %250  ;;  %330 = vadd.xlane.f32.xlu1 %v329_v22 }
  0x9a   :  { %v289_v32 = vmul.f32 %v3081_v34, %v251_v25  ;;  %v290_v33 = vmul.f32 %v3083_v35, %v251_v25  ;;  %v239_v41 = vpop.permute.xlu0 %238 }
  0x9b   :  { %v323_v36 = vadd.f32 %v3125_v24, %v3123_v23  ;;  %v283_v43 = vmul.f32 %v3081_v34, %v239_v41  ;;  %v284_v44 = vmul.f32 %v3083_v35, %v239_v41 }
  0x9c   :  { %v3131_v37 = vadd.f32 %v289_v32, %v223_v26  ;;  %v3133_v38 = vadd.f32 %v290_v33, %v224_v27 }
  0x9d   :  { %324 = vadd.xlane.f32.xlu0 %v323_v36 }
  0x9e   :  { %v85_v39 = vpop.permute.xlu1 %84  ;;  %v326_v40 = vadd.f32 %v3133_v38, %v3131_v37  ;;  %v231_v18 = vpop.permute.xlu0 %230 }
  0x9f   :  { %v135_v45 = vmul.f32 %v3077_v30, %v85_v39  ;;  %v136_v49 = vmul.f32 %v3079_v31, %v85_v39  ;;  %v279_v25 = vmul.f32 %v3081_v34, %v231_v18  ;;  %v280_v26 = vmul.f32 %v3083_v35, %v231_v18 }
  0xa0   :  { %327 = vadd.xlane.f32.xlu1 %v326_v40 }
  0xa3   :  { %v157_v42 = vpop.permute.xlu1 %156 }
  0xa4   :  { %v201_v50 = vmul.f32 %v3073_v28, %v157_v42  ;;  %v202_v52 = vmul.f32 %v3075_v29, %v157_v42 }
  0xa6   :  { %v217_v53 = vadd.f32 %v201_v50, %v135_v45  ;;  %v218_v54 = vadd.f32 %v202_v52, %v136_v49  ;;  %v133_v45 = vmul.f32 %v3077_v30, %v3099_v51  ;;  %v134_v49 = vmul.f32 %v3079_v31, %v3099_v51 }
  0xa7   :  { %v161_v55 = vpop.permute.xlu1 %160 }
  0xa8   :  { %v3143_v56 = vadd.f32 %v283_v43, %v217_v53  ;;  %v3145_v57 = vadd.f32 %v284_v44, %v218_v54  ;;  %v203_v58 = vmul.f32 %v3073_v28, %v161_v55  ;;  %v204_v59 = vmul.f32 %v3075_v29, %v161_v55 }
  0xa9   :  { %v355_v43 = vmul.f32 %v3111_v11, %v3111_v11  ;;  %v356_v44 = vmul.f32 %v3113_v12, %v3113_v12  ;;  %v351_v55 = vmul.f32 %v3123_v23, %v3123_v23 }
  0xaa   :  { %v317_v60 = vadd.f32 %v3145_v57, %v3143_v56  ;;  %v219_v0 = vadd.f32 %v203_v58, %v137_v61  ;;  %v220_v1 = vadd.f32 %v204_v59, %v138_v62  ;;  %v352_v58 = vmul.f32 %v3125_v24, %v3125_v24 }
  0xab   :  { %v377_v54 = vadd.f32 %v356_v44, %v355_v43  ;;  %v348_v61 = vmul.f32 %v3145_v57, %v3145_v57 }
  0xac   :  { %v243_v63 = vpop.permute.xlu1 %242  ;;  %318 = vadd.xlane.f32.xlu0 %v317_v60  ;;  %v371_v51 = vadd.f32 %v352_v58, %v351_v55  ;;  %v347_v60 = vmul.f32 %v3143_v56, %v3143_v56 }
  0xad   :  { %v285_v5 = vmul.f32 %v3081_v34, %v243_v63  ;;  %v286_v13 = vmul.f32 %v3083_v35, %v243_v63  ;;  %v353_v63 = vmul.f32 %v3131_v37, %v3131_v37 }
  0xaf   :  { %v3157_v14 = vadd.f32 %v285_v5, %v219_v0  ;;  %v3159_v15 = vadd.f32 %v286_v13, %v220_v1  ;;  %v354_v0 = vmul.f32 %v3133_v38, %v3133_v38  ;;  %v365_v1 = vadd.f32 %v348_v61, %v347_v60 }
  0xb1   :  { %v75_v16 = vpop.permute.xlu1 %74  ;;  %v320_v17 = vadd.f32 %v3159_v15, %v3157_v14  ;;  %v350_v18 = vmul.f32 %v3159_v15, %v3159_v15 }
  0xb2   :  { %v131_v48 = vmul.f32 %v3077_v30, %v75_v16  ;;  %v132_v20 = vmul.f32 %v3079_v31, %v75_v16  ;;  %v374_v16 = vadd.f32 %v354_v0, %v353_v63 }
  0xb3   :  { %321 = vadd.xlane.f32.xlu1 %v320_v17  ;;  %v349_v17 = vmul.f32 %v3157_v14, %v3157_v14 }
  0xb6   :  { %v149_v19 = vpop.permute.xlu1 %148 }
  0xb7   :  { %v197_v21 = vmul.f32 %v3073_v28, %v149_v19  ;;  %v198_v22 = vmul.f32 %v3075_v29, %v149_v19 }
  0xb9   :  { %v213_v27 = vadd.f32 %v197_v21, %v131_v48  ;;  %v214_v32 = vadd.f32 %v198_v22, %v132_v20  ;;  %v368_v48 = vadd.f32 %v350_v18, %v349_v17 }
  0xba   :  { %v153_v33 = vpop.permute.xlu1 %152 }
  0xbb   :  { %v3169_v36 = vadd.f32 %v279_v25, %v213_v27  ;;  %v3171_v39 = vadd.f32 %v280_v26, %v214_v32  ;;  %v199_v40 = vmul.f32 %v3073_v28, %v153_v33  ;;  %v200_v41 = vmul.f32 %v3075_v29, %v153_v33 }
  0xbc   :  { %v4409_v25 = vmov 0  }
  0xbd   :  { %v311_v42 = vadd.f32 %v3171_v39, %v3169_v36  ;;  %v215_v28 = vadd.f32 %v199_v40, %v133_v45  ;;  %v216_v52 = vadd.f32 %v200_v41, %v134_v49  ;;  %v343_v5 = vmul.f32 %v3169_v36, %v3169_v36  ;;  %2802 = vset.pattern.permute.xlu0 %v4409_v25 }
  0xbe   :  { %v344_v13 = vmul.f32 %v3171_v39, %v3171_v39  ;;  %2801 = vset.pattern.permute.xlu1 %v4409_v25  ;;  %688 = vmatprep.mubr.bf16.mxu0 %v4409_v25 }
  0xbf   :  { %v235_v50 = vpop.permute.xlu1 %234  ;;  %312 = vadd.xlane.f32.xlu0 %v311_v42  ;;  %708 = vmatprep.mubr.bf16.mxu1 %v4409_v25 }
  0xc0   :  { %v281_v29 = vmul.f32 %v3081_v34, %v235_v50  ;;  %v282_v53 = vmul.f32 %v3083_v35, %v235_v50  ;;  %v357_v34 = vmul.f32 %v3091_v46, %v3091_v46  ;;  %v358_v35 = vmul.f32 %v3093_v47, %v3093_v47 }
  0xc1   :  { %v359_v19 = vadd.f32 %v344_v13, %v343_v5 }
  0xc2   :  { %v3191_v59 = vadd.f32 %v281_v29, %v215_v28  ;;  %v3193_v30 = vadd.f32 %v282_v53, %v216_v52  ;;  %v380_v62 = vadd.f32 %v358_v35, %v357_v34 }
  0xc3   :  { %378 = vadd.xlane.f32.xlu0 %v377_v54 }
  0xc4   :  { %v314_v31 = vadd.f32 %v3193_v30, %v3191_v59  ;;  %v345_v20 = vmul.f32 %v3191_v59, %v3191_v59  ;;  %v346_v21 = vmul.f32 %v3193_v30, %v3193_v30 }
  0xc6   :  { %315 = vadd.xlane.f32.xlu1 %v314_v31  ;;  %v362_v22 = vadd.f32 %v346_v21, %v345_v20 }
  0xc7   :  { %372 = vadd.xlane.f32.xlu0 %v371_v51 }
  0xca   :  { %381 = vadd.xlane.f32.xlu1 %v380_v62 }
  0xcb   :  { %366 = vadd.xlane.f32.xlu0 %v365_v1 }
  0xce   :  { %375 = vadd.xlane.f32.xlu1 %v374_v16 }
  0xcf   :  { %360 = vadd.xlane.f32.xlu0 %v359_v19 }
  0xd2   :  { %369 = vadd.xlane.f32.xlu1 %v368_v48 }
  0xd6   :  { %363 = vadd.xlane.f32.xlu1 %v362_v22 }
 0x116   :  { %v334_v26 = vpop.xlane.xlu0 %333 }
 0x117   :  { %v3231_v29 = vmul.f32 0.00390625, %v334_v26 }
 0x119   :  { %v398_v60 = vmul.f32 %v3231_v29, %v3231_v29 }
 0x122   :  { %v331_v32 = vpop.xlane.xlu1 %330 }
 0x123   :  { %v3225_v42 = vmul.f32 0.00390625, %v331_v32 }
 0x125   :  { %v397_v45 = vmul.f32 %v3225_v42, %v3225_v42 }
 0x126   :  { %v325_v27 = vpop.xlane.xlu0 %324 }
 0x127   :  { %v3229_v49 = vmul.f32 0.00390625, %v325_v27 }
 0x129   :  { %v328_v40 = vpop.xlane.xlu1 %327  ;;  %v395_v55 = vmul.f32 %v3229_v49, %v3229_v49 }
 0x12a   :  { %v3239_v61 = vmul.f32 0.00390625, %v328_v40 }
 0x12c   :  { %v396_v20 = vmul.f32 %v3239_v61, %v3239_v61 }
 0x135   :  { %v319_v33 = vpop.xlane.xlu0 %318 }
 0x136   :  { %v3233_v53 = vmul.f32 0.00390625, %v319_v33 }
 0x138   :  { %v393_v62 = vmul.f32 %v3233_v53, %v3233_v53 }
 0x13c   :  { %v322_v43 = vpop.xlane.xlu1 %321 }
 0x13d   :  { %v338_v17 = vmul.f32 0.00390625, %v322_v43 }
 0x148   :  { %v313_v41 = vpop.xlane.xlu0 %312 }
 0x149   :  { %v3243_v1 = vmul.f32 0.00390625, %v313_v41 }
 0x14b   :  { %v391_v27 = vmul.f32 %v3243_v1, %v3243_v1 }
 0x14c   :  { %v379_v44 = vpop.xlane.xlu0 %378 }
 0x14d   :  { %v389_v50 = vmul.f32 0.00390625, %v379_v44  ;;  %v394_v44 = vmul.f32 %v338_v17, %v338_v17 }
 0x14f   :  { %v405_v28 = vsub.f32 %v389_v50, %v397_v45  ;;  %v316_v52 = vpop.xlane.xlu1 %315 }
 0x150   :  { %v373_v54 = vpop.xlane.xlu0 %372 }
 0x151   :  { %v413_v58 = vmax.f32 %v405_v28, 0.0  ;;  %v387_v31 = vmul.f32 0.00390625, %v373_v54  ;;  %v336_v28 = vmul.f32 0.00390625, %v316_v52 }
 0x153   :  { %v421_v34 = vadd.f32 1e-05, %v413_v58  ;;  %v403_v35 = vsub.f32 %v387_v31, %v395_v55  ;;  %v382_v51 = vpop.xlane.xlu1 %381 }
 0x154   :  { %v390_v63 = vmul.f32 0.00390625, %v382_v51  ;;  %v367_v0 = vpop.xlane.xlu0 %366 }
 0x155   :  { %2860 = vrsqrt.f32 %v421_v34  ;;  %v411_v5 = vmax.f32 %v403_v35, 0.0  ;;  %v385_v13 = vmul.f32 0.00390625, %v367_v0 }
 0x156   :  { %v406_v16 = vsub.f32 %v390_v63, %v398_v60  ;;  %v392_v60 = vmul.f32 %v336_v28, %v336_v28 }
 0x157   :  { %v419_v18 = vadd.f32 1e-05, %v411_v5  ;;  %v401_v19 = vsub.f32 %v385_v13, %v393_v62  ;;  %v376_v48 = vpop.xlane.xlu1 %375 }
 0x158   :  { %v414_v21 = vmax.f32 %v406_v16, 0.0  ;;  %v388_v22 = vmul.f32 0.00390625, %v376_v48  ;;  %v361_v26 = vpop.xlane.xlu0 %360 }
 0x159   :  { %v409_v32 = vmax.f32 %v401_v19, 0.0  ;;  %v383_v33 = vmul.f32 0.00390625, %v361_v26  ;;  %2862 = vrsqrt.f32 %v419_v18 }
 0x15a   :  { %v422_v40 = vadd.f32 1e-05, %v414_v21  ;;  %v404_v41 = vsub.f32 %v388_v22, %v396_v20 }
 0x15b   :  { %v417_v45 = vadd.f32 1e-05, %v409_v32  ;;  %v399_v43 = vsub.f32 %v383_v33, %v391_v27  ;;  %v370_v50 = vpop.xlane.xlu1 %369 }
 0x15c   :  { %2864 = vrsqrt.f32 %v422_v40  ;;  %v412_v54 = vmax.f32 %v404_v41, 0.0  ;;  %v386_v55 = vmul.f32 0.00390625, %v370_v50 }
 0x15d   :  { %v407_v58 = vmax.f32 %v399_v43, 0.0  ;;  %2866 = vrsqrt.f32 %v417_v45 }
 0x15e   :  { %v420_v31 = vadd.f32 1e-05, %v412_v54  ;;  %v402_v34 = vsub.f32 %v386_v55, %v394_v44 }
 0x15f   :  { %v415_v35 = vadd.f32 1e-05, %v407_v58  ;;  %v364_v51 = vpop.xlane.xlu1 %363 }
 0x160   :  { %2868 = vrsqrt.f32 %v420_v31  ;;  %v410_v62 = vmax.f32 %v402_v34, 0.0  ;;  %v384_v63 = vmul.f32 0.00390625, %v364_v51 }
 0x161   :  { %2870 = vrsqrt.f32 %v415_v35 }
 0x162   :  { %v2861_v0 = vpop.eup %2860  ;;  %v418_v5 = vadd.f32 1e-05, %v410_v62  ;;  %v400_v13 = vsub.f32 %v384_v63, %v392_v60 }
 0x163   :  { %v437_v16 = vmul.f32 %v2861_v0, %v3009_v2 }
 0x164   :  { %2872 = vrsqrt.f32 %v418_v5  ;;  %v408_v52 = vmax.f32 %v400_v13, 0.0 }
 0x165   :  { %v445_v18 = vmul.f32 %v437_v16, %v3225_v42 }
 0x166   :  { %v416_v19 = vadd.f32 1e-05, %v408_v52  ;;  %v2863_v48 = vpop.eup %2862 }
 0x167   :  { %467 = vrot.lane.b32.xlu0 %v445_v18, %s2976_s0  ;;  %v435_v27 = vmul.f32 %v2863_v48, %v3035_v7 }
 0x168   :  { %2874 = vrsqrt.f32 %v416_v19 }
 0x169   :  { %v2865_v20 = vpop.eup %2864  ;;  %v443_v41 = vmul.f32 %v435_v27, %v3229_v49 }
 0x16a   :  { %v438_v21 = vmul.f32 %v2865_v20, %v3016_v3  ;;  %v2867_v22 = vpop.eup %2866 }
 0x16b   :  { %v433_v44 = vmul.f32 %v2867_v22, %v3053_v9 }
 0x16c   :  { %v446_v26 = vmul.f32 %v438_v21, %v3231_v29 }
 0x16d   :  { %v2869_v32 = vpop.eup %2868  ;;  %v441_v50 = vmul.f32 %v433_v44, %v3233_v53  ;;  %v2977_v53 = vmov 1  }
 0x16e   :  { %469 = vrot.lane.b32.xlu1 %v446_v26, %s2976_s0  ;;  %v436_v33 = vmul.f32 %v2869_v32, %v3023_v4  ;;  %v2871_v42 = vpop.eup %2870 }
 0x16f   :  { %v431_v54 = vmul.f32 %v2871_v42, %v3059_v10 }
 0x170   :  { %v444_v40 = vmul.f32 %v436_v33, %v3239_v61 }
 0x171   :  { %v2873_v45 = vpop.eup %2872  ;;  %v439_v58 = vmul.f32 %v431_v54, %v3243_v1 }
 0x172   :  { %465 = vrot.lane.b32.xlu0 %v444_v40, %s2976_s0  ;;  %463 = vrot.lane.b32.xlu1 %v443_v41, %s2976_s0  ;;  %v434_v29 = vmul.f32 %v2873_v45, %v3030_v6 }
 0x174   :  { %v442_v43 = vmul.f32 %v434_v29, %v338_v17 }
 0x175   :  { %v2875_v55 = vpop.eup %2874 }
 0x176   :  { %461 = vrot.lane.b32.xlu0 %v442_v43, %s2976_s0  ;;  %459 = vrot.lane.b32.xlu1 %v441_v50, %s2976_s0  ;;  %v432_v49 = vmul.f32 %v2875_v55, %v3041_v8 }
 0x178   :  { %v440_v61 = vmul.f32 %v432_v49, %v336_v28 }
 0x17a   :  { %457 = vrot.lane.b32.xlu0 %v440_v61, %s2976_s0  ;;  %455 = vrot.lane.b32.xlu1 %v439_v58, %s2976_s0 }
 0x17e   :  { %524 = vperm.xlu0 %2802, %v438_v21   ;;  %519 = vperm.xlu1 %2801, %v437_v16  }
 0x182   :  { %509 = vperm.xlu0 %2802, %v435_v27   ;;  %514 = vperm.xlu1 %2801, %v436_v33  }
 0x186   :  { %504 = vperm.xlu0 %2802, %v434_v29   ;;  %499 = vperm.xlu1 %2801, %v433_v44  }
 0x18a   :  { %2803 = vset.pattern.permute.xlu1 %v2977_v53  ;;  %2804 = vset.pattern.permute.xlu0 %v2977_v53 }
 0x1d9   :  { %v468_v17 = vpop.permute.xlu0 %467 }
 0x1da   :  { %v485_v31 = vsub.f32 %v3009_v2, %v468_v17 }
 0x1dc   :  { %575 = vperm.xlu1 %2803, %v485_v31  }
 0x1e0   :  { %v470_v28 = vpop.permute.xlu1 %469 }
 0x1e1   :  { %v486_v1 = vsub.f32 %v3016_v3, %v470_v28 }
 0x1e3   :  { %580 = vperm.xlu1 %2803, %v486_v1  }
 0x1e4   :  { %v464_v34 = vpop.permute.xlu1 %463  ;;  %v466_v51 = vpop.permute.xlu0 %465 }
 0x1e5   :  { %v483_v35 = vsub.f32 %v3035_v7, %v464_v34  ;;  %v484_v62 = vsub.f32 %v3023_v4, %v466_v51 }
 0x1e7   :  { %565 = vperm.xlu0 %2804, %v483_v35   ;;  %2806 = vset.pattern.permute.xlu1 %v4409_v25 }
 0x1e8   :  { %v460_v60 = vpop.permute.xlu1 %459  ;;  %494 = vperm.xlu1 %2806, %v432_v49   ;;  %v462_v63 = vpop.permute.xlu0 %461 }
 0x1e9   :  { %v481_v3 = vsub.f32 %v3053_v9, %v460_v60  ;;  %v482_v7 = vsub.f32 %v3030_v6, %v462_v63 }
 0x1eb   :  { %2805 = vset.pattern.permute.xlu0 %v4409_v25 }
 0x1ec   :  { %489 = vperm.xlu0 %2805, %v431_v54   ;;  %v456_v2 = vpop.permute.xlu1 %455  ;;  %2807 = vset.pattern.permute.xlu1 %v2977_v53  ;;  %v458_v5 = vpop.permute.xlu0 %457 }
 0x1ed   :  { %570 = vperm.xlu1 %2807, %v484_v62   ;;  %v479_v0 = vsub.f32 %v3059_v10, %v456_v2  ;;  %v480_v4 = vsub.f32 %v3041_v8, %v458_v5 }
 0x1f0   :  { %2808 = vset.pattern.permute.xlu0 %v2977_v53 }
 0x1f1   :  { %545 = vperm.xlu0 %2808, %v479_v0   ;;  %555 = vperm.xlu1 %2807, %v481_v3  }
 0x1f5   :  { %560 = vperm.xlu1 %2807, %v482_v7  }
 0x1f9   :  { %550 = vperm.xlu1 %2807, %v480_v4   ;;  %v520_v13 = vpop.permute.xlu1 %519  ;;  %v525_v52 = vpop.permute.xlu0 %524 }
 0x1fa   :  { %v539_v9 = vmul.f32 %v520_v13, %v3111_v11  ;;  %v540_v10 = vmul.f32 %v520_v13, %v3113_v12  ;;  %v541_v20 = vmul.f32 %v525_v52, %v3091_v46  ;;  %v542_v21 = vmul.f32 %v525_v52, %v3093_v47 }
 0x1fd   :  { %v515_v16 = vpop.permute.xlu1 %514  ;;  %v510_v19 = vpop.permute.xlu0 %509 }
 0x1fe   :  { %v535_v46 = vmul.f32 %v510_v19, %v3123_v23  ;;  %v536_v47 = vmul.f32 %v510_v19, %v3125_v24  ;;  %v537_v12 = vmul.f32 %v515_v16, %v3131_v37  ;;  %v538_v43 = vmul.f32 %v515_v16, %v3133_v38 }
 0x201   :  { %v500_v18 = vpop.permute.xlu1 %499  ;;  %v505_v27 = vpop.permute.xlu0 %504 }
 0x202   :  { %v531_v23 = vmul.f32 %v500_v18, %v3143_v56  ;;  %v532_v24 = vmul.f32 %v500_v18, %v3145_v57  ;;  %v533_v37 = vmul.f32 %v505_v27, %v3157_v14  ;;  %v534_v38 = vmul.f32 %v505_v27, %v3159_v15 }
 0x257   :  { %v576_v48 = vpop.permute.xlu1 %575 }
 0x258   :  { %v595_v6 = vadd.f32 %v576_v48, %v539_v9  ;;  %v596_v22 = vadd.f32 %v576_v48, %v540_v10 }
 0x25a   :  { %v612_v33 = vmax.f32 %v596_v22, 0.0  ;;  %v611_v40 = vmax.f32 %v595_v6, 0.0  ;;  %v2841_v6 = vld [vmem:[%s4407_s1 + $0x10] sm:$0xff]   ;;  %v2842_v22 = vld [vmem:[%s4407_s1 + $0x8] sm:$0xff]  }
 0x25e   :  { %v581_v26 = vpop.permute.xlu1 %580 }
 0x25f   :  { %v597_v8 = vadd.f32 %v581_v26, %v541_v20  ;;  %v598_v32 = vadd.f32 %v581_v26, %v542_v21  ;;  %v2840_v21 = vld [vmem:[%s4407_s1] sm:$0xff]   ;;  %v2843_v26 = vld [vmem:[%s4407_s1 + $0x18] sm:$0xff]  }
 0x261   :  { %v614_v42 = vmax.f32 %v598_v32, 0.0  ;;  %v613_v41 = vmax.f32 %v597_v8, 0.0 }
 0x262   :  { %v566_v44 = vpop.permute.xlu0 %565 }
 0x263   :  { %v495_v45 = vpop.permute.xlu1 %494  ;;  %v622_v29 = vpack.c.bf16 %v614_v42, %v612_v33  ;;  %v621_v11 = vpack.c.bf16 %v613_v41, %v611_v40  ;;  %v591_v50 = vadd.f32 %v566_v44, %v535_v46  ;;  %v592_v54 = vadd.f32 %v566_v44, %v536_v47 }
 0x264   :  { %v529_v57 = vmul.f32 %v495_v45, %v3191_v59  ;;  %v530_v14 = vmul.f32 %v495_v45, %v3193_v30 }
 0x265   :  { %664 = vmatprep.subr.bf16.mxu0 %v622_v29  ;;  %2766 = vmatprep.subr.bf16.mxu1 %v622_v29  ;;  %v607_v31 = vmax.f32 %v591_v50, 0.0  ;;  %v608_v28 = vmax.f32 %v592_v54, 0.0 }
 0x266   :  { %665 = vmatpush1.bf16.msra.mxu0 %v621_v11  ;;  %2770 = vmatpush1.bf16.msra.mxu1 %v621_v11 }
 0x267   :  { %v490_v49 = vpop.permute.xlu0 %489 }
 0x268   :  { %v571_v55 = vpop.permute.xlu1 %570  ;;  %v527_v2 = vmul.f32 %v490_v49, %v3169_v36  ;;  %v528_v63 = vmul.f32 %v490_v49, %v3171_v39 }
 0x269   :  { %v593_v61 = vadd.f32 %v571_v55, %v537_v12  ;;  %v594_v58 = vadd.f32 %v571_v55, %v538_v43 }
 0x26b   :  { %v609_v53 = vmax.f32 %v593_v61, 0.0  ;;  %v610_v17 = vmax.f32 %v594_v58, 0.0 }
 0x26c   :  { %v556_v1 = vpop.permute.xlu1 %555  ;;  %v546_v62 = vpop.permute.xlu0 %545 }
 0x26d   :  { %v620_v34 = vpack.c.bf16 %v610_v17, %v608_v28  ;;  %v619_v35 = vpack.c.bf16 %v609_v53, %v607_v31  ;;  %v587_v51 = vadd.f32 %v556_v1, %v531_v23  ;;  %v588_v60 = vadd.f32 %v556_v1, %v532_v24 }
 0x26e   :  { %v583_v7 = vadd.f32 %v546_v62, %v527_v2  ;;  %v584_v15 = vadd.f32 %v546_v62, %v528_v63 }
 0x26f   :  { %666 = vmatprep.subr.bf16.mxu0 %v620_v34  ;;  %2767 = vmatprep.subr.bf16.mxu1 %v620_v34  ;;  %v603_v5 = vmax.f32 %v587_v51, 0.0  ;;  %v604_v4 = vmax.f32 %v588_v60, 0.0 }
 0x270   :  { %v561_v3 = vpop.permute.xlu1 %560  ;;  %667 = vmatpush1.bf16.msra.mxu0 %v619_v35  ;;  %2771 = vmatpush1.bf16.msra.mxu1 %v619_v35  ;;  %v599_v48 = vmax.f32 %v583_v7, 0.0  ;;  %v600_v9 = vmax.f32 %v584_v15, 0.0 }
 0x271   :  { %v589_v0 = vadd.f32 %v561_v3, %v533_v37  ;;  %v590_v56 = vadd.f32 %v561_v3, %v534_v38 }
 0x273   :  { %v605_v13 = vmax.f32 %v589_v0, 0.0  ;;  %v606_v16 = vmax.f32 %v590_v56, 0.0 }
 0x274   :  { %v551_v36 = vpop.permute.xlu1 %550 }
 0x275   :  { %v585_v52 = vadd.f32 %v551_v36, %v529_v57  ;;  %v586_v39 = vadd.f32 %v551_v36, %v530_v14  ;;  %v618_v18 = vpack.c.bf16 %v606_v16, %v604_v4  ;;  %v617_v19 = vpack.c.bf16 %v605_v13, %v603_v5 }
 0x276   :  { %v2978_v36 = vmov 2  }
 0x277   :  { %v601_v10 = vmax.f32 %v585_v52, 0.0  ;;  %v602_v20 = vmax.f32 %v586_v39, 0.0  ;;  %668 = vmatprep.subr.bf16.mxu0 %v618_v18  ;;  %2768 = vmatprep.subr.bf16.mxu1 %v618_v18 }
 0x278   :  { %669 = vmatpush1.bf16.msra.mxu0 %v617_v19  ;;  %2772 = vmatpush1.bf16.msra.mxu1 %v617_v19 }
 0x279   :  { %v616_v59 = vpack.c.bf16 %v602_v20, %v600_v9  ;;  %v615_v30 = vpack.c.bf16 %v601_v10, %v599_v48  ;;  %2810 = vset.pattern.permute.xlu0 %v2978_v36  ;;  %2809 = vset.pattern.permute.xlu1 %v2978_v36 }
 0x27b   :  { %670 = vmatprep.subr.bf16.mxu0 %v616_v59  ;;  %2769 = vmatprep.subr.bf16.mxu1 %v616_v59 }
 0x27c   :  { %671 = vmatpush1.bf16.msra.mxu0 %v615_v30  ;;  %2773 = vmatpush1.bf16.msra.mxu1 %v615_v30 }
 0x27f   :  { %2734 = vmatmul.mubr.msk.bf16.vlgmr.msra.gmra.mxu0 %vm643_vm0, %v2840_v21  ;;  %2736 = vmatmul.mubr.msk.bf16.vlgmr.msra.gmra.mxu1 %vm643_vm0, %v2841_v6 }
 0x280   :  { %698 = vmatprep.mubr.bf16.mxu0 %v4409_v25  ;;  %718 = vmatprep.mubr.bf16.mxu1 %v4409_v25 }
 0x287   :  { %2735 = vmatmul.mubr.msk.bf16.gmra.mxu0 %vm643_vm0, %v2842_v22  ;;  %2737 = vmatmul.mubr.msk.bf16.gmra.mxu1 %vm643_vm0, %v2843_v26 }
 0x288   :  { %1105 = vmatprep.mubr.bf16.mxu1 %v4409_v25  ;;  %1554 = vmatprep.mubr.bf16.mxu0 %v4409_v25 }
 0x33f   :  { %v3317_v27 = vpop.f32.mrf.mxu0  ;;  %v3319_v8 = vpop.f32.mrf.mxu1 }
 0x340   :  { %v769_v45 = vmul.f32 %v3319_v8, %v3319_v8  ;;  %v761_v14 = vmul.f32 %v3317_v27, %v3317_v27 }
 0x341   :  { %v3321_v32 = vpop.f32.mrf.mxu0  ;;  %v3323_v33 = vpop.f32.mrf.mxu1 }
 0x342   :  { %v741_v42 = vadd.f32 %v3323_v33, %v3319_v8  ;;  %v770_v40 = vmul.f32 %v3323_v33, %v3323_v33  ;;  %v729_v56 = vadd.f32 %v3321_v32, %v3317_v27  ;;  %v762_v7 = vmul.f32 %v3321_v32, %v3321_v32 }
 0x343   :  { %v3329_v41 = vpop.f32.mrf.mxu0  ;;  %v3331_v44 = vpop.f32.mrf.mxu1 }
 0x344   :  { %742 = vadd.xlane.f32.xlu0 %v741_v42  ;;  %v789_v46 = vadd.f32 %v770_v40, %v769_v45  ;;  %v771_v54 = vmul.f32 %v3331_v44, %v3331_v44  ;;  %v777_v4 = vadd.f32 %v762_v7, %v761_v14  ;;  %v763_v13 = vmul.f32 %v3329_v41, %v3329_v41 }
 0x345   :  { %v3335_v29 = vpop.f32.mrf.mxu0  ;;  %v3337_v11 = vpop.f32.mrf.mxu1 }
 0x346   :  { %v744_v47 = vadd.f32 %v3337_v11, %v3331_v44  ;;  %v772_v12 = vmul.f32 %v3337_v11, %v3337_v11  ;;  %v732_v3 = vadd.f32 %v3335_v29, %v3329_v41  ;;  %v764_v5 = vmul.f32 %v3335_v29, %v3335_v29 }
 0x347   :  { %v3343_v43 = vpop.f32.mrf.mxu0  ;;  %v3345_v50 = vpop.f32.mrf.mxu1 }
 0x348   :  { %790 = vadd.xlane.f32.xlu0 %v789_v46  ;;  %745 = vadd.xlane.f32.xlu1 %v744_v47  ;;  %v773_v55 = vmul.f32 %v3345_v50, %v3345_v50  ;;  %v792_v58 = vadd.f32 %v772_v12, %v771_v54  ;;  %v765_v60 = vmul.f32 %v3343_v43, %v3343_v43 }
 0x349   :  { %v3351_v49 = vpop.f32.mrf.mxu0  ;;  %v3353_v61 = vpop.f32.mrf.mxu1  ;;  %v780_v16 = vadd.f32 %v764_v5, %v763_v13 }
 0x34a   :  { %v774_v53 = vmul.f32 %v3353_v61, %v3353_v61  ;;  %v747_v23 = vadd.f32 %v3353_v61, %v3345_v50  ;;  %v735_v38 = vadd.f32 %v3351_v49, %v3343_v43  ;;  %v766_v62 = vmul.f32 %v3351_v49, %v3351_v49 }
 0x34b   :  { %v3357_v17 = vpop.f32.mrf.mxu0  ;;  %v3359_v31 = vpop.f32.mrf.mxu1 }
 0x34c   :  { %793 = vadd.xlane.f32.xlu1 %v792_v58  ;;  %v795_v28 = vadd.f32 %v774_v53, %v773_v55  ;;  %v775_v51 = vmul.f32 %v3359_v31, %v3359_v31  ;;  %v783_v63 = vadd.f32 %v766_v62, %v765_v60  ;;  %v767_v57 = vmul.f32 %v3357_v17, %v3357_v17 }
 0x34d   :  { %v3361_v1 = vpop.f32.mrf.mxu1  ;;  %v3365_v24 = vpop.f32.mrf.mxu0 }
 0x34e   :  { %796 = vadd.xlane.f32.xlu0 %v795_v28  ;;  %v750_v34 = vadd.f32 %v3361_v1, %v3359_v31  ;;  %v738_v35 = vadd.f32 %v3365_v24, %v3357_v17  ;;  %v776_v37 = vmul.f32 %v3361_v1, %v3361_v1  ;;  %v768_v0 = vmul.f32 %v3365_v24, %v3365_v24 }
 0x350   :  { %748 = vadd.xlane.f32.xlu1 %v747_v23  ;;  %v798_v2 = vadd.f32 %v776_v37, %v775_v51  ;;  %v786_v15 = vadd.f32 %v768_v0, %v767_v57 }
 0x352   :  { %751 = vadd.xlane.f32.xlu0 %v750_v34 }
 0x354   :  { %739 = vadd.xlane.f32.xlu1 %v738_v35 }
 0x356   :  { %736 = vadd.xlane.f32.xlu0 %v735_v38 }
 0x358   :  { %799 = vadd.xlane.f32.xlu1 %v798_v2 }
 0x35a   :  { %784 = vadd.xlane.f32.xlu0 %v783_v63 }
 0x35c   :  { %733 = vadd.xlane.f32.xlu1 %v732_v3 }
 0x35e   :  { %730 = vadd.xlane.f32.xlu0 %v729_v56 }
 0x360   :  { %787 = vadd.xlane.f32.xlu1 %v786_v15 }
 0x362   :  { %778 = vadd.xlane.f32.xlu0 %v777_v4 }
 0x364   :  { %781 = vadd.xlane.f32.xlu1 %v780_v16 }
 0x3cd   :  { %v743_v52 = vpop.xlane.xlu0 %742 }
 0x3ce   :  { %v3403_v20 = vmul.f32 0.00390625, %v743_v52 }
 0x3d0   :  { %v813_v26 = vmul.f32 %v3403_v20, %v3403_v20 }
 0x3d1   :  { %v746_v39 = vpop.xlane.xlu1 %745  ;;  %v791_v19 = vpop.xlane.xlu0 %790 }
 0x3d2   :  { %v3399_v18 = vmul.f32 0.00390625, %v746_v39  ;;  %v805_v21 = vmul.f32 0.00390625, %v791_v19 }
 0x3d4   :  { %v814_v9 = vmul.f32 %v3399_v18, %v3399_v18  ;;  %v821_v47 = vsub.f32 %v805_v21, %v813_v26 }
 0x3d5   :  { %v794_v48 = vpop.xlane.xlu1 %793 }
 0x3d6   :  { %v806_v10 = vmul.f32 0.00390625, %v794_v48  ;;  %v829_v34 = vmax.f32 %v821_v47, 0.0 }
 0x3d7   :  { %v797_v59 = vpop.xlane.xlu0 %796 }
 0x3d8   :  { %v822_v30 = vsub.f32 %v806_v10, %v814_v9  ;;  %v807_v45 = vmul.f32 0.00390625, %v797_v59  ;;  %v837_v3 = vadd.f32 1e-05, %v829_v34 }
 0x3d9   :  { %v749_v6 = vpop.xlane.xlu1 %748 }
 0x3da   :  { %v759_v22 = vmul.f32 0.00390625, %v749_v6  ;;  %v830_v42 = vmax.f32 %v822_v30, 0.0 }
 0x3db   :  { %v752_v40 = vpop.xlane.xlu0 %751 }
 0x3dc   :  { %v815_v46 = vmul.f32 %v759_v22, %v759_v22  ;;  %v3407_v55 = vmul.f32 0.00390625, %v752_v40  ;;  %v838_v58 = vadd.f32 1e-05, %v830_v42 }
 0x3dd   :  { %v740_v12 = vpop.xlane.xlu1 %739 }
 0x3de   :  { %v823_v54 = vsub.f32 %v807_v45, %v815_v46  ;;  %v816_v38 = vmul.f32 %v3407_v55, %v3407_v55  ;;  %2876 = vrsqrt.f32 %v838_v58  ;;  %v756_v56 = vmul.f32 0.00390625, %v740_v12 }
 0x3df   :  { %v737_v53 = vpop.xlane.xlu0 %736 }
 0x3e0   :  { %v831_v28 = vmax.f32 %v823_v54, 0.0  ;;  %v3409_v23 = vmul.f32 0.00390625, %v737_v53  ;;  %v812_v52 = vmul.f32 %v756_v56, %v756_v56  ;;  %v3422_v54 = vld [vmem:[%s4405_s2 + $0x30] sm:$0xff] }
 0x3e1   :  { %v800_v35 = vpop.xlane.xlu1 %799 }
 0x3e2   :  { %v839_v37 = vadd.f32 1e-05, %v831_v28  ;;  %v808_v51 = vmul.f32 0.00390625, %v800_v35  ;;  %v811_v62 = vmul.f32 %v3409_v23, %v3409_v23 }
 0x3e3   :  { %v785_v60 = vpop.xlane.xlu0 %784 }
 0x3e4   :  { %2878 = vrsqrt.f32 %v839_v37  ;;  %v824_v2 = vsub.f32 %v808_v51, %v816_v38  ;;  %v803_v63 = vmul.f32 0.00390625, %v785_v60  ;;  %v3428_v37 = vld [vmem:[%s4405_s2 + $0x28] sm:$0xff] }
 0x3e5   :  { %v734_v0 = vpop.xlane.xlu1 %733  ;;  %2880 = vrsqrt.f32 %v837_v3  ;;  %v3444_v3 = vld [vmem:[%s4405_s2 + $0x20] sm:$0xff] }
 0x3e6   :  { %v832_v57 = vmax.f32 %v824_v2, 0.0  ;;  %v819_v14 = vsub.f32 %v803_v63, %v811_v62  ;;  %v754_v13 = vmul.f32 0.00390625, %v734_v0 }
 0x3e7   :  { %v731_v7 = vpop.xlane.xlu0 %730 }
 0x3e8   :  { %v840_v15 = vadd.f32 1e-05, %v832_v57  ;;  %v827_v5 = vmax.f32 %v819_v14, 0.0  ;;  %v3415_v4 = vmul.f32 0.00390625, %v731_v7  ;;  %v810_v30 = vmul.f32 %v754_v13, %v754_v13  ;;  %v3452_v14 = vld [vmem:[%s4405_s2 + $0x10] sm:$0xff] }
 0x3e9   :  { %v788_v16 = vpop.xlane.xlu1 %787 }
 0x3ea   :  { %2882 = vrsqrt.f32 %v840_v15  ;;  %v835_v39 = vadd.f32 1e-05, %v827_v5  ;;  %v804_v19 = vmul.f32 0.00390625, %v788_v16  ;;  %v809_v9 = vmul.f32 %v3415_v4, %v3415_v4  ;;  %v3459_v15 = vld [vmem:[%s4405_s2 + $0x18] sm:$0xff] }
 0x3eb   :  { %v779_v48 = vpop.xlane.xlu0 %778  ;;  %v2877_v40 = vpop.eup %2876 }
 0x3ec   :  { %v820_v10 = vsub.f32 %v804_v19, %v812_v52  ;;  %v801_v59 = vmul.f32 0.00390625, %v779_v48  ;;  %2884 = vrsqrt.f32 %v835_v39  ;;  %v854_v38 = vmul.f32 %v3428_v37, %v2877_v40  ;;  %v3466_v39 = vld [vmem:[%s4405_s2] sm:$0xff] }
 0x3ed   :  { %v782_v21 = vpop.xlane.xlu1 %781 }
 0x3ee   :  { %v828_v6 = vmax.f32 %v820_v10, 0.0  ;;  %v817_v26 = vsub.f32 %v801_v59, %v809_v9  ;;  %v802_v42 = vmul.f32 0.00390625, %v782_v21  ;;  %v862_v62 = vmul.f32 %v854_v38, %v3399_v18  ;;  %v3474_v9 = vld [vmem:[%s4405_s2 + $0x8] sm:$0xff] }
 0x3ef   :  { %v2979_v59 = vmov 3  }
 0x3f0   :  { %v836_v45 = vadd.f32 1e-05, %v828_v6  ;;  %v825_v46 = vmax.f32 %v817_v26, 0.0  ;;  %v818_v47 = vsub.f32 %v802_v42, %v810_v30 }
 0x3f1   :  { %v2879_v12 = vpop.eup %2878 }
 0x3f2   :  { %v855_v58 = vmul.f32 %v3422_v54, %v2879_v12  ;;  %2886 = vrsqrt.f32 %v836_v45  ;;  %v833_v53 = vadd.f32 1e-05, %v825_v46  ;;  %v826_v28 = vmax.f32 %v818_v47, 0.0  ;;  %v2881_v51 = vpop.eup %2880 }
 0x3f3   :  { %v853_v0 = vmul.f32 %v3444_v3, %v2881_v51 }
 0x3f4   :  { %v863_v34 = vmul.f32 %v855_v58, %v759_v22  ;;  %2888 = vrsqrt.f32 %v833_v53  ;;  %v834_v35 = vadd.f32 1e-05, %v826_v28  ;;  %v3436_v22 = vld [vmem:[%s4405_s2 + $0x38] sm:$0xff] }
 0x3f5   :  { %v861_v18 = vmul.f32 %v853_v0, %v3403_v20 }
 0x3f6   :  { %2890 = vrsqrt.f32 %v834_v35  ;;  %885 = vrot.lane.b32.xlu0 %v863_v34, %s2976_s0 }
 0x3f7   :  { %v2883_v60 = vpop.eup %2882 }
 0x3f8   :  { %v856_v2 = vmul.f32 %v3436_v22, %v2883_v60 }
 0x3f9   :  { %v2885_v57 = vpop.eup %2884 }
 0x3fa   :  { %883 = vrot.lane.b32.xlu0 %v862_v62, %s2976_s0  ;;  %v864_v63 = vmul.f32 %v856_v2, %v3407_v55  ;;  %v851_v7 = vmul.f32 %v3452_v14, %v2885_v57 }
 0x3fc   :  { %887 = vrot.lane.b32.xlu1 %v864_v63, %s2976_s0  ;;  %v859_v20 = vmul.f32 %v851_v7, %v3409_v23 }
 0x3ff   :  { %v2887_v55 = vpop.eup %2886 }
 0x400   :  { %881 = vrot.lane.b32.xlu1 %v861_v18, %s2976_s0  ;;  %v852_v5 = vmul.f32 %v3459_v15, %v2887_v55 }
 0x401   :  { %v2889_v16 = vpop.eup %2888 }
 0x402   :  { %v860_v52 = vmul.f32 %v852_v5, %v756_v56  ;;  %v849_v19 = vmul.f32 %v3466_v39, %v2889_v16 }
 0x403   :  { %v2891_v48 = vpop.eup %2890 }
 0x404   :  { %877 = vrot.lane.b32.xlu1 %v859_v20, %s2976_s0  ;;  %879 = vrot.lane.b32.xlu0 %v860_v52, %s2976_s0  ;;  %v850_v23 = vmul.f32 %v3474_v9, %v2891_v48  ;;  %v857_v56 = vmul.f32 %v849_v19, %v3415_v4 }
 0x406   :  { %v858_v10 = vmul.f32 %v850_v23, %v754_v13 }
 0x408   :  { %873 = vrot.lane.b32.xlu1 %v857_v56, %s2976_s0  ;;  %875 = vrot.lane.b32.xlu0 %v858_v10, %s2976_s0 }
 0x40c   :  { %937 = vperm.xlu1 %2809, %v855_v58   ;;  %942 = vperm.xlu0 %2810, %v856_v2  }
 0x410   :  { %932 = vperm.xlu1 %2809, %v854_v38   ;;  %927 = vperm.xlu0 %2810, %v853_v0  }
 0x414   :  { %917 = vperm.xlu1 %2809, %v851_v7   ;;  %922 = vperm.xlu0 %2810, %v852_v5  }
 0x418   :  { %2813 = vset.pattern.permute.xlu1 %v2979_v59  ;;  %2811 = vset.pattern.permute.xlu0 %v2979_v59 }
 0x468   :  { %v886_v30 = vpop.permute.xlu0 %885 }
 0x469   :  { %v903_v4 = vsub.f32 %v3422_v54, %v886_v30 }
 0x46c   :  { %v884_v21 = vpop.permute.xlu0 %883 }
 0x46d   :  { %v902_v6 = vsub.f32 %v3428_v37, %v884_v21 }
 0x46e   :  { %v888_v26 = vpop.permute.xlu1 %887 }
 0x46f   :  { %988 = vperm.xlu1 %2813, %v902_v6   ;;  %v904_v47 = vsub.f32 %v3436_v22, %v888_v26 }
 0x472   :  { %v882_v13 = vpop.permute.xlu1 %881 }
 0x473   :  { %v901_v42 = vsub.f32 %v3444_v3, %v882_v13  ;;  %993 = vperm.xlu1 %2813, %v903_v4  }
 0x475   :  { %983 = vperm.xlu0 %2811, %v901_v42  }
 0x476   :  { %v878_v40 = vpop.permute.xlu1 %877  ;;  %v880_v58 = vpop.permute.xlu0 %879 }
 0x477   :  { %v899_v45 = vsub.f32 %v3452_v14, %v878_v40  ;;  %v900_v53 = vsub.f32 %v3459_v15, %v880_v58 }
 0x479   :  { %2812 = vset.pattern.permute.xlu0 %v2978_v36  ;;  %973 = vperm.xlu1 %2813, %v899_v45  }
 0x47a   :  { %907 = vperm.xlu0 %2812, %v849_v19   ;;  %v874_v46 = vpop.permute.xlu1 %873  ;;  %v876_v28 = vpop.permute.xlu0 %875 }
 0x47b   :  { %v897_v12 = vsub.f32 %v3466_v39, %v874_v46  ;;  %v898_v34 = vsub.f32 %v3474_v9, %v876_v28 }
 0x47d   :  { %998 = vperm.xlu1 %2813, %v904_v47  }
 0x47e   :  { %2815 = vset.pattern.permute.xlu0 %v2979_v59 }
 0x47f   :  { %963 = vperm.xlu0 %2815, %v897_v12  }
 0x481   :  { %2814 = vset.pattern.permute.xlu1 %v2978_v36 }
 0x482   :  { %912 = vperm.xlu1 %2814, %v850_v23  }
 0x486   :  { %2816 = vset.pattern.permute.xlu1 %v2979_v59 }
 0x487   :  { %978 = vperm.xlu1 %2816, %v900_v53   ;;  %v938_v35 = vpop.permute.xlu1 %937  ;;  %v943_v51 = vpop.permute.xlu0 %942 }
 0x488   :  { %v957_v57 = vmul.f32 %v938_v35, %v3345_v50  ;;  %v958_v7 = vmul.f32 %v938_v35, %v3353_v61  ;;  %v959_v5 = vmul.f32 %v943_v51, %v3359_v31  ;;  %v960_v20 = vmul.f32 %v943_v51, %v3361_v1 }
 0x48b   :  { %968 = vperm.xlu1 %2816, %v898_v34   ;;  %v933_v38 = vpop.permute.xlu1 %932  ;;  %v928_v62 = vpop.permute.xlu0 %927 }
 0x48c   :  { %v954_v55 = vmul.f32 %v928_v62, %v3323_v33  ;;  %v956_v52 = vmul.f32 %v933_v38, %v3337_v11  ;;  %v953_v23 = vmul.f32 %v928_v62, %v3319_v8  ;;  %v955_v30 = vmul.f32 %v933_v38, %v3331_v44 }
 0x48f   :  { %v918_v60 = vpop.permute.xlu1 %917  ;;  %v923_v63 = vpop.permute.xlu0 %922 }
 0x490   :  { %v949_v8 = vmul.f32 %v918_v60, %v3343_v43  ;;  %v950_v45 = vmul.f32 %v918_v60, %v3351_v49  ;;  %v951_v53 = vmul.f32 %v923_v63, %v3357_v17  ;;  %v952_v28 = vmul.f32 %v923_v63, %v3365_v24 }
 0x4ea   :  { %v989_v2 = vpop.permute.xlu1 %988 }
 0x4eb   :  { %v1012_v10 = vadd.f32 %v989_v2, %v956_v52  ;;  %v1011_v1 = vadd.f32 %v989_v2, %v955_v30 }
 0x4ed   :  { %v1028_v13 = vmax.f32 %v1012_v10, 0.0  ;;  %v1027_v44 = vmax.f32 %v1011_v1, 0.0 }
 0x4ee   :  { %v994_v0 = vpop.permute.xlu1 %993 }
 0x4ef   :  { %v1013_v16 = vadd.f32 %v994_v0, %v957_v57  ;;  %v1014_v19 = vadd.f32 %v994_v0, %v958_v7 }
 0x4f0   :  { %v984_v36 = vpop.permute.xlu0 %983 }
 0x4f1   :  { %v1010_v48 = vadd.f32 %v984_v36, %v954_v55  ;;  %v1029_v61 = vmax.f32 %v1013_v16, 0.0  ;;  %v1009_v21 = vadd.f32 %v984_v36, %v953_v23  ;;  %v1030_v33 = vmax.f32 %v1014_v19, 0.0  ;;  %v2846_v23 = vld [vmem:[%s4407_s1 + $0x30] sm:$0xff]  }
 0x4f3   :  { %v1026_v6 = vmax.f32 %v1010_v48, 0.0  ;;  %v1025_v46 = vmax.f32 %v1009_v21, 0.0 }
 0x4f4   :  { %v974_v18 = vpop.permute.xlu1 %973 }
 0x4f5   :  { %v908_v31 = vpop.permute.xlu0 %907  ;;  %v1038_v47 = vpack.c.bf16 %v1028_v13, %v1026_v6  ;;  %v1005_v12 = vadd.f32 %v974_v18, %v949_v8  ;;  %v1006_v58 = vadd.f32 %v974_v18, %v950_v45  ;;  %v1037_v35 = vpack.c.bf16 %v1027_v44, %v1025_v46 }
 0x4f6   :  { %v945_v38 = vmul.f32 %v908_v31, %v3317_v27  ;;  %v946_v43 = vmul.f32 %v908_v31, %v3321_v32 }
 0x4f7   :  { %v1021_v62 = vmax.f32 %v1005_v12, 0.0  ;;  %v1022_v2 = vmax.f32 %v1006_v58, 0.0 }
 0x4f8   :  { %v999_v56 = vpop.permute.xlu1 %998 }
 0x4f9   :  { %v1015_v50 = vadd.f32 %v999_v56, %v959_v5  ;;  %v1016_v59 = vadd.f32 %v999_v56, %v960_v20  ;;  %v2847_v56 = vld [vmem:[%s4407_s1 + $0x38] sm:$0xff]  }
 0x4fa   :  { %v964_v34 = vpop.permute.xlu0 %963 }
 0x4fb   :  { %v1031_v26 = vmax.f32 %v1015_v50, 0.0  ;;  %v1032_v4 = vmax.f32 %v1016_v59, 0.0  ;;  %v1001_v0 = vadd.f32 %v964_v34, %v945_v38  ;;  %v1002_v57 = vadd.f32 %v964_v34, %v946_v43 }
 0x4fd   :  { %v1039_v11 = vpack.c.bf16 %v1031_v26, %v1029_v61  ;;  %v913_v42 = vpop.permute.xlu1 %912  ;;  %v1040_v40 = vpack.c.bf16 %v1032_v4, %v1030_v33  ;;  %v1017_v32 = vmax.f32 %v1001_v0, 0.0  ;;  %v1018_v16 = vmax.f32 %v1002_v57, 0.0 }
 0x4fe   :  { %v947_v36 = vmul.f32 %v913_v42, %v3329_v41  ;;  %v948_v17 = vmul.f32 %v913_v42, %v3335_v29  ;;  %v2844_v41 = vld [vmem:[%s4407_s1 + $0x20] sm:$0xff]   ;;  %v2845_v29 = vld [vmem:[%s4407_s1 + $0x28] sm:$0xff]  }
 0x4ff   :  { %1081 = vmatprep.subr.bf16.mxu1 %v1040_v40 }
 0x500   :  { %1082 = vmatpush1.bf16.msra.mxu1 %v1039_v11 }
 0x501   :  { %1083 = vmatprep.subr.bf16.mxu1 %v1038_v47 }
 0x502   :  { %v979_v51 = vpop.permute.xlu1 %978 }
 0x503   :  { %v1007_v49 = vadd.f32 %v979_v51, %v951_v53  ;;  %v1008_v60 = vadd.f32 %v979_v51, %v952_v28 }
 0x504   :  { %1084 = vmatpush1.bf16.msra.mxu1 %v1037_v35 }
 0x505   :  { %v1023_v24 = vmax.f32 %v1007_v49, 0.0  ;;  %v1024_v63 = vmax.f32 %v1008_v60, 0.0 }
 0x506   :  { %v969_v18 = vpop.permute.xlu1 %968 }
 0x507   :  { %v1035_v7 = vpack.c.bf16 %v1023_v24, %v1021_v62  ;;  %v1003_v55 = vadd.f32 %v969_v18, %v947_v36  ;;  %v1004_v27 = vadd.f32 %v969_v18, %v948_v17  ;;  %v1036_v5 = vpack.c.bf16 %v1024_v63, %v1022_v2 }
 0x509   :  { %v1019_v20 = vmax.f32 %v1003_v55, 0.0  ;;  %v1020_v52 = vmax.f32 %v1004_v27, 0.0  ;;  %1085 = vmatprep.subr.bf16.mxu1 %v1036_v5 }
 0x50a   :  { %1086 = vmatpush1.bf16.msra.mxu1 %v1035_v7 }
 0x50b   :  { %v1033_v19 = vpack.c.bf16 %v1019_v20, %v1017_v32  ;;  %v1034_v48 = vpack.c.bf16 %v1020_v52, %v1018_v16  ;;  %v2980_v52 = vmov 4  }
 0x50c   :  { %2817 = vset.pattern.permute.xlu1 %v2980_v52  ;;  %2818 = vset.pattern.permute.xlu0 %v2980_v52 }
 0x50d   :  { %1087 = vmatprep.subr.bf16.mxu1 %v1034_v48 }
 0x50e   :  { %1088 = vmatpush1.bf16.msra.mxu1 %v1033_v19 }
 0x511   :  { %2742 = vmatmul.mubr.msk.bf16.vlgmr.msra.gmra.mxu1 %vm643_vm0, %v2844_v41 }
 0x512   :  { %1115 = vmatprep.mubr.bf16.mxu1 %v4409_v25 }
 0x519   :  { %2743 = vmatmul.mubr.msk.bf16.gmra.mxu1 %vm643_vm0, %v2845_v29 }
 0x51a   :  { %1125 = vmatprep.mubr.bf16.mxu1 %v4409_v25 }
 0x521   :  { %2744 = vmatmul.mubr.msk.bf16.gmra.mxu1 %vm643_vm0, %v2846_v23 }
 0x522   :  { %1135 = vmatprep.mubr.bf16.mxu1 %v4409_v25 }
 0x529   :  { %2745 = vmatmul.mubr.msk.bf16.gmra.mxu1 %vm643_vm0, %v2847_v56 }
 0x52a   :  { %2315 = vmatprep.mubr.bf16.mxu1 %v4409_v25 }
 0x5d1   :  { %v3526_v10 = vpop.f32.mrf.mxu1 }
 0x5d2   :  { %v1178_v55 = vmul.f32 %v3526_v10, %v3526_v10 }
 0x5d3   :  { %v3528_v50 = vpop.f32.mrf.mxu1 }
 0x5d4   :  { %v1146_v18 = vadd.f32 %v3528_v50, %v3526_v10  ;;  %v1179_v7 = vmul.f32 %v3528_v50, %v3528_v50 }
 0x5d5   :  { %v3530_v59 = vpop.f32.mrf.mxu1 }
 0x5d6   :  { %v1180_v32 = vmul.f32 %v3530_v59, %v3530_v59  ;;  %v1194_v16 = vadd.f32 %v1179_v7, %v1178_v55 }
 0x5d7   :  { %v3532_v30 = vpop.f32.mrf.mxu1 }
 0x5d8   :  { %v1149_v27 = vadd.f32 %v3532_v30, %v3530_v59  ;;  %v1181_v5 = vmul.f32 %v3532_v30, %v3532_v30 }
 0x5d9   :  { %v3534_v61 = vpop.f32.mrf.mxu1 }
 0x5da   :  { %v1182_v0 = vmul.f32 %v3534_v61, %v3534_v61  ;;  %v1197_v20 = vadd.f32 %v1181_v5, %v1180_v32 }
 0x5db   :  { %v3536_v21 = vpop.f32.mrf.mxu1 }
 0x5dc   :  { %v1152_v60 = vadd.f32 %v3536_v21, %v3534_v61  ;;  %v1183_v62 = vmul.f32 %v3536_v21, %v3536_v21 }
 0x5dd   :  { %v3538_v33 = vpop.f32.mrf.mxu1 }
 0x5de   :  { %v1184_v17 = vmul.f32 %v3538_v33, %v3538_v33  ;;  %v1200_v24 = vadd.f32 %v1183_v62, %v1182_v0 }
 0x5df   :  { %v3540_v6 = vpop.f32.mrf.mxu1 }
 0x5e0   :  { %v1155_v51 = vadd.f32 %v3540_v6, %v3538_v33  ;;  %v1185_v57 = vmul.f32 %v3540_v6, %v3540_v6 }
 0x5e1   :  { %v3542_v31 = vpop.f32.mrf.mxu1 }
 0x5e2   :  { %v1186_v11 = vmul.f32 %v3542_v31, %v3542_v31  ;;  %v1203_v63 = vadd.f32 %v1185_v57, %v1184_v17 }
 0x5e3   :  { %v3544_v26 = vpop.f32.mrf.mxu1 }
 0x5e4   :  { %v1158_v4 = vadd.f32 %v3544_v26, %v3542_v31  ;;  %v1187_v1 = vmul.f32 %v3544_v26, %v3544_v26 }
 0x5e5   :  { %v3550_v13 = vpop.f32.mrf.mxu1 }
 0x5e6   :  { %1159 = vadd.xlane.f32.xlu0 %v1158_v4  ;;  %v1206_v45 = vadd.f32 %v1187_v1, %v1186_v11  ;;  %v1188_v47 = vmul.f32 %v3550_v13, %v3550_v13 }
 0x5e7   :  { %v3554_v42 = vpop.f32.mrf.mxu1 }
 0x5e8   :  { %v1161_v40 = vadd.f32 %v3554_v42, %v3550_v13  ;;  %v1189_v8 = vmul.f32 %v3554_v42, %v3554_v42 }
 0x5e9   :  { %v3560_v46 = vpop.f32.mrf.mxu1 }
 0x5ea   :  { %1207 = vadd.xlane.f32.xlu0 %v1206_v45  ;;  %1162 = vadd.xlane.f32.xlu1 %v1161_v40  ;;  %v1190_v44 = vmul.f32 %v3560_v46, %v3560_v46  ;;  %v1209_v58 = vadd.f32 %v1189_v8, %v1188_v47 }
 0x5eb   :  { %v3566_v12 = vpop.f32.mrf.mxu1 }
 0x5ec   :  { %v1191_v53 = vmul.f32 %v3566_v12, %v3566_v12  ;;  %v1164_v38 = vadd.f32 %v3566_v12, %v3560_v46 }
 0x5ed   :  { %v3570_v28 = vpop.f32.mrf.mxu1 }
 0x5ee   :  { %1210 = vadd.xlane.f32.xlu1 %v1209_v58  ;;  %v1212_v34 = vadd.f32 %v1191_v53, %v1190_v44  ;;  %v1192_v2 = vmul.f32 %v3570_v28, %v3570_v28 }
 0x5ef   :  { %v3572_v35 = vpop.f32.mrf.mxu1 }
 0x5f0   :  { %1213 = vadd.xlane.f32.xlu0 %v1212_v34  ;;  %v1167_v43 = vadd.f32 %v3572_v35, %v3570_v28  ;;  %v1193_v49 = vmul.f32 %v3572_v35, %v3572_v35 }
 0x5f2   :  { %1165 = vadd.xlane.f32.xlu1 %v1164_v38  ;;  %v1215_v36 = vadd.f32 %v1193_v49, %v1192_v2 }
 0x5f4   :  { %1168 = vadd.xlane.f32.xlu0 %v1167_v43 }
 0x5f6   :  { %1156 = vadd.xlane.f32.xlu1 %v1155_v51 }
 0x5f8   :  { %1153 = vadd.xlane.f32.xlu0 %v1152_v60 }
 0x5fa   :  { %1216 = vadd.xlane.f32.xlu1 %v1215_v36 }
 0x5fc   :  { %1201 = vadd.xlane.f32.xlu0 %v1200_v24 }
 0x5fe   :  { %1204 = vadd.xlane.f32.xlu1 %v1203_v63 }
 0x600   :  { %1147 = vadd.xlane.f32.xlu0 %v1146_v18 }
 0x602   :  { %1150 = vadd.xlane.f32.xlu1 %v1149_v27 }
 0x604   :  { %1195 = vadd.xlane.f32.xlu0 %v1194_v16 }
 0x606   :  { %1198 = vadd.xlane.f32.xlu1 %v1197_v20 }
 0x66f   :  { %v1160_v19 = vpop.xlane.xlu0 %1159 }
 0x670   :  { %v3612_v1 = vmul.f32 0.00390625, %v1160_v19 }
 0x672   :  { %v1230_v44 = vmul.f32 %v3612_v1, %v3612_v1 }
 0x673   :  { %v1163_v48 = vpop.xlane.xlu1 %1162  ;;  %v1208_v29 = vpop.xlane.xlu0 %1207 }
 0x674   :  { %v3608_v41 = vmul.f32 0.00390625, %v1163_v48  ;;  %v1222_v8 = vmul.f32 0.00390625, %v1208_v29 }
 0x676   :  { %v1231_v56 = vmul.f32 %v3608_v41, %v3608_v41  ;;  %v1238_v43 = vsub.f32 %v1222_v8, %v1230_v44 }
 0x677   :  { %v1211_v23 = vpop.xlane.xlu1 %1210 }
 0x678   :  { %v1223_v4 = vmul.f32 0.00390625, %v1211_v23  ;;  %v1246_v36 = vmax.f32 %v1238_v43, 0.0 }
 0x679   :  { %v1214_v11 = vpop.xlane.xlu0 %1213 }
 0x67a   :  { %v1239_v40 = vsub.f32 %v1223_v4, %v1231_v56  ;;  %v1224_v34 = vmul.f32 0.00390625, %v1214_v11  ;;  %v1254_v16 = vadd.f32 1e-05, %v1246_v36 }
 0x67b   :  { %v1166_v45 = vpop.xlane.xlu1 %1165 }
 0x67c   :  { %v1176_v47 = vmul.f32 0.00390625, %v1166_v45  ;;  %v1247_v58 = vmax.f32 %v1239_v40, 0.0 }
 0x67d   :  { %v1169_v53 = vpop.xlane.xlu0 %1168 }
 0x67e   :  { %v1232_v38 = vmul.f32 %v1176_v47, %v1176_v47  ;;  %v3616_v60 = vmul.f32 0.00390625, %v1169_v53  ;;  %v1255_v62 = vadd.f32 1e-05, %v1247_v58 }
 0x67f   :  { %v1157_v51 = vpop.xlane.xlu1 %1156 }
 0x680   :  { %v1240_v49 = vsub.f32 %v1224_v34, %v1232_v38  ;;  %v1233_v63 = vmul.f32 %v3616_v60, %v3616_v60  ;;  %v1173_v18 = vmul.f32 0.00390625, %v1157_v51  ;;  %2892 = vrsqrt.f32 %v1255_v62 }
 0x681   :  { %v1154_v2 = vpop.xlane.xlu0 %1153 }
 0x682   :  { %v1248_v0 = vmax.f32 %v1240_v49, 0.0  ;;  %v3618_v57 = vmul.f32 0.00390625, %v1154_v2  ;;  %v1229_v19 = vmul.f32 %v1173_v18, %v1173_v18 }
 0x683   :  { %v1217_v17 = vpop.xlane.xlu1 %1216 }
 0x684   :  { %v1256_v24 = vadd.f32 1e-05, %v1248_v0  ;;  %v1225_v7 = vmul.f32 0.00390625, %v1217_v17  ;;  %v1228_v27 = vmul.f32 %v3618_v57, %v3618_v57 }
 0x685   :  { %v1202_v55 = vpop.xlane.xlu0 %1201 }
 0x686   :  { %2894 = vrsqrt.f32 %v1256_v24  ;;  %v1241_v5 = vsub.f32 %v1225_v7, %v1233_v63  ;;  %v1220_v32 = vmul.f32 0.00390625, %v1202_v55 }
 0x687   :  { %v1205_v20 = vpop.xlane.xlu1 %1204  ;;  %2896 = vrsqrt.f32 %v1254_v16 }
 0x688   :  { %v1249_v48 = vmax.f32 %v1241_v5, 0.0  ;;  %v1236_v29 = vsub.f32 %v1220_v32, %v1228_v27  ;;  %v1221_v23 = vmul.f32 0.00390625, %v1205_v20 }
 0x689   :  { %v1148_v56 = vpop.xlane.xlu0 %1147 }
 0x68a   :  { %v1257_v4 = vadd.f32 1e-05, %v1249_v48  ;;  %v1244_v11 = vmax.f32 %v1236_v29, 0.0  ;;  %v1237_v40 = vsub.f32 %v1221_v23, %v1229_v19  ;;  %v1170_v8 = vmul.f32 0.00390625, %v1148_v56 }
 0x68b   :  { %v1151_v45 = vpop.xlane.xlu1 %1150 }
 0x68c   :  { %2898 = vrsqrt.f32 %v1257_v4  ;;  %v1252_v44 = vadd.f32 1e-05, %v1244_v11  ;;  %v1245_v58 = vmax.f32 %v1237_v40, 0.0  ;;  %v1171_v53 = vmul.f32 0.00390625, %v1151_v45 }
 0x68d   :  { %v1196_v34 = vpop.xlane.xlu0 %1195  ;;  %v1226_v43 = vmul.f32 %v1170_v8, %v1170_v8  ;;  %v2893_v36 = vpop.eup %2892 }
 0x68e   :  { %v1253_v38 = vadd.f32 1e-05, %v1245_v58  ;;  %v1218_v51 = vmul.f32 0.00390625, %v1196_v34  ;;  %2900 = vrsqrt.f32 %v1252_v44  ;;  %v1227_v62 = vmul.f32 %v1171_v53, %v1171_v53 }
 0x68f   :  { %v1199_v49 = vpop.xlane.xlu1 %1198  ;;  %v1271_v16 = vmul.f32 %v3428_v37, %v2893_v36 }
 0x690   :  { %2902 = vrsqrt.f32 %v1253_v38  ;;  %v1234_v2 = vsub.f32 %v1218_v51, %v1226_v43  ;;  %v1219_v0 = vmul.f32 0.00390625, %v1199_v49 }
 0x691   :  { %v1279_v48 = vmul.f32 %v1271_v16, %v3608_v41 }
 0x692   :  { %v1242_v17 = vmax.f32 %v1234_v2, 0.0  ;;  %v1235_v24 = vsub.f32 %v1219_v0, %v1227_v62 }
 0x693   :  { %v2895_v63 = vpop.eup %2894 }
 0x694   :  { %v1272_v7 = vmul.f32 %v3422_v54, %v2895_v63  ;;  %v1250_v55 = vadd.f32 1e-05, %v1242_v17  ;;  %v1243_v27 = vmax.f32 %v1235_v24, 0.0  ;;  %v2897_v20 = vpop.eup %2896 }
 0x696   :  { %v1280_v5 = vmul.f32 %v1272_v7, %v1176_v47  ;;  %2904 = vrsqrt.f32 %v1250_v55  ;;  %v1251_v32 = vadd.f32 1e-05, %v1243_v27  ;;  %v1270_v47 = vmul.f32 %v3444_v3, %v2897_v20 }
 0x698   :  { %2906 = vrsqrt.f32 %v1251_v32  ;;  %1302 = vrot.lane.b32.xlu0 %v1280_v5, %s2976_s0  ;;  %v1278_v45 = vmul.f32 %v1270_v47, %v3612_v1  ;;  %v2981_v1 = vmov 5  }
 0x699   :  { %v2899_v19 = vpop.eup %2898 }
 0x69a   :  { %v1273_v29 = vmul.f32 %v3436_v22, %v2899_v19 }
 0x69b   :  { %v2901_v23 = vpop.eup %2900 }
 0x69c   :  { %1300 = vrot.lane.b32.xlu0 %v1279_v48, %s2976_s0  ;;  %v1281_v56 = vmul.f32 %v1273_v29, %v3616_v60  ;;  %v1268_v44 = vmul.f32 %v3452_v14, %v2901_v23 }
 0x69d   :  { %v2903_v4 = vpop.eup %2902 }
 0x69e   :  { %1304 = vrot.lane.b32.xlu1 %v1281_v56, %s2976_s0  ;;  %v1269_v11 = vmul.f32 %v3459_v15, %v2903_v4  ;;  %v1276_v58 = vmul.f32 %v1268_v44, %v3618_v57 }
 0x6a0   :  { %v1277_v40 = vmul.f32 %v1269_v11, %v1173_v18 }
 0x6a2   :  { %1296 = vrot.lane.b32.xlu0 %v1277_v40, %s2976_s0  ;;  %1298 = vrot.lane.b32.xlu1 %v1278_v45, %s2976_s0 }
 0x6a3   :  { %v2905_v41 = vpop.eup %2904 }
 0x6a4   :  { %v1266_v60 = vmul.f32 %v3466_v39, %v2905_v41 }
 0x6a5   :  { %v2907_v34 = vpop.eup %2906 }
 0x6a6   :  { %1294 = vrot.lane.b32.xlu1 %v1276_v58, %s2976_s0  ;;  %v1267_v38 = vmul.f32 %v3474_v9, %v2907_v34  ;;  %v1274_v18 = vmul.f32 %v1266_v60, %v1170_v8 }
 0x6a8   :  { %v1275_v43 = vmul.f32 %v1267_v38, %v1171_v53 }
 0x6aa   :  { %1292 = vrot.lane.b32.xlu0 %v1275_v43, %s2976_s0  ;;  %1290 = vrot.lane.b32.xlu1 %v1274_v18, %s2976_s0 }
 0x6ae   :  { %1359 = vperm.xlu0 %2818, %v1273_v29   ;;  %1354 = vperm.xlu1 %2817, %v1272_v7  }
 0x6b2   :  { %1344 = vperm.xlu0 %2818, %v1270_v47   ;;  %1349 = vperm.xlu1 %2817, %v1271_v16  }
 0x6b6   :  { %1339 = vperm.xlu0 %2818, %v1269_v11   ;;  %1334 = vperm.xlu1 %2817, %v1268_v44  }
 0x6ba   :  { %2820 = vset.pattern.permute.xlu0 %v2981_v1  ;;  %2819 = vset.pattern.permute.xlu1 %v2981_v1 }
 0x70a   :  { %v1303_v51 = vpop.permute.xlu0 %1302 }
 0x70b   :  { %v1320_v24 = vsub.f32 %v3422_v54, %v1303_v51 }
 0x70e   :  { %v1301_v2 = vpop.permute.xlu0 %1300 }
 0x70f   :  { %v1319_v36 = vsub.f32 %v3428_v37, %v1301_v2 }
 0x710   :  { %v1305_v57 = vpop.permute.xlu1 %1304 }
 0x714   :  { %v1299_v49 = vpop.permute.xlu1 %1298  ;;  %v1297_v63 = vpop.permute.xlu0 %1296 }
 0x715   :  { %v1318_v62 = vsub.f32 %v3444_v3, %v1299_v49  ;;  %v1321_v3 = vsub.f32 %v3436_v22, %v1305_v57 }
 0x717   :  { %1400 = vperm.xlu0 %2820, %v1318_v62  }
 0x718   :  { %v1295_v8 = vpop.permute.xlu1 %1294 }
 0x719   :  { %v1316_v53 = vsub.f32 %v3452_v14, %v1295_v8  ;;  %v1317_v14 = vsub.f32 %v3459_v15, %v1297_v63 }
 0x71b   :  { %2821 = vset.pattern.permute.xlu0 %v2980_v52  ;;  %1390 = vperm.xlu1 %2819, %v1316_v53  }
 0x71c   :  { %1324 = vperm.xlu0 %2821, %v1266_v60   ;;  %v1291_v0 = vpop.permute.xlu1 %1290  ;;  %v1293_v7 = vpop.permute.xlu0 %1292 }
 0x71d   :  { %v1314_v17 = vsub.f32 %v3466_v39, %v1291_v0  ;;  %v1315_v37 = vsub.f32 %v3474_v9, %v1293_v7 }
 0x71f   :  { %1405 = vperm.xlu1 %2819, %v1319_v36  }
 0x720   :  { %2823 = vset.pattern.permute.xlu0 %v2981_v1 }
 0x721   :  { %1380 = vperm.xlu0 %2823, %v1314_v17  }
 0x723   :  { %1410 = vperm.xlu1 %2819, %v1320_v24  }
 0x727   :  { %1415 = vperm.xlu1 %2819, %v1321_v3  }
 0x729   :  { %v1355_v39 = vpop.permute.xlu1 %1354  ;;  %v1360_v54 = vpop.permute.xlu0 %1359 }
 0x72a   :  { %v1374_v19 = vmul.f32 %v1355_v39, %v3560_v46  ;;  %v1376_v23 = vmul.f32 %v1360_v54, %v3570_v28  ;;  %v1377_v56 = vmul.f32 %v1360_v54, %v3572_v35 }
 0x72b   :  { %1395 = vperm.xlu1 %2819, %v1317_v14  }
 0x72d   :  { %v1350_v55 = vpop.permute.xlu1 %1349  ;;  %v1345_v5 = vpop.permute.xlu0 %1344 }
 0x72e   :  { %v1373_v20 = vmul.f32 %v1350_v55, %v3554_v42  ;;  %v1371_v9 = vmul.f32 %v1345_v5, %v3544_v26  ;;  %v1372_v11 = vmul.f32 %v1350_v55, %v3550_v13  ;;  %v1370_v42 = vmul.f32 %v1345_v5, %v3542_v31 }
 0x72f   :  { %2822 = vset.pattern.permute.xlu1 %v2980_v52  ;;  %v1375_v52 = vmul.f32 %v1355_v39, %v3566_v12 }
 0x730   :  { %1329 = vperm.xlu1 %2822, %v1267_v38  }
 0x731   :  { %v1335_v27 = vpop.permute.xlu1 %1334  ;;  %v1340_v16 = vpop.permute.xlu0 %1339 }
 0x732   :  { %v1367_v12 = vmul.f32 %v1335_v27, %v3536_v21  ;;  %v1369_v41 = vmul.f32 %v1340_v16, %v3540_v6  ;;  %v1368_v38 = vmul.f32 %v1340_v16, %v3538_v33  ;;  %v1366_v21 = vmul.f32 %v1335_v27, %v3534_v61 }
 0x734   :  { %2824 = vset.pattern.permute.xlu1 %v2981_v1 }
 0x735   :  { %1385 = vperm.xlu1 %2824, %v1315_v37  }
 0x792   :  { %v1401_v48 = vpop.permute.xlu0 %1400 }
 0x793   :  { %v1427_v40 = vadd.f32 %v1401_v48, %v1371_v9  ;;  %v1426_v43 = vadd.f32 %v1401_v48, %v1370_v42  ;;  %v2851_v48 = vld [vmem:[%s4407_s1 + $0x58] sm:$0xff]   ;;  %v2852_v9 = vld [vmem:[%s4407_s1 + $0x60] sm:$0xff]  }
 0x795   :  { %v1443_v13 = vmax.f32 %v1427_v40, 0.0  ;;  %v1442_v2 = vmax.f32 %v1426_v43, 0.0 }
 0x796   :  { %v1391_v32 = vpop.permute.xlu1 %1390 }
 0x797   :  { %v1325_v18 = vpop.permute.xlu0 %1324  ;;  %v1423_v57 = vadd.f32 %v1391_v32, %v1367_v12  ;;  %v1422_v0 = vadd.f32 %v1391_v32, %v1366_v21 }
 0x798   :  { %v1362_v63 = vmul.f32 %v1325_v18, %v3526_v10  ;;  %v1363_v14 = vmul.f32 %v1325_v18, %v3528_v50 }
 0x799   :  { %v1439_v36 = vmax.f32 %v1423_v57, 0.0  ;;  %v1438_v61 = vmax.f32 %v1422_v0, 0.0 }
 0x79a   :  { %v1406_v22 = vpop.permute.xlu1 %1405 }
 0x79b   :  { %v1429_v29 = vadd.f32 %v1406_v22, %v1373_v20  ;;  %v1428_v26 = vadd.f32 %v1406_v22, %v1372_v11 }
 0x79c   :  { %v1381_v24 = vpop.permute.xlu0 %1380 }
 0x79d   :  { %v1445_v58 = vmax.f32 %v1429_v29, 0.0  ;;  %v1444_v62 = vmax.f32 %v1428_v26, 0.0  ;;  %v1418_v37 = vadd.f32 %v1381_v24, %v1362_v63  ;;  %v1419_v39 = vadd.f32 %v1381_v24, %v1363_v14  ;;  %v2853_v29 = vld [vmem:[%s4407_s1 + $0x68] sm:$0xff]  }
 0x79e   :  { %v1411_v15 = vpop.permute.xlu1 %1410 }
 0x79f   :  { %v1430_v47 = vadd.f32 %v1411_v15, %v1374_v19  ;;  %v1431_v4 = vadd.f32 %v1411_v15, %v1375_v52  ;;  %v1455_v53 = vpack.c.bf16 %v1445_v58, %v1443_v13  ;;  %v1454_v17 = vpack.c.bf16 %v1444_v62, %v1442_v2  ;;  %v2848_v52 = vld [vmem:[%s4407_s1 + $0x40] sm:$0xff]  }
 0x7a0   :  { %v1434_v16 = vmax.f32 %v1418_v37, 0.0  ;;  %v1435_v20 = vmax.f32 %v1419_v39, 0.0 }
 0x7a1   :  { %v1446_v60 = vmax.f32 %v1430_v47, 0.0  ;;  %v1447_v28 = vmax.f32 %v1431_v4, 0.0 }
 0x7a2   :  { %v1416_v45 = vpop.permute.xlu1 %1415 }
 0x7a3   :  { %v1432_v44 = vadd.f32 %v1416_v45, %v1376_v23  ;;  %v1433_v46 = vadd.f32 %v1416_v45, %v1377_v56  ;;  %v2854_v23 = vld [vmem:[%s4407_s1 + $0x70] sm:$0xff]   ;;  %v2855_v56 = vld [vmem:[%s4407_s1 + $0x78] sm:$0xff]  }
 0x7a5   :  { %v1448_v34 = vmax.f32 %v1432_v44, 0.0  ;;  %v1449_v35 = vmax.f32 %v1433_v46, 0.0 }
 0x7a6   :  { %v1396_v1 = vpop.permute.xlu1 %1395 }
 0x7a7   :  { %v1456_v31 = vpack.c.bf16 %v1448_v34, %v1446_v60  ;;  %v1425_v51 = vadd.f32 %v1396_v1, %v1369_v41  ;;  %v1457_v49 = vpack.c.bf16 %v1449_v35, %v1447_v28  ;;  %v1424_v6 = vadd.f32 %v1396_v1, %v1368_v38 }
 0x7a9   :  { %v1441_v8 = vmax.f32 %v1425_v51, 0.0  ;;  %1530 = vmatprep.subr.bf16.mxu0 %v1457_v49  ;;  %v1440_v3 = vmax.f32 %v1424_v6, 0.0 }
 0x7aa   :  { %1531 = vmatpush1.bf16.msra.mxu0 %v1456_v31 }
 0x7ab   :  { %v1330_v33 = vpop.permute.xlu1 %1329  ;;  %1532 = vmatprep.subr.bf16.mxu0 %v1455_v53  ;;  %v1453_v7 = vpack.c.bf16 %v1441_v8, %v1439_v36  ;;  %v1452_v27 = vpack.c.bf16 %v1440_v3, %v1438_v61 }
 0x7ac   :  { %v1364_v55 = vmul.f32 %v1330_v33, %v3530_v59  ;;  %v1365_v54 = vmul.f32 %v1330_v33, %v3532_v30  ;;  %v2849_v59 = vld [vmem:[%s4407_s1 + $0x48] sm:$0xff]   ;;  %v2850_v30 = vld [vmem:[%s4407_s1 + $0x50] sm:$0xff]  }
 0x7ae   :  { %1533 = vmatpush1.bf16.msra.mxu0 %v1454_v17 }
 0x7af   :  { %1534 = vmatprep.subr.bf16.mxu0 %v1453_v7 }
 0x7b0   :  { %v1386_v5 = vpop.permute.xlu1 %1385 }
 0x7b1   :  { %v1420_v32 = vadd.f32 %v1386_v5, %v1364_v55  ;;  %v1421_v22 = vadd.f32 %v1386_v5, %v1365_v54 }
 0x7b2   :  { %1535 = vmatpush1.bf16.msra.mxu0 %v1452_v27 }
 0x7b3   :  { %v1436_v10 = vmax.f32 %v1420_v32, 0.0  ;;  %v1437_v15 = vmax.f32 %v1421_v22, 0.0 }
 0x7b5   :  { %v1450_v50 = vpack.c.bf16 %v1436_v10, %v1434_v16  ;;  %v1451_v19 = vpack.c.bf16 %v1437_v15, %v1435_v20 }
 0x7b7   :  { %1536 = vmatprep.subr.bf16.mxu0 %v1451_v19 }
 0x7b8   :  { %1537 = vmatpush1.bf16.msra.mxu0 %v1450_v50 }
 0x7bb   :  { %2754 = vmatmul.mubr.msk.bf16.vlgmr.msra.gmra.mxu0 %vm643_vm0, %v2848_v52 }
 0x7bc   :  { %1564 = vmatprep.mubr.bf16.mxu0 %v4409_v25 }
 0x7c3   :  { %2755 = vmatmul.mubr.msk.bf16.gmra.mxu0 %vm643_vm0, %v2849_v59 }
 0x7c4   :  { %1574 = vmatprep.mubr.bf16.mxu0 %v4409_v25 }
 0x7cb   :  { %2756 = vmatmul.mubr.msk.bf16.gmra.mxu0 %vm643_vm0, %v2850_v30 }
 0x7cc   :  { %1584 = vmatprep.mubr.bf16.mxu0 %v4409_v25 }
 0x7d3   :  { %2757 = vmatmul.mubr.msk.bf16.gmra.mxu0 %vm643_vm0, %v2851_v48 }
 0x7d4   :  { %1594 = vmatprep.mubr.bf16.mxu0 %v4409_v25 }
 0x7db   :  { %2758 = vmatmul.mubr.msk.bf16.gmra.mxu0 %vm643_vm0, %v2852_v9 }
 0x7dc   :  { %1604 = vmatprep.mubr.bf16.mxu0 %v4409_v25 }
 0x7e3   :  { %2759 = vmatmul.mubr.msk.bf16.gmra.mxu0 %vm643_vm0, %v2853_v29 }
 0x7e4   :  { %1614 = vmatprep.mubr.bf16.mxu0 %v4409_v25 }
 0x7eb   :  { %2760 = vmatmul.mubr.msk.bf16.gmra.mxu0 %vm643_vm0, %v2854_v23 }
 0x7ec   :  { %1624 = vmatprep.mubr.bf16.mxu0 %v4409_v25 }
 0x7f3   :  { %2761 = vmatmul.mubr.msk.bf16.gmra.mxu0 %vm643_vm0, %v2855_v56 }
 0x87b   :  { %v3709_v47 = vpop.f32.mrf.mxu0 }
 0x87c   :  { %4426 = vst [vmem:[#allocation2_spill] sm:$0xff] %v3709_v47 }
 0x87d   :  { %v3711_v4 = vpop.f32.mrf.mxu0 }
 0x87e   :  { %4427 = vst [vmem:[#allocation3_spill] sm:$0xff] %v3711_v4 }
 0x87f   :  { %v3713_v11 = vpop.f32.mrf.mxu0 }
 0x880   :  { %4428 = vst [vmem:[#allocation4_spill] sm:$0xff] %v3713_v11 }
 0x881   :  { %v3715_v40 = vpop.f32.mrf.mxu0 }
 0x882   :  { %4429 = vst [vmem:[#allocation5_spill] sm:$0xff] %v3715_v40 }
 0x883   :  { %v3717_v45 = vpop.f32.mrf.mxu0 }
 0x884   :  { %4430 = vst [vmem:[#allocation6_spill] sm:$0xff] %v3717_v45 }
 0x885   :  { %v3719_v42 = vpop.f32.mrf.mxu0 }
 0x886   :  { %4431 = vst [vmem:[#allocation7_spill] sm:$0xff] %v3719_v42 }
 0x887   :  { %v3721_v44 = vpop.f32.mrf.mxu0 }
 0x888   :  { %4432 = vst [vmem:[#allocation8_spill] sm:$0xff] %v3721_v44 }
 0x889   :  { %v3723_v46 = vpop.f32.mrf.mxu0 }
 0x88a   :  { %4433 = vst [vmem:[#allocation9_spill] sm:$0xff] %v3723_v46 }
 0x88b   :  { %v3725_v12 = vpop.f32.mrf.mxu0 }
 0x88c   :  { %4434 = vst [vmem:[#allocation10_spill] sm:$0xff] %v3725_v12 }
 0x88d   :  { %v3727_v41 = vpop.f32.mrf.mxu0 }
 0x88f   :  { %v3729_v26 = vpop.f32.mrf.mxu0 }
 0x890   :  { %4435 = vst [vmem:[#allocation11_spill] sm:$0xff] %v3729_v26 }
 0x891   :  { %v3731_v58 = vpop.f32.mrf.mxu0 }
 0x893   :  { %v3733_v60 = vpop.f32.mrf.mxu0 }
 0x894   :  { %4436 = vst [vmem:[#allocation12_spill] sm:$0xff] %v3733_v60 }
 0x895   :  { %v3735_v28 = vpop.f32.mrf.mxu0 }
 0x897   :  { %v3737_v34 = vpop.f32.mrf.mxu0 }
 0x899   :  { %v3739_v35 = vpop.f32.mrf.mxu0 }
 0x89a   :  { %v1656_v23 = vadd.f32 %v3739_v35, %v3737_v34 }
 0x89b   :  { %v3741_v38 = vpop.f32.mrf.mxu0 }
 0x89c   :  { %v1715_v57 = vmul.f32 %v3741_v38, %v3741_v38 }
 0x89d   :  { %v3743_v43 = vpop.f32.mrf.mxu0 }
 0x89e   :  { %v1659_v13 = vadd.f32 %v3743_v43, %v3741_v38  ;;  %v1716_v18 = vmul.f32 %v3743_v43, %v3743_v43 }
 0x89f   :  { %v3749_v1 = vpop.f32.mrf.mxu0 }
 0x8a0   :  { %1660 = vadd.xlane.f32.xlu0 %v1659_v13  ;;  %v1755_v21 = vadd.f32 %v1716_v18, %v1715_v57  ;;  %v1717_v6 = vmul.f32 %v3749_v1, %v3749_v1  ;;  %v1653_v13 = vadd.f32 %v3735_v28, %v3733_v60  ;;  %v1712_v18 = vmul.f32 %v3735_v28, %v3735_v28 }
 0x8a1   :  { %v3753_v31 = vpop.f32.mrf.mxu0 }
 0x8a2   :  { %v1662_v51 = vadd.f32 %v3753_v31, %v3749_v1  ;;  %v1718_v49 = vmul.f32 %v3753_v31, %v3753_v31 }
 0x8a3   :  { %v3759_v62 = vpop.f32.mrf.mxu0 }
 0x8a4   :  { %1756 = vadd.xlane.f32.xlu0 %v1755_v21  ;;  %1663 = vadd.xlane.f32.xlu1 %v1662_v51  ;;  %v1758_v0 = vadd.f32 %v1718_v49, %v1717_v6  ;;  %v1719_v33 = vmul.f32 %v3759_v62, %v3759_v62  ;;  %v1711_v51 = vmul.f32 %v3733_v60, %v3733_v60 }
 0x8a5   :  { %v3763_v8 = vpop.f32.mrf.mxu0  ;;  %v1714_v49 = vmul.f32 %v3739_v35, %v3739_v35  ;;  %v1713_v6 = vmul.f32 %v3737_v34, %v3737_v34 }
 0x8a6   :  { %v1665_v53 = vadd.f32 %v3763_v8, %v3759_v62  ;;  %v1720_v2 = vmul.f32 %v3763_v8, %v3763_v8 }
 0x8a7   :  { %v3769_v36 = vpop.f32.mrf.mxu0 }
 0x8a8   :  { %1759 = vadd.xlane.f32.xlu1 %v1758_v0  ;;  %1666 = vadd.xlane.f32.xlu0 %v1665_v53  ;;  %v1761_v63 = vadd.f32 %v1720_v2, %v1719_v33  ;;  %v1721_v7 = vmul.f32 %v3769_v36, %v3769_v36  ;;  %v1749_v53 = vadd.f32 %v1712_v18, %v1711_v51 }
 0x8a9   :  { %v3773_v17 = vpop.f32.mrf.mxu0  ;;  %v1752_v2 = vadd.f32 %v1714_v49, %v1713_v6  ;;  %v1647_v0 = vadd.f32 %v3727_v41, %v3725_v12  ;;  %v1708_v33 = vmul.f32 %v3727_v41, %v3727_v41 }
 0x8aa   :  { %v1668_v24 = vadd.f32 %v3773_v17, %v3769_v36  ;;  %v1722_v3 = vmul.f32 %v3773_v17, %v3773_v17 }
 0x8ab   :  { %v3779_v14 = vpop.f32.mrf.mxu0 }
 0x8ac   :  { %1762 = vadd.xlane.f32.xlu0 %v1761_v63  ;;  %1669 = vadd.xlane.f32.xlu1 %v1668_v24  ;;  %v1764_v55 = vadd.f32 %v1722_v3, %v1721_v7  ;;  %v1723_v27 = vmul.f32 %v3779_v14, %v3779_v14  ;;  %v1707_v24 = vmul.f32 %v3725_v12, %v3725_v12 }
 0x8ad   :  { %v3783_v61 = vpop.f32.mrf.mxu0  ;;  %v1650_v3 = vadd.f32 %v3731_v58, %v3729_v26  ;;  %v1710_v63 = vmul.f32 %v3731_v58, %v3731_v58  ;;  %v1709_v7 = vmul.f32 %v3729_v26, %v3729_v26 }
 0x8ae   :  { %v1671_v37 = vadd.f32 %v3783_v61, %v3779_v14  ;;  %v1724_v39 = vmul.f32 %v3783_v61, %v3783_v61 }
 0x8af   :  { %v3789_v54 = vpop.f32.mrf.mxu0 }
 0x8b0   :  { %1765 = vadd.xlane.f32.xlu1 %v1764_v55  ;;  %1672 = vadd.xlane.f32.xlu0 %v1671_v37  ;;  %v1767_v16 = vadd.f32 %v1724_v39, %v1723_v27  ;;  %v1725_v10 = vmul.f32 %v3789_v54, %v3789_v54  ;;  %v1743_v37 = vadd.f32 %v1708_v33, %v1707_v24 }
 0x8b1   :  { %v3793_v5 = vpop.f32.mrf.mxu0  ;;  %v1746_v39 = vadd.f32 %v1710_v63, %v1709_v7  ;;  %v1641_v55 = vadd.f32 %v3719_v42, %v3717_v45  ;;  %v1704_v27 = vmul.f32 %v3719_v42, %v3719_v42 }
 0x8b2   :  { %v1674_v32 = vadd.f32 %v3793_v5, %v3789_v54  ;;  %v1726_v22 = vmul.f32 %v3793_v5, %v3793_v5 }
 0x8b3   :  { %v3799_v20 = vpop.f32.mrf.mxu0 }
 0x8b4   :  { %v1727_v15 = vmul.f32 %v3799_v20, %v3799_v20  ;;  %1768 = vadd.xlane.f32.xlu0 %v1767_v16  ;;  %1675 = vadd.xlane.f32.xlu1 %v1674_v32  ;;  %v1770_v52 = vadd.f32 %v1726_v22, %v1725_v10  ;;  %v1703_v32 = vmul.f32 %v3717_v45, %v3717_v45 }
 0x8b5   :  { %v3805_v50 = vpop.f32.mrf.mxu0  ;;  %v1644_v22 = vadd.f32 %v3723_v46, %v3721_v44  ;;  %v1706_v16 = vmul.f32 %v3723_v46, %v3723_v46  ;;  %v1705_v10 = vmul.f32 %v3721_v44, %v3721_v44 }
 0x8b6   :  { %v1728_v19 = vmul.f32 %v3805_v50, %v3805_v50  ;;  %v1677_v9 = vadd.f32 %v3805_v50, %v3799_v20 }
 0x8b7   :  { %v3809_v59 = vpop.f32.mrf.mxu0 }
 0x8b8   :  { %1771 = vadd.xlane.f32.xlu1 %v1770_v52  ;;  %v1773_v30 = vadd.f32 %v1728_v19, %v1727_v15  ;;  %v1729_v57 = vmul.f32 %v3809_v59, %v3809_v59  ;;  %v1737_v15 = vadd.f32 %v1704_v27, %v1703_v32  ;;  %v1740_v19 = vadd.f32 %v1706_v16, %v1705_v10 }
 0x8b9   :  { %v3811_v48 = vpop.f32.mrf.mxu0  ;;  %v1635_v52 = vadd.f32 %v3711_v4, %v3709_v47 }
 0x8ba   :  { %1774 = vadd.xlane.f32.xlu0 %v1773_v30  ;;  %v1680_v29 = vadd.f32 %v3811_v48, %v3809_v59  ;;  %v1730_v56 = vmul.f32 %v3811_v48, %v3811_v48  ;;  %v1700_v30 = vmul.f32 %v3711_v4, %v3711_v4 }
 0x8bc   :  { %1678 = vadd.xlane.f32.xlu1 %v1677_v9  ;;  %v1776_v21 = vadd.f32 %v1730_v56, %v1729_v57  ;;  %v1699_v9 = vmul.f32 %v3709_v47, %v3709_v47  ;;  %v1701_v56 = vmul.f32 %v3713_v11, %v3713_v11  ;;  %v4411_v57 = vmov 6  }
 0x8bd   :  { %2825 = vset.pattern.permute.xlu1 %v4411_v57 }
 0x8be   :  { %1681 = vadd.xlane.f32.xlu0 %v1680_v29  ;;  %v1638_v29 = vadd.f32 %v3715_v40, %v3713_v11 }
 0x8c0   :  { %1657 = vadd.xlane.f32.xlu1 %v1656_v23  ;;  %v1702_v23 = vmul.f32 %v3715_v40, %v3715_v40 }
 0x8c2   :  { %1654 = vadd.xlane.f32.xlu0 %v1653_v13  ;;  %v1731_v13 = vadd.f32 %v1700_v30, %v1699_v9  ;;  %v1734_v18 = vadd.f32 %v1702_v23, %v1701_v56 }
 0x8c4   :  { %1777 = vadd.xlane.f32.xlu1 %v1776_v21 }
 0x8c6   :  { %1750 = vadd.xlane.f32.xlu0 %v1749_v53 }
 0x8c8   :  { %1753 = vadd.xlane.f32.xlu1 %v1752_v2 }
 0x8ca   :  { %1648 = vadd.xlane.f32.xlu0 %v1647_v0 }
 0x8cc   :  { %1651 = vadd.xlane.f32.xlu1 %v1650_v3 }
 0x8ce   :  { %1744 = vadd.xlane.f32.xlu0 %v1743_v37 }
 0x8d0   :  { %1747 = vadd.xlane.f32.xlu1 %v1746_v39 }
 0x8d2   :  { %1642 = vadd.xlane.f32.xlu0 %v1641_v55 }
 0x8d4   :  { %1645 = vadd.xlane.f32.xlu1 %v1644_v22 }
 0x8d6   :  { %1738 = vadd.xlane.f32.xlu0 %v1737_v15 }
 0x8d8   :  { %1741 = vadd.xlane.f32.xlu1 %v1740_v19 }
 0x8da   :  { %1636 = vadd.xlane.f32.xlu0 %v1635_v52 }
 0x8dc   :  { %1639 = vadd.xlane.f32.xlu1 %v1638_v29 }
 0x8de   :  { %1732 = vadd.xlane.f32.xlu0 %v1731_v13 }
 0x8e0   :  { %1735 = vadd.xlane.f32.xlu1 %v1734_v18 }
 0x929   :  { %v1661_v51 = vpop.xlane.xlu0 %1660 }
 0x92a   :  { %v3872_v3 = vmul.f32 0.00390625, %v1661_v51 }
 0x92c   :  { %v1803_v32 = vmul.f32 %v3872_v3, %v3872_v3 }
 0x92d   :  { %v1757_v49 = vpop.xlane.xlu0 %1756  ;;  %v1664_v21 = vpop.xlane.xlu1 %1663 }
 0x92e   :  { %v1787_v39 = vmul.f32 0.00390625, %v1757_v49 }
 0x930   :  { %v1819_v10 = vsub.f32 %v1787_v39, %v1803_v32 }
 0x931   :  { %v1760_v6 = vpop.xlane.xlu1 %1759  ;;  %v1667_v53 = vpop.xlane.xlu0 %1666 }
 0x932   :  { %v3870_v2 = vmul.f32 0.00390625, %v1667_v53  ;;  %v1835_v56 = vmax.f32 %v1819_v10, 0.0  ;;  %v1788_v32 = vmul.f32 0.00390625, %v1760_v6 }
 0x934   :  { %v1805_v63 = vmul.f32 %v3870_v2, %v3870_v2 }
 0x935   :  { %v1763_v0 = vpop.xlane.xlu0 %1762  ;;  %v1670_v33 = vpop.xlane.xlu1 %1669 }
 0x936   :  { %v1789_v24 = vmul.f32 0.00390625, %v1763_v0  ;;  %v3884_v29 = vmul.f32 0.00390625, %v1670_v33  ;;  %v1851_v33 = vadd.f32 1e-05, %v1835_v56 }
 0x938   :  { %v1821_v27 = vsub.f32 %v1789_v24, %v1805_v63  ;;  %v3888_v24 = vmul.f32 0.00390625, %v1664_v21  ;;  %v1806_v39 = vmul.f32 %v3884_v29, %v3884_v29 }
 0x939   :  { %v1766_v7 = vpop.xlane.xlu1 %1765  ;;  %v1673_v37 = vpop.xlane.xlu0 %1672 }
 0x93a   :  { %v3876_v55 = vmul.f32 0.00390625, %v1673_v37  ;;  %v1837_v30 = vmax.f32 %v1821_v27, 0.0  ;;  %v1790_v53 = vmul.f32 0.00390625, %v1766_v7  ;;  %v1804_v7 = vmul.f32 %v3888_v24, %v3888_v24 }
 0x93c   :  { %v1807_v15 = vmul.f32 %v3876_v55, %v3876_v55  ;;  %v1853_v49 = vadd.f32 1e-05, %v1837_v30 }
 0x93d   :  { %v1769_v22 = vpop.xlane.xlu0 %1768  ;;  %v1676_v16 = vpop.xlane.xlu1 %1675 }
 0x93e   :  { %v1791_v19 = vmul.f32 0.00390625, %v1769_v22  ;;  %v3882_v52 = vmul.f32 0.00390625, %v1676_v16  ;;  %v1822_v16 = vsub.f32 %v1790_v53, %v1806_v39 }
 0x940   :  { %v1823_v9 = vsub.f32 %v1791_v19, %v1807_v15  ;;  %v1808_v18 = vmul.f32 %v3882_v52, %v3882_v52  ;;  %v1838_v56 = vmax.f32 %v1822_v16, 0.0 }
 0x941   :  { %v1772_v23 = vpop.xlane.xlu1 %1771 }
 0x942   :  { %v1839_v13 = vmax.f32 %v1823_v9, 0.0  ;;  %v1792_v51 = vmul.f32 0.00390625, %v1772_v23  ;;  %v1820_v9 = vsub.f32 %v1788_v32, %v1804_v7 }
 0x943   :  { %v1775_v0 = vpop.xlane.xlu0 %1774 }
 0x944   :  { %v1855_v63 = vadd.f32 1e-05, %v1839_v13  ;;  %v1824_v37 = vsub.f32 %v1792_v51, %v1808_v18  ;;  %v1793_v21 = vmul.f32 0.00390625, %v1775_v0  ;;  %v1854_v0 = vadd.f32 1e-05, %v1838_v56 }
 0x945   :  { %v1679_v27 = vpop.xlane.xlu1 %1678 }
 0x946   :  { %2908 = vrsqrt.f32 %v1855_v63  ;;  %v3892_v22 = vmul.f32 0.00390625, %v1679_v27  ;;  %v1840_v10 = vmax.f32 %v1824_v37, 0.0  ;;  %v1836_v63 = vmax.f32 %v1820_v9, 0.0 }
 0x947   :  { %2910 = vrsqrt.f32 %v1853_v49  ;;  %v1682_v15 = vpop.xlane.xlu0 %1681 }
 0x948   :  { %v1809_v19 = vmul.f32 %v3892_v22, %v3892_v22  ;;  %2912 = vrsqrt.f32 %v1851_v33  ;;  %v1856_v6 = vadd.f32 1e-05, %v1840_v10  ;;  %v3900_v49 = vmul.f32 0.00390625, %v1682_v15 }
 0x949   :  { %v1658_v30 = vpop.xlane.xlu1 %1657  ;;  %v1852_v15 = vadd.f32 1e-05, %v1836_v63 }
 0x94a   :  { %v1825_v23 = vsub.f32 %v1793_v21, %v1809_v19  ;;  %v3902_v39 = vmul.f32 0.00390625, %v1658_v30  ;;  %2914 = vrsqrt.f32 %v1856_v6  ;;  %v1810_v16 = vmul.f32 %v3900_v49, %v3900_v49  ;;  %v3913_v30 = vld [vmem:[%s4405_s2 + $0x60] sm:$0xff] }
 0x94b   :  { %v1655_v13 = vpop.xlane.xlu0 %1654 }
 0x94c   :  { %v1841_v18 = vmax.f32 %v1825_v23, 0.0  ;;  %v3898_v51 = vmul.f32 0.00390625, %v1655_v13  ;;  %v1802_v7 = vmul.f32 %v3902_v39, %v3902_v39 }
 0x94d   :  { %v1778_v53 = vpop.xlane.xlu1 %1777 }
 0x94e   :  { %v1857_v37 = vadd.f32 1e-05, %v1841_v18  ;;  %v1794_v27 = vmul.f32 0.00390625, %v1778_v53  ;;  %v1801_v33 = vmul.f32 %v3898_v51, %v3898_v51  ;;  %v3920_v53 = vld [vmem:[%s4405_s2 + $0x50] sm:$0xff] }
 0x94f   :  { %v1751_v25 = vpop.xlane.xlu0 %1750 }
 0x950   :  { %2916 = vrsqrt.f32 %v1857_v37  ;;  %v1785_v32 = vmul.f32 0.00390625, %v1751_v25  ;;  %v1826_v23 = vsub.f32 %v1794_v27, %v1810_v16 }
 0x951   :  { %v1754_v10 = vpop.xlane.xlu1 %1753  ;;  %2918 = vrsqrt.f32 %v1854_v0  ;;  %v4413_v0 = vmov 7  }
 0x952   :  { %v1817_v21 = vsub.f32 %v1785_v32, %v1801_v33  ;;  %v1786_v19 = vmul.f32 0.00390625, %v1754_v10  ;;  %2920 = vrsqrt.f32 %v1852_v15  ;;  %2827 = vset.pattern.permute.xlu0 %v4413_v0  ;;  %v1842_v16 = vmax.f32 %v1826_v23, 0.0  ;;  %v3936_v15 = vld [vmem:[%s4405_s2 + $0x40] sm:$0xff] }
 0x953   :  { %v2909_v9 = vpop.eup %2908  ;;  %v1649_v56 = vpop.xlane.xlu0 %1648 }
 0x954   :  { %v2911_v25 = vpop.eup %2910  ;;  %v1833_v6 = vmax.f32 %v1817_v21, 0.0  ;;  %v1818_v13 = vsub.f32 %v1786_v19, %v1802_v7  ;;  %v3915_v18 = vmul.f32 0.00390625, %v1649_v56  ;;  %v3923_v37 = vmul.f32 %v2909_v9, %v3913_v30 }
 0x955   :  { %v1652_v63 = vpop.xlane.xlu1 %1651  ;;  %v2913_v27 = vpop.eup %2912  ;;  %v3931_v19 = vmul.f32 %v2911_v25, %v3920_v53 }
 0x956   :  { %v1849_v33 = vadd.f32 1e-05, %v1833_v6  ;;  %v1834_v32 = vmax.f32 %v1818_v13, 0.0  ;;  %v3926_v10 = vmul.f32 0.00390625, %v1652_v63  ;;  %v1903_v21 = vmul.f32 %v3923_v37, %v3876_v55 }
 0x957   :  { %v1745_v7 = vpop.xlane.xlu0 %1744  ;;  %v1799_v56 = vmul.f32 %v3915_v18, %v3915_v18  ;;  %v3944_v63 = vmul.f32 %v2913_v27, %v3936_v15  ;;  %v3958_v27 = vld [vmem:[%s4405_s2 + $0x68] sm:$0xff] }
 0x958   :  { %2922 = vrsqrt.f32 %v1849_v33  ;;  %v1850_v9 = vadd.f32 1e-05, %v1834_v32  ;;  %v1783_v23 = vmul.f32 0.00390625, %v1745_v7  ;;  %1947 = vrot.lane.b32.xlu1 %v1903_v21, %s2976_s0  ;;  %v1800_v55 = vmul.f32 %v3926_v10, %v3926_v10  ;;  %v3949_v33 = vld [vmem:[%s4405_s2 + $0x70] sm:$0xff]  ;;  %v2915_v21 = vpop.eup %2914 }
 0x959   :  { %v1748_v6 = vpop.xlane.xlu1 %1747  ;;  %v1858_v32 = vadd.f32 1e-05, %v1842_v16  ;;  %v1901_v7 = vmul.f32 %v3931_v19, %v3870_v2  ;;  %v1899_v2 = vmul.f32 %v3944_v63, %v3872_v3  ;;  %v3978_v3 = vld [vmem:[%s4405_s2 + $0x58] sm:$0xff] }
 0x95a   :  { %v1815_v13 = vsub.f32 %v1783_v23, %v1799_v56  ;;  %v1784_v25 = vmul.f32 0.00390625, %v1748_v6  ;;  %2924 = vrsqrt.f32 %v1850_v9 }
 0x95b   :  { %v1643_v57 = vpop.xlane.xlu0 %1642  ;;  %2926 = vrsqrt.f32 %v1858_v32 }
 0x95c   :  { %v1831_v0 = vmax.f32 %v1815_v13, 0.0  ;;  %v1816_v40 = vsub.f32 %v1784_v25, %v1800_v55  ;;  %v3953_v11 = vmul.f32 0.00390625, %v1643_v57  ;;  %1943 = vrot.lane.b32.xlu1 %v1901_v7, %s2976_s0  ;;  %v3971_v25 = vmul.f32 %v2915_v21, %v3958_v27 }
 0x95d   :  { %v2917_v56 = vpop.eup %2916  ;;  %v1646_v23 = vpop.xlane.xlu1 %1645 }
 0x95e   :  { %v3962_v16 = vmul.f32 %v2917_v56, %v3949_v33  ;;  %v1847_v9 = vadd.f32 1e-05, %v1831_v0  ;;  %v1832_v6 = vmax.f32 %v1816_v40, 0.0  ;;  %v1797_v57 = vmul.f32 %v3953_v11, %v3953_v11  ;;  %v2919_v7 = vpop.eup %2918 }
 0x95f   :  { %v3968_v55 = vmul.f32 0.00390625, %v1646_v23  ;;  %v1739_v13 = vpop.xlane.xlu0 %1738 }
 0x960   :  { %v1905_v56 = vmul.f32 %v3962_v16, %v3892_v22  ;;  %2928 = vrsqrt.f32 %v1847_v9  ;;  %v1848_v0 = vadd.f32 1e-05, %v1832_v6  ;;  %v1781_v40 = vmul.f32 0.00390625, %v1739_v13  ;;  %1939 = vrot.lane.b32.xlu1 %v1899_v2, %s2976_s0  ;;  %v2921_v22 = vpop.eup %2920 }
 0x961   :  { %v1742_v32 = vpop.xlane.xlu1 %1741  ;;  %v1798_v21 = vmul.f32 %v3968_v55, %v3968_v55  ;;  %v3985_v6 = vmul.f32 %v2919_v7, %v3978_v3  ;;  %v1904_v2 = vmul.f32 %v3971_v25, %v3882_v52  ;;  %v4004_v52 = vld [vmem:[%s4405_s2 + $0x30] sm:$0xff] }
 0x962   :  { %2930 = vrsqrt.f32 %v1848_v0  ;;  %v1813_v23 = vsub.f32 %v1781_v40, %v1797_v57  ;;  %v1782_v4 = vmul.f32 0.00390625, %v1742_v32  ;;  %1951 = vrot.lane.b32.xlu0 %v1905_v56, %s2976_s0  ;;  %v3994_v0 = vld [vmem:[%s4405_s2 + $0x48] sm:$0xff] }
 0x963   :  { %v1637_v9 = vpop.xlane.xlu0 %1636 }
 0x964   :  { %v1829_v13 = vmax.f32 %v1813_v23, 0.0  ;;  %v1814_v47 = vsub.f32 %v1782_v4, %v1798_v21  ;;  %v3987_v46 = vmul.f32 0.00390625, %v1637_v9  ;;  %v1902_v4 = vmul.f32 %v3985_v6, %v3884_v29 }
 0x965   :  { %v2923_v57 = vpop.eup %2922  ;;  %v1640_v40 = vpop.xlane.xlu1 %1639  ;;  %v4010_v23 = vmul.f32 %v2921_v22, %v3994_v0  ;;  %v4023_v22 = vld [vmem:[%s4405_s2 + $0x38] sm:$0xff] }
 0x966   :  { %v1845_v56 = vadd.f32 1e-05, %v1829_v13  ;;  %v1830_v32 = vmax.f32 %v1814_v47, 0.0  ;;  %v3996_v44 = vmul.f32 0.00390625, %v1640_v40  ;;  %1949 = vrot.lane.b32.xlu0 %v1904_v2, %s2976_s0  ;;  %v4007_v21 = vmul.f32 %v4004_v52, %v2923_v57 }
 0x967   :  { %v1733_v7 = vpop.xlane.xlu0 %1732  ;;  %v2925_v47 = vpop.eup %2924  ;;  %v1795_v13 = vmul.f32 %v3987_v46, %v3987_v46 }
 0x968   :  { %2932 = vrsqrt.f32 %v1845_v56  ;;  %v1846_v9 = vadd.f32 1e-05, %v1830_v32  ;;  %v1779_v2 = vmul.f32 0.00390625, %v1733_v7  ;;  %v1897_v29 = vmul.f32 %v4007_v21, %v3898_v51  ;;  %v2927_v32 = vpop.eup %2926 }
 0x969   :  { %v1736_v40 = vpop.xlane.xlu1 %1735  ;;  %v1796_v42 = vmul.f32 %v3996_v44, %v3996_v44  ;;  %v4026_v56 = vmul.f32 %v4023_v22, %v2925_v47  ;;  %v4039_v47 = vld [vmem:[%s4405_s2 + $0x20] sm:$0xff] }
 0x96a   :  { %2934 = vrsqrt.f32 %v1846_v9  ;;  %v1811_v57 = vsub.f32 %v1779_v2, %v1795_v13  ;;  %v1780_v45 = vmul.f32 0.00390625, %v1736_v40  ;;  %1945 = vrot.lane.b32.xlu0 %v1902_v4, %s2976_s0  ;;  %1935 = vrot.lane.b32.xlu1 %v1897_v29, %s2976_s0  ;;  %v1900_v9 = vmul.f32 %v4010_v23, %v3888_v24  ;;  %v4033_v4 = vld [vmem:[%s4405_s2 + $0x78] sm:$0xff] }
 0x96b   :  { %v1898_v24 = vmul.f32 %v4026_v56, %v3902_v39  ;;  %v1890_v29 = vmul.f32 %v2927_v32, %v4033_v4 }
 0x96c   :  { %v1827_v51 = vmax.f32 %v1811_v57, 0.0  ;;  %v1812_v7 = vsub.f32 %v1780_v45, %v1796_v42 }
 0x96d   :  { %v2929_v13 = vpop.eup %2928  ;;  %v1906_v32 = vmul.f32 %v1890_v29, %v3900_v49  ;;  %v4077_v49 = vld [vmem:[%s4405_s2 + $0x18] sm:$0xff] }
 0x96e   :  { %v1843_v2 = vadd.f32 1e-05, %v1827_v51  ;;  %v1828_v40 = vmax.f32 %v1812_v7, 0.0  ;;  %1941 = vrot.lane.b32.xlu0 %v1900_v9, %s2976_s0  ;;  %v4042_v45 = vmul.f32 %v4039_v47, %v2929_v13  ;;  %v4052_v7 = vld [vmem:[%s4405_s2 + $0x28] sm:$0xff] }
 0x96f   :  { %v2931_v42 = vpop.eup %2930 }
 0x970   :  { %2936 = vrsqrt.f32 %v1843_v2  ;;  %v1844_v57 = vadd.f32 1e-05, %v1828_v40  ;;  %v1895_v51 = vmul.f32 %v4042_v45, %v3915_v18  ;;  %v4055_v9 = vmul.f32 %v4052_v7, %v2931_v42  ;;  %v4067_v18 = vld [vmem:[%s4405_s2 + $0x10] sm:$0xff] }
 0x972   :  { %2938 = vrsqrt.f32 %v1844_v57  ;;  %1937 = vrot.lane.b32.xlu0 %v1898_v24, %s2976_s0  ;;  %1931 = vrot.lane.b32.xlu1 %v1895_v51, %s2976_s0  ;;  %v1896_v39 = vmul.f32 %v4055_v9, %v3926_v10  ;;  %v4086_v51 = vld [vmem:[%s4405_s2] sm:$0xff] }
 0x975   :  { %v2933_v13 = vpop.eup %2932 }
 0x976   :  { %1933 = vrot.lane.b32.xlu0 %v1896_v39, %s2976_s0  ;;  %1953 = vrot.lane.b32.xlu1 %v1906_v32, %s2976_s0  ;;  %v4070_v2 = vmul.f32 %v4067_v18, %v2933_v13  ;;  %v4093_v13 = vld [vmem:[%s4405_s2 + $0x8] sm:$0xff] }
 0x977   :  { %v2935_v40 = vpop.eup %2934 }
 0x978   :  { %v1893_v42 = vmul.f32 %v4070_v2, %v3953_v11  ;;  %v1878_v10 = vmul.f32 %v4077_v49, %v2935_v40 }
 0x97a   :  { %1927 = vrot.lane.b32.xlu1 %v1893_v42, %s2976_s0  ;;  %v1894_v24 = vmul.f32 %v1878_v10, %v3968_v55 }
 0x97c   :  { %1929 = vrot.lane.b32.xlu0 %v1894_v24, %s2976_s0 }
 0x97d   :  { %v2937_v57 = vpop.eup %2936 }
 0x97e   :  { %v1875_v11 = vmul.f32 %v4086_v51, %v2937_v57 }
 0x97f   :  { %v2939_v39 = vpop.eup %2938 }
 0x980   :  { %v1891_v32 = vmul.f32 %v1875_v11, %v3987_v46  ;;  %v4096_v55 = vmul.f32 %v4093_v13, %v2939_v39  ;;  %v4437_v46 = vmov 7  }
 0x982   :  { %1923 = vrot.lane.b32.xlu1 %v1891_v32, %s2976_s0  ;;  %v1892_v40 = vmul.f32 %v4096_v55, %v3996_v44 }
 0x984   :  { %1925 = vrot.lane.b32.xlu0 %v1892_v40, %s2976_s0 }
 0x986   :  { %2059 = vperm.xlu1 %2825, %v3962_v16  }
 0x98a   :  { %2054 = vperm.xlu1 %2825, %v3971_v25  }
 0x98e   :  { %2039 = vperm.xlu1 %2825, %v3931_v19  }
 0x992   :  { %2034 = vperm.xlu1 %2825, %v4010_v23  }
 0x996   :  { %2019 = vperm.xlu1 %2825, %v4007_v21  }
 0x99a   :  { %2826 = vset.pattern.permute.xlu1 %v4437_v46 }
 0x9ca   :  { %v1948_v42 = vpop.permute.xlu1 %1947 }
 0x9cb   :  { %v1983_v32 = vsub.f32 %v3913_v30, %v1948_v42 }
 0x9ce   :  { %v1944_v24 = vpop.permute.xlu1 %1943 }
 0x9cf   :  { %v1981_v30 = vsub.f32 %v3920_v53, %v1944_v24 }
 0x9d2   :  { %v1940_v57 = vpop.permute.xlu1 %1939 }
 0x9d3   :  { %v1979_v39 = vsub.f32 %v3936_v15, %v1940_v57  ;;  %v4438_v57 = vmov 6  }
 0x9d4   :  { %v1952_v44 = vpop.permute.xlu0 %1951 }
 0x9d5   :  { %2141 = vperm.xlu0 %2827, %v1979_v39  }
 0x9d8   :  { %v1950_v16 = vpop.permute.xlu0 %1949 }
 0x9d9   :  { %2161 = vperm.xlu0 %2827, %v1983_v32  }
 0x9dc   :  { %v1946_v25 = vpop.permute.xlu0 %1945  ;;  %v1936_v40 = vpop.permute.xlu1 %1935 }
 0x9dd   :  { %v1977_v19 = vsub.f32 %v4004_v52, %v1936_v40  ;;  %v1982_v42 = vsub.f32 %v3978_v3, %v1946_v25 }
 0x9df   :  { %2131 = vperm.xlu1 %2826, %v1977_v19  }
 0x9e0   :  { %v1942_v23 = vpop.permute.xlu0 %1941 }
 0x9e1   :  { %v1980_v15 = vsub.f32 %v3994_v0, %v1942_v23 }
 0x9e4   :  { %v1932_v21 = vpop.permute.xlu1 %1931  ;;  %v1938_v26 = vpop.permute.xlu0 %1937 }
 0x9e5   :  { %v1975_v12 = vsub.f32 %v4039_v47, %v1932_v21  ;;  %v1978_v60 = vsub.f32 %v4023_v22, %v1938_v26  ;;  %v1984_v26 = vsub.f32 %v3958_v27, %v1950_v16 }
 0x9e7   :  { %2121 = vperm.xlu0 %2827, %v1975_v12   ;;  %2136 = vperm.xlu1 %2826, %v1978_v60   ;;  %v1985_v12 = vsub.f32 %v3949_v33, %v1952_v44 }
 0x9e8   :  { %v1954_v60 = vpop.permute.xlu1 %1953 }
 0x9e9   :  { %v1986_v53 = vsub.f32 %v4033_v4, %v1954_v60 }
 0x9eb   :  { %2829 = vset.pattern.permute.xlu0 %v4438_v57  ;;  %2146 = vperm.xlu1 %2826, %v1980_v15  }
 0x9ec   :  { %2064 = vperm.xlu0 %2829, %v1890_v29   ;;  %v1928_v3 = vpop.permute.xlu1 %1927 }
 0x9ef   :  { %2151 = vperm.xlu1 %2826, %v1981_v30  }
 0x9f0   :  { %2049 = vperm.xlu0 %2829, %v3923_v37   ;;  %v1934_v37 = vpop.permute.xlu0 %1933 }
 0x9f3   :  { %2156 = vperm.xlu1 %2826, %v1982_v42  }
 0x9f4   :  { %2044 = vperm.xlu0 %2829, %v3985_v6   ;;  %v1924_v27 = vpop.permute.xlu1 %1923  ;;  %v1973_v6 = vsub.f32 %v4067_v18, %v1928_v3  ;;  %v1930_v0 = vpop.permute.xlu0 %1929 }
 0x9f5   :  { %v1971_v33 = vsub.f32 %v4086_v51, %v1924_v27 }
 0x9f7   :  { %2166 = vperm.xlu1 %2826, %v1984_v26  }
 0x9f8   :  { %2029 = vperm.xlu0 %2829, %v3944_v63   ;;  %v1976_v63 = vsub.f32 %v4052_v7, %v1934_v37  ;;  %v1926_v4 = vpop.permute.xlu0 %1925 }
 0x9fb   :  { %2171 = vperm.xlu1 %2826, %v1985_v12  }
 0x9fc   :  { %2024 = vperm.xlu0 %2829, %v4026_v56   ;;  %v1974_v56 = vsub.f32 %v4077_v49, %v1930_v0 }
 0x9ff   :  { %2176 = vperm.xlu1 %2826, %v1986_v53  }
 0xa00   :  { %2009 = vperm.xlu0 %2829, %v4042_v45   ;;  %v1972_v45 = vsub.f32 %v4093_v13, %v1926_v4 }
 0xa01   :  { %v2060_v29 = vpop.permute.xlu1 %2059 }
 0xa02   :  { %v2095_v30 = vmul.f32 %v2060_v29, %v3799_v20  ;;  %v2096_v42 = vmul.f32 %v2060_v29, %v3805_v50 }
 0xa03   :  { %2828 = vset.pattern.permute.xlu1 %v4438_v57 }
 0xa04   :  { %2004 = vperm.xlu0 %2829, %v1878_v10   ;;  %2014 = vperm.xlu1 %2828, %v4055_v9  }
 0xa05   :  { %v2055_v9 = vpop.permute.xlu1 %2054 }
 0xa06   :  { %v2094_v15 = vmul.f32 %v2055_v9, %v3793_v5 }
 0xa08   :  { %1989 = vperm.xlu0 %2829, %v1875_v11   ;;  %2830 = vset.pattern.permute.xlu1 %v4437_v46 }
 0xa09   :  { %2126 = vperm.xlu1 %2830, %v1976_v63  }
 0xa0c   :  { %2834 = vset.pattern.permute.xlu0 %v4437_v46 }
 0xa0d   :  { %2101 = vperm.xlu0 %2834, %v1971_v33   ;;  %2831 = vset.pattern.permute.xlu1 %v4438_v57  ;;  %v2093_v33 = vmul.f32 %v2055_v9, %v3789_v54 }
 0xa0e   :  { %1999 = vperm.xlu1 %2831, %v4070_v2   ;;  %v2040_v2 = vpop.permute.xlu1 %2039 }
 0xa0f   :  { %v2088_v5 = vmul.f32 %v2040_v2, %v3763_v8  ;;  %v2087_v54 = vmul.f32 %v2040_v2, %v3759_v62 }
 0xa12   :  { %2832 = vset.pattern.permute.xlu1 %v4437_v46  ;;  %v2035_v10 = vpop.permute.xlu1 %2034 }
 0xa13   :  { %2111 = vperm.xlu1 %2832, %v1973_v6  }
 0xa16   :  { %v4142_v24 = vpop.permute.xlu1 %2019 }
 0xa17   :  { %2116 = vperm.xlu1 %2832, %v1974_v56  }
 0xa1b   :  { %2833 = vset.pattern.permute.xlu1 %v4438_v57 }
 0xa1c   :  { %1994 = vperm.xlu1 %2833, %v4096_v55  }
 0xa20   :  { %2835 = vset.pattern.permute.xlu1 %v4437_v46 }
 0xa21   :  { %2106 = vperm.xlu1 %2835, %v1972_v45  }
 0xa50   :  { %v4140_v11 = vpop.permute.xlu0 %2141 }
 0xa54   :  { %v2162_v39 = vpop.permute.xlu0 %2161 }
 0xa5a   :  { %v4144_v44 = vpop.permute.xlu1 %2131 }
 0xa62   :  { %v4146_v32 = vpop.permute.xlu1 %2136  ;;  %v4148_v16 = vpop.permute.xlu0 %2121 }
 0xa66   :  { %v4150_v55 = vpop.permute.xlu1 %2146 }
 0xa67   :  { %v2065_v25 = vpop.permute.xlu0 %2064 }
 0xa68   :  { %v2097_v37 = vmul.f32 %v2065_v25, %v3809_v59  ;;  %v2098_v3 = vmul.f32 %v2065_v25, %v3811_v48 }
 0xa6a   :  { %v2152_v46 = vpop.permute.xlu1 %2151 }
 0xa6b   :  { %v2050_v40 = vpop.permute.xlu0 %2049  ;;  %v2199_v2 = vadd.f32 %v2152_v46, %v2087_v54 }
 0xa6c   :  { %v2092_v26 = vmul.f32 %v2050_v40, %v3783_v61  ;;  %v2091_v20 = vmul.f32 %v2050_v40, %v3779_v14  ;;  %v2200_v14 = vadd.f32 %v2152_v46, %v2088_v5 }
 0xa6e   :  { %v2157_v19 = vpop.permute.xlu1 %2156  ;;  %v2204_v50 = vadd.f32 %v2162_v39, %v2092_v26  ;;  %v2203_v8 = vadd.f32 %v2162_v39, %v2091_v20 }
 0xa6f   :  { %v2045_v23 = vpop.permute.xlu0 %2044 }
 0xa70   :  { %v2090_v12 = vmul.f32 %v2045_v23, %v3773_v17  ;;  %v2089_v61 = vmul.f32 %v2045_v23, %v3769_v36  ;;  %v2236_v40 = vmax.f32 %v2204_v50, 0.0  ;;  %v2086_v23 = vmul.f32 %v2035_v10, %v3753_v31 }
 0xa71   :  { %v2235_v39 = vmax.f32 %v2203_v8, 0.0 }
 0xa72   :  { %v2167_v21 = vpop.permute.xlu1 %2166  ;;  %v2202_v56 = vadd.f32 %v2157_v19, %v2090_v12 }
 0xa73   :  { %v2206_v60 = vadd.f32 %v2167_v21, %v2094_v15  ;;  %v2030_v53 = vpop.permute.xlu0 %2029  ;;  %v2205_v4 = vadd.f32 %v2167_v21, %v2093_v33 }
 0xa74   :  { %v2084_v59 = vmul.f32 %v2030_v53, %v3743_v43  ;;  %v2083_v26 = vmul.f32 %v2030_v53, %v3741_v38  ;;  %v2234_v43 = vmax.f32 %v2202_v56, 0.0 }
 0xa75   :  { %v2238_v45 = vmax.f32 %v2206_v60, 0.0  ;;  %v2237_v21 = vmax.f32 %v2205_v4, 0.0 }
 0xa76   :  { %v2172_v57 = vpop.permute.xlu1 %2171  ;;  %v2196_v12 = vadd.f32 %v4140_v11, %v2084_v59  ;;  %v2195_v38 = vadd.f32 %v4140_v11, %v2083_v26 }
 0xa77   :  { %v2207_v63 = vadd.f32 %v2172_v57, %v2095_v30  ;;  %v2208_v27 = vadd.f32 %v2172_v57, %v2096_v42  ;;  %v2025_v9 = vpop.permute.xlu0 %2024  ;;  %v2201_v42 = vadd.f32 %v2157_v19, %v2089_v61  ;;  %v2256_v62 = vpack.c.bf16 %v2238_v45, %v2236_v40  ;;  %v4439_v61 = vld [vmem:[#allocation12_spill] sm:$0xff] }
 0xa78   :  { %v2082_v60 = vmul.f32 %v2025_v9, %v3739_v35  ;;  %v2255_v19 = vpack.c.bf16 %v2237_v21, %v2235_v39  ;;  %v2081_v53 = vmul.f32 %v2025_v9, %v3737_v34  ;;  %v2080_v35 = vmul.f32 %v4142_v24, %v3735_v28  ;;  %v4442_v21 = vld [vmem:[#allocation6_spill] sm:$0xff]  ;;  %v4445_v39 = vld [vmem:[#allocation9_spill] sm:$0xff] }
 0xa79   :  { %v2239_v48 = vmax.f32 %v2207_v63, 0.0  ;;  %v2240_v29 = vmax.f32 %v2208_v27, 0.0  ;;  %v2232_v63 = vmax.f32 %v2200_v14, 0.0  ;;  %v2233_v31 = vmax.f32 %v2201_v42, 0.0 }
 0xa7a   :  { %v2177_v6 = vpop.permute.xlu1 %2176  ;;  %v2228_v46 = vmax.f32 %v2196_v12, 0.0  ;;  %v2194_v5 = vadd.f32 %v4146_v32, %v2082_v60  ;;  %v2193_v56 = vadd.f32 %v4146_v32, %v2081_v53  ;;  %v4444_v60 = vld [vmem:[#allocation8_spill] sm:$0xff] }
 0xa7b   :  { %v2209_v0 = vadd.f32 %v2177_v6, %v2097_v37  ;;  %v2210_v17 = vadd.f32 %v2177_v6, %v2098_v3  ;;  %v2085_v37 = vmul.f32 %v2035_v10, %v3749_v1  ;;  %v2198_v3 = vadd.f32 %v4150_v55, %v2086_v23  ;;  %v2010_v27 = vpop.permute.xlu0 %2009 }
 0xa7c   :  { %v2254_v20 = vpack.c.bf16 %v2234_v43, %v2232_v63  ;;  %v2231_v10 = vmax.f32 %v2199_v2, 0.0  ;;  %v2192_v6 = vadd.f32 %v4144_v44, %v2080_v35  ;;  %v2076_v11 = vmul.f32 %v2010_v27, %v3727_v41  ;;  %v4441_v41 = vld [vmem:[#allocation11_spill] sm:$0xff] }
 0xa7d   :  { %v2241_v25 = vmax.f32 %v2209_v0, 0.0  ;;  %v2242_v15 = vmax.f32 %v2210_v17, 0.0  ;;  %v2197_v1 = vadd.f32 %v4150_v55, %v2085_v37  ;;  %v2230_v50 = vmax.f32 %v2198_v3, 0.0 }
 0xa7e   :  { %v2079_v0 = vmul.f32 %v4142_v24, %v4439_v61  ;;  %v2253_v28 = vpack.c.bf16 %v2233_v31, %v2231_v10  ;;  %v2227_v17 = vmax.f32 %v2195_v38, 0.0  ;;  %v2226_v4 = vmax.f32 %v2194_v5, 0.0  ;;  %v4447_v61 = vld [vmem:[#allocation3_spill] sm:$0xff] }
 0xa7f   :  { %v2257_v57 = vpack.c.bf16 %v2241_v25, %v2239_v48  ;;  %v2015_v30 = vpop.permute.xlu1 %2014  ;;  %v2258_v36 = vpack.c.bf16 %v2242_v15, %v2240_v29  ;;  %v2252_v59 = vpack.c.bf16 %v2230_v50, %v2228_v46  ;;  %v2229_v29 = vmax.f32 %v2197_v1, 0.0  ;;  %v4440_v25 = vld [vmem:[#allocation10_spill] sm:$0xff]  ;;  %v2005_v14 = vpop.permute.xlu0 %2004 }
 0xa80   :  { %v2078_v34 = vmul.f32 %v2015_v30, %v3731_v58  ;;  %v2191_v48 = vadd.f32 %v4144_v44, %v2079_v0  ;;  %v2075_v15 = vmul.f32 %v2010_v27, %v4440_v25  ;;  %v2077_v54 = vmul.f32 %v2015_v30, %v4441_v41  ;;  %v4443_v30 = vld [vmem:[#allocation7_spill] sm:$0xff] }
 0xa81   :  { %2283 = vmatprep.subr.bf16.mxu1 %v2258_v36  ;;  %v2224_v58 = vmax.f32 %v2192_v6, 0.0  ;;  %v2188_v8 = vadd.f32 %v4148_v16, %v2076_v11  ;;  %v2251_v24 = vpack.c.bf16 %v2229_v29, %v2227_v17  ;;  %v2225_v9 = vmax.f32 %v2193_v56, 0.0  ;;  %v4446_v11 = vld [vmem:[#allocation2_spill] sm:$0xff]  ;;  %v4448_v56 = vld [vmem:[#allocation4_spill] sm:$0xff] }
 0xa82   :  { %2284 = vmatpush1.bf16.msra.mxu1 %v2257_v57  ;;  %v2223_v36 = vmax.f32 %v2191_v48, 0.0  ;;  %v2187_v23 = vadd.f32 %v4148_v16, %v2075_v15  ;;  %v2074_v37 = vmul.f32 %v2005_v14, %v4445_v39 }
 0xa83   :  { %2285 = vmatprep.subr.bf16.mxu1 %v2256_v62  ;;  %v2250_v57 = vpack.c.bf16 %v2226_v4, %v2224_v58  ;;  %v2220_v42 = vmax.f32 %v2188_v8, 0.0  ;;  %v2073_v62 = vmul.f32 %v2005_v14, %v4444_v60  ;;  %v1990_v38 = vpop.permute.xlu0 %1989  ;;  %v2857_v14 = vld [vmem:[%s4407_s1 + $0x88] sm:$0xff]  }
 0xa84   :  { %v2127_v33 = vpop.permute.xlu1 %2126  ;;  %v2249_v12 = vpack.c.bf16 %v2225_v9, %v2223_v36  ;;  %v2068_v0 = vmul.f32 %v1990_v38, %v4447_v61  ;;  %v4450_v9 = vmov 0  }
 0xa85   :  { %v2190_v45 = vadd.f32 %v2127_v33, %v2078_v34  ;;  %v2189_v32 = vadd.f32 %v2127_v33, %v2077_v54  ;;  %v2067_v34 = vmul.f32 %v1990_v38, %v4446_v11 }
 0xa86   :  { %2286 = vmatpush1.bf16.msra.mxu1 %v2255_v19  ;;  %v2219_v19 = vmax.f32 %v2187_v23, 0.0 }
 0xa87   :  { %2287 = vmatprep.subr.bf16.mxu1 %v2254_v20  ;;  %v2222_v40 = vmax.f32 %v2190_v45, 0.0  ;;  %v2221_v2 = vmax.f32 %v2189_v32, 0.0  ;;  %v4449_v45 = vld [vmem:[#allocation5_spill] sm:$0xff]  ;;  %v2858_v32 = vld [vmem:[%s4407_s1 + $0x90] sm:$0xff]  }
 0xa88   :  { %v2102_v50 = vpop.permute.xlu0 %2101 }
 0xa89   :  { %v2000_v55 = vpop.permute.xlu1 %1999  ;;  %v2248_v31 = vpack.c.bf16 %v2222_v40, %v2220_v42  ;;  %v2247_v33 = vpack.c.bf16 %v2221_v2, %v2219_v19  ;;  %v2180_v17 = vadd.f32 %v2102_v50, %v2068_v0  ;;  %v2859_v40 = vld [vmem:[%s4407_s1 + $0x98] sm:$0xff]  }
 0xa8a   :  { %2288 = vmatpush1.bf16.msra.mxu1 %v2253_v28  ;;  %v2071_v26 = vmul.f32 %v2000_v55, %v4442_v21  ;;  %v2072_v43 = vmul.f32 %v2000_v55, %v4443_v30  ;;  %v2179_v28 = vadd.f32 %v2102_v50, %v2067_v34 }
 0xa8b   :  { %2289 = vmatprep.subr.bf16.mxu1 %v2252_v59  ;;  %v2212_v15 = vmax.f32 %v2180_v17, 0.0 }
 0xa8c   :  { %v2211_v25 = vmax.f32 %v2179_v28, 0.0 }
 0xa8e   :  { %v2112_v44 = vpop.permute.xlu1 %2111  ;;  %2290 = vmatpush1.bf16.msra.mxu1 %v2251_v24  ;;  %v2856_v24 = vld [vmem:[%s4407_s1 + $0x80] sm:$0xff]  }
 0xa8f   :  { %2291 = vmatprep.subr.bf16.mxu1 %v2250_v57  ;;  %v2183_v3 = vadd.f32 %v2112_v44, %v2071_v26  ;;  %v2184_v63 = vadd.f32 %v2112_v44, %v2072_v43 }
 0xa91   :  { %v2215_v35 = vmax.f32 %v2183_v3, 0.0  ;;  %v2216_v46 = vmax.f32 %v2184_v63, 0.0 }
 0xa92   :  { %v2117_v16 = vpop.permute.xlu1 %2116  ;;  %2292 = vmatpush1.bf16.msra.mxu1 %v2249_v12 }
 0xa93   :  { %v2185_v53 = vadd.f32 %v2117_v16, %v2073_v62  ;;  %v2186_v27 = vadd.f32 %v2117_v16, %v2074_v37  ;;  %2293 = vmatprep.subr.bf16.mxu1 %v2248_v31 }
 0xa95   :  { %v2217_v5 = vmax.f32 %v2185_v53, 0.0  ;;  %v2218_v20 = vmax.f32 %v2186_v27, 0.0 }
 0xa96   :  { %2294 = vmatpush1.bf16.msra.mxu1 %v2247_v33 }
 0xa97   :  { %v2245_v1 = vpack.c.bf16 %v2217_v5, %v2215_v35  ;;  %v1995_v10 = vpop.permute.xlu1 %1994  ;;  %v2246_v6 = vpack.c.bf16 %v2218_v20, %v2216_v46 }
 0xa98   :  { %v2069_v4 = vmul.f32 %v1995_v10, %v4448_v56  ;;  %v2070_v55 = vmul.f32 %v1995_v10, %v4449_v45 }
 0xa99   :  { %2295 = vmatprep.subr.bf16.mxu1 %v2246_v6 }
 0xa9a   :  { %2296 = vmatpush1.bf16.msra.mxu1 %v2245_v1 }
 0xa9c   :  { %v2107_v59 = vpop.permute.xlu1 %2106 }
 0xa9d   :  { %v2181_v48 = vadd.f32 %v2107_v59, %v2069_v4  ;;  %v2182_v29 = vadd.f32 %v2107_v59, %v2070_v55 }
 0xa9f   :  { %v2213_v41 = vmax.f32 %v2181_v48, 0.0  ;;  %v2214_v54 = vmax.f32 %v2182_v29, 0.0 }
 0xaa1   :  { %v2243_v58 = vpack.c.bf16 %v2213_v41, %v2211_v25  ;;  %v2244_v8 = vpack.c.bf16 %v2214_v54, %v2212_v15  ;;  %v2984_v54 = vmov 8  }
 0xaa2   :  { %2836 = vset.pattern.permute.xlu1 %v2984_v54  ;;  %2837 = vset.pattern.permute.xlu0 %v2984_v54 }
 0xaa3   :  { %2297 = vmatprep.subr.bf16.mxu1 %v2244_v8 }
 0xaa4   :  { %2298 = vmatpush1.bf16.msra.mxu1 %v2243_v58 }
 0xaa7   :  { %2316 = vmatmul.mubr.bf16.vlgmr.msra.gmra.mxu1 %v2856_v24 }
 0xaa8   :  { %2325 = vmatprep.mubr.bf16.mxu1 %v4450_v9 }
 0xaaf   :  { %2326 = vmatmul.mubr.bf16.gmra.mxu1 %v2857_v14 }
 0xab0   :  { %2335 = vmatprep.mubr.bf16.mxu1 %v4450_v9 }
 0xab7   :  { %2336 = vmatmul.mubr.bf16.gmra.mxu1 %v2858_v32 }
 0xab8   :  { %2345 = vmatprep.mubr.bf16.mxu1 %v4450_v9 }
 0xabf   :  { %2346 = vmatmul.mubr.bf16.gmra.mxu1 %v2859_v40 }
 0xb67   :  { %v4211_v57 = vpop.f32.mrf.mxu1 }
 0xb68   :  { %v2388_v23 = vmul.f32 %v4211_v57, %v4211_v57 }
 0xb69   :  { %v4213_v36 = vpop.f32.mrf.mxu1 }
 0xb6a   :  { %v2356_v44 = vadd.f32 %v4213_v36, %v4211_v57  ;;  %v2389_v42 = vmul.f32 %v4213_v36, %v4213_v36 }
 0xb6b   :  { %v4221_v21 = vpop.f32.mrf.mxu1 }
 0xb6c   :  { %2357 = vadd.xlane.f32.xlu1 %v2356_v44  ;;  %v2404_v26 = vadd.f32 %v2389_v42, %v2388_v23  ;;  %v2390_v43 = vmul.f32 %v4221_v21, %v4221_v21 }
 0xb6d   :  { %v4223_v30 = vpop.f32.mrf.mxu1 }
 0xb6e   :  { %v2391_v12 = vmul.f32 %v4223_v30, %v4223_v30  ;;  %2405 = vadd.xlane.f32.xlu0 %v2404_v26  ;;  %v2359_v62 = vadd.f32 %v4223_v30, %v4221_v21 }
 0xb6f   :  { %v4229_v60 = vpop.f32.mrf.mxu1 }
 0xb70   :  { %v2407_v2 = vadd.f32 %v2391_v12, %v2390_v43  ;;  %v2392_v19 = vmul.f32 %v4229_v60, %v4229_v60 }
 0xb71   :  { %v4233_v39 = vpop.f32.mrf.mxu1 }
 0xb72   :  { %2408 = vadd.xlane.f32.xlu1 %v2407_v2  ;;  %2360 = vadd.xlane.f32.xlu0 %v2359_v62  ;;  %v2362_v3 = vadd.f32 %v4233_v39, %v4229_v60  ;;  %v2393_v63 = vmul.f32 %v4233_v39, %v4233_v39 }
 0xb73   :  { %v4235_v37 = vpop.f32.mrf.mxu1 }
 0xb74   :  { %v2394_v27 = vmul.f32 %v4235_v37, %v4235_v37  ;;  %v2410_v33 = vadd.f32 %v2393_v63, %v2392_v19 }
 0xb75   :  { %v4241_v31 = vpop.f32.mrf.mxu1 }
 0xb76   :  { %v2365_v38 = vadd.f32 %v4241_v31, %v4235_v37  ;;  %v2395_v16 = vmul.f32 %v4241_v31, %v4241_v31  ;;  %2363 = vadd.xlane.f32.xlu0 %v2362_v3 }
 0xb77   :  { %v4249_v53 = vpop.f32.mrf.mxu1 }
 0xb78   :  { %2366 = vadd.xlane.f32.xlu1 %v2365_v38  ;;  %v2413_v46 = vadd.f32 %v2395_v16, %v2394_v27  ;;  %v2396_v6 = vmul.f32 %v4249_v53, %v4249_v53 }
 0xb79   :  { %v4253_v35 = vpop.f32.mrf.mxu1 }
 0xb7a   :  { %2411 = vadd.xlane.f32.xlu0 %v2410_v33  ;;  %v2368_v20 = vadd.f32 %v4253_v35, %v4249_v53  ;;  %v2397_v1 = vmul.f32 %v4253_v35, %v4253_v35 }
 0xb7b   :  { %v4255_v5 = vpop.f32.mrf.mxu1 }
 0xb7c   :  { %2414 = vadd.xlane.f32.xlu1 %v2413_v46  ;;  %v2398_v61 = vmul.f32 %v4255_v5, %v4255_v5  ;;  %v2416_v0 = vadd.f32 %v2397_v1, %v2396_v6 }
 0xb7d   :  { %v4261_v10 = vpop.f32.mrf.mxu1 }
 0xb7e   :  { %v2371_v50 = vadd.f32 %v4261_v10, %v4255_v5  ;;  %v2399_v11 = vmul.f32 %v4261_v10, %v4261_v10  ;;  %2369 = vadd.xlane.f32.xlu0 %v2368_v20 }
 0xb7f   :  { %v4269_v34 = vpop.f32.mrf.mxu1 }
 0xb80   :  { %2372 = vadd.xlane.f32.xlu1 %v2371_v50  ;;  %v2419_v17 = vadd.f32 %v2399_v11, %v2398_v61  ;;  %v2400_v59 = vmul.f32 %v4269_v34, %v4269_v34 }
 0xb81   :  { %v4273_v28 = vpop.f32.mrf.mxu1 }
 0xb82   :  { %2417 = vadd.xlane.f32.xlu0 %v2416_v0  ;;  %v2374_v4 = vadd.f32 %v4273_v28, %v4269_v34  ;;  %v2401_v45 = vmul.f32 %v4273_v28, %v4273_v28 }
 0xb83   :  { %v4275_v56 = vpop.f32.mrf.mxu1 }
 0xb84   :  { %2420 = vadd.xlane.f32.xlu1 %v2419_v17  ;;  %v2402_v25 = vmul.f32 %v4275_v56, %v4275_v56  ;;  %v2422_v15 = vadd.f32 %v2401_v45, %v2400_v59 }
 0xb85   :  { %v4281_v55 = vpop.f32.mrf.mxu1 }
 0xb86   :  { %v2377_v48 = vadd.f32 %v4281_v55, %v4275_v56  ;;  %v2403_v29 = vmul.f32 %v4281_v55, %v4281_v55  ;;  %2375 = vadd.xlane.f32.xlu0 %v2374_v4 }
 0xb88   :  { %2378 = vadd.xlane.f32.xlu1 %v2377_v48  ;;  %v2425_v41 = vadd.f32 %v2403_v29, %v2402_v25 }
 0xb8a   :  { %2423 = vadd.xlane.f32.xlu0 %v2422_v15 }
 0xb8c   :  { %2426 = vadd.xlane.f32.xlu1 %v2425_v41 }
 0xbf5   :  { %v2358_v58 = vpop.xlane.xlu1 %2357 }
 0xbf6   :  { %v2380_v8 = vmul.f32 0.00390625, %v2358_v58 }
 0xbf7   :  { %v2406_v24 = vpop.xlane.xlu0 %2405 }
 0xbf8   :  { %v2436_v9 = vmul.f32 %v2380_v8, %v2380_v8  ;;  %v2428_v14 = vmul.f32 0.00390625, %v2406_v24 }
 0xbfa   :  { %v2444_v32 = vsub.f32 %v2428_v14, %v2436_v9 }
 0xbfb   :  { %v2409_v40 = vpop.xlane.xlu1 %2408  ;;  %v2361_v23 = vpop.xlane.xlu0 %2360 }
 0xbfc   :  { %v2452_v44 = vmax.f32 %v2444_v32, 0.0  ;;  %v2381_v42 = vmul.f32 0.00390625, %v2361_v23  ;;  %v2429_v43 = vmul.f32 0.00390625, %v2409_v40 }
 0xbfe   :  { %v2460_v26 = vadd.f32 1e-05, %v2452_v44  ;;  %v2437_v12 = vmul.f32 %v2381_v42, %v2381_v42 }
 0xbff   :  { %v2364_v62 = vpop.xlane.xlu0 %2363 }
 0xc00   :  { %2940 = vrsqrt.f32 %v2460_v26  ;;  %v2445_v2 = vsub.f32 %v2429_v43, %v2437_v12  ;;  %v4291_v3 = vmul.f32 0.00390625, %v2364_v62 }
 0xc01   :  { %v2367_v63 = vpop.xlane.xlu1 %2366 }
 0xc02   :  { %v2453_v19 = vmax.f32 %v2445_v2, 0.0  ;;  %v4293_v38 = vmul.f32 0.00390625, %v2367_v63  ;;  %v2438_v33 = vmul.f32 %v4291_v3, %v4291_v3 }
 0xc03   :  { %v2412_v16 = vpop.xlane.xlu0 %2411 }
 0xc04   :  { %v2461_v27 = vadd.f32 1e-05, %v2453_v19  ;;  %v2430_v46 = vmul.f32 0.00390625, %v2412_v16  ;;  %v2439_v1 = vmul.f32 %v4293_v38, %v4293_v38 }
 0xc05   :  { %v2415_v20 = vpop.xlane.xlu1 %2414 }
 0xc06   :  { %2942 = vrsqrt.f32 %v2461_v27  ;;  %v2446_v6 = vsub.f32 %v2430_v46, %v2438_v33  ;;  %v2431_v50 = vmul.f32 0.00390625, %v2415_v20 }
 0xc07   :  { %v2370_v11 = vpop.xlane.xlu0 %2369 }
 0xc08   :  { %v2454_v61 = vmax.f32 %v2446_v6, 0.0  ;;  %v2447_v0 = vsub.f32 %v2431_v50, %v2439_v1  ;;  %v2384_v17 = vmul.f32 0.00390625, %v2370_v11 }
 0xc09   :  { %v2373_v4 = vpop.xlane.xlu1 %2372 }
 0xc0a   :  { %v2462_v45 = vadd.f32 1e-05, %v2454_v61  ;;  %v2455_v59 = vmax.f32 %v2447_v0, 0.0  ;;  %v2385_v48 = vmul.f32 0.00390625, %v2373_v4  ;;  %v2440_v15 = vmul.f32 %v2384_v17, %v2384_v17 }
 0xc0b   :  { %v2418_v29 = vpop.xlane.xlu0 %2417 }
 0xc0c   :  { %2944 = vrsqrt.f32 %v2462_v45  ;;  %v2463_v25 = vadd.f32 1e-05, %v2455_v59  ;;  %v2432_v41 = vmul.f32 0.00390625, %v2418_v29  ;;  %v2441_v58 = vmul.f32 %v2385_v48, %v2385_v48 }
 0xc0d   :  { %v2941_v54 = vpop.eup %2940  ;;  %v2421_v24 = vpop.xlane.xlu1 %2420 }
 0xc0e   :  { %2946 = vrsqrt.f32 %v2463_v25  ;;  %v2448_v9 = vsub.f32 %v2432_v41, %v2440_v15  ;;  %v2433_v14 = vmul.f32 0.00390625, %v2421_v24  ;;  %v2476_v32 = vmul.f32 %v4086_v51, %v2941_v54 }
 0xc0f   :  { %v2376_v40 = vpop.xlane.xlu0 %2375 }
 0xc10   :  { %v2456_v23 = vmax.f32 %v2448_v9, 0.0  ;;  %v2449_v44 = vsub.f32 %v2433_v14, %v2441_v58  ;;  %v2484_v26 = vmul.f32 %v2476_v32, %v2380_v8  ;;  %v2386_v43 = vmul.f32 0.00390625, %v2376_v40 }
 0xc11   :  { %v2379_v12 = vpop.xlane.xlu1 %2378 }
 0xc12   :  { %v2464_v62 = vadd.f32 1e-05, %v2456_v23  ;;  %v2457_v2 = vmax.f32 %v2449_v44, 0.0  ;;  %v2387_v63 = vmul.f32 0.00390625, %v2379_v12  ;;  %2500 = vrot.lane.b32.xlu0 %v2484_v26, %s2976_s0  ;;  %v2442_v46 = vmul.f32 %v2386_v43, %v2386_v43 }
 0xc13   :  { %v2943_v19 = vpop.eup %2942  ;;  %v2424_v16 = vpop.xlane.xlu0 %2423 }
 0xc14   :  { %v2477_v27 = vmul.f32 %v4093_v13, %v2943_v19  ;;  %2948 = vrsqrt.f32 %v2464_v62  ;;  %v2465_v33 = vadd.f32 1e-05, %v2457_v2  ;;  %v2434_v20 = vmul.f32 0.00390625, %v2424_v16 }
 0xc15   :  { %v2427_v1 = vpop.xlane.xlu1 %2426  ;;  %v2443_v50 = vmul.f32 %v2387_v63, %v2387_v63 }
 0xc16   :  { %v2485_v6 = vmul.f32 %v2477_v27, %v2381_v42  ;;  %2950 = vrsqrt.f32 %v2465_v33  ;;  %v2435_v8 = vmul.f32 0.00390625, %v2427_v1  ;;  %v2450_v11 = vsub.f32 %v2434_v20, %v2442_v46 }
 0xc18   :  { %v2451_v61 = vsub.f32 %v2435_v8, %v2443_v50  ;;  %2502 = vrot.lane.b32.xlu1 %v2485_v6, %s2976_s0  ;;  %v2458_v4 = vmax.f32 %v2450_v11, 0.0 }
 0xc19   :  { %v2945_v0 = vpop.eup %2944 }
 0xc1a   :  { %v2459_v45 = vmax.f32 %v2451_v61, 0.0  ;;  %v2478_v59 = vmul.f32 %v4067_v18, %v2945_v0  ;;  %v2466_v25 = vadd.f32 1e-05, %v2458_v4 }
 0xc1b   :  { %v2947_v29 = vpop.eup %2946 }
 0xc1c   :  { %v2467_v15 = vadd.f32 1e-05, %v2459_v45  ;;  %v2486_v41 = vmul.f32 %v2478_v59, %v4291_v3  ;;  %v2479_v54 = vmul.f32 %v4077_v49, %v2947_v29  ;;  %2952 = vrsqrt.f32 %v2466_v25 }
 0xc1e   :  { %2954 = vrsqrt.f32 %v2467_v15  ;;  %2504 = vrot.lane.b32.xlu1 %v2486_v41, %s2976_s0  ;;  %v2487_v42 = vmul.f32 %v2479_v54, %v4293_v38 }
 0xc20   :  { %2506 = vrot.lane.b32.xlu0 %v2487_v42, %s2976_s0 }
 0xc21   :  { %v2949_v58 = vpop.eup %2948 }
 0xc22   :  { %v2480_v24 = vmul.f32 %v4039_v47, %v2949_v58 }
 0xc23   :  { %v2951_v9 = vpop.eup %2950 }
 0xc24   :  { %v2488_v14 = vmul.f32 %v2480_v24, %v2384_v17  ;;  %v2481_v40 = vmul.f32 %v4052_v7, %v2951_v9  ;;  %v2985_v17 = vmov 9  }
 0xc26   :  { %2508 = vrot.lane.b32.xlu1 %v2488_v14, %s2976_s0  ;;  %v2489_v3 = vmul.f32 %v2481_v40, %v2385_v48 }
 0xc28   :  { %2510 = vrot.lane.b32.xlu0 %v2489_v3, %s2976_s0 }
 0xc29   :  { %v2953_v23 = vpop.eup %2952 }
 0xc2a   :  { %v2482_v26 = vmul.f32 %v4004_v52, %v2953_v23 }
 0xc2b   :  { %v2955_v44 = vpop.eup %2954 }
 0xc2c   :  { %v2483_v38 = vmul.f32 %v4023_v22, %v2955_v44  ;;  %v2490_v12 = vmul.f32 %v2482_v26, %v2386_v43 }
 0xc2e   :  { %v2491_v62 = vmul.f32 %v2483_v38, %v2387_v63  ;;  %2512 = vrot.lane.b32.xlu1 %v2490_v12, %s2976_s0 }
 0xc30   :  { %2514 = vrot.lane.b32.xlu0 %v2491_v62, %s2976_s0 }
 0xc32   :  { %2534 = vperm.xlu1 %2836, %v2476_v32  }
 0xc34   :  { %2539 = vperm.xlu0 %2837, %v2477_v27  }
 0xc36   :  { %2544 = vperm.xlu1 %2836, %v2478_v59  }
 0xc38   :  { %2554 = vperm.xlu0 %2837, %v2480_v24  }
 0xc3a   :  { %2549 = vperm.xlu1 %2836, %v2479_v54  }
 0xc3c   :  { %2564 = vperm.xlu0 %2837, %v2482_v26  }
 0xc3e   :  { %2559 = vperm.xlu1 %2836, %v2481_v40  }
 0xc40   :  { %2838 = vset.pattern.permute.xlu0 %v2985_v17 }
 0xc42   :  { %2569 = vperm.xlu1 %2836, %v2483_v38  }
 0xc46   :  { %2839 = vset.pattern.permute.xlu1 %v2985_v17 }
 0xc84   :  { %v2501_v48 = vpop.permute.xlu0 %2500 }
 0xc85   :  { %v2524_v2 = vsub.f32 %v4086_v51, %v2501_v48 }
 0xc87   :  { %2590 = vperm.xlu0 %2838, %v2524_v2  }
 0xc8a   :  { %v2503_v43 = vpop.permute.xlu1 %2502 }
 0xc8b   :  { %v2525_v63 = vsub.f32 %v4093_v13, %v2503_v43 }
 0xc8d   :  { %2595 = vperm.xlu1 %2839, %v2525_v63  }
 0xc90   :  { %v2505_v19 = vpop.permute.xlu1 %2504 }
 0xc91   :  { %v2526_v32 = vsub.f32 %v4067_v18, %v2505_v19 }
 0xc92   :  { %v2507_v16 = vpop.permute.xlu0 %2506 }
 0xc93   :  { %v2527_v27 = vsub.f32 %v4077_v49, %v2507_v16  ;;  %2600 = vperm.xlu1 %2839, %v2526_v32  }
 0xc95   :  { %2605 = vperm.xlu0 %2838, %v2527_v27  }
 0xc98   :  { %v2509_v33 = vpop.permute.xlu1 %2508 }
 0xc99   :  { %v2528_v46 = vsub.f32 %v4039_v47, %v2509_v33 }
 0xc9a   :  { %v2511_v20 = vpop.permute.xlu0 %2510 }
 0xc9b   :  { %v2529_v1 = vsub.f32 %v4052_v7, %v2511_v20  ;;  %2610 = vperm.xlu1 %2839, %v2528_v46  }
 0xc9d   :  { %2615 = vperm.xlu0 %2838, %v2529_v1  }
 0xca0   :  { %v2513_v51 = vpop.permute.xlu1 %2512 }
 0xca1   :  { %v2530_v13 = vsub.f32 %v4004_v52, %v2513_v51 }
 0xca2   :  { %v2515_v6 = vpop.permute.xlu0 %2514 }
 0xca3   :  { %v2531_v50 = vsub.f32 %v4023_v22, %v2515_v6  ;;  %2620 = vperm.xlu1 %2839, %v2530_v13  }
 0xca5   :  { %2625 = vperm.xlu0 %2838, %v2531_v50  }
 0xcad   :  { %v2535_v18 = vpop.permute.xlu1 %2534 }
 0xcae   :  { %v2572_v4 = vmul.f32 %v2535_v18, %v4211_v57  ;;  %v2573_v7 = vmul.f32 %v2535_v18, %v4213_v36 }
 0xcaf   :  { %v2540_v49 = vpop.permute.xlu0 %2539 }
 0xcb0   :  { %v2574_v22 = vmul.f32 %v2540_v49, %v4221_v21  ;;  %v2575_v41 = vmul.f32 %v2540_v49, %v4223_v30 }
 0xcb1   :  { %v2545_v8 = vpop.permute.xlu1 %2544 }
 0xcb2   :  { %v2576_v57 = vmul.f32 %v2545_v8, %v4229_v60  ;;  %v2577_v14 = vmul.f32 %v2545_v8, %v4233_v39 }
 0xcb3   :  { %v2555_v11 = vpop.permute.xlu0 %2554 }
 0xcb4   :  { %v2580_v62 = vmul.f32 %v2555_v11, %v4249_v53  ;;  %v2581_v48 = vmul.f32 %v2555_v11, %v4253_v35 }
 0xcb5   :  { %v2550_v61 = vpop.permute.xlu1 %2549 }
 0xcb6   :  { %v2578_v40 = vmul.f32 %v2550_v61, %v4235_v37  ;;  %v2579_v30 = vmul.f32 %v2550_v61, %v4241_v31 }
 0xcb7   :  { %v2565_v0 = vpop.permute.xlu0 %2564 }
 0xcb8   :  { %v2584_v33 = vmul.f32 %v2565_v0, %v4269_v34  ;;  %v2585_v20 = vmul.f32 %v2565_v0, %v4273_v28 }
 0xcb9   :  { %v2560_v47 = vpop.permute.xlu1 %2559 }
 0xcba   :  { %v2582_v39 = vmul.f32 %v2560_v47, %v4255_v5  ;;  %v2583_v31 = vmul.f32 %v2560_v47, %v4261_v10 }
 0xcbd   :  { %v2570_v52 = vpop.permute.xlu1 %2569 }
 0xcbe   :  { %v2586_v35 = vmul.f32 %v2570_v52, %v4275_v56  ;;  %v2587_v51 = vmul.f32 %v2570_v52, %v4281_v55 }
 0xd02   :  { %v2591_v45 = vpop.permute.xlu0 %2590 }
 0xd03   :  { %v2628_v59 = vadd.f32 %v2591_v45, %v2572_v4  ;;  %v2629_v29 = vadd.f32 %v2591_v45, %v2573_v7 }
 0xd05   :  { %v2644_v25 = vmax.f32 %v2628_v59, 0.0  ;;  %v2645_v15 = vmax.f32 %v2629_v29, 0.0 }
 0xd07   :  { %2693 = vmax.xlane.f32.xlu0 %v2645_v15  ;;  %2660 = vmax.xlane.f32.xlu1 %v2644_v25 }
 0xd08   :  { %v2596_v54 = vpop.permute.xlu1 %2595 }
 0xd09   :  { %v2630_v42 = vadd.f32 %v2596_v54, %v2574_v22  ;;  %v2631_v58 = vadd.f32 %v2596_v54, %v2575_v41 }
 0xd0b   :  { %v2646_v24 = vmax.f32 %v2630_v42, 0.0  ;;  %v2647_v9 = vmax.f32 %v2631_v58, 0.0 }
 0xd0d   :  { %2695 = vmax.xlane.f32.xlu1 %v2647_v9  ;;  %2662 = vmax.xlane.f32.xlu0 %v2646_v24 }
 0xd0e   :  { %v2601_v36 = vpop.permute.xlu1 %2600 }
 0xd0f   :  { %v2632_v3 = vadd.f32 %v2601_v36, %v2576_v57  ;;  %v2633_v23 = vadd.f32 %v2601_v36, %v2577_v14 }
 0xd10   :  { %v2606_v21 = vpop.permute.xlu0 %2605 }
 0xd11   :  { %v2648_v44 = vmax.f32 %v2632_v3, 0.0  ;;  %v2634_v26 = vadd.f32 %v2606_v21, %v2578_v40  ;;  %v2635_v38 = vadd.f32 %v2606_v21, %v2579_v30  ;;  %v2649_v60 = vmax.f32 %v2633_v23, 0.0 }
 0xd13   :  { %v2650_v12 = vmax.f32 %v2634_v26, 0.0  ;;  %2664 = vmax.xlane.f32.xlu0 %v2648_v44  ;;  %v2651_v37 = vmax.f32 %v2635_v38, 0.0 }
 0xd15   :  { %2666 = vmax.xlane.f32.xlu1 %v2650_v12 }
 0xd16   :  { %v2611_v17 = vpop.permute.xlu1 %2610 }
 0xd17   :  { %v2636_v2 = vadd.f32 %v2611_v17, %v2580_v62  ;;  %2697 = vmax.xlane.f32.xlu0 %v2649_v60  ;;  %v2637_v63 = vadd.f32 %v2611_v17, %v2581_v48 }
 0xd18   :  { %v2616_v43 = vpop.permute.xlu0 %2615 }
 0xd19   :  { %v2652_v19 = vmax.f32 %v2636_v2, 0.0  ;;  %v2638_v32 = vadd.f32 %v2616_v43, %v2582_v39  ;;  %2699 = vmax.xlane.f32.xlu1 %v2651_v37  ;;  %v2639_v16 = vadd.f32 %v2616_v43, %v2583_v31  ;;  %v2653_v53 = vmax.f32 %v2637_v63, 0.0 }
 0xd1b   :  { %v2654_v27 = vmax.f32 %v2638_v32, 0.0  ;;  %2668 = vmax.xlane.f32.xlu0 %v2652_v19  ;;  %v2655_v5 = vmax.f32 %v2639_v16, 0.0 }
 0xd1d   :  { %2670 = vmax.xlane.f32.xlu1 %v2654_v27 }
 0xd1e   :  { %v2621_v46 = vpop.permute.xlu1 %2620 }
 0xd1f   :  { %2701 = vmax.xlane.f32.xlu0 %v2653_v53  ;;  %v2640_v1 = vadd.f32 %v2621_v46, %v2584_v33  ;;  %v2641_v6 = vadd.f32 %v2621_v46, %v2585_v20 }
 0xd20   :  { %v2626_v10 = vpop.permute.xlu0 %2625 }
 0xd21   :  { %v2642_v13 = vadd.f32 %v2626_v10, %v2586_v35  ;;  %2703 = vmax.xlane.f32.xlu1 %v2655_v5  ;;  %v2656_v50 = vmax.f32 %v2640_v1, 0.0  ;;  %v2643_v18 = vadd.f32 %v2626_v10, %v2587_v51  ;;  %v2657_v34 = vmax.f32 %v2641_v6, 0.0 }
 0xd23   :  { %v2658_v49 = vmax.f32 %v2642_v13, 0.0  ;;  %2672 = vmax.xlane.f32.xlu0 %v2656_v50  ;;  %v2659_v8 = vmax.f32 %v2643_v18, 0.0 }
 0xd25   :  { %2674 = vmax.xlane.f32.xlu1 %v2658_v49 }
 0xd27   :  { %2705 = vmax.xlane.f32.xlu0 %v2657_v34 }
 0xd29   :  { %2707 = vmax.xlane.f32.xlu1 %v2659_v8 }
 0xd90   :  { %v2694_v56 = vpop.xlane.xlu0 %2693  ;;  %v2661_v11 = vpop.xlane.xlu1 %2660 }
 0xd91   :  { %v2709_v28 = vmul.f32 2.0, %v2694_v56  ;;  %v2676_v61 = vmul.f32 2.0, %v2661_v11 }
 0xd93   :  { %2685 = vst.msk [vmem:[%s4408_s3] sm:$0xff] %vm2684_vm1, %v2676_v61 }
 0xd94   :  { %2718 = vst.msk [vmem:[%s4408_s3] sm:$0xff] %vm2717_vm2, %v2709_v28 }
 0xd96   :  { %v2663_v55 = vpop.xlane.xlu0 %2662  ;;  %v2696_v0 = vpop.xlane.xlu1 %2695 }
 0xd97   :  { %v2677_v47 = vmul.f32 2.0, %v2663_v55  ;;  %v2710_v4 = vmul.f32 2.0, %v2696_v0 }
 0xd99   :  { %2686 = vst.msk [vmem:[%s4408_s3 + $0x8] sm:$0xff] %vm2684_vm1, %v2677_v47 }
 0xd9a   :  { %2719 = vst.msk [vmem:[%s4408_s3 + $0x8] sm:$0xff] %vm2717_vm2, %v2710_v4 }
 0xd9c   :  { %v2665_v7 = vpop.xlane.xlu0 %2664 }
 0xd9d   :  { %v2678_v45 = vmul.f32 2.0, %v2665_v7 }
 0xd9e   :  { %v2667_v59 = vpop.xlane.xlu1 %2666 }
 0xd9f   :  { %2687 = vst.msk [vmem:[%s4408_s3 + $0x10] sm:$0xff] %vm2684_vm1, %v2678_v45  ;;  %v2679_v29 = vmul.f32 2.0, %v2667_v59 }
 0xda0   :  { %v2698_v52 = vpop.xlane.xlu0 %2697 }
 0xda1   :  { %2688 = vst.msk [vmem:[%s4408_s3 + $0x18] sm:$0xff] %vm2684_vm1, %v2679_v29  ;;  %v2711_v25 = vmul.f32 2.0, %v2698_v52 }
 0xda2   :  { %v2700_v15 = vpop.xlane.xlu1 %2699 }
 0xda3   :  { %2720 = vst.msk [vmem:[%s4408_s3 + $0x10] sm:$0xff] %vm2717_vm2, %v2711_v25  ;;  %v2712_v22 = vmul.f32 2.0, %v2700_v15 }
 0xda4   :  { %v2669_v41 = vpop.xlane.xlu0 %2668 }
 0xda5   :  { %2721 = vst.msk [vmem:[%s4408_s3 + $0x18] sm:$0xff] %vm2717_vm2, %v2712_v22  ;;  %v2680_v54 = vmul.f32 2.0, %v2669_v41 }
 0xda6   :  { %v2671_v42 = vpop.xlane.xlu1 %2670 }
 0xda7   :  { %2689 = vst.msk [vmem:[%s4408_s3 + $0x20] sm:$0xff] %vm2684_vm1, %v2680_v54  ;;  %v2681_v58 = vmul.f32 2.0, %v2671_v42 }
 0xda8   :  { %v2702_v24 = vpop.xlane.xlu0 %2701 }
 0xda9   :  { %2690 = vst.msk [vmem:[%s4408_s3 + $0x28] sm:$0xff] %vm2684_vm1, %v2681_v58  ;;  %v2713_v9 = vmul.f32 2.0, %v2702_v24 }
 0xdaa   :  { %v2704_v57 = vpop.xlane.xlu1 %2703 }
 0xdab   :  { %2722 = vst.msk [vmem:[%s4408_s3 + $0x20] sm:$0xff] %vm2717_vm2, %v2713_v9  ;;  %v2714_v36 = vmul.f32 2.0, %v2704_v57 }
 0xdac   :  { %v2673_v14 = vpop.xlane.xlu0 %2672 }
 0xdad   :  { %2723 = vst.msk [vmem:[%s4408_s3 + $0x28] sm:$0xff] %vm2717_vm2, %v2714_v36  ;;  %v2682_v40 = vmul.f32 2.0, %v2673_v14 }
 0xdae   :  { %v2675_v3 = vpop.xlane.xlu1 %2674 }
 0xdaf   :  { %v2683_v21 = vmul.f32 2.0, %v2675_v3  ;;  %2691 = vst.msk [vmem:[%s4408_s3 + $0x30] sm:$0xff] %vm2684_vm1, %v2682_v40 }
 0xdb0   :  { %v2706_v30 = vpop.xlane.xlu0 %2705 }
 0xdb1   :  { %2692 = vst.msk [vmem:[%s4408_s3 + $0x38] sm:$0xff] %vm2684_vm1, %v2683_v21  ;;  %v2715_v23 = vmul.f32 2.0, %v2706_v30 }
 0xdb2   :  { %v2708_v44 = vpop.xlane.xlu1 %2707 }
 0xdb3   :  { %v2716_v26 = vmul.f32 2.0, %v2708_v44  ;;  %2724 = vst.msk [vmem:[%s4408_s3 + $0x30] sm:$0xff] %vm2717_vm2, %v2715_v23 }
 0xdb5   :  { %2725 = vst.msk [vmem:[%s4408_s3 + $0x38] sm:$0xff] %vm2717_vm2, %v2716_v26 }

// kernel: dcp_forward.5
= control target key start
LH: loop header
LB: loop body
LE: loop exit
PB: predicated region body
PF: predicated region fallthrough
CT: control target
= control target key end

     0   :  { %v3939_v0 = vmov 11   ;;  %v5602_v1 = vmov 10   ;;  %v3941_v5 = vmov 12   ;;  %v39_v11 = vlaneseq  ;;  %s3956_s17 = smov 80   ;;  %s3957_s18 = smov 72   ;;  %s5592_s4 = inlined_call_operand.vmem [shape: f32[128,13], index: 4, kind: input, shape index: {}]   ;;  %s5593_s2 = inlined_call_operand.vmem [shape: f32[3,256], index: 2, kind: input, shape index: {}]   ;;  %s5594_s0 = inlined_call_operand.vmem [shape: f32[9,256], index: 0, kind: input, shape index: {}]   ;;  %s5595_s1 = inlined_call_operand.vmem [shape: f32[3,256], index: 1, kind: input, shape index: {}]   ;;  %s5596_s3 = inlined_call_operand.vmem [shape: bf16[320,128], index: 3, kind: input, shape index: {}]   ;;  %s5597_s5 = inlined_call_operand.vmem [shape: f32[64,2], index: 5, kind: input, shape index: {}]   ;;  %s5598_s6 = inlined_call_operand.vmem [shape: f32[32,256], index: 6, kind: input, shape index: {}]   ;;  %s5599_s7 = inlined_call_operand.vmem [shape: f32[32,11], index: 7, kind: input, shape index: {}]   ;;  %s5600_s9 = inlined_call_operand.vmem [shape: f32[3,2], index: 9, kind: output, shape index: {1}]   ;;  %s5601_s8 = inlined_call_operand.vmem [shape: f32[4,2], index: 8, kind: output, shape index: {0}]  }
   0x1   :  { %3719 = vset.pattern.permute.xlu1 %v3939_v0  ;;  %3718 = vset.pattern.permute.xlu0 %v5602_v1  ;;  %v4012_v2 = vld [vmem:[%s5592_s4 + $0x30] sm:$0xff]  ;;  %v4019_v3 = vld [vmem:[%s5592_s4 + $0x38] sm:$0xff]  ;;  %v4026_v4 = vld [vmem:[%s5592_s4 + $0x28] sm:$0xff]  ;;  %vm734_vm0 = vcmask 523264   ;;  %vm2825_vm1 = vcmask 15360   ;;  %vm2775_vm2 = vcmask 7168  }
   0x2   :  { %283 = vperm.xlu1 %3719, %v4012_v2   ;;  %226 = vperm.xlu0 %3718, %v4012_v2   ;;  %v4033_v6 = vld [vmem:[%s5592_s4 + $0x18] sm:$0xff]  ;;  %v4038_v7 = vld [vmem:[%s5592_s4 + $0x20] sm:$0xff]  ;;  %v4045_v8 = vld [vmem:[%s5592_s4 + $0x8] sm:$0xff]  ;;  %v40_v12 = vshrl.u32 %v39_v11, 7  ;;  %vm2808_vm3 = vcmask 15368   ;;  %vm3109_vm4 = vcmask 261120  }
   0x3   :  { %v4057_v9 = vld [vmem:[%s5592_s4 + $0x10] sm:$0xff]  ;;  %v4063_v10 = vld [vmem:[%s5592_s4] sm:$0xff]  ;;  %v34_v23 = vld [vmem:[%s5594_s0 + $0x8] sm:$0xff]  ;;  %vm3954_vm5 = vmmov 0   ;;  %vm3265_vm6 = vcmask 130048   ;;  %vm3378_vm7 = vcmask 64512  }
   0x4   :  { %v53_v13 = vsub.s32 1, %v40_v12  ;;  %v57_v14 = vsub.s32 5, %v40_v12  ;;  %v32_v15 = vld [vmem:[%s5593_s2] sm:$0x77]  ;;  %v41_v16 = vsub.s32 0, %v40_v12  ;;  %v45_v17 = vsub.s32 4, %v40_v12 }
   0x5   :  { %v73_v18 = vsub.s32 2, %v40_v12  ;;  %v77_v19 = vsub.s32 6, %v40_v12  ;;  %v33_v22 = vld [vmem:[%s5594_s0] sm:$0xff]  ;;  %v35_v30 = vld [vmem:[%s5594_s0 + $0x10] sm:$0x1]  ;;  %v292_v57 = vsub.s32 3, %v40_v12 }
   0x6   :  { %287 = vperm.xlu1 %3719, %v4019_v3   ;;  %231 = vperm.xlu0 %3718, %v4019_v3   ;;  %v54_v20 = vrot.slane %v32_v15, %v53_v13  ;;  %v58_v21 = vrot.slane %v32_v15, %v57_v14  ;;  %v42_v24 = vrot.slane %v32_v15, %v41_v16  ;;  %v36_v31 = vld [vmem:[%s5594_s0 + $0x18] sm:$0x1]  ;;  %v37_v40 = vld [vmem:[%s5595_s1] sm:$0x77]  ;;  %s3943_s0 = smov 1   ;;  %vm3452_vm8 = vcmask 11264  }
   0x7   :  { %v46_v25 = vrot.slane %v32_v15, %v45_v17  ;;  %v74_v28 = vrot.slane %v32_v15, %v73_v18  ;;  %v78_v29 = vrot.slane %v32_v15, %v77_v19  ;;  %v107_v47 = vrot.slane %v37_v40, %v53_v13 }
   0x8   :  { %v61_v26 = vmul.f32 %v54_v20, %v33_v22  ;;  %v62_v27 = vmul.f32 %v58_v21, %v34_v23  ;;  %v49_v32 = vmul.f32 %v42_v24, %v33_v22  ;;  %v111_v48 = vrot.slane %v37_v40, %v57_v14 }
   0x9   :  { %v50_v33 = vmul.f32 %v46_v25, %v34_v23  ;;  %v81_v36 = vmul.f32 %v74_v28, %v33_v22  ;;  %v82_v37 = vmul.f32 %v78_v29, %v34_v23  ;;  %v116_v38 = vmul.f32 %v74_v28, %v35_v30 }
   0xa   :  { %3720 = vset.pattern.permute.xlu1 %v3941_v5  ;;  %221 = vperm.xlu0 %3718, %v4026_v4   ;;  %v65_v34 = vrot.slane %v61_v26, 1  ;;  %v66_v35 = vrot.slane %v62_v27, 1  ;;  %v117_v39 = vmul.f32 %v78_v29, %v36_v31  ;;  %v95_v51 = vrot.slane %v37_v40, %v41_v16 }
   0xb   :  { %359 = vperm.xlu1 %3720, %v4019_v3   ;;  %v85_v43 = vrot.slane %v81_v36, 2  ;;  %v86_v44 = vrot.slane %v82_v37, 2  ;;  %v120_v45 = vrot.slane %v116_v38, 2  ;;  %v99_v52 = vrot.slane %v37_v40, %v45_v17 }
   0xc   :  { %v69_v41 = vadd.f32 %v65_v34, %v49_v32  ;;  %v70_v42 = vadd.f32 %v66_v35, %v50_v33  ;;  %v121_v46 = vrot.slane %v117_v39, 2  ;;  %v129_v55 = vrot.slane %v37_v40, %v73_v18 }
   0xd   :  { %v133_v56 = vrot.slane %v37_v40, %v77_v19  ;;  %vm3549_vm9 = vcmask 10240  }
   0xe   :  { %211 = vperm.xlu0 %3718, %v4033_v6   ;;  %v89_v49 = vadd.f32 %v85_v43, %v69_v41  ;;  %v90_v50 = vadd.f32 %v86_v44, %v70_v42  ;;  %v124_v53 = vadd.f32 %v120_v45, %v69_v41  ;;  %v125_v54 = vadd.f32 %v121_v46, %v70_v42 }
   0xf   :  { %3721 = vset.pattern.permute.xlu1 %v5602_v1 }
  0x10   :  { %216 = vperm.xlu1 %3721, %v4038_v7   ;;  %v114_v59 = vadd.f32 %v107_v47, %v89_v49  ;;  %v115_v60 = vadd.f32 %v111_v48, %v90_v50  ;;  %v102_v62 = vadd.f32 %v95_v51, %v89_v49  ;;  %v103_v63 = vadd.f32 %v99_v52, %v90_v50 }
  0x12   :  { %201 = vperm.xlu0 %3718, %v4045_v8   ;;  %v4094_v11 = vrot.slane %v114_v59, %v292_v57  ;;  %v4096_v13 = vrot.slane %v115_v60, %v292_v57  ;;  %v4098_v14 = vrot.slane %v102_v62, %v41_v16  ;;  %v4100_v15 = vrot.slane %v103_v63, %v41_v16 }
  0x14   :  { %3722 = vset.pattern.permute.xlu1 %v3939_v0 }
  0x15   :  { %275 = vperm.xlu1 %3722, %v4038_v7  }
  0x16   :  { %3728 = vset.pattern.permute.xlu0 %v3941_v5 }
  0x17   :  { %355 = vperm.xlu0 %3728, %v4012_v2  }
  0x19   :  { %279 = vperm.xlu1 %3722, %v4026_v4  }
  0x1b   :  { %347 = vperm.xlu0 %3728, %v4038_v7  }
  0x1d   :  { %3723 = vset.pattern.permute.xlu1 %v3941_v5 }
  0x1e   :  { %351 = vperm.xlu1 %3723, %v4026_v4  }
  0x1f   :  { %339 = vperm.xlu0 %3728, %v4057_v9  }
  0x22   :  { %3724 = vset.pattern.permute.xlu1 %v5602_v1 }
  0x23   :  { %206 = vperm.xlu1 %3724, %v4057_v9   ;;  %331 = vperm.xlu0 %3728, %v4063_v10  }
  0x27   :  { %3725 = vset.pattern.permute.xlu1 %v3939_v0 }
  0x28   :  { %267 = vperm.xlu1 %3725, %v4057_v9  }
  0x2c   :  { %271 = vperm.xlu1 %3725, %v4033_v6  }
  0x30   :  { %3726 = vset.pattern.permute.xlu1 %v3941_v5 }
  0x31   :  { %343 = vperm.xlu1 %3726, %v4033_v6  }
  0x35   :  { %3727 = vset.pattern.permute.xlu1 %v5602_v1 }
  0x36   :  { %196 = vperm.xlu1 %3727, %v4063_v10  }
  0x3a   :  { %3729 = vset.pattern.permute.xlu1 %v3939_v0  ;;  %v136_v0 = vadd.f32 %v129_v55, %v124_v53 }
  0x3b   :  { %259 = vperm.xlu1 %3729, %v4063_v10  }
  0x3c   :  { %v4102_v20 = vrot.slane %v136_v0, %v77_v19 }
  0x3f   :  { %263 = vperm.xlu1 %3729, %v4045_v8  }
  0x43   :  { %3730 = vset.pattern.permute.xlu1 %v3941_v5  ;;  %v137_v5 = vadd.f32 %v133_v56, %v125_v54 }
  0x44   :  { %335 = vperm.xlu1 %3730, %v4045_v8  }
  0x45   :  { %v4104_v12 = vrot.slane %v137_v5, %v77_v19 }
  0x7d   :  { %v284_v58 = vpop.permute.xlu1 %283  ;;  %v227_v61 = vpop.permute.xlu0 %226 }
  0x7e   :  { %v310_v35 = vmul.f32 %v4094_v11, %v284_v58  ;;  %v311_v36 = vmul.f32 %v4096_v13, %v284_v58  ;;  %v254_v37 = vmul.f32 %v4098_v14, %v227_v61  ;;  %v255_v38 = vmul.f32 %v4100_v15, %v227_v61 }
  0x80   :  { %v326_v40 = vadd.f32 %v310_v35, %v254_v37  ;;  %v327_v41 = vadd.f32 %v311_v36, %v255_v38 }
  0x81   :  { %v288_v17 = vpop.permute.xlu1 %287  ;;  %v232_v18 = vpop.permute.xlu0 %231 }
  0x82   :  { %v312_v21 = vmul.f32 %v4094_v11, %v288_v17  ;;  %v313_v22 = vmul.f32 %v4096_v13, %v288_v17  ;;  %v256_v23 = vmul.f32 %v4098_v14, %v232_v18  ;;  %v257_v24 = vmul.f32 %v4100_v15, %v232_v18 }
  0x84   :  { %v328_v27 = vadd.f32 %v312_v21, %v256_v23  ;;  %v329_v28 = vadd.f32 %v313_v22, %v257_v24 }
  0x85   :  { %v222_v25 = vpop.permute.xlu0 %221 }
  0x86   :  { %v360_v26 = vpop.permute.xlu1 %359  ;;  %v252_v52 = vmul.f32 %v4098_v14, %v222_v25  ;;  %v253_v53 = vmul.f32 %v4100_v15, %v222_v25 }
  0x87   :  { %v384_v16 = vmul.f32 %v4102_v20, %v360_v26  ;;  %v385_v29 = vmul.f32 %v4104_v12, %v360_v26 }
  0x89   :  { %v4112_v30 = vadd.f32 %v384_v16, %v328_v27  ;;  %v4114_v19 = vadd.f32 %v385_v29, %v329_v28  ;;  %v4116_v31 = vpop.permute.xlu0 %211 }
  0x8b   :  { %v217_v32 = vpop.permute.xlu1 %216  ;;  %v423_v33 = vadd.f32 %v4114_v19, %v4112_v30 }
  0x8c   :  { %v250_v48 = vmul.f32 %v4098_v14, %v217_v32  ;;  %v251_v49 = vmul.f32 %v4100_v15, %v217_v32 }
  0x8d   :  { %424 = vadd.xlane.f32.xlu0 %v423_v33  ;;  %v4120_v34 = vpop.permute.xlu0 %201 }
  0x90   :  { %v276_v39 = vpop.permute.xlu1 %275 }
  0x91   :  { %v306_v43 = vmul.f32 %v4094_v11, %v276_v39  ;;  %v307_v44 = vmul.f32 %v4096_v13, %v276_v39 }
  0x92   :  { %v356_v42 = vpop.permute.xlu0 %355 }
  0x93   :  { %v382_v45 = vmul.f32 %v4102_v20, %v356_v42  ;;  %v383_v46 = vmul.f32 %v4104_v12, %v356_v42  ;;  %v322_v57 = vadd.f32 %v306_v43, %v250_v48  ;;  %v323_v58 = vadd.f32 %v307_v44, %v251_v49 }
  0x94   :  { %v280_v47 = vpop.permute.xlu1 %279 }
  0x95   :  { %v4132_v50 = vadd.f32 %v382_v45, %v326_v40  ;;  %v4134_v51 = vadd.f32 %v383_v46, %v327_v41  ;;  %v308_v54 = vmul.f32 %v4094_v11, %v280_v47  ;;  %v309_v55 = vmul.f32 %v4096_v13, %v280_v47 }
  0x96   :  { %v348_v56 = vpop.permute.xlu0 %347  ;;  %v248_v45 = vmul.f32 %v4098_v14, %v4116_v31  ;;  %v249_v46 = vmul.f32 %v4100_v15, %v4116_v31 }
  0x97   :  { %v378_v59 = vmul.f32 %v4102_v20, %v348_v56  ;;  %v379_v60 = vmul.f32 %v4104_v12, %v348_v56  ;;  %v420_v61 = vadd.f32 %v4134_v51, %v4132_v50  ;;  %v324_v5 = vadd.f32 %v308_v54, %v252_v52 }
  0x98   :  { %v325_v17 = vadd.f32 %v309_v55, %v253_v53 }
  0x99   :  { %v4144_v62 = vadd.f32 %v378_v59, %v322_v57  ;;  %v4146_v63 = vadd.f32 %v379_v60, %v323_v58  ;;  %v352_v0 = vpop.permute.xlu1 %351  ;;  %421 = vadd.xlane.f32.xlu1 %v420_v61 }
  0x9a   :  { %v380_v18 = vmul.f32 %v4102_v20, %v352_v0  ;;  %v381_v21 = vmul.f32 %v4104_v12, %v352_v0  ;;  %v340_v27 = vpop.permute.xlu0 %339 }
  0x9b   :  { %v414_v22 = vadd.f32 %v4146_v63, %v4144_v62  ;;  %v374_v16 = vmul.f32 %v4102_v20, %v340_v27  ;;  %v375_v29 = vmul.f32 %v4104_v12, %v340_v27 }
  0x9c   :  { %v4152_v23 = vadd.f32 %v380_v18, %v324_v5  ;;  %v4154_v24 = vadd.f32 %v381_v21, %v325_v17 }
  0x9d   :  { %415 = vadd.xlane.f32.xlu0 %v414_v22 }
  0x9e   :  { %v207_v25 = vpop.permute.xlu1 %206  ;;  %v417_v26 = vadd.f32 %v4154_v24, %v4152_v23  ;;  %v332_v58 = vpop.permute.xlu0 %331 }
  0x9f   :  { %v246_v32 = vmul.f32 %v4098_v14, %v207_v25  ;;  %v247_v33 = vmul.f32 %v4100_v15, %v207_v25  ;;  %v370_v5 = vmul.f32 %v4102_v20, %v332_v58  ;;  %v371_v17 = vmul.f32 %v4104_v12, %v332_v58 }
  0xa0   :  { %418 = vadd.xlane.f32.xlu1 %v417_v26 }
  0xa3   :  { %v268_v28 = vpop.permute.xlu1 %267 }
  0xa4   :  { %v302_v35 = vmul.f32 %v4094_v11, %v268_v28  ;;  %v303_v36 = vmul.f32 %v4096_v13, %v268_v28 }
  0xa6   :  { %v318_v37 = vadd.f32 %v302_v35, %v246_v32  ;;  %v319_v38 = vadd.f32 %v303_v36, %v247_v33  ;;  %v447_v32 = vmul.f32 %v4134_v51, %v4134_v51  ;;  %v244_v33 = vmul.f32 %v4098_v14, %v4120_v34 }
  0xa7   :  { %v272_v39 = vpop.permute.xlu1 %271  ;;  %v245_v35 = vmul.f32 %v4100_v15, %v4120_v34 }
  0xa8   :  { %v4164_v40 = vadd.f32 %v374_v16, %v318_v37  ;;  %v4166_v41 = vadd.f32 %v375_v29, %v319_v38  ;;  %v304_v42 = vmul.f32 %v4094_v11, %v272_v39  ;;  %v305_v43 = vmul.f32 %v4096_v13, %v272_v39 }
  0xa9   :  { %v446_v29 = vmul.f32 %v4132_v50, %v4132_v50 }
  0xaa   :  { %v408_v44 = vadd.f32 %v4166_v41, %v4164_v40  ;;  %v320_v48 = vadd.f32 %v304_v42, %v248_v45  ;;  %v321_v49 = vadd.f32 %v305_v43, %v249_v46  ;;  %v442_v42 = vmul.f32 %v4144_v62, %v4144_v62 }
  0xab   :  { %v468_v39 = vadd.f32 %v447_v32, %v446_v29  ;;  %v443_v43 = vmul.f32 %v4146_v63, %v4146_v63  ;;  %v438_v45 = vmul.f32 %v4164_v40, %v4164_v40  ;;  %v439_v46 = vmul.f32 %v4166_v41, %v4166_v41 }
  0xac   :  { %v344_v47 = vpop.permute.xlu1 %343  ;;  %409 = vadd.xlane.f32.xlu0 %v408_v44 }
  0xad   :  { %v376_v52 = vmul.f32 %v4102_v20, %v344_v47  ;;  %v377_v53 = vmul.f32 %v4104_v12, %v344_v47  ;;  %v462_v34 = vadd.f32 %v443_v43, %v442_v42 }
  0xaf   :  { %v4178_v54 = vadd.f32 %v376_v52, %v320_v48  ;;  %v4180_v55 = vadd.f32 %v377_v53, %v321_v49  ;;  %v444_v48 = vmul.f32 %v4152_v23, %v4152_v23  ;;  %v445_v49 = vmul.f32 %v4154_v24, %v4154_v24 }
  0xb0   :  { %v456_v52 = vadd.f32 %v439_v46, %v438_v45 }
  0xb1   :  { %v197_v56 = vpop.permute.xlu1 %196  ;;  %v411_v57 = vadd.f32 %v4180_v55, %v4178_v54  ;;  %v440_v58 = vmul.f32 %v4178_v54, %v4178_v54 }
  0xb2   :  { %v242_v31 = vmul.f32 %v4098_v14, %v197_v56  ;;  %v243_v60 = vmul.f32 %v4100_v15, %v197_v56 }
  0xb3   :  { %412 = vadd.xlane.f32.xlu1 %v411_v57  ;;  %v465_v57 = vadd.f32 %v445_v49, %v444_v48 }
  0xb6   :  { %v260_v59 = vpop.permute.xlu1 %259 }
  0xb7   :  { %v298_v61 = vmul.f32 %v4094_v11, %v260_v59  ;;  %v299_v0 = vmul.f32 %v4096_v13, %v260_v59  ;;  %v441_v59 = vmul.f32 %v4180_v55, %v4180_v55 }
  0xb9   :  { %v314_v18 = vadd.f32 %v298_v61, %v242_v31  ;;  %v315_v21 = vadd.f32 %v299_v0, %v243_v60  ;;  %v459_v60 = vadd.f32 %v441_v59, %v440_v58 }
  0xba   :  { %v264_v22 = vpop.permute.xlu1 %263 }
  0xbb   :  { %v4190_v25 = vadd.f32 %v370_v5, %v314_v18  ;;  %v4192_v26 = vadd.f32 %v371_v17, %v315_v21  ;;  %v300_v27 = vmul.f32 %v4094_v11, %v264_v22  ;;  %v301_v28 = vmul.f32 %v4096_v13, %v264_v22 }
  0xbc   :  { %v5612_v17 = vmov 0  }
  0xbd   :  { %v402_v16 = vadd.f32 %v4192_v26, %v4190_v25  ;;  %v316_v11 = vadd.f32 %v300_v27, %v244_v33  ;;  %v317_v37 = vadd.f32 %v301_v28, %v245_v35  ;;  %v434_v53 = vmul.f32 %v4190_v25, %v4190_v25  ;;  %3732 = vset.pattern.permute.xlu0 %v5612_v17 }
  0xbe   :  { %v435_v56 = vmul.f32 %v4192_v26, %v4192_v26  ;;  %3731 = vset.pattern.permute.xlu1 %v5612_v17  ;;  %779 = vmatprep.mubr.bf16.mxu0 %v5612_v17 }
  0xbf   :  { %v336_v36 = vpop.permute.xlu1 %335  ;;  %403 = vadd.xlane.f32.xlu0 %v402_v16  ;;  %1196 = vmatprep.mubr.bf16.mxu1 %v5612_v17 }
  0xc0   :  { %v372_v13 = vmul.f32 %v4102_v20, %v336_v36  ;;  %v373_v38 = vmul.f32 %v4104_v12, %v336_v36  ;;  %v448_v20 = vmul.f32 %v4112_v30, %v4112_v30  ;;  %v449_v12 = vmul.f32 %v4114_v19, %v4114_v19 }
  0xc1   :  { %v450_v31 = vadd.f32 %v435_v56, %v434_v53 }
  0xc2   :  { %v4212_v44 = vadd.f32 %v372_v13, %v316_v11  ;;  %v4214_v14 = vadd.f32 %v373_v38, %v317_v37  ;;  %v471_v47 = vadd.f32 %v449_v12, %v448_v20 }
  0xc3   :  { %469 = vadd.xlane.f32.xlu0 %v468_v39 }
  0xc4   :  { %v405_v15 = vadd.f32 %v4214_v14, %v4212_v44  ;;  %v436_v61 = vmul.f32 %v4212_v44, %v4212_v44  ;;  %v437_v0 = vmul.f32 %v4214_v14, %v4214_v14 }
  0xc6   :  { %406 = vadd.xlane.f32.xlu1 %v405_v15  ;;  %v453_v5 = vadd.f32 %v437_v0, %v436_v61 }
  0xc7   :  { %463 = vadd.xlane.f32.xlu0 %v462_v34 }
  0xca   :  { %472 = vadd.xlane.f32.xlu1 %v471_v47 }
  0xcb   :  { %457 = vadd.xlane.f32.xlu0 %v456_v52 }
  0xce   :  { %466 = vadd.xlane.f32.xlu1 %v465_v57 }
  0xcf   :  { %451 = vadd.xlane.f32.xlu0 %v450_v31 }
  0xd2   :  { %460 = vadd.xlane.f32.xlu1 %v459_v60 }
  0xd6   :  { %454 = vadd.xlane.f32.xlu1 %v453_v5 }
 0x116   :  { %v425_v18 = vpop.xlane.xlu0 %424 }
 0x117   :  { %v4252_v38 = vmul.f32 0.00390625, %v425_v18 }
 0x119   :  { %v489_v46 = vmul.f32 %v4252_v38, %v4252_v38 }
 0x122   :  { %v422_v22 = vpop.xlane.xlu1 %421 }
 0x123   :  { %v4246_v29 = vmul.f32 0.00390625, %v422_v22 }
 0x125   :  { %v488_v35 = vmul.f32 %v4246_v29, %v4246_v29 }
 0x126   :  { %v416_v21 = vpop.xlane.xlu0 %415 }
 0x127   :  { %v4250_v36 = vmul.f32 0.00390625, %v416_v21 }
 0x129   :  { %v419_v28 = vpop.xlane.xlu1 %418  ;;  %v486_v43 = vmul.f32 %v4250_v36, %v4250_v36 }
 0x12a   :  { %v4260_v47 = vmul.f32 0.00390625, %v419_v28 }
 0x12c   :  { %v487_v0 = vmul.f32 %v4260_v47, %v4260_v47 }
 0x135   :  { %v410_v27 = vpop.xlane.xlu0 %409 }
 0x136   :  { %v4254_v39 = vmul.f32 0.00390625, %v410_v27 }
 0x138   :  { %v484_v48 = vmul.f32 %v4254_v39, %v4254_v39 }
 0x13c   :  { %v413_v32 = vpop.xlane.xlu1 %412 }
 0x13d   :  { %v429_v59 = vmul.f32 0.00390625, %v413_v32 }
 0x148   :  { %v404_v16 = vpop.xlane.xlu0 %403 }
 0x149   :  { %v4264_v53 = vmul.f32 0.00390625, %v404_v16 }
 0x14b   :  { %v482_v22 = vmul.f32 %v4264_v53, %v4264_v53 }
 0x14c   :  { %v470_v33 = vpop.xlane.xlu0 %469 }
 0x14d   :  { %v480_v11 = vmul.f32 0.00390625, %v470_v33 }
 0x14f   :  { %v496_v37 = vsub.f32 %v480_v11, %v488_v35  ;;  %v407_v13 = vpop.xlane.xlu1 %406  ;;  %v485_v35 = vmul.f32 %v429_v59, %v429_v59 }
 0x150   :  { %v464_v42 = vpop.xlane.xlu0 %463 }
 0x151   :  { %v504_v15 = vmax.f32 %v496_v37, 0.0  ;;  %v478_v20 = vmul.f32 0.00390625, %v464_v42  ;;  %v427_v42 = vmul.f32 0.00390625, %v407_v13 }
 0x153   :  { %v512_v12 = vadd.f32 1e-05, %v504_v15  ;;  %v494_v34 = vsub.f32 %v478_v20, %v486_v43  ;;  %v473_v45 = vpop.xlane.xlu1 %472 }
 0x154   :  { %v481_v49 = vmul.f32 0.00390625, %v473_v45  ;;  %v458_v52 = vpop.xlane.xlu0 %457 }
 0x155   :  { %3809 = vrsqrt.f32 %v512_v12  ;;  %v502_v56 = vmax.f32 %v494_v34, 0.0  ;;  %v476_v57 = vmul.f32 0.00390625, %v458_v52 }
 0x156   :  { %v497_v58 = vsub.f32 %v481_v49, %v489_v46 }
 0x157   :  { %v510_v31 = vadd.f32 1e-05, %v502_v56  ;;  %v492_v60 = vsub.f32 %v476_v57, %v484_v48  ;;  %v467_v61 = vpop.xlane.xlu1 %466  ;;  %v483_v48 = vmul.f32 %v427_v42, %v427_v42 }
 0x158   :  { %v505_v5 = vmax.f32 %v497_v58, 0.0  ;;  %v479_v18 = vmul.f32 0.00390625, %v467_v61  ;;  %v452_v21 = vpop.xlane.xlu0 %451 }
 0x159   :  { %v500_v27 = vmax.f32 %v492_v60, 0.0  ;;  %v474_v28 = vmul.f32 0.00390625, %v452_v21  ;;  %3811 = vrsqrt.f32 %v510_v31 }
 0x15a   :  { %v513_v16 = vadd.f32 1e-05, %v505_v5  ;;  %v495_v33 = vsub.f32 %v479_v18, %v487_v0 }
 0x15b   :  { %v508_v11 = vadd.f32 1e-05, %v500_v27  ;;  %v490_v32 = vsub.f32 %v474_v28, %v482_v22  ;;  %v461_v37 = vpop.xlane.xlu1 %460 }
 0x15c   :  { %3813 = vrsqrt.f32 %v513_v16  ;;  %v503_v43 = vmax.f32 %v495_v33, 0.0  ;;  %v477_v15 = vmul.f32 0.00390625, %v461_v37 }
 0x15d   :  { %v498_v20 = vmax.f32 %v490_v32, 0.0  ;;  %3815 = vrsqrt.f32 %v508_v11 }
 0x15e   :  { %v511_v12 = vadd.f32 1e-05, %v503_v43  ;;  %v493_v34 = vsub.f32 %v477_v15, %v485_v35 }
 0x15f   :  { %v506_v45 = vadd.f32 1e-05, %v498_v20  ;;  %v455_v46 = vpop.xlane.xlu1 %454 }
 0x160   :  { %3817 = vrsqrt.f32 %v511_v12  ;;  %v501_v49 = vmax.f32 %v493_v34, 0.0  ;;  %v475_v52 = vmul.f32 0.00390625, %v455_v46 }
 0x161   :  { %3819 = vrsqrt.f32 %v506_v45 }
 0x162   :  { %v3810_v56 = vpop.eup %3809  ;;  %v509_v57 = vadd.f32 1e-05, %v501_v49  ;;  %v491_v58 = vsub.f32 %v475_v52, %v483_v48 }
 0x163   :  { %v528_v31 = vmul.f32 %v3810_v56, %v4012_v2 }
 0x164   :  { %3821 = vrsqrt.f32 %v509_v57  ;;  %v499_v13 = vmax.f32 %v491_v58, 0.0 }
 0x165   :  { %v536_v60 = vmul.f32 %v528_v31, %v4246_v29 }
 0x166   :  { %v507_v61 = vadd.f32 1e-05, %v499_v13  ;;  %v3812_v0 = vpop.eup %3811 }
 0x167   :  { %558 = vrot.lane.b32.xlu0 %v536_v60, %s3943_s0  ;;  %v526_v27 = vmul.f32 %v3812_v0, %v4038_v7 }
 0x168   :  { %3823 = vrsqrt.f32 %v507_v61 }
 0x169   :  { %v3814_v5 = vpop.eup %3813  ;;  %v534_v35 = vmul.f32 %v526_v27, %v4250_v36 }
 0x16a   :  { %v529_v18 = vmul.f32 %v3814_v5, %v4019_v3  ;;  %v3816_v21 = vpop.eup %3815 }
 0x16b   :  { %v524_v11 = vmul.f32 %v3816_v21, %v4057_v9 }
 0x16c   :  { %v537_v22 = vmul.f32 %v529_v18, %v4252_v38 }
 0x16d   :  { %v3818_v28 = vpop.eup %3817  ;;  %v532_v43 = vmul.f32 %v524_v11, %v4254_v39  ;;  %v5610_v39 = vmov 1  }
 0x16e   :  { %560 = vrot.lane.b32.xlu1 %v537_v22, %s3943_s0  ;;  %v527_v16 = vmul.f32 %v3818_v28, %v4026_v4  ;;  %v3820_v29 = vpop.eup %3819 }
 0x16f   :  { %v522_v15 = vmul.f32 %v3820_v29, %v4063_v10 }
 0x170   :  { %v535_v33 = vmul.f32 %v527_v16, %v4260_v47 }
 0x171   :  { %v3822_v32 = vpop.eup %3821  ;;  %v530_v12 = vmul.f32 %v522_v15, %v4264_v53 }
 0x172   :  { %556 = vrot.lane.b32.xlu0 %v535_v33, %s3943_s0  ;;  %554 = vrot.lane.b32.xlu1 %v534_v35, %s3943_s0  ;;  %v525_v38 = vmul.f32 %v3822_v32, %v4033_v6 }
 0x174   :  { %v533_v37 = vmul.f32 %v525_v38, %v429_v59 }
 0x175   :  { %v3824_v20 = vpop.eup %3823 }
 0x176   :  { %552 = vrot.lane.b32.xlu0 %v533_v37, %s3943_s0  ;;  %550 = vrot.lane.b32.xlu1 %v532_v43, %s3943_s0  ;;  %v523_v36 = vmul.f32 %v3824_v20, %v4045_v8 }
 0x178   :  { %v531_v47 = vmul.f32 %v523_v36, %v427_v42 }
 0x17a   :  { %548 = vrot.lane.b32.xlu0 %v531_v47, %s3943_s0  ;;  %546 = vrot.lane.b32.xlu1 %v530_v12, %s3943_s0 }
 0x17e   :  { %615 = vperm.xlu0 %3732, %v529_v18   ;;  %610 = vperm.xlu1 %3731, %v528_v31  }
 0x182   :  { %600 = vperm.xlu0 %3732, %v526_v27   ;;  %605 = vperm.xlu1 %3731, %v527_v16  }
 0x186   :  { %595 = vperm.xlu0 %3732, %v525_v38   ;;  %590 = vperm.xlu1 %3731, %v524_v11  }
 0x18a   :  { %3733 = vset.pattern.permute.xlu1 %v5610_v39  ;;  %3734 = vset.pattern.permute.xlu0 %v5610_v39 }
 0x1d9   :  { %v559_v59 = vpop.permute.xlu0 %558 }
 0x1da   :  { %v576_v42 = vsub.f32 %v4012_v2, %v559_v59 }
 0x1dc   :  { %666 = vperm.xlu1 %3733, %v576_v42  }
 0x1e0   :  { %v561_v53 = vpop.permute.xlu1 %560 }
 0x1e1   :  { %v577_v34 = vsub.f32 %v4019_v3, %v561_v53 }
 0x1e3   :  { %671 = vperm.xlu1 %3733, %v577_v34  }
 0x1e4   :  { %v555_v45 = vpop.permute.xlu1 %554  ;;  %v557_v48 = vpop.permute.xlu0 %556 }
 0x1e5   :  { %v574_v46 = vsub.f32 %v4038_v7, %v555_v45  ;;  %v575_v52 = vsub.f32 %v4026_v4, %v557_v48 }
 0x1e7   :  { %656 = vperm.xlu0 %3734, %v574_v46   ;;  %3736 = vset.pattern.permute.xlu1 %v5612_v17 }
 0x1e8   :  { %v551_v49 = vpop.permute.xlu1 %550  ;;  %585 = vperm.xlu1 %3736, %v523_v36   ;;  %v553_v3 = vpop.permute.xlu0 %552 }
 0x1e9   :  { %v572_v56 = vsub.f32 %v4057_v9, %v551_v49  ;;  %v573_v57 = vsub.f32 %v4033_v6, %v553_v3 }
 0x1eb   :  { %3735 = vset.pattern.permute.xlu0 %v5612_v17 }
 0x1ec   :  { %580 = vperm.xlu0 %3735, %v522_v15   ;;  %v547_v2 = vpop.permute.xlu1 %546  ;;  %3737 = vset.pattern.permute.xlu1 %v5610_v39  ;;  %v549_v58 = vpop.permute.xlu0 %548 }
 0x1ed   :  { %661 = vperm.xlu1 %3737, %v575_v52   ;;  %v570_v7 = vsub.f32 %v4063_v10, %v547_v2  ;;  %v571_v4 = vsub.f32 %v4045_v8, %v549_v58 }
 0x1f0   :  { %3738 = vset.pattern.permute.xlu0 %v5610_v39 }
 0x1f1   :  { %636 = vperm.xlu0 %3738, %v570_v7   ;;  %646 = vperm.xlu1 %3737, %v572_v56  }
 0x1f5   :  { %651 = vperm.xlu1 %3737, %v573_v57  }
 0x1f9   :  { %641 = vperm.xlu1 %3737, %v571_v4   ;;  %v611_v31 = vpop.permute.xlu1 %610  ;;  %v616_v60 = vpop.permute.xlu0 %615 }
 0x1fa   :  { %v630_v9 = vmul.f32 %v611_v31, %v4132_v50  ;;  %v631_v10 = vmul.f32 %v611_v31, %v4134_v51  ;;  %v632_v18 = vmul.f32 %v616_v60, %v4112_v30  ;;  %v633_v21 = vmul.f32 %v616_v60, %v4114_v19 }
 0x1fd   :  { %v606_v13 = vpop.permute.xlu1 %605  ;;  %v601_v0 = vpop.permute.xlu0 %600 }
 0x1fe   :  { %v626_v51 = vmul.f32 %v601_v0, %v4144_v62  ;;  %v627_v30 = vmul.f32 %v601_v0, %v4146_v63  ;;  %v628_v19 = vmul.f32 %v606_v13, %v4152_v23  ;;  %v629_v43 = vmul.f32 %v606_v13, %v4154_v24 }
 0x201   :  { %v591_v61 = vpop.permute.xlu1 %590  ;;  %v596_v28 = vpop.permute.xlu0 %595 }
 0x202   :  { %v622_v62 = vmul.f32 %v591_v61, %v4164_v40  ;;  %v623_v63 = vmul.f32 %v591_v61, %v4166_v41  ;;  %v624_v23 = vmul.f32 %v596_v28, %v4178_v54  ;;  %v625_v24 = vmul.f32 %v596_v28, %v4180_v55  ;;  %v3791_v28 = vld [vmem:[%s5596_s3 + $0x10] sm:$0xff]  }
 0x257   :  { %v667_v5 = vpop.permute.xlu1 %666 }
 0x258   :  { %v686_v6 = vadd.f32 %v667_v5, %v630_v9  ;;  %v687_v22 = vadd.f32 %v667_v5, %v631_v10 }
 0x25a   :  { %v703_v29 = vmax.f32 %v687_v22, 0.0  ;;  %v702_v35 = vmax.f32 %v686_v6, 0.0 }
 0x25e   :  { %v672_v27 = vpop.permute.xlu1 %671 }
 0x25f   :  { %v688_v8 = vadd.f32 %v672_v27, %v632_v18  ;;  %v689_v16 = vadd.f32 %v672_v27, %v633_v21  ;;  %v3790_v27 = vld [vmem:[%s5596_s3 + $0x8] sm:$0xff]  }
 0x261   :  { %v705_v33 = vmax.f32 %v689_v16, 0.0  ;;  %v704_v11 = vmax.f32 %v688_v8, 0.0  ;;  %v3792_v8 = vld [vmem:[%s5596_s3 + $0x18] sm:$0xff]  }
 0x262   :  { %v657_v32 = vpop.permute.xlu0 %656 }
 0x263   :  { %v586_v38 = vpop.permute.xlu1 %585  ;;  %v713_v37 = vpack.c.bf16 %v705_v33, %v703_v29  ;;  %v712_v50 = vpack.c.bf16 %v704_v11, %v702_v35  ;;  %v682_v15 = vadd.f32 %v657_v32, %v626_v51  ;;  %v683_v20 = vadd.f32 %v657_v32, %v627_v30 }
 0x264   :  { %v620_v40 = vmul.f32 %v586_v38, %v4212_v44  ;;  %v621_v41 = vmul.f32 %v586_v38, %v4214_v14  ;;  %v3789_v14 = vld [vmem:[%s5596_s3] sm:$0xff]  }
 0x265   :  { %755 = vmatprep.subr.bf16.mxu0 %v713_v37  ;;  %v698_v34 = vmax.f32 %v682_v15, 0.0  ;;  %v699_v45 = vmax.f32 %v683_v20, 0.0 }
 0x266   :  { %756 = vmatpush1.bf16.msra.mxu0 %v712_v50 }
 0x267   :  { %v581_v47 = vpop.permute.xlu0 %580 }
 0x268   :  { %v662_v36 = vpop.permute.xlu1 %661  ;;  %v618_v56 = vmul.f32 %v581_v47, %v4190_v25  ;;  %v619_v7 = vmul.f32 %v581_v47, %v4192_v26 }
 0x269   :  { %v684_v12 = vadd.f32 %v662_v36, %v628_v19  ;;  %v685_v59 = vadd.f32 %v662_v36, %v629_v43 }
 0x26b   :  { %v700_v42 = vmax.f32 %v684_v12, 0.0  ;;  %v701_v53 = vmax.f32 %v685_v59, 0.0 }
 0x26c   :  { %v647_v46 = vpop.permute.xlu1 %646  ;;  %v637_v3 = vpop.permute.xlu0 %636 }
 0x26d   :  { %v711_v48 = vpack.c.bf16 %v701_v53, %v699_v45  ;;  %v710_v49 = vpack.c.bf16 %v700_v42, %v698_v34  ;;  %v678_v52 = vadd.f32 %v647_v46, %v622_v62  ;;  %v679_v2 = vadd.f32 %v647_v46, %v623_v63 }
 0x26e   :  { %v674_v31 = vadd.f32 %v637_v3, %v618_v56  ;;  %v675_v54 = vadd.f32 %v637_v3, %v619_v7 }
 0x26f   :  { %757 = vmatprep.subr.bf16.mxu0 %v711_v48  ;;  %v694_v13 = vmax.f32 %v678_v52, 0.0  ;;  %v695_v55 = vmax.f32 %v679_v2, 0.0 }
 0x270   :  { %v652_v57 = vpop.permute.xlu1 %651  ;;  %758 = vmatpush1.bf16.msra.mxu0 %v710_v49  ;;  %v690_v10 = vmax.f32 %v674_v31, 0.0  ;;  %v691_v18 = vmax.f32 %v675_v54, 0.0 }
 0x271   :  { %v680_v58 = vadd.f32 %v652_v57, %v624_v23  ;;  %v681_v4 = vadd.f32 %v652_v57, %v625_v24 }
 0x273   :  { %v696_v60 = vmax.f32 %v680_v58, 0.0  ;;  %v697_v61 = vmax.f32 %v681_v4, 0.0 }
 0x274   :  { %v642_v0 = vpop.permute.xlu1 %641 }
 0x275   :  { %v676_v5 = vadd.f32 %v642_v0, %v620_v40  ;;  %v677_v25 = vadd.f32 %v642_v0, %v621_v41  ;;  %v709_v9 = vpack.c.bf16 %v697_v61, %v695_v55  ;;  %v708_v26 = vpack.c.bf16 %v696_v60, %v694_v13 }
 0x277   :  { %v692_v21 = vmax.f32 %v676_v5, 0.0  ;;  %v693_v6 = vmax.f32 %v677_v25, 0.0  ;;  %759 = vmatprep.subr.bf16.mxu0 %v709_v9  ;;  %v5608_v25 = vmov 2  }
 0x278   :  { %760 = vmatpush1.bf16.msra.mxu0 %v708_v26  ;;  %3740 = vset.pattern.permute.xlu0 %v5608_v25 }
 0x279   :  { %v707_v44 = vpack.c.bf16 %v693_v6, %v691_v18  ;;  %v706_v22 = vpack.c.bf16 %v692_v21, %v690_v10  ;;  %3739 = vset.pattern.permute.xlu1 %v5608_v25 }
 0x27b   :  { %761 = vmatprep.subr.bf16.mxu0 %v707_v44 }
 0x27c   :  { %762 = vmatpush1.bf16.msra.mxu0 %v706_v22 }
 0x27f   :  { %3563 = vmatmul.mubr.msk.bf16.vlgmr.msra.gmra.mxu0 %vm734_vm0, %v3789_v14 }
 0x280   :  { %789 = vmatprep.mubr.bf16.mxu0 %v5612_v17 }
 0x287   :  { %3564 = vmatmul.mubr.msk.bf16.gmra.mxu0 %vm734_vm0, %v3790_v27 }
 0x288   :  { %799 = vmatprep.mubr.bf16.mxu0 %v5612_v17 }
 0x28f   :  { %3565 = vmatmul.mubr.msk.bf16.gmra.mxu0 %vm734_vm0, %v3791_v28 }
 0x290   :  { %809 = vmatprep.mubr.bf16.mxu0 %v5612_v17 }
 0x297   :  { %3566 = vmatmul.mubr.msk.bf16.gmra.mxu0 %vm734_vm0, %v3792_v8 }
 0x298   :  { %1645 = vmatprep.mubr.bf16.mxu0 %v5612_v17 }
 0x33f   :  { %v4342_v16 = vpop.f32.mrf.mxu0 }
 0x340   :  { %v852_v55 = vmul.f32 %v4342_v16, %v4342_v16 }
 0x341   :  { %v4344_v29 = vpop.f32.mrf.mxu0 }
 0x342   :  { %v820_v31 = vadd.f32 %v4344_v29, %v4342_v16  ;;  %v853_v54 = vmul.f32 %v4344_v29, %v4344_v29 }
 0x343   :  { %v4346_v33 = vpop.f32.mrf.mxu0 }
 0x344   :  { %v868_v61 = vadd.f32 %v853_v54, %v852_v55  ;;  %v854_v0 = vmul.f32 %v4346_v33, %v4346_v33 }
 0x345   :  { %v4348_v35 = vpop.f32.mrf.mxu0 }
 0x346   :  { %v823_v13 = vadd.f32 %v4348_v35, %v4346_v33  ;;  %v855_v60 = vmul.f32 %v4348_v35, %v4348_v35 }
 0x347   :  { %v4350_v11 = vpop.f32.mrf.mxu0 }
 0x348   :  { %v856_v57 = vmul.f32 %v4350_v11, %v4350_v11  ;;  %v871_v5 = vadd.f32 %v855_v60, %v854_v0 }
 0x349   :  { %v4352_v32 = vpop.f32.mrf.mxu0 }
 0x34a   :  { %v826_v2 = vadd.f32 %v4352_v32, %v4350_v11  ;;  %v857_v56 = vmul.f32 %v4352_v32, %v4352_v32 }
 0x34b   :  { %v4354_v38 = vpop.f32.mrf.mxu0 }
 0x34c   :  { %v874_v4 = vadd.f32 %v857_v56, %v856_v57  ;;  %v858_v40 = vmul.f32 %v4354_v38, %v4354_v38 }
 0x34d   :  { %v4356_v37 = vpop.f32.mrf.mxu0 }
 0x34e   :  { %v829_v24 = vadd.f32 %v4356_v37, %v4354_v38  ;;  %v859_v58 = vmul.f32 %v4356_v37, %v4356_v37 }
 0x34f   :  { %v4358_v50 = vpop.f32.mrf.mxu0 }
 0x350   :  { %v860_v15 = vmul.f32 %v4358_v50, %v4358_v50  ;;  %v877_v41 = vadd.f32 %v859_v58, %v858_v40 }
 0x351   :  { %v4360_v51 = vpop.f32.mrf.mxu0 }
 0x352   :  { %v832_v30 = vadd.f32 %v4360_v51, %v4358_v50  ;;  %v861_v19 = vmul.f32 %v4360_v51, %v4360_v51 }
 0x353   :  { %v4366_v43 = vpop.f32.mrf.mxu0 }
 0x354   :  { %833 = vadd.xlane.f32.xlu0 %v832_v30  ;;  %v880_v36 = vadd.f32 %v861_v19, %v860_v15  ;;  %v862_v42 = vmul.f32 %v4366_v43, %v4366_v43 }
 0x355   :  { %v4370_v20 = vpop.f32.mrf.mxu0 }
 0x356   :  { %v835_v47 = vadd.f32 %v4370_v20, %v4366_v43  ;;  %v863_v12 = vmul.f32 %v4370_v20, %v4370_v20 }
 0x357   :  { %v4376_v59 = vpop.f32.mrf.mxu0 }
 0x358   :  { %881 = vadd.xlane.f32.xlu0 %v880_v36  ;;  %836 = vadd.xlane.f32.xlu1 %v835_v47  ;;  %v864_v53 = vmul.f32 %v4376_v59, %v4376_v59  ;;  %v883_v45 = vadd.f32 %v863_v12, %v862_v42 }
 0x359   :  { %v4382_v34 = vpop.f32.mrf.mxu0 }
 0x35a   :  { %v865_v46 = vmul.f32 %v4382_v34, %v4382_v34  ;;  %v838_v49 = vadd.f32 %v4382_v34, %v4376_v59 }
 0x35b   :  { %v4386_v62 = vpop.f32.mrf.mxu0 }
 0x35c   :  { %884 = vadd.xlane.f32.xlu1 %v883_v45  ;;  %v886_v63 = vadd.f32 %v865_v46, %v864_v53  ;;  %v866_v3 = vmul.f32 %v4386_v62, %v4386_v62 }
 0x35d   :  { %v4388_v48 = vpop.f32.mrf.mxu0 }
 0x35e   :  { %887 = vadd.xlane.f32.xlu0 %v886_v63  ;;  %v841_v23 = vadd.f32 %v4388_v48, %v4386_v62  ;;  %v867_v52 = vmul.f32 %v4388_v48, %v4388_v48 }
 0x360   :  { %839 = vadd.xlane.f32.xlu1 %v838_v49  ;;  %v889_v7 = vadd.f32 %v867_v52, %v866_v3 }
 0x362   :  { %842 = vadd.xlane.f32.xlu0 %v841_v23 }
 0x364   :  { %830 = vadd.xlane.f32.xlu1 %v829_v24 }
 0x366   :  { %827 = vadd.xlane.f32.xlu0 %v826_v2 }
 0x368   :  { %890 = vadd.xlane.f32.xlu1 %v889_v7 }
 0x36a   :  { %875 = vadd.xlane.f32.xlu0 %v874_v4 }
 0x36c   :  { %878 = vadd.xlane.f32.xlu1 %v877_v41 }
 0x36e   :  { %821 = vadd.xlane.f32.xlu0 %v820_v31 }
 0x370   :  { %824 = vadd.xlane.f32.xlu1 %v823_v13 }
 0x372   :  { %869 = vadd.xlane.f32.xlu0 %v868_v61 }
 0x374   :  { %872 = vadd.xlane.f32.xlu1 %v871_v5 }
 0x3dd   :  { %v834_v9 = vpop.xlane.xlu0 %833 }
 0x3de   :  { %v4428_v22 = vmul.f32 0.00390625, %v834_v9 }
 0x3e0   :  { %v904_v19 = vmul.f32 %v4428_v22, %v4428_v22 }
 0x3e1   :  { %v837_v26 = vpop.xlane.xlu1 %836  ;;  %v882_v18 = vpop.xlane.xlu0 %881 }
 0x3e2   :  { %v4424_v10 = vmul.f32 0.00390625, %v837_v26  ;;  %v896_v28 = vmul.f32 0.00390625, %v882_v18 }
 0x3e4   :  { %v905_v6 = vmul.f32 %v4424_v10, %v4424_v10  ;;  %v912_v42 = vsub.f32 %v896_v28, %v904_v19 }
 0x3e5   :  { %v885_v21 = vpop.xlane.xlu1 %884 }
 0x3e6   :  { %v897_v44 = vmul.f32 0.00390625, %v885_v21  ;;  %v920_v52 = vmax.f32 %v912_v42, 0.0 }
 0x3e7   :  { %v888_v14 = vpop.xlane.xlu0 %887 }
 0x3e8   :  { %v913_v27 = vsub.f32 %v897_v44, %v905_v6  ;;  %v898_v47 = vmul.f32 0.00390625, %v888_v14  ;;  %v928_v31 = vadd.f32 1e-05, %v920_v52 }
 0x3e9   :  { %v840_v8 = vpop.xlane.xlu1 %839 }
 0x3ea   :  { %v850_v30 = vmul.f32 0.00390625, %v840_v8  ;;  %v921_v15 = vmax.f32 %v913_v27, 0.0 }
 0x3eb   :  { %v843_v36 = vpop.xlane.xlu0 %842 }
 0x3ec   :  { %v906_v12 = vmul.f32 %v850_v30, %v850_v30  ;;  %v4432_v46 = vmul.f32 0.00390625, %v843_v36  ;;  %v929_v63 = vadd.f32 1e-05, %v921_v15 }
 0x3ed   :  { %v831_v53 = vpop.xlane.xlu1 %830 }
 0x3ee   :  { %v914_v45 = vsub.f32 %v898_v47, %v906_v12  ;;  %v907_v56 = vmul.f32 %v4432_v46, %v4432_v46  ;;  %v4438_v7 = vmul.f32 0.00390625, %v831_v53  ;;  %3825 = vrsqrt.f32 %v929_v63 }
 0x3ef   :  { %v828_v49 = vpop.xlane.xlu0 %827 }
 0x3f0   :  { %v922_v23 = vmax.f32 %v914_v45, 0.0  ;;  %v4434_v24 = vmul.f32 0.00390625, %v828_v49  ;;  %v903_v13 = vmul.f32 %v4438_v7, %v4438_v7  ;;  %v4447_v49 = vld [vmem:[%s5592_s4 + $0x30] sm:$0xff] }
 0x3f1   :  { %v891_v2 = vpop.xlane.xlu1 %890 }
 0x3f2   :  { %v930_v3 = vadd.f32 1e-05, %v922_v23  ;;  %v899_v57 = vmul.f32 0.00390625, %v891_v2  ;;  %v902_v4 = vmul.f32 %v4434_v24, %v4434_v24 }
 0x3f3   :  { %v876_v58 = vpop.xlane.xlu0 %875 }
 0x3f4   :  { %3827 = vrsqrt.f32 %v930_v3  ;;  %v915_v40 = vsub.f32 %v899_v57, %v907_v56  ;;  %v894_v41 = vmul.f32 0.00390625, %v876_v58  ;;  %v4453_v57 = vld [vmem:[%s5592_s4 + $0x28] sm:$0xff] }
 0x3f5   :  { %v879_v54 = vpop.xlane.xlu1 %878  ;;  %3829 = vrsqrt.f32 %v928_v31 }
 0x3f6   :  { %v923_v55 = vmax.f32 %v915_v40, 0.0  ;;  %v910_v60 = vsub.f32 %v894_v41, %v902_v4  ;;  %v895_v61 = vmul.f32 0.00390625, %v879_v54 }
 0x3f7   :  { %v822_v0 = vpop.xlane.xlu0 %821 }
 0x3f8   :  { %v931_v5 = vadd.f32 1e-05, %v923_v55  ;;  %v918_v9 = vmax.f32 %v910_v60, 0.0  ;;  %v911_v26 = vsub.f32 %v895_v61, %v903_v13  ;;  %v844_v18 = vmul.f32 0.00390625, %v822_v0  ;;  %v4469_v55 = vld [vmem:[%s5592_s4 + $0x20] sm:$0xff]  ;;  %v4476_v61 = vld [vmem:[%s5592_s4 + $0x18] sm:$0xff] }
 0x3f9   :  { %v825_v21 = vpop.xlane.xlu1 %824 }
 0x3fa   :  { %3831 = vrsqrt.f32 %v931_v5  ;;  %v926_v6 = vadd.f32 1e-05, %v918_v9  ;;  %v919_v44 = vmax.f32 %v911_v26, 0.0  ;;  %v845_v14 = vmul.f32 0.00390625, %v825_v21  ;;  %v4484_v9 = vld [vmem:[%s5592_s4 + $0x10] sm:$0xff] }
 0x3fb   :  { %v870_v27 = vpop.xlane.xlu0 %869  ;;  %v900_v8 = vmul.f32 %v844_v18, %v844_v18  ;;  %v3826_v42 = vpop.eup %3825 }
 0x3fc   :  { %v927_v28 = vadd.f32 1e-05, %v919_v44  ;;  %v892_v19 = vmul.f32 0.00390625, %v870_v27  ;;  %3833 = vrsqrt.f32 %v926_v6  ;;  %v901_v36 = vmul.f32 %v845_v14, %v845_v14  ;;  %v4500_v27 = vld [vmem:[%s5592_s4 + $0x8] sm:$0xff] }
 0x3fd   :  { %v873_v15 = vpop.xlane.xlu1 %872  ;;  %v945_v58 = vmul.f32 %v4453_v57, %v3826_v42 }
 0x3fe   :  { %3835 = vrsqrt.f32 %v927_v28  ;;  %v908_v47 = vsub.f32 %v892_v19, %v900_v8  ;;  %v893_v12 = vmul.f32 0.00390625, %v873_v15 }
 0x3ff   :  { %v953_v41 = vmul.f32 %v945_v58, %v4424_v10 }
 0x400   :  { %v916_v53 = vmax.f32 %v908_v47, 0.0  ;;  %v909_v45 = vsub.f32 %v893_v12, %v901_v36 }
 0x401   :  { %v3828_v63 = vpop.eup %3827 }
 0x402   :  { %v946_v23 = vmul.f32 %v4447_v49, %v3828_v63  ;;  %v924_v52 = vadd.f32 1e-05, %v916_v53  ;;  %v917_v2 = vmax.f32 %v909_v45, 0.0  ;;  %v3830_v4 = vpop.eup %3829 }
 0x403   :  { %v944_v60 = vmul.f32 %v4469_v55, %v3830_v4 }
 0x404   :  { %v954_v3 = vmul.f32 %v946_v23, %v850_v30  ;;  %3837 = vrsqrt.f32 %v924_v52  ;;  %v925_v56 = vadd.f32 1e-05, %v917_v2  ;;  %v4461_v30 = vld [vmem:[%s5592_s4 + $0x38] sm:$0xff] }
 0x406   :  { %3839 = vrsqrt.f32 %v925_v56  ;;  %976 = vrot.lane.b32.xlu0 %v954_v3, %s3943_s0 }
 0x407   :  { %v3832_v40 = vpop.eup %3831 }
 0x408   :  { %v947_v31 = vmul.f32 %v4461_v30, %v3832_v40 }
 0x409   :  { %v3834_v54 = vpop.eup %3833 }
 0x40a   :  { %974 = vrot.lane.b32.xlu0 %v953_v41, %s3943_s0  ;;  %v955_v13 = vmul.f32 %v947_v31, %v4432_v46  ;;  %v952_v46 = vmul.f32 %v944_v60, %v4428_v22  ;;  %v942_v26 = vmul.f32 %v4484_v9, %v3834_v54 }
 0x40b   :  { %v3836_v10 = vpop.eup %3835 }
 0x40c   :  { %978 = vrot.lane.b32.xlu1 %v955_v13, %s3943_s0  ;;  %v943_v0 = vmul.f32 %v4476_v61, %v3836_v10  ;;  %v950_v6 = vmul.f32 %v942_v26, %v4434_v24  ;;  %v5607_v24 = vmov 3  }
 0x40e   :  { %v951_v5 = vmul.f32 %v943_v0, %v4438_v7  ;;  %v4493_v7 = vld [vmem:[%s5592_s4] sm:$0xff] }
 0x410   :  { %970 = vrot.lane.b32.xlu0 %v951_v5, %s3943_s0  ;;  %972 = vrot.lane.b32.xlu1 %v952_v46, %s3943_s0 }
 0x411   :  { %v3838_v21 = vpop.eup %3837 }
 0x412   :  { %v940_v22 = vmul.f32 %v4493_v7, %v3838_v21 }
 0x413   :  { %v3840_v44 = vpop.eup %3839 }
 0x414   :  { %968 = vrot.lane.b32.xlu1 %v950_v6, %s3943_s0  ;;  %v941_v28 = vmul.f32 %v4500_v27, %v3840_v44  ;;  %v948_v19 = vmul.f32 %v940_v22, %v844_v18 }
 0x416   :  { %v949_v8 = vmul.f32 %v941_v28, %v845_v14 }
 0x418   :  { %966 = vrot.lane.b32.xlu0 %v949_v8, %s3943_s0  ;;  %964 = vrot.lane.b32.xlu1 %v948_v19, %s3943_s0 }
 0x41c   :  { %1033 = vperm.xlu0 %3740, %v947_v31   ;;  %1028 = vperm.xlu1 %3739, %v946_v23  }
 0x420   :  { %1018 = vperm.xlu0 %3740, %v944_v60   ;;  %1023 = vperm.xlu1 %3739, %v945_v58  }
 0x424   :  { %1013 = vperm.xlu0 %3740, %v943_v0   ;;  %1008 = vperm.xlu1 %3739, %v942_v26  }
 0x428   :  { %3742 = vset.pattern.permute.xlu0 %v5607_v24  ;;  %3741 = vset.pattern.permute.xlu1 %v5607_v24 }
 0x478   :  { %v977_v36 = vpop.permute.xlu0 %976 }
 0x479   :  { %v994_v23 = vsub.f32 %v4447_v49, %v977_v36 }
 0x47c   :  { %v975_v42 = vpop.permute.xlu0 %974 }
 0x47d   :  { %v993_v45 = vsub.f32 %v4453_v57, %v975_v42 }
 0x47e   :  { %v979_v15 = vpop.permute.xlu1 %978 }
 0x47f   :  { %v995_v52 = vsub.f32 %v4461_v30, %v979_v15 }
 0x482   :  { %v973_v47 = vpop.permute.xlu1 %972  ;;  %v971_v2 = vpop.permute.xlu0 %970 }
 0x483   :  { %v992_v18 = vsub.f32 %v4469_v55, %v973_v47  ;;  %v991_v3 = vsub.f32 %v4476_v61, %v971_v2 }
 0x485   :  { %1074 = vperm.xlu0 %3742, %v992_v18  }
 0x486   :  { %v969_v14 = vpop.permute.xlu1 %968 }
 0x487   :  { %v990_v12 = vsub.f32 %v4484_v9, %v969_v14 }
 0x489   :  { %3743 = vset.pattern.permute.xlu0 %v5608_v25  ;;  %1064 = vperm.xlu1 %3741, %v990_v12  }
 0x48a   :  { %998 = vperm.xlu0 %3743, %v940_v22   ;;  %v965_v53 = vpop.permute.xlu1 %964  ;;  %v967_v56 = vpop.permute.xlu0 %966 }
 0x48b   :  { %v988_v63 = vsub.f32 %v4493_v7, %v965_v53  ;;  %v989_v58 = vsub.f32 %v4500_v27, %v967_v56 }
 0x48d   :  { %1079 = vperm.xlu1 %3741, %v993_v45  }
 0x48e   :  { %3745 = vset.pattern.permute.xlu0 %v5607_v24 }
 0x48f   :  { %1054 = vperm.xlu0 %3745, %v988_v63  }
 0x491   :  { %1084 = vperm.xlu1 %3741, %v994_v23  }
 0x495   :  { %1089 = vperm.xlu1 %3741, %v995_v52  }
 0x497   :  { %v1029_v4 = vpop.permute.xlu1 %1028  ;;  %v1034_v41 = vpop.permute.xlu0 %1033 }
 0x498   :  { %v1048_v46 = vmul.f32 %v1029_v4, %v4376_v59  ;;  %v1049_v26 = vmul.f32 %v1029_v4, %v4382_v34  ;;  %v1050_v44 = vmul.f32 %v1034_v41, %v4386_v62 }
 0x499   :  { %1069 = vperm.xlu1 %3741, %v991_v3  }
 0x49b   :  { %v1024_v40 = vpop.permute.xlu1 %1023  ;;  %v1019_v54 = vpop.permute.xlu0 %1018 }
 0x49c   :  { %v1047_v0 = vmul.f32 %v1024_v40, %v4370_v20  ;;  %v1045_v6 = vmul.f32 %v1019_v54, %v4360_v51  ;;  %v1046_v15 = vmul.f32 %v1024_v40, %v4366_v43  ;;  %v1044_v20 = vmul.f32 %v1019_v54, %v4358_v50 }
 0x49d   :  { %3744 = vset.pattern.permute.xlu1 %v5608_v25 }
 0x49e   :  { %1003 = vperm.xlu1 %3744, %v941_v28   ;;  %v1051_v28 = vmul.f32 %v1034_v41, %v4388_v48 }
 0x49f   :  { %v1009_v31 = vpop.permute.xlu1 %1008  ;;  %v1014_v10 = vpop.permute.xlu0 %1013 }
 0x4a0   :  { %v1041_v34 = vmul.f32 %v1009_v31, %v4352_v32  ;;  %v1043_v14 = vmul.f32 %v1014_v10, %v4356_v37  ;;  %v1042_v45 = vmul.f32 %v1014_v10, %v4354_v38  ;;  %v1040_v32 = vmul.f32 %v1009_v31, %v4350_v11 }
 0x4a2   :  { %3746 = vset.pattern.permute.xlu1 %v5607_v24 }
 0x4a3   :  { %1059 = vperm.xlu1 %3746, %v989_v58  }
 0x500   :  { %v1075_v21 = vpop.permute.xlu0 %1074 }
 0x501   :  { %v1101_v36 = vadd.f32 %v1075_v21, %v1045_v6  ;;  %v1100_v63 = vadd.f32 %v1075_v21, %v1044_v20 }
 0x503   :  { %v1117_v43 = vmax.f32 %v1101_v36, 0.0  ;;  %v1116_v41 = vmax.f32 %v1100_v63, 0.0 }
 0x504   :  { %v1065_v13 = vpop.permute.xlu1 %1064 }
 0x505   :  { %v999_v23 = vpop.permute.xlu0 %998  ;;  %v1097_v2 = vadd.f32 %v1065_v13, %v1041_v34  ;;  %v1096_v54 = vadd.f32 %v1065_v13, %v1040_v32 }
 0x507   :  { %v1112_v11 = vmax.f32 %v1096_v54, 0.0 }
 0x508   :  { %v1080_v60 = vpop.permute.xlu1 %1079 }
 0x509   :  { %v1103_v22 = vadd.f32 %v1080_v60, %v1047_v0  ;;  %v1102_v51 = vadd.f32 %v1080_v60, %v1046_v15  ;;  %v1113_v60 = vmax.f32 %v1097_v2, 0.0 }
 0x50a   :  { %v1055_v10 = vpop.permute.xlu0 %1054 }
 0x50b   :  { %v1119_v12 = vmax.f32 %v1103_v22, 0.0  ;;  %v1118_v58 = vmax.f32 %v1102_v51, 0.0 }
 0x50c   :  { %v1085_v5 = vpop.permute.xlu1 %1084 }
 0x50d   :  { %v1104_v8 = vadd.f32 %v1085_v5, %v1048_v46  ;;  %v1105_v19 = vadd.f32 %v1085_v5, %v1049_v26  ;;  %v1129_v40 = vpack.c.bf16 %v1119_v12, %v1117_v43  ;;  %v1128_v5 = vpack.c.bf16 %v1118_v58, %v1116_v41 }
 0x50e   :  { %v1036_v46 = vmul.f32 %v999_v23, %v4342_v16  ;;  %v1037_v26 = vmul.f32 %v999_v23, %v4344_v29 }
 0x50f   :  { %v1121_v42 = vmax.f32 %v1105_v19, 0.0  ;;  %v1120_v53 = vmax.f32 %v1104_v8, 0.0 }
 0x510   :  { %v1090_v47 = vpop.permute.xlu1 %1089  ;;  %v1092_v31 = vadd.f32 %v1055_v10, %v1036_v46  ;;  %v1093_v6 = vadd.f32 %v1055_v10, %v1037_v26 }
 0x511   :  { %v1106_v18 = vadd.f32 %v1090_v47, %v1050_v44  ;;  %v1107_v59 = vadd.f32 %v1090_v47, %v1051_v28 }
 0x512   :  { %v1108_v15 = vmax.f32 %v1092_v31, 0.0  ;;  %v1109_v36 = vmax.f32 %v1093_v6, 0.0 }
 0x513   :  { %v1123_v62 = vmax.f32 %v1107_v59, 0.0  ;;  %v1122_v48 = vmax.f32 %v1106_v18, 0.0  ;;  %v3793_v18 = vld [vmem:[%s5596_s3 + $0x20] sm:$0xff]   ;;  %v3796_v59 = vld [vmem:[%s5596_s3 + $0x38] sm:$0xff]  }
 0x514   :  { %v1070_v52 = vpop.permute.xlu1 %1069 }
 0x515   :  { %v1099_v50 = vadd.f32 %v1070_v52, %v1043_v14  ;;  %v1131_v3 = vpack.c.bf16 %v1123_v62, %v1121_v42  ;;  %v1130_v56 = vpack.c.bf16 %v1122_v48, %v1120_v53  ;;  %v1098_v37 = vadd.f32 %v1070_v52, %v1042_v45 }
 0x517   :  { %v1115_v4 = vmax.f32 %v1099_v50, 0.0  ;;  %1172 = vmatprep.subr.bf16.mxu1 %v1131_v3  ;;  %v1114_v0 = vmax.f32 %v1098_v37, 0.0 }
 0x518   :  { %1173 = vmatpush1.bf16.msra.mxu1 %v1130_v56 }
 0x519   :  { %v1004_v38 = vpop.permute.xlu1 %1003  ;;  %1174 = vmatprep.subr.bf16.mxu1 %v1129_v40  ;;  %v1127_v21 = vpack.c.bf16 %v1115_v4, %v1113_v60  ;;  %v1126_v28 = vpack.c.bf16 %v1114_v0, %v1112_v11 }
 0x51a   :  { %v1038_v22 = vmul.f32 %v1004_v38, %v4346_v33  ;;  %v1039_v13 = vmul.f32 %v1004_v38, %v4348_v35  ;;  %v3794_v33 = vld [vmem:[%s5596_s3 + $0x28] sm:$0xff]   ;;  %v3795_v35 = vld [vmem:[%s5596_s3 + $0x30] sm:$0xff]  }
 0x51c   :  { %1175 = vmatpush1.bf16.msra.mxu1 %v1128_v5 }
 0x51d   :  { %1176 = vmatprep.subr.bf16.mxu1 %v1127_v21 }
 0x51e   :  { %v1060_v44 = vpop.permute.xlu1 %1059 }
 0x51f   :  { %v1094_v8 = vadd.f32 %v1060_v44, %v1038_v22  ;;  %v1095_v19 = vadd.f32 %v1060_v44, %v1039_v13 }
 0x520   :  { %1177 = vmatpush1.bf16.msra.mxu1 %v1126_v28 }
 0x521   :  { %v1110_v16 = vmax.f32 %v1094_v8, 0.0  ;;  %v1111_v47 = vmax.f32 %v1095_v19, 0.0 }
 0x523   :  { %v1125_v29 = vpack.c.bf16 %v1111_v47, %v1109_v36  ;;  %v1124_v20 = vpack.c.bf16 %v1110_v16, %v1108_v15 }
 0x525   :  { %1178 = vmatprep.subr.bf16.mxu1 %v1125_v29 }
 0x526   :  { %1179 = vmatpush1.bf16.msra.mxu1 %v1124_v20 }
 0x529   :  { %3571 = vmatmul.mubr.msk.bf16.vlgmr.msra.gmra.mxu1 %vm734_vm0, %v3793_v18 }
 0x52a   :  { %1206 = vmatprep.mubr.bf16.mxu1 %v5612_v17 }
 0x531   :  { %3572 = vmatmul.mubr.msk.bf16.gmra.mxu1 %vm734_vm0, %v3794_v33  ;;  %v5604_v33 = vmov 4  }
 0x532   :  { %1216 = vmatprep.mubr.bf16.mxu1 %v5612_v17  ;;  %3748 = vset.pattern.permute.xlu0 %v5604_v33 }
 0x533   :  { %3747 = vset.pattern.permute.xlu1 %v5604_v33 }
 0x539   :  { %3573 = vmatmul.mubr.msk.bf16.gmra.mxu1 %vm734_vm0, %v3795_v35 }
 0x53a   :  { %1226 = vmatprep.mubr.bf16.mxu1 %v5612_v17 }
 0x541   :  { %3574 = vmatmul.mubr.msk.bf16.gmra.mxu1 %vm734_vm0, %v3796_v59 }
 0x542   :  { %2406 = vmatprep.mubr.bf16.mxu1 %v5612_v17 }
 0x5e9   :  { %v4555_v34 = vpop.f32.mrf.mxu1 }
 0x5ea   :  { %v1269_v36 = vmul.f32 %v4555_v34, %v4555_v34 }
 0x5eb   :  { %v4557_v14 = vpop.f32.mrf.mxu1 }
 0x5ec   :  { %v1237_v19 = vadd.f32 %v4557_v14, %v4555_v34  ;;  %v1270_v15 = vmul.f32 %v4557_v14, %v4557_v14 }
 0x5ed   :  { %v4559_v51 = vpop.f32.mrf.mxu1 }
 0x5ee   :  { %v1271_v29 = vmul.f32 %v4559_v51, %v4559_v51  ;;  %v1285_v20 = vadd.f32 %v1270_v15, %v1269_v36 }
 0x5ef   :  { %v4561_v12 = vpop.f32.mrf.mxu1 }
 0x5f0   :  { %v1240_v16 = vadd.f32 %v4561_v12, %v4559_v51  ;;  %v1272_v47 = vmul.f32 %v4561_v12, %v4561_v12 }
 0x5f1   :  { %v4563_v42 = vpop.f32.mrf.mxu1 }
 0x5f2   :  { %v1273_v6 = vmul.f32 %v4563_v42, %v4563_v42  ;;  %v1288_v18 = vadd.f32 %v1272_v47, %v1271_v29 }
 0x5f3   :  { %v4565_v62 = vpop.f32.mrf.mxu1 }
 0x5f4   :  { %v1243_v21 = vadd.f32 %v4565_v62, %v4563_v42  ;;  %v1274_v11 = vmul.f32 %v4565_v62, %v4565_v62 }
 0x5f5   :  { %v4567_v53 = vpop.f32.mrf.mxu1 }
 0x5f6   :  { %v1275_v44 = vmul.f32 %v4567_v53, %v4567_v53  ;;  %v1291_v28 = vadd.f32 %v1274_v11, %v1273_v6 }
 0x5f7   :  { %v4569_v48 = vpop.f32.mrf.mxu1 }
 0x5f8   :  { %v1246_v46 = vadd.f32 %v4569_v48, %v4567_v53  ;;  %v1276_v22 = vmul.f32 %v4569_v48, %v4569_v48 }
 0x5f9   :  { %v4571_v45 = vpop.f32.mrf.mxu1 }
 0x5fa   :  { %v1277_v2 = vmul.f32 %v4571_v45, %v4571_v45  ;;  %v1294_v8 = vadd.f32 %v1276_v22, %v1275_v44 }
 0x5fb   :  { %v4573_v63 = vpop.f32.mrf.mxu1 }
 0x5fc   :  { %v1249_v43 = vadd.f32 %v4573_v63, %v4571_v45  ;;  %v1278_v23 = vmul.f32 %v4573_v63, %v4573_v63 }
 0x5fd   :  { %v4579_v52 = vpop.f32.mrf.mxu1 }
 0x5fe   :  { %1250 = vadd.xlane.f32.xlu0 %v1249_v43  ;;  %v1297_v32 = vadd.f32 %v1278_v23, %v1277_v2  ;;  %v1279_v37 = vmul.f32 %v4579_v52, %v4579_v52 }
 0x5ff   :  { %v4583_v50 = vpop.f32.mrf.mxu1 }
 0x600   :  { %v1252_v3 = vadd.f32 %v4583_v50, %v4579_v52  ;;  %v1280_v56 = vmul.f32 %v4583_v50, %v4583_v50 }
 0x601   :  { %v4589_v58 = vpop.f32.mrf.mxu1 }
 0x602   :  { %1298 = vadd.xlane.f32.xlu0 %v1297_v32  ;;  %1253 = vadd.xlane.f32.xlu1 %v1252_v3  ;;  %v1281_v4 = vmul.f32 %v4589_v58, %v4589_v58  ;;  %v1300_v41 = vadd.f32 %v1280_v56, %v1279_v37 }
 0x603   :  { %v4595_v40 = vpop.f32.mrf.mxu1 }
 0x604   :  { %v1282_v54 = vmul.f32 %v4595_v40, %v4595_v40  ;;  %v1255_v0 = vadd.f32 %v4595_v40, %v4589_v58 }
 0x605   :  { %v4599_v60 = vpop.f32.mrf.mxu1 }
 0x606   :  { %1301 = vadd.xlane.f32.xlu1 %v1300_v41  ;;  %v1303_v38 = vadd.f32 %v1282_v54, %v1281_v4  ;;  %v1283_v31 = vmul.f32 %v4599_v60, %v4599_v60 }
 0x607   :  { %v4601_v10 = vpop.f32.mrf.mxu1 }
 0x608   :  { %1304 = vadd.xlane.f32.xlu0 %v1303_v38  ;;  %v1258_v5 = vadd.f32 %v4601_v10, %v4599_v60  ;;  %v1284_v26 = vmul.f32 %v4601_v10, %v4601_v10 }
 0x60a   :  { %1256 = vadd.xlane.f32.xlu1 %v1255_v0  ;;  %v1306_v13 = vadd.f32 %v1284_v26, %v1283_v31 }
 0x60c   :  { %1259 = vadd.xlane.f32.xlu0 %v1258_v5 }
 0x60e   :  { %1247 = vadd.xlane.f32.xlu1 %v1246_v46 }
 0x610   :  { %1244 = vadd.xlane.f32.xlu0 %v1243_v21 }
 0x612   :  { %1307 = vadd.xlane.f32.xlu1 %v1306_v13 }
 0x614   :  { %1292 = vadd.xlane.f32.xlu0 %v1291_v28 }
 0x616   :  { %1295 = vadd.xlane.f32.xlu1 %v1294_v8 }
 0x618   :  { %1238 = vadd.xlane.f32.xlu0 %v1237_v19 }
 0x61a   :  { %1241 = vadd.xlane.f32.xlu1 %v1240_v16 }
 0x61c   :  { %1286 = vadd.xlane.f32.xlu0 %v1285_v20 }
 0x61e   :  { %1289 = vadd.xlane.f32.xlu1 %v1288_v18 }
 0x687   :  { %v1251_v35 = vpop.xlane.xlu0 %1250 }
 0x688   :  { %v4641_v32 = vmul.f32 0.00390625, %v1251_v35 }
 0x68a   :  { %v1321_v0 = vmul.f32 %v4641_v32, %v4641_v32 }
 0x68b   :  { %v1254_v59 = vpop.xlane.xlu1 %1253  ;;  %v1299_v23 = vpop.xlane.xlu0 %1298 }
 0x68c   :  { %v4637_v43 = vmul.f32 0.00390625, %v1254_v59  ;;  %v1313_v41 = vmul.f32 0.00390625, %v1299_v23 }
 0x68e   :  { %v1322_v3 = vmul.f32 %v4637_v43, %v4637_v43  ;;  %v1329_v11 = vsub.f32 %v1313_v41, %v1321_v0 }
 0x68f   :  { %v1302_v2 = vpop.xlane.xlu1 %1301 }
 0x690   :  { %v1314_v56 = vmul.f32 0.00390625, %v1302_v2  ;;  %v1337_v19 = vmax.f32 %v1329_v11, 0.0 }
 0x691   :  { %v1305_v37 = vpop.xlane.xlu0 %1304 }
 0x692   :  { %v1330_v4 = vsub.f32 %v1314_v56, %v1322_v3  ;;  %v1315_v26 = vmul.f32 0.00390625, %v1305_v37  ;;  %v1345_v23 = vadd.f32 1e-05, %v1337_v19 }
 0x693   :  { %v1257_v54 = vpop.xlane.xlu1 %1256 }
 0x694   :  { %v1267_v38 = vmul.f32 0.00390625, %v1257_v54  ;;  %v1338_v5 = vmax.f32 %v1330_v4, 0.0 }
 0x695   :  { %v1260_v46 = vpop.xlane.xlu0 %1259 }
 0x696   :  { %v1323_v21 = vmul.f32 %v1267_v38, %v1267_v38  ;;  %v4645_v22 = vmul.f32 0.00390625, %v1260_v46  ;;  %v1346_v13 = vadd.f32 1e-05, %v1338_v5 }
 0x697   :  { %v1248_v31 = vpop.xlane.xlu1 %1247 }
 0x698   :  { %v1331_v6 = vsub.f32 %v1315_v26, %v1323_v21  ;;  %v1324_v16 = vmul.f32 %v4645_v22, %v4645_v22  ;;  %v1264_v47 = vmul.f32 0.00390625, %v1248_v31  ;;  %3841 = vrsqrt.f32 %v1346_v13 }
 0x699   :  { %v1245_v44 = vpop.xlane.xlu0 %1244 }
 0x69a   :  { %v1339_v28 = vmax.f32 %v1331_v6, 0.0  ;;  %v4647_v8 = vmul.f32 0.00390625, %v1245_v44  ;;  %v1320_v3 = vmul.f32 %v1264_v47, %v1264_v47 }
 0x69b   :  { %v1308_v15 = vpop.xlane.xlu1 %1307 }
 0x69c   :  { %v1347_v36 = vadd.f32 1e-05, %v1339_v28  ;;  %v1316_v29 = vmul.f32 0.00390625, %v1308_v15  ;;  %v1319_v18 = vmul.f32 %v4647_v8, %v4647_v8 }
 0x69d   :  { %v1293_v20 = vpop.xlane.xlu0 %1292 }
 0x69e   :  { %3843 = vrsqrt.f32 %v1347_v36  ;;  %v1332_v35 = vsub.f32 %v1316_v29, %v1324_v16  ;;  %v1311_v59 = vmul.f32 0.00390625, %v1293_v20 }
 0x69f   :  { %v1296_v2 = vpop.xlane.xlu1 %1295  ;;  %3845 = vrsqrt.f32 %v1345_v23 }
 0x6a0   :  { %v1340_v56 = vmax.f32 %v1332_v35, 0.0  ;;  %v1327_v37 = vsub.f32 %v1311_v59, %v1319_v18  ;;  %v1312_v4 = vmul.f32 0.00390625, %v1296_v2 }
 0x6a1   :  { %v1239_v41 = vpop.xlane.xlu0 %1238 }
 0x6a2   :  { %v1348_v54 = vadd.f32 1e-05, %v1340_v56  ;;  %v1335_v0 = vmax.f32 %v1327_v37, 0.0  ;;  %v1328_v5 = vsub.f32 %v1312_v4, %v1320_v3  ;;  %v1261_v46 = vmul.f32 0.00390625, %v1239_v41 }
 0x6a3   :  { %v1242_v26 = vpop.xlane.xlu1 %1241 }
 0x6a4   :  { %3847 = vrsqrt.f32 %v1348_v54  ;;  %v1343_v21 = vadd.f32 1e-05, %v1335_v0  ;;  %v1336_v11 = vmax.f32 %v1328_v5, 0.0  ;;  %v1262_v31 = vmul.f32 0.00390625, %v1242_v26 }
 0x6a5   :  { %v1287_v6 = vpop.xlane.xlu0 %1286  ;;  %v1317_v44 = vmul.f32 %v1261_v46, %v1261_v46  ;;  %v3842_v29 = vpop.eup %3841 }
 0x6a6   :  { %v1344_v13 = vadd.f32 1e-05, %v1336_v11  ;;  %v1309_v28 = vmul.f32 0.00390625, %v1287_v6  ;;  %3849 = vrsqrt.f32 %v1343_v21  ;;  %v1318_v15 = vmul.f32 %v1262_v31, %v1262_v31 }
 0x6a7   :  { %v1290_v19 = vpop.xlane.xlu1 %1289  ;;  %v1362_v37 = vmul.f32 %v4453_v57, %v3842_v29 }
 0x6a8   :  { %3851 = vrsqrt.f32 %v1344_v13  ;;  %v1325_v36 = vsub.f32 %v1309_v28, %v1317_v44  ;;  %v1310_v16 = vmul.f32 0.00390625, %v1290_v19 }
 0x6a9   :  { %v1370_v54 = vmul.f32 %v1362_v37, %v4637_v43 }
 0x6aa   :  { %v1333_v20 = vmax.f32 %v1325_v36, 0.0  ;;  %v1326_v18 = vsub.f32 %v1310_v16, %v1318_v15 }
 0x6ab   :  { %v3844_v35 = vpop.eup %3843 }
 0x6ac   :  { %v1363_v59 = vmul.f32 %v4447_v49, %v3844_v35  ;;  %v1341_v23 = vadd.f32 1e-05, %v1333_v20  ;;  %v1334_v2 = vmax.f32 %v1326_v18, 0.0  ;;  %v3846_v4 = vpop.eup %3845 }
 0x6ae   :  { %v1371_v3 = vmul.f32 %v1363_v59, %v1267_v38  ;;  %3853 = vrsqrt.f32 %v1341_v23  ;;  %v1342_v56 = vadd.f32 1e-05, %v1334_v2  ;;  %v1361_v38 = vmul.f32 %v4469_v55, %v3846_v4 }
 0x6b0   :  { %3855 = vrsqrt.f32 %v1342_v56  ;;  %1393 = vrot.lane.b32.xlu0 %v1371_v3, %s3943_s0  ;;  %v1369_v13 = vmul.f32 %v1361_v38, %v4641_v32  ;;  %v5605_v32 = vmov 5  }
 0x6b1   :  { %v3848_v41 = vpop.eup %3847 }
 0x6b2   :  { %v1364_v0 = vmul.f32 %v4461_v30, %v3848_v41 }
 0x6b3   :  { %v3850_v5 = vpop.eup %3849 }
 0x6b4   :  { %1391 = vrot.lane.b32.xlu0 %v1370_v54, %s3943_s0  ;;  %v1372_v26 = vmul.f32 %v1364_v0, %v4645_v22  ;;  %v1359_v44 = vmul.f32 %v4484_v9, %v3850_v5 }
 0x6b5   :  { %v3852_v21 = vpop.eup %3851 }
 0x6b6   :  { %1395 = vrot.lane.b32.xlu1 %v1372_v26, %s3943_s0  ;;  %v1360_v11 = vmul.f32 %v4476_v61, %v3852_v21  ;;  %v1367_v28 = vmul.f32 %v1359_v44, %v4647_v8 }
 0x6b8   :  { %v1368_v6 = vmul.f32 %v1360_v11, %v1264_v47 }
 0x6ba   :  { %1387 = vrot.lane.b32.xlu0 %v1368_v6, %s3943_s0  ;;  %1389 = vrot.lane.b32.xlu1 %v1369_v13, %s3943_s0 }
 0x6bb   :  { %v3854_v43 = vpop.eup %3853 }
 0x6bc   :  { %v1357_v22 = vmul.f32 %v4493_v7, %v3854_v43 }
 0x6bd   :  { %v3856_v19 = vpop.eup %3855 }
 0x6be   :  { %1385 = vrot.lane.b32.xlu1 %v1367_v28, %s3943_s0  ;;  %v1358_v15 = vmul.f32 %v4500_v27, %v3856_v19  ;;  %v1365_v47 = vmul.f32 %v1357_v22, %v1261_v46 }
 0x6c0   :  { %v1366_v36 = vmul.f32 %v1358_v15, %v1262_v31 }
 0x6c2   :  { %1383 = vrot.lane.b32.xlu0 %v1366_v36, %s3943_s0  ;;  %1381 = vrot.lane.b32.xlu1 %v1365_v47, %s3943_s0 }
 0x6c6   :  { %1450 = vperm.xlu0 %3748, %v1364_v0   ;;  %1445 = vperm.xlu1 %3747, %v1363_v59  }
 0x6ca   :  { %1435 = vperm.xlu0 %3748, %v1361_v38   ;;  %1440 = vperm.xlu1 %3747, %v1362_v37  }
 0x6ce   :  { %1430 = vperm.xlu0 %3748, %v1360_v11   ;;  %1425 = vperm.xlu1 %3747, %v1359_v44  }
 0x6d2   :  { %3750 = vset.pattern.permute.xlu0 %v5605_v32  ;;  %3749 = vset.pattern.permute.xlu1 %v5605_v32 }
 0x722   :  { %v1394_v16 = vpop.permute.xlu0 %1393 }
 0x723   :  { %v1411_v2 = vsub.f32 %v4447_v49, %v1394_v16 }
 0x726   :  { %v1392_v18 = vpop.permute.xlu0 %1391 }
 0x727   :  { %v1410_v59 = vsub.f32 %v4453_v57, %v1392_v18 }
 0x728   :  { %v1396_v8 = vpop.permute.xlu1 %1395 }
 0x72c   :  { %v1390_v29 = vpop.permute.xlu1 %1389 }
 0x72d   :  { %v1409_v46 = vsub.f32 %v4469_v55, %v1390_v29  ;;  %v1412_v55 = vsub.f32 %v4461_v30, %v1396_v8 }
 0x72f   :  { %1491 = vperm.xlu0 %3750, %v1409_v46  }
 0x730   :  { %v1386_v31 = vpop.permute.xlu1 %1385 }
 0x731   :  { %v1407_v20 = vsub.f32 %v4484_v9, %v1386_v31  ;;  %v1388_v9 = vpop.permute.xlu0 %1387 }
 0x732   :  { %v1408_v3 = vsub.f32 %v4476_v61, %v1388_v9 }
 0x733   :  { %3751 = vset.pattern.permute.xlu0 %v5604_v33  ;;  %1481 = vperm.xlu1 %3749, %v1407_v20  }
 0x734   :  { %1415 = vperm.xlu0 %3751, %v1357_v22   ;;  %v1382_v35 = vpop.permute.xlu1 %1381 }
 0x735   :  { %v1405_v23 = vsub.f32 %v4493_v7, %v1382_v35  ;;  %v1384_v56 = vpop.permute.xlu0 %1383 }
 0x736   :  { %v1406_v57 = vsub.f32 %v4500_v27, %v1384_v56 }
 0x737   :  { %1496 = vperm.xlu1 %3749, %v1410_v59  }
 0x738   :  { %3753 = vset.pattern.permute.xlu0 %v5605_v32 }
 0x739   :  { %1471 = vperm.xlu0 %3753, %v1405_v23  }
 0x73b   :  { %1501 = vperm.xlu1 %3749, %v1411_v2  }
 0x73f   :  { %1506 = vperm.xlu1 %3749, %v1412_v55  }
 0x741   :  { %v1446_v7 = vpop.permute.xlu1 %1445  ;;  %v1451_v37 = vpop.permute.xlu0 %1450 }
 0x742   :  { %v1465_v26 = vmul.f32 %v1446_v7, %v4589_v58  ;;  %v1466_v38 = vmul.f32 %v1446_v7, %v4595_v40  ;;  %v1467_v6 = vmul.f32 %v1451_v37, %v4599_v60  ;;  %v1468_v13 = vmul.f32 %v1451_v37, %v4601_v10 }
 0x743   :  { %1486 = vperm.xlu1 %3749, %v1408_v3  }
 0x745   :  { %v1441_v49 = vpop.permute.xlu1 %1440  ;;  %v1436_v41 = vpop.permute.xlu0 %1435 }
 0x746   :  { %v1464_v61 = vmul.f32 %v1441_v49, %v4583_v50  ;;  %v1462_v27 = vmul.f32 %v1436_v41, %v4573_v63  ;;  %v1463_v28 = vmul.f32 %v1441_v49, %v4579_v52  ;;  %v1461_v50 = vmul.f32 %v1436_v41, %v4571_v45 }
 0x747   :  { %3752 = vset.pattern.permute.xlu1 %v5604_v33 }
 0x748   :  { %1420 = vperm.xlu1 %3752, %v1358_v15  }
 0x749   :  { %v1426_v4 = vpop.permute.xlu1 %1425  ;;  %v1431_v0 = vpop.permute.xlu0 %1430 }
 0x74a   :  { %v1458_v40 = vmul.f32 %v1426_v4, %v4565_v62  ;;  %v1460_v36 = vmul.f32 %v1431_v0, %v4569_v48  ;;  %v1459_v29 = vmul.f32 %v1431_v0, %v4567_v53  ;;  %v1457_v62 = vmul.f32 %v1426_v4, %v4563_v42 }
 0x74c   :  { %3754 = vset.pattern.permute.xlu1 %v5605_v32 }
 0x74d   :  { %1476 = vperm.xlu1 %3754, %v1406_v57  }
 0x7aa   :  { %v1492_v21 = vpop.permute.xlu0 %1491 }
 0x7ab   :  { %v1518_v22 = vadd.f32 %v1492_v21, %v1462_v27  ;;  %v1517_v46 = vadd.f32 %v1492_v21, %v1461_v50  ;;  %v3804_v50 = vld [vmem:[%s5596_s3 + $0x78] sm:$0xff]  }
 0x7ad   :  { %v1534_v52 = vmax.f32 %v1518_v22, 0.0  ;;  %v1533_v9 = vmax.f32 %v1517_v46, 0.0  ;;  %v3802_v22 = vld [vmem:[%s5596_s3 + $0x68] sm:$0xff]  }
 0x7ae   :  { %v1482_v30 = vpop.permute.xlu1 %1481 }
 0x7af   :  { %v1416_v31 = vpop.permute.xlu0 %1415  ;;  %v1514_v18 = vadd.f32 %v1482_v30, %v1458_v40  ;;  %v1513_v3 = vadd.f32 %v1482_v30, %v1457_v62 }
 0x7b0   :  { %v1453_v37 = vmul.f32 %v1416_v31, %v4555_v34  ;;  %v1454_v41 = vmul.f32 %v1416_v31, %v4557_v14 }
 0x7b1   :  { %v1530_v56 = vmax.f32 %v1514_v18, 0.0  ;;  %v1529_v42 = vmax.f32 %v1513_v3, 0.0 }
 0x7b2   :  { %v1497_v54 = vpop.permute.xlu1 %1496 }
 0x7b3   :  { %v1520_v11 = vadd.f32 %v1497_v54, %v1464_v61  ;;  %v1519_v63 = vadd.f32 %v1497_v54, %v1463_v28  ;;  %v3801_v28 = vld [vmem:[%s5596_s3 + $0x60] sm:$0xff]  }
 0x7b4   :  { %v1472_v7 = vpop.permute.xlu0 %1471 }
 0x7b5   :  { %v1536_v47 = vmax.f32 %v1520_v11, 0.0  ;;  %v1535_v23 = vmax.f32 %v1519_v63, 0.0  ;;  %v1509_v4 = vadd.f32 %v1472_v7, %v1453_v37  ;;  %v1510_v0 = vadd.f32 %v1472_v7, %v1454_v41 }
 0x7b6   :  { %v1502_v5 = vpop.permute.xlu1 %1501 }
 0x7b7   :  { %v1521_v44 = vadd.f32 %v1502_v5, %v1465_v26  ;;  %v1522_v43 = vadd.f32 %v1502_v5, %v1466_v38  ;;  %v1546_v55 = vpack.c.bf16 %v1536_v47, %v1534_v52  ;;  %v1545_v57 = vpack.c.bf16 %v1535_v23, %v1533_v9 }
 0x7b8   :  { %v1525_v27 = vmax.f32 %v1509_v4, 0.0  ;;  %v1526_v11 = vmax.f32 %v1510_v0, 0.0 }
 0x7b9   :  { %v1537_v8 = vmax.f32 %v1521_v44, 0.0  ;;  %v1538_v60 = vmax.f32 %v1522_v43, 0.0  ;;  %v3797_v44 = vld [vmem:[%s5596_s3 + $0x40] sm:$0xff]   ;;  %v3800_v43 = vld [vmem:[%s5596_s3 + $0x58] sm:$0xff]  }
 0x7ba   :  { %v1507_v19 = vpop.permute.xlu1 %1506 }
 0x7bb   :  { %v1523_v15 = vadd.f32 %v1507_v19, %v1467_v6  ;;  %v1524_v58 = vadd.f32 %v1507_v19, %v1468_v13  ;;  %v3803_v19 = vld [vmem:[%s5596_s3 + $0x70] sm:$0xff]  }
 0x7bd   :  { %v1539_v16 = vmax.f32 %v1523_v15, 0.0  ;;  %v1540_v10 = vmax.f32 %v1524_v58, 0.0 }
 0x7be   :  { %v1487_v20 = vpop.permute.xlu1 %1486 }
 0x7bf   :  { %v1547_v45 = vpack.c.bf16 %v1539_v16, %v1537_v8  ;;  %v1516_v35 = vadd.f32 %v1487_v20, %v1460_v36  ;;  %v1548_v59 = vpack.c.bf16 %v1540_v10, %v1538_v60  ;;  %v1515_v48 = vadd.f32 %v1487_v20, %v1459_v29 }
 0x7c1   :  { %v1532_v2 = vmax.f32 %v1516_v35, 0.0  ;;  %1621 = vmatprep.subr.bf16.mxu0 %v1548_v59  ;;  %v1531_v49 = vmax.f32 %v1515_v48, 0.0 }
 0x7c2   :  { %1622 = vmatpush1.bf16.msra.mxu0 %v1547_v45 }
 0x7c3   :  { %v1421_v53 = vpop.permute.xlu1 %1420  ;;  %1623 = vmatprep.subr.bf16.mxu0 %v1546_v55  ;;  %v1544_v54 = vpack.c.bf16 %v1532_v2, %v1530_v56  ;;  %v1543_v5 = vpack.c.bf16 %v1531_v49, %v1529_v42 }
 0x7c4   :  { %v1455_v61 = vmul.f32 %v1421_v53, %v4559_v51  ;;  %v1456_v30 = vmul.f32 %v1421_v53, %v4561_v12  ;;  %v3798_v51 = vld [vmem:[%s5596_s3 + $0x48] sm:$0xff]   ;;  %v3799_v12 = vld [vmem:[%s5596_s3 + $0x50] sm:$0xff]  }
 0x7c6   :  { %1624 = vmatpush1.bf16.msra.mxu0 %v1545_v57 }
 0x7c7   :  { %1625 = vmatprep.subr.bf16.mxu0 %v1544_v54 }
 0x7c8   :  { %v1477_v26 = vpop.permute.xlu1 %1476 }
 0x7c9   :  { %v1511_v38 = vadd.f32 %v1477_v26, %v1455_v61  ;;  %v1512_v21 = vadd.f32 %v1477_v26, %v1456_v30 }
 0x7ca   :  { %1626 = vmatpush1.bf16.msra.mxu0 %v1543_v5 }
 0x7cb   :  { %v1527_v34 = vmax.f32 %v1511_v38, 0.0  ;;  %v1528_v6 = vmax.f32 %v1512_v21, 0.0 }
 0x7cd   :  { %v1541_v14 = vpack.c.bf16 %v1527_v34, %v1525_v27  ;;  %v1542_v13 = vpack.c.bf16 %v1528_v6, %v1526_v11 }
 0x7cf   :  { %1627 = vmatprep.subr.bf16.mxu0 %v1542_v13 }
 0x7d0   :  { %1628 = vmatpush1.bf16.msra.mxu0 %v1541_v14 }
 0x7d3   :  { %3583 = vmatmul.mubr.msk.bf16.vlgmr.msra.gmra.mxu0 %vm734_vm0, %v3797_v44 }
 0x7d4   :  { %1655 = vmatprep.mubr.bf16.mxu0 %v5612_v17 }
 0x7db   :  { %3584 = vmatmul.mubr.msk.bf16.gmra.mxu0 %vm734_vm0, %v3798_v51 }
 0x7dc   :  { %1665 = vmatprep.mubr.bf16.mxu0 %v5612_v17 }
 0x7e3   :  { %3585 = vmatmul.mubr.msk.bf16.gmra.mxu0 %vm734_vm0, %v3799_v12 }
 0x7e4   :  { %1675 = vmatprep.mubr.bf16.mxu0 %v5612_v17 }
 0x7eb   :  { %3586 = vmatmul.mubr.msk.bf16.gmra.mxu0 %vm734_vm0, %v3800_v43 }
 0x7ec   :  { %1685 = vmatprep.mubr.bf16.mxu0 %v5612_v17 }
 0x7f3   :  { %3587 = vmatmul.mubr.msk.bf16.gmra.mxu0 %vm734_vm0, %v3801_v28 }
 0x7f4   :  { %1695 = vmatprep.mubr.bf16.mxu0 %v5612_v17 }
 0x7fb   :  { %3588 = vmatmul.mubr.msk.bf16.gmra.mxu0 %vm734_vm0, %v3802_v22 }
 0x7fc   :  { %1705 = vmatprep.mubr.bf16.mxu0 %v5612_v17 }
 0x803   :  { %3589 = vmatmul.mubr.msk.bf16.gmra.mxu0 %vm734_vm0, %v3803_v19 }
 0x804   :  { %1715 = vmatprep.mubr.bf16.mxu0 %v5612_v17 }
 0x80b   :  { %3590 = vmatmul.mubr.msk.bf16.gmra.mxu0 %vm734_vm0, %v3804_v50 }
 0x893   :  { %v4742_v15 = vpop.f32.mrf.mxu0 }
 0x894   :  { %5629 = vst [vmem:[#allocation3_spill] sm:$0xff] %v4742_v15 }
 0x895   :  { %v4744_v58 = vpop.f32.mrf.mxu0 }
 0x896   :  { %5630 = vst [vmem:[#allocation4_spill] sm:$0xff] %v4744_v58 }
 0x897   :  { %v4746_v40 = vpop.f32.mrf.mxu0 }
 0x898   :  { %5631 = vst [vmem:[#allocation5_spill] sm:$0xff] %v4746_v40 }
 0x899   :  { %v4748_v36 = vpop.f32.mrf.mxu0 }
 0x89a   :  { %5632 = vst [vmem:[#allocation6_spill] sm:$0xff] %v4748_v36 }
 0x89b   :  { %v4750_v63 = vpop.f32.mrf.mxu0 }
 0x89c   :  { %5633 = vst [vmem:[#allocation7_spill] sm:$0xff] %v4750_v63 }
 0x89d   :  { %v4752_v47 = vpop.f32.mrf.mxu0 }
 0x89e   :  { %5634 = vst [vmem:[#allocation8_spill] sm:$0xff] %v4752_v47 }
 0x89f   :  { %v4754_v8 = vpop.f32.mrf.mxu0 }
 0x8a0   :  { %5635 = vst [vmem:[#allocation9_spill] sm:$0xff] %v4754_v8 }
 0x8a1   :  { %v4756_v60 = vpop.f32.mrf.mxu0 }
 0x8a2   :  { %5636 = vst [vmem:[#allocation10_spill] sm:$0xff] %v4756_v60 }
 0x8a3   :  { %v4758_v16 = vpop.f32.mrf.mxu0 }
 0x8a4   :  { %5637 = vst [vmem:[#allocation11_spill] sm:$0xff] %v4758_v16 }
 0x8a5   :  { %v4760_v10 = vpop.f32.mrf.mxu0 }
 0x8a7   :  { %v4762_v29 = vpop.f32.mrf.mxu0 }
 0x8a8   :  { %5638 = vst [vmem:[#allocation12_spill] sm:$0xff] %v4762_v29 }
 0x8a9   :  { %v4764_v46 = vpop.f32.mrf.mxu0 }
 0x8ab   :  { %v4766_v52 = vpop.f32.mrf.mxu0 }
 0x8ac   :  { %5639 = vst [vmem:[#allocation13_spill] sm:$0xff] %v4766_v52 }
 0x8ad   :  { %v4768_v31 = vpop.f32.mrf.mxu0 }
 0x8af   :  { %v4770_v20 = vpop.f32.mrf.mxu0 }
 0x8b1   :  { %v4772_v18 = vpop.f32.mrf.mxu0 }
 0x8b3   :  { %v4774_v45 = vpop.f32.mrf.mxu0 }
 0x8b4   :  { %v1806_v48 = vmul.f32 %v4774_v45, %v4774_v45 }
 0x8b5   :  { %v4776_v35 = vpop.f32.mrf.mxu0 }
 0x8b6   :  { %v1750_v59 = vadd.f32 %v4776_v35, %v4774_v45  ;;  %v1807_v62 = vmul.f32 %v4776_v35, %v4776_v35 }
 0x8b7   :  { %v4782_v23 = vpop.f32.mrf.mxu0 }
 0x8b8   :  { %1751 = vadd.xlane.f32.xlu0 %v1750_v59  ;;  %v1846_v3 = vadd.f32 %v1807_v62, %v1806_v48  ;;  %v1808_v53 = vmul.f32 %v4782_v23, %v4782_v23 }
 0x8b9   :  { %v4786_v2 = vpop.f32.mrf.mxu0 }
 0x8ba   :  { %v1753_v55 = vadd.f32 %v4786_v2, %v4782_v23  ;;  %v1809_v9 = vmul.f32 %v4786_v2, %v4786_v2 }
 0x8bb   :  { %v4792_v56 = vpop.f32.mrf.mxu0 }
 0x8bc   :  { %1847 = vadd.xlane.f32.xlu0 %v1846_v3  ;;  %1754 = vadd.xlane.f32.xlu1 %v1753_v55  ;;  %v1849_v37 = vadd.f32 %v1809_v9, %v1808_v53  ;;  %v1810_v54 = vmul.f32 %v4792_v56, %v4792_v56  ;;  %v1747_v9 = vadd.f32 %v4772_v18, %v4770_v20 }
 0x8bd   :  { %v4796_v57 = vpop.f32.mrf.mxu0  ;;  %v1744_v53 = vadd.f32 %v4768_v31, %v4766_v52 }
 0x8be   :  { %v1756_v7 = vadd.f32 %v4796_v57, %v4792_v56  ;;  %v1811_v49 = vmul.f32 %v4796_v57, %v4796_v57 }
 0x8bf   :  { %v4802_v41 = vpop.f32.mrf.mxu0 }
 0x8c0   :  { %1850 = vadd.xlane.f32.xlu1 %v1849_v37  ;;  %1757 = vadd.xlane.f32.xlu0 %v1756_v7  ;;  %v1852_v61 = vadd.f32 %v1811_v49, %v1810_v54  ;;  %v1812_v5 = vmul.f32 %v4802_v41, %v4802_v41  ;;  %v1803_v7 = vmul.f32 %v4768_v31, %v4768_v31 }
 0x8c1   :  { %v4806_v42 = vpop.f32.mrf.mxu0  ;;  %v1802_v37 = vmul.f32 %v4766_v52, %v4766_v52  ;;  %v1805_v54 = vmul.f32 %v4772_v18, %v4772_v18 }
 0x8c2   :  { %v1759_v4 = vadd.f32 %v4806_v42, %v4802_v41  ;;  %v1813_v0 = vmul.f32 %v4806_v42, %v4806_v42 }
 0x8c3   :  { %v4812_v30 = vpop.f32.mrf.mxu0 }
 0x8c4   :  { %1853 = vadd.xlane.f32.xlu0 %v1852_v61  ;;  %1760 = vadd.xlane.f32.xlu1 %v1759_v4  ;;  %v1855_v27 = vadd.f32 %v1813_v0, %v1812_v5  ;;  %v1814_v34 = vmul.f32 %v4812_v30, %v4812_v30  ;;  %v1804_v0 = vmul.f32 %v4770_v20, %v4770_v20 }
 0x8c5   :  { %v4816_v26 = vpop.f32.mrf.mxu0  ;;  %v1840_v61 = vadd.f32 %v1803_v7, %v1802_v37  ;;  %v1791_v7 = vmul.f32 %v4744_v58, %v4744_v58  ;;  %v1729_v37 = vadd.f32 %v4748_v36, %v4746_v40 }
 0x8c6   :  { %v1762_v38 = vadd.f32 %v4816_v26, %v4812_v30  ;;  %v1815_v21 = vmul.f32 %v4816_v26, %v4816_v26  ;;  %v1843_v5 = vadd.f32 %v1805_v54, %v1804_v0  ;;  %v1793_v54 = vmul.f32 %v4748_v36, %v4748_v36 }
 0x8c7   :  { %v4822_v11 = vpop.f32.mrf.mxu0 }
 0x8c8   :  { %1856 = vadd.xlane.f32.xlu1 %v1855_v27  ;;  %1763 = vadd.xlane.f32.xlu0 %v1762_v38  ;;  %v1858_v44 = vadd.f32 %v1815_v21, %v1814_v34  ;;  %v1816_v12 = vmul.f32 %v4822_v11, %v4822_v11  ;;  %v1738_v38 = vadd.f32 %v4760_v10, %v4758_v16 }
 0x8c9   :  { %v4826_v6 = vpop.f32.mrf.mxu0  ;;  %v1799_v21 = vmul.f32 %v4760_v10, %v4760_v10  ;;  %v1798_v27 = vmul.f32 %v4758_v16, %v4758_v16  ;;  %v1741_v34 = vadd.f32 %v4764_v46, %v4762_v29 }
 0x8ca   :  { %v1765_v14 = vadd.f32 %v4826_v6, %v4822_v11  ;;  %v1817_v13 = vmul.f32 %v4826_v6, %v4826_v6 }
 0x8cb   :  { %v4832_v51 = vpop.f32.mrf.mxu0 }
 0x8cc   :  { %v1818_v43 = vmul.f32 %v4832_v51, %v4832_v51  ;;  %1859 = vadd.xlane.f32.xlu0 %v1858_v44  ;;  %1766 = vadd.xlane.f32.xlu1 %v1765_v14  ;;  %v1861_v19 = vadd.f32 %v1817_v13, %v1816_v12  ;;  %v1801_v14 = vmul.f32 %v4764_v46, %v4764_v46 }
 0x8cd   :  { %v4838_v28 = vpop.f32.mrf.mxu0  ;;  %v1800_v13 = vmul.f32 %v4762_v29, %v4762_v29  ;;  %v1834_v44 = vadd.f32 %v1799_v21, %v1798_v27 }
 0x8ce   :  { %v1819_v22 = vmul.f32 %v4838_v28, %v4838_v28  ;;  %v1768_v48 = vadd.f32 %v4838_v28, %v4832_v51 }
 0x8cf   :  { %v4842_v50 = vpop.f32.mrf.mxu0  ;;  %v1837_v12 = vadd.f32 %v1801_v14, %v1800_v13 }
 0x8d0   :  { %1862 = vadd.xlane.f32.xlu1 %v1861_v19  ;;  %v1864_v59 = vadd.f32 %v1819_v22, %v1818_v43  ;;  %v1820_v49 = vmul.f32 %v4842_v50, %v4842_v50  ;;  %v1732_v43 = vadd.f32 %v4752_v47, %v4750_v63  ;;  %v1795_v22 = vmul.f32 %v4752_v47, %v4752_v47 }
 0x8d1   :  { %v4844_v62 = vpop.f32.mrf.mxu0  ;;  %v1794_v19 = vmul.f32 %v4750_v63, %v4750_v63 }
 0x8d2   :  { %1865 = vadd.xlane.f32.xlu0 %v1864_v59  ;;  %v1771_v55 = vadd.f32 %v4844_v62, %v4842_v50  ;;  %v1821_v3 = vmul.f32 %v4844_v62, %v4844_v62  ;;  %v1735_v59 = vadd.f32 %v4756_v60, %v4754_v8 }
 0x8d4   :  { %1769 = vadd.xlane.f32.xlu1 %v1768_v48  ;;  %v1867_v4 = vadd.f32 %v1821_v3, %v1820_v49  ;;  %v1797_v48 = vmul.f32 %v4756_v60, %v4756_v60  ;;  %v1790_v49 = vmul.f32 %v4742_v15, %v4742_v15 }
 0x8d6   :  { %1772 = vadd.xlane.f32.xlu0 %v1771_v55  ;;  %v1796_v55 = vmul.f32 %v4754_v8, %v4754_v8  ;;  %v1822_v0 = vadd.f32 %v1791_v7, %v1790_v49 }
 0x8d8   :  { %1748 = vadd.xlane.f32.xlu1 %v1747_v9  ;;  %v1828_v9 = vadd.f32 %v1795_v22, %v1794_v19  ;;  %v1831_v3 = vadd.f32 %v1797_v48, %v1796_v55 }
 0x8da   :  { %1745 = vadd.xlane.f32.xlu0 %v1744_v53  ;;  %v1726_v53 = vadd.f32 %v4744_v58, %v4742_v15 }
 0x8dc   :  { %1868 = vadd.xlane.f32.xlu1 %v1867_v4  ;;  %v1792_v4 = vmul.f32 %v4746_v40, %v4746_v40 }
 0x8de   :  { %1841 = vadd.xlane.f32.xlu0 %v1840_v61  ;;  %v1825_v61 = vadd.f32 %v1793_v54, %v1792_v4 }
 0x8e0   :  { %1844 = vadd.xlane.f32.xlu1 %v1843_v5  ;;  %v5614_v5 = vmov 6  }
 0x8e1   :  { %3755 = vset.pattern.permute.xlu1 %v5614_v5 }
 0x8e2   :  { %1739 = vadd.xlane.f32.xlu0 %v1738_v38 }
 0x8e4   :  { %1742 = vadd.xlane.f32.xlu1 %v1741_v34 }
 0x8e6   :  { %1835 = vadd.xlane.f32.xlu0 %v1834_v44 }
 0x8e8   :  { %1838 = vadd.xlane.f32.xlu1 %v1837_v12 }
 0x8ea   :  { %1733 = vadd.xlane.f32.xlu0 %v1732_v43 }
 0x8ec   :  { %1736 = vadd.xlane.f32.xlu1 %v1735_v59 }
 0x8ee   :  { %1829 = vadd.xlane.f32.xlu0 %v1828_v9 }
 0x8f0   :  { %1832 = vadd.xlane.f32.xlu1 %v1831_v3 }
 0x8f2   :  { %1727 = vadd.xlane.f32.xlu0 %v1726_v53 }
 0x8f4   :  { %1730 = vadd.xlane.f32.xlu1 %v1729_v37 }
 0x8f6   :  { %1823 = vadd.xlane.f32.xlu0 %v1822_v0 }
 0x8f8   :  { %1826 = vadd.xlane.f32.xlu1 %v1825_v61 }
 0x941   :  { %v1752_v38 = vpop.xlane.xlu0 %1751 }
 0x942   :  { %v4905_v22 = vmul.f32 0.00390625, %v1752_v38 }
 0x944   :  { %v1894_v53 = vmul.f32 %v4905_v22, %v4905_v22 }
 0x945   :  { %v1848_v21 = vpop.xlane.xlu0 %1847  ;;  %v1755_v27 = vpop.xlane.xlu1 %1754 }
 0x946   :  { %v1878_v55 = vmul.f32 0.00390625, %v1848_v21 }
 0x948   :  { %v1910_v37 = vsub.f32 %v1878_v55, %v1894_v53  ;;  %v4921_v53 = vmul.f32 0.00390625, %v1755_v27 }
 0x949   :  { %v1851_v34 = vpop.xlane.xlu1 %1850  ;;  %v1758_v14 = vpop.xlane.xlu0 %1757 }
 0x94a   :  { %v4903_v13 = vmul.f32 0.00390625, %v1758_v14 }
 0x94c   :  { %v1896_v19 = vmul.f32 %v4903_v13, %v4903_v13 }
 0x94d   :  { %v1854_v44 = vpop.xlane.xlu0 %1853  ;;  %v1761_v12 = vpop.xlane.xlu1 %1760 }
 0x94e   :  { %v1880_v43 = vmul.f32 0.00390625, %v1854_v44  ;;  %v4917_v14 = vmul.f32 0.00390625, %v1761_v12  ;;  %v1926_v44 = vmax.f32 %v1910_v37, 0.0 }
 0x950   :  { %v1912_v3 = vsub.f32 %v1880_v43, %v1896_v19  ;;  %v1942_v12 = vadd.f32 1e-05, %v1926_v44 }
 0x951   :  { %v1857_v59 = vpop.xlane.xlu1 %1856  ;;  %v1764_v48 = vpop.xlane.xlu0 %1763 }
 0x952   :  { %v4909_v9 = vmul.f32 0.00390625, %v1764_v48  ;;  %v1928_v61 = vmax.f32 %v1912_v3, 0.0  ;;  %v1881_v33 = vmul.f32 0.00390625, %v1857_v59  ;;  %v1897_v3 = vmul.f32 %v4917_v14, %v4917_v14 }
 0x953   :  { %v1895_v59 = vmul.f32 %v4921_v53, %v4921_v53 }
 0x954   :  { %v1898_v54 = vmul.f32 %v4909_v9, %v4909_v9  ;;  %v1944_v1 = vadd.f32 1e-05, %v1928_v61 }
 0x955   :  { %v1860_v7 = vpop.xlane.xlu0 %1859  ;;  %v1767_v49 = vpop.xlane.xlu1 %1766 }
 0x956   :  { %v1882_v4 = vmul.f32 0.00390625, %v1860_v7  ;;  %v4915_v0 = vmul.f32 0.00390625, %v1767_v49 }
 0x958   :  { %v1914_v38 = vsub.f32 %v1882_v4, %v1898_v54  ;;  %v1899_v43 = vmul.f32 %v4915_v0, %v4915_v0  ;;  %v1879_v54 = vmul.f32 0.00390625, %v1851_v34  ;;  %v1913_v4 = vsub.f32 %v1881_v33, %v1897_v3 }
 0x959   :  { %v1863_v21 = vpop.xlane.xlu1 %1862 }
 0x95a   :  { %v1930_v48 = vmax.f32 %v1914_v38, 0.0  ;;  %v1883_v19 = vmul.f32 0.00390625, %v1863_v21  ;;  %v1929_v44 = vmax.f32 %v1913_v4, 0.0 }
 0x95b   :  { %v1866_v55 = vpop.xlane.xlu0 %1865 }
 0x95c   :  { %v1946_v32 = vadd.f32 1e-05, %v1930_v48  ;;  %v1915_v7 = vsub.f32 %v1883_v19, %v1899_v43  ;;  %v1884_v27 = vmul.f32 0.00390625, %v1866_v55  ;;  %v1911_v43 = vsub.f32 %v1879_v54, %v1895_v59 }
 0x95d   :  { %v1770_v49 = vpop.xlane.xlu1 %1769  ;;  %v1945_v55 = vadd.f32 1e-05, %v1929_v44 }
 0x95e   :  { %3857 = vrsqrt.f32 %v1946_v32  ;;  %v4925_v37 = vmul.f32 0.00390625, %v1770_v49  ;;  %v1931_v38 = vmax.f32 %v1915_v7, 0.0  ;;  %v1927_v7 = vmax.f32 %v1911_v43, 0.0 }
 0x95f   :  { %3859 = vrsqrt.f32 %v1944_v1  ;;  %v1773_v21 = vpop.xlane.xlu0 %1772 }
 0x960   :  { %v1900_v61 = vmul.f32 %v4925_v37, %v4925_v37  ;;  %3861 = vrsqrt.f32 %v1942_v12  ;;  %v1947_v34 = vadd.f32 1e-05, %v1931_v38  ;;  %v4933_v1 = vmul.f32 0.00390625, %v1773_v21 }
 0x961   :  { %v1749_v48 = vpop.xlane.xlu1 %1748  ;;  %v1943_v21 = vadd.f32 1e-05, %v1927_v7 }
 0x962   :  { %v1916_v19 = vsub.f32 %v1884_v27, %v1900_v61  ;;  %v4935_v25 = vmul.f32 0.00390625, %v1749_v48  ;;  %3863 = vrsqrt.f32 %v1947_v34  ;;  %v1901_v4 = vmul.f32 %v4933_v1, %v4933_v1  ;;  %v4946_v48 = vld [vmem:[%s5592_s4 + $0x60] sm:$0xff] }
 0x963   :  { %v1746_v32 = vpop.xlane.xlu0 %1745 }
 0x964   :  { %v1932_v49 = vmax.f32 %v1916_v19, 0.0  ;;  %v4931_v24 = vmul.f32 0.00390625, %v1746_v32  ;;  %v1893_v59 = vmul.f32 %v4935_v25, %v4935_v25 }
 0x965   :  { %v1869_v33 = vpop.xlane.xlu1 %1868 }
 0x966   :  { %v1948_v3 = vadd.f32 1e-05, %v1932_v49  ;;  %v1885_v39 = vmul.f32 0.00390625, %v1869_v33  ;;  %v1892_v12 = vmul.f32 %v4931_v24, %v4931_v24  ;;  %v4953_v33 = vld [vmem:[%s5592_s4 + $0x50] sm:$0xff] }
 0x967   :  { %v1842_v17 = vpop.xlane.xlu0 %1841 }
 0x968   :  { %3865 = vrsqrt.f32 %v1948_v3  ;;  %v1876_v54 = vmul.f32 0.00390625, %v1842_v17  ;;  %v1917_v19 = vsub.f32 %v1885_v39, %v1901_v4 }
 0x969   :  { %v1845_v38 = vpop.xlane.xlu1 %1844  ;;  %3867 = vrsqrt.f32 %v1945_v55  ;;  %v5616_v55 = vmov 7  }
 0x96a   :  { %v1908_v27 = vsub.f32 %v1876_v54, %v1892_v12  ;;  %v1877_v61 = vmul.f32 0.00390625, %v1845_v38  ;;  %3869 = vrsqrt.f32 %v1943_v21  ;;  %3757 = vset.pattern.permute.xlu0 %v5616_v55  ;;  %v1933_v4 = vmax.f32 %v1917_v19, 0.0  ;;  %v4969_v21 = vld [vmem:[%s5592_s4 + $0x40] sm:$0xff] }
 0x96b   :  { %v3858_v43 = vpop.eup %3857  ;;  %v1740_v44 = vpop.xlane.xlu0 %1739 }
 0x96c   :  { %v3860_v17 = vpop.eup %3859  ;;  %v1924_v34 = vmax.f32 %v1908_v27, 0.0  ;;  %v1909_v32 = vsub.f32 %v1877_v61, %v1893_v59  ;;  %v4948_v49 = vmul.f32 0.00390625, %v1740_v44  ;;  %v4956_v3 = vmul.f32 %v3858_v43, %v4946_v48 }
 0x96d   :  { %v1743_v7 = vpop.xlane.xlu1 %1742  ;;  %v3862_v39 = vpop.eup %3861  ;;  %v4964_v61 = vmul.f32 %v3860_v17, %v4953_v33 }
 0x96e   :  { %v1940_v12 = vadd.f32 1e-05, %v1924_v34  ;;  %v1925_v54 = vmax.f32 %v1909_v32, 0.0  ;;  %v4959_v38 = vmul.f32 0.00390625, %v1743_v7  ;;  %v1994_v27 = vmul.f32 %v4956_v3, %v4909_v9 }
 0x96f   :  { %v1836_v59 = vpop.xlane.xlu0 %1835  ;;  %v1890_v44 = vmul.f32 %v4948_v49, %v4948_v49  ;;  %v4977_v7 = vmul.f32 %v3862_v39, %v4969_v21  ;;  %v4991_v39 = vld [vmem:[%s5592_s4 + $0x68] sm:$0xff] }
 0x970   :  { %3871 = vrsqrt.f32 %v1940_v12  ;;  %v1941_v43 = vadd.f32 1e-05, %v1925_v54  ;;  %v1874_v19 = vmul.f32 0.00390625, %v1836_v59  ;;  %2038 = vrot.lane.b32.xlu1 %v1994_v27, %s3943_s0  ;;  %v1891_v9 = vmul.f32 %v4959_v38, %v4959_v38  ;;  %v4982_v12 = vld [vmem:[%s5592_s4 + $0x70] sm:$0xff]  ;;  %v3864_v27 = vpop.eup %3863 }
 0x971   :  { %v1839_v34 = vpop.xlane.xlu1 %1838  ;;  %v1949_v54 = vadd.f32 1e-05, %v1933_v4  ;;  %v1992_v59 = vmul.f32 %v4964_v61, %v4903_v13  ;;  %v1990_v13 = vmul.f32 %v4977_v7, %v4905_v22  ;;  %v5011_v22 = vld [vmem:[%s5592_s4 + $0x58] sm:$0xff] }
 0x972   :  { %v1906_v32 = vsub.f32 %v1874_v19, %v1890_v44  ;;  %v1875_v17 = vmul.f32 0.00390625, %v1839_v34  ;;  %3873 = vrsqrt.f32 %v1941_v43 }
 0x973   :  { %v1734_v5 = vpop.xlane.xlu0 %1733  ;;  %3875 = vrsqrt.f32 %v1949_v54 }
 0x974   :  { %v1922_v55 = vmax.f32 %v1906_v32, 0.0  ;;  %v1907_v36 = vsub.f32 %v1875_v17, %v1891_v9  ;;  %v4986_v40 = vmul.f32 0.00390625, %v1734_v5  ;;  %2034 = vrot.lane.b32.xlu1 %v1992_v59, %s3943_s0  ;;  %v5004_v17 = vmul.f32 %v3864_v27, %v4991_v39 }
 0x975   :  { %v3866_v44 = vpop.eup %3865  ;;  %v1737_v19 = vpop.xlane.xlu1 %1736 }
 0x976   :  { %v4995_v4 = vmul.f32 %v3866_v44, %v4982_v12  ;;  %v1938_v43 = vadd.f32 1e-05, %v1922_v55  ;;  %v1923_v34 = vmax.f32 %v1907_v36, 0.0  ;;  %v1888_v5 = vmul.f32 %v4986_v40, %v4986_v40  ;;  %v3868_v59 = vpop.eup %3867 }
 0x977   :  { %v5001_v9 = vmul.f32 0.00390625, %v1737_v19  ;;  %v1830_v32 = vpop.xlane.xlu0 %1829 }
 0x978   :  { %v1996_v44 = vmul.f32 %v4995_v4, %v4925_v37  ;;  %3877 = vrsqrt.f32 %v1938_v43  ;;  %v1939_v55 = vadd.f32 1e-05, %v1923_v34  ;;  %v1872_v36 = vmul.f32 0.00390625, %v1830_v32  ;;  %2030 = vrot.lane.b32.xlu1 %v1990_v13, %s3943_s0  ;;  %v3870_v37 = vpop.eup %3869 }
 0x979   :  { %v1833_v54 = vpop.xlane.xlu1 %1832  ;;  %v1889_v27 = vmul.f32 %v5001_v9, %v5001_v9  ;;  %v5018_v34 = vmul.f32 %v3868_v59, %v5011_v22  ;;  %v1995_v13 = vmul.f32 %v5004_v17, %v4915_v0  ;;  %v5037_v0 = vld [vmem:[%s5592_s4 + $0x30] sm:$0xff] }
 0x97a   :  { %3879 = vrsqrt.f32 %v1939_v55  ;;  %v1904_v19 = vsub.f32 %v1872_v36, %v1888_v5  ;;  %v1873_v58 = vmul.f32 0.00390625, %v1833_v54  ;;  %2042 = vrot.lane.b32.xlu0 %v1996_v44, %s3943_s0  ;;  %v5027_v55 = vld [vmem:[%s5592_s4 + $0x48] sm:$0xff] }
 0x97b   :  { %v1728_v43 = vpop.xlane.xlu0 %1727 }
 0x97c   :  { %v1920_v32 = vmax.f32 %v1904_v19, 0.0  ;;  %v1905_v15 = vsub.f32 %v1873_v58, %v1889_v27  ;;  %v5020_v60 = vmul.f32 0.00390625, %v1728_v43  ;;  %v1993_v58 = vmul.f32 %v5018_v34, %v4917_v14 }
 0x97d   :  { %v3872_v5 = vpop.eup %3871  ;;  %v1731_v36 = vpop.xlane.xlu1 %1730  ;;  %v5043_v19 = vmul.f32 %v3870_v37, %v5027_v55  ;;  %v5056_v37 = vld [vmem:[%s5592_s4 + $0x38] sm:$0xff] }
 0x97e   :  { %v1936_v44 = vadd.f32 1e-05, %v1920_v32  ;;  %v1921_v54 = vmax.f32 %v1905_v15, 0.0  ;;  %v5029_v8 = vmul.f32 0.00390625, %v1731_v36  ;;  %2040 = vrot.lane.b32.xlu0 %v1995_v13, %s3943_s0  ;;  %v5040_v27 = vmul.f32 %v5037_v0, %v3872_v5 }
 0x97f   :  { %v1824_v59 = vpop.xlane.xlu0 %1823  ;;  %v3874_v15 = vpop.eup %3873  ;;  %v1886_v32 = vmul.f32 %v5020_v60, %v5020_v60 }
 0x980   :  { %3881 = vrsqrt.f32 %v1936_v44  ;;  %v1937_v43 = vadd.f32 1e-05, %v1921_v54  ;;  %v1870_v13 = vmul.f32 0.00390625, %v1824_v59  ;;  %v1988_v14 = vmul.f32 %v5040_v27, %v4931_v24  ;;  %v3876_v54 = vpop.eup %3875 }
 0x981   :  { %v1827_v36 = vpop.xlane.xlu1 %1826  ;;  %v1887_v47 = vmul.f32 %v5029_v8, %v5029_v8  ;;  %v5059_v44 = vmul.f32 %v5056_v37, %v3874_v15  ;;  %v5072_v15 = vld [vmem:[%s5592_s4 + $0x20] sm:$0xff] }
 0x982   :  { %3883 = vrsqrt.f32 %v1937_v43  ;;  %v1902_v5 = vsub.f32 %v1870_v13, %v1886_v32  ;;  %v1871_v63 = vmul.f32 0.00390625, %v1827_v36  ;;  %2036 = vrot.lane.b32.xlu0 %v1993_v58, %s3943_s0  ;;  %2026 = vrot.lane.b32.xlu1 %v1988_v14, %s3943_s0  ;;  %v1991_v43 = vmul.f32 %v5043_v19, %v4921_v53  ;;  %v5066_v58 = vld [vmem:[%s5592_s4 + $0x78] sm:$0xff] }
 0x983   :  { %v1989_v53 = vmul.f32 %v5059_v44, %v4935_v25  ;;  %v1981_v14 = vmul.f32 %v3876_v54, %v5066_v58 }
 0x984   :  { %v1918_v24 = vmax.f32 %v1902_v5, 0.0  ;;  %v1903_v59 = vsub.f32 %v1871_v63, %v1887_v47 }
 0x985   :  { %v3878_v32 = vpop.eup %3877  ;;  %v1997_v54 = vmul.f32 %v1981_v14, %v4933_v1  ;;  %v5110_v1 = vld [vmem:[%s5592_s4 + $0x18] sm:$0xff] }
 0x986   :  { %v1934_v13 = vadd.f32 1e-05, %v1918_v24  ;;  %v1919_v36 = vmax.f32 %v1903_v59, 0.0  ;;  %2032 = vrot.lane.b32.xlu0 %v1991_v43, %s3943_s0  ;;  %v5075_v63 = vmul.f32 %v5072_v15, %v3878_v32  ;;  %v5085_v59 = vld [vmem:[%s5592_s4 + $0x28] sm:$0xff] }
 0x987   :  { %v3880_v47 = vpop.eup %3879 }
 0x988   :  { %3885 = vrsqrt.f32 %v1934_v13  ;;  %v1935_v5 = vadd.f32 1e-05, %v1919_v36  ;;  %v1986_v24 = vmul.f32 %v5075_v63, %v4948_v49  ;;  %v5088_v43 = vmul.f32 %v5085_v59, %v3880_v47  ;;  %v5100_v49 = vld [vmem:[%s5592_s4 + $0x10] sm:$0xff] }
 0x98a   :  { %3887 = vrsqrt.f32 %v1935_v5  ;;  %2028 = vrot.lane.b32.xlu0 %v1989_v53, %s3943_s0  ;;  %2022 = vrot.lane.b32.xlu1 %v1986_v24, %s3943_s0  ;;  %v1987_v25 = vmul.f32 %v5088_v43, %v4959_v38  ;;  %v5119_v24 = vld [vmem:[%s5592_s4] sm:$0xff] }
 0x98d   :  { %v3882_v32 = vpop.eup %3881 }
 0x98e   :  { %2024 = vrot.lane.b32.xlu0 %v1987_v25, %s3943_s0  ;;  %2044 = vrot.lane.b32.xlu1 %v1997_v54, %s3943_s0  ;;  %v5103_v13 = vmul.f32 %v5100_v49, %v3882_v32  ;;  %v5126_v32 = vld [vmem:[%s5592_s4 + $0x8] sm:$0xff] }
 0x98f   :  { %v3884_v36 = vpop.eup %3883 }
 0x990   :  { %v1984_v47 = vmul.f32 %v5103_v13, %v4986_v40  ;;  %v1969_v38 = vmul.f32 %v5110_v1, %v3884_v36 }
 0x992   :  { %2018 = vrot.lane.b32.xlu1 %v1984_v47, %s3943_s0  ;;  %v1985_v53 = vmul.f32 %v1969_v38, %v5001_v9 }
 0x994   :  { %2020 = vrot.lane.b32.xlu0 %v1985_v53, %s3943_s0 }
 0x995   :  { %v3886_v5 = vpop.eup %3885 }
 0x996   :  { %v1966_v40 = vmul.f32 %v5119_v24, %v3886_v5 }
 0x997   :  { %v3888_v25 = vpop.eup %3887 }
 0x998   :  { %v1982_v54 = vmul.f32 %v1966_v40, %v5020_v60  ;;  %v5129_v9 = vmul.f32 %v5126_v32, %v3888_v25  ;;  %v5640_v60 = vmov 7  }
 0x99a   :  { %2014 = vrot.lane.b32.xlu1 %v1982_v54, %s3943_s0  ;;  %v1983_v36 = vmul.f32 %v5129_v9, %v5029_v8 }
 0x99c   :  { %2016 = vrot.lane.b32.xlu0 %v1983_v36, %s3943_s0 }
 0x99e   :  { %2150 = vperm.xlu1 %3755, %v4995_v4  }
 0x9a2   :  { %2145 = vperm.xlu1 %3755, %v5004_v17  }
 0x9a6   :  { %2130 = vperm.xlu1 %3755, %v4964_v61  }
 0x9aa   :  { %2125 = vperm.xlu1 %3755, %v5043_v19  }
 0x9ae   :  { %2110 = vperm.xlu1 %3755, %v5040_v27  }
 0x9b2   :  { %3756 = vset.pattern.permute.xlu1 %v5640_v60 }
 0x9e2   :  { %v2039_v47 = vpop.permute.xlu1 %2038 }
 0x9e3   :  { %v2074_v54 = vsub.f32 %v4946_v48, %v2039_v47 }
 0x9e6   :  { %v2035_v53 = vpop.permute.xlu1 %2034 }
 0x9e7   :  { %v2072_v48 = vsub.f32 %v4953_v33, %v2035_v53 }
 0x9ea   :  { %v2031_v5 = vpop.permute.xlu1 %2030 }
 0x9eb   :  { %v2070_v25 = vsub.f32 %v4969_v21, %v2031_v5  ;;  %v5641_v5 = vmov 6  }
 0x9ec   :  { %v2043_v8 = vpop.permute.xlu0 %2042 }
 0x9ed   :  { %2232 = vperm.xlu0 %3757, %v2070_v25  }
 0x9f0   :  { %v2041_v4 = vpop.permute.xlu0 %2040 }
 0x9f1   :  { %2252 = vperm.xlu0 %3757, %v2074_v54  }
 0x9f4   :  { %v2037_v17 = vpop.permute.xlu0 %2036  ;;  %v2027_v36 = vpop.permute.xlu1 %2026 }
 0x9f5   :  { %v2068_v61 = vsub.f32 %v5037_v0, %v2027_v36  ;;  %v2073_v47 = vsub.f32 %v5011_v22, %v2037_v17 }
 0x9f7   :  { %2222 = vperm.xlu1 %3756, %v2068_v61  }
 0x9f8   :  { %v2033_v19 = vpop.permute.xlu0 %2032 }
 0x9f9   :  { %v2071_v21 = vsub.f32 %v5027_v55, %v2033_v19 }
 0x9fc   :  { %v2023_v27 = vpop.permute.xlu1 %2022  ;;  %v2029_v29 = vpop.permute.xlu0 %2028 }
 0x9fd   :  { %v2066_v16 = vsub.f32 %v5072_v15, %v2023_v27  ;;  %v2069_v52 = vsub.f32 %v5056_v37, %v2029_v29  ;;  %v2075_v29 = vsub.f32 %v4991_v39, %v2041_v4 }
 0x9ff   :  { %2212 = vperm.xlu0 %3757, %v2066_v16   ;;  %2227 = vperm.xlu1 %3756, %v2069_v52   ;;  %v2076_v16 = vsub.f32 %v4982_v12, %v2043_v8 }
 0xa00   :  { %v2045_v52 = vpop.permute.xlu1 %2044 }
 0xa01   :  { %v2077_v33 = vsub.f32 %v5066_v58, %v2045_v52 }
 0xa03   :  { %3759 = vset.pattern.permute.xlu0 %v5641_v5  ;;  %2237 = vperm.xlu1 %3756, %v2071_v21  }
 0xa04   :  { %2155 = vperm.xlu0 %3759, %v1981_v14   ;;  %v2019_v22 = vpop.permute.xlu1 %2018 }
 0xa07   :  { %2242 = vperm.xlu1 %3756, %v2072_v48  }
 0xa08   :  { %2140 = vperm.xlu0 %3759, %v4956_v3   ;;  %v2025_v3 = vpop.permute.xlu0 %2024 }
 0xa0b   :  { %2247 = vperm.xlu1 %3756, %v2073_v47  }
 0xa0c   :  { %2135 = vperm.xlu0 %3759, %v5018_v34   ;;  %v2015_v39 = vpop.permute.xlu1 %2014  ;;  %v2064_v34 = vsub.f32 %v5100_v49, %v2019_v22  ;;  %v2021_v55 = vpop.permute.xlu0 %2020 }
 0xa0d   :  { %v2062_v12 = vsub.f32 %v5119_v24, %v2015_v39 }
 0xa0f   :  { %2257 = vperm.xlu1 %3756, %v2075_v29  }
 0xa10   :  { %2120 = vperm.xlu0 %3759, %v4977_v7   ;;  %v2067_v7 = vsub.f32 %v5085_v59, %v2025_v3  ;;  %v2017_v58 = vpop.permute.xlu0 %2016 }
 0xa13   :  { %2262 = vperm.xlu1 %3756, %v2076_v16  }
 0xa14   :  { %2115 = vperm.xlu0 %3759, %v5059_v44   ;;  %v2065_v44 = vsub.f32 %v5110_v1, %v2021_v55 }
 0xa17   :  { %2267 = vperm.xlu1 %3756, %v2077_v33  }
 0xa18   :  { %2100 = vperm.xlu0 %3759, %v5075_v63   ;;  %v2063_v63 = vsub.f32 %v5126_v32, %v2017_v58 }
 0xa19   :  { %v2151_v14 = vpop.permute.xlu1 %2150 }
 0xa1a   :  { %v2186_v29 = vmul.f32 %v2151_v14, %v4832_v51  ;;  %v2187_v16 = vmul.f32 %v2151_v14, %v4838_v28 }
 0xa1b   :  { %3758 = vset.pattern.permute.xlu1 %v5641_v5 }
 0xa1c   :  { %2095 = vperm.xlu0 %3759, %v1969_v38   ;;  %2105 = vperm.xlu1 %3758, %v5088_v43  }
 0xa1d   :  { %v2146_v43 = vpop.permute.xlu1 %2145 }
 0xa1e   :  { %v2185_v48 = vmul.f32 %v2146_v43, %v4826_v6  ;;  %v2184_v55 = vmul.f32 %v2146_v43, %v4822_v11 }
 0xa20   :  { %2080 = vperm.xlu0 %3759, %v1966_v40   ;;  %3760 = vset.pattern.permute.xlu1 %v5640_v60 }
 0xa21   :  { %2217 = vperm.xlu1 %3760, %v2067_v7  }
 0xa24   :  { %3764 = vset.pattern.permute.xlu0 %v5640_v60 }
 0xa25   :  { %2192 = vperm.xlu0 %3764, %v2062_v12   ;;  %3761 = vset.pattern.permute.xlu1 %v5641_v5 }
 0xa26   :  { %2090 = vperm.xlu1 %3761, %v5103_v13   ;;  %v2131_v13 = vpop.permute.xlu1 %2130 }
 0xa27   :  { %v2179_v6 = vmul.f32 %v2131_v13, %v4796_v57  ;;  %v2178_v11 = vmul.f32 %v2131_v13, %v4792_v56 }
 0xa2a   :  { %3762 = vset.pattern.permute.xlu1 %v5640_v60  ;;  %v2126_v38 = vpop.permute.xlu1 %2125 }
 0xa2b   :  { %2202 = vperm.xlu1 %3762, %v2064_v34  }
 0xa2e   :  { %v5175_v53 = vpop.permute.xlu1 %2110 }
 0xa2f   :  { %2207 = vperm.xlu1 %3762, %v2065_v44  }
 0xa33   :  { %3763 = vset.pattern.permute.xlu1 %v5641_v5 }
 0xa34   :  { %2085 = vperm.xlu1 %3763, %v5129_v9  }
 0xa38   :  { %3765 = vset.pattern.permute.xlu1 %v5640_v60 }
 0xa39   :  { %2197 = vperm.xlu1 %3765, %v2063_v63  }
 0xa68   :  { %v5173_v40 = vpop.permute.xlu0 %2232 }
 0xa6c   :  { %v2253_v25 = vpop.permute.xlu0 %2252 }
 0xa72   :  { %v5177_v8 = vpop.permute.xlu1 %2222 }
 0xa7a   :  { %v5179_v54 = vpop.permute.xlu1 %2227  ;;  %v5181_v4 = vpop.permute.xlu0 %2212 }
 0xa7e   :  { %v5183_v9 = vpop.permute.xlu1 %2237 }
 0xa7f   :  { %v2156_v17 = vpop.permute.xlu0 %2155 }
 0xa80   :  { %v2188_v7 = vmul.f32 %v2156_v17, %v4842_v50  ;;  %v2189_v39 = vmul.f32 %v2156_v17, %v4844_v62 }
 0xa82   :  { %v2243_v36 = vpop.permute.xlu1 %2242 }
 0xa83   :  { %v2141_v61 = vpop.permute.xlu0 %2140  ;;  %v2290_v13 = vadd.f32 %v2243_v36, %v2178_v11  ;;  %v5643_v11 = vld [vmem:[#allocation11_spill] sm:$0xff] }
 0xa84   :  { %v2183_v52 = vmul.f32 %v2141_v61, %v4816_v26  ;;  %v2182_v51 = vmul.f32 %v2141_v61, %v4812_v30  ;;  %v2291_v30 = vadd.f32 %v2243_v36, %v2179_v6 }
 0xa86   :  { %v2248_v19 = vpop.permute.xlu1 %2247  ;;  %v2295_v28 = vadd.f32 %v2253_v25, %v2183_v52  ;;  %v2294_v57 = vadd.f32 %v2253_v25, %v2182_v51 }
 0xa87   :  { %v2136_v27 = vpop.permute.xlu0 %2135 }
 0xa88   :  { %v2181_v33 = vmul.f32 %v2136_v27, %v4806_v42  ;;  %v2180_v26 = vmul.f32 %v2136_v27, %v4802_v41  ;;  %v2327_v41 = vmax.f32 %v2295_v28, 0.0  ;;  %v2177_v27 = vmul.f32 %v2126_v38, %v4786_v2 }
 0xa89   :  { %v2326_v25 = vmax.f32 %v2294_v57, 0.0 }
 0xa8a   :  { %v2258_v21 = vpop.permute.xlu1 %2257  ;;  %v2293_v63 = vadd.f32 %v2248_v19, %v2181_v33  ;;  %v2292_v33 = vadd.f32 %v2248_v19, %v2180_v26 }
 0xa8b   :  { %v2297_v3 = vadd.f32 %v2258_v21, %v2185_v48  ;;  %v2121_v22 = vpop.permute.xlu0 %2120  ;;  %v2296_v14 = vadd.f32 %v2258_v21, %v2184_v55  ;;  %v2323_v55 = vmax.f32 %v2291_v30, 0.0 }
 0xa8c   :  { %v2175_v50 = vmul.f32 %v2121_v22, %v4776_v35  ;;  %v2325_v35 = vmax.f32 %v2293_v63, 0.0  ;;  %v2324_v2 = vmax.f32 %v2292_v33, 0.0 }
 0xa8d   :  { %v2329_v48 = vmax.f32 %v2297_v3, 0.0  ;;  %v2328_v21 = vmax.f32 %v2296_v14, 0.0  ;;  %v2174_v3 = vmul.f32 %v2121_v22, %v4774_v45 }
 0xa8e   :  { %v2263_v47 = vpop.permute.xlu1 %2262  ;;  %v2345_v28 = vpack.c.bf16 %v2325_v35, %v2323_v55  ;;  %v5645_v35 = vld [vmem:[#allocation7_spill] sm:$0xff] }
 0xa8f   :  { %v2298_v12 = vadd.f32 %v2263_v47, %v2186_v29  ;;  %v2299_v34 = vadd.f32 %v2263_v47, %v2187_v16  ;;  %v2116_v43 = vpop.permute.xlu0 %2115  ;;  %v2347_v56 = vpack.c.bf16 %v2329_v48, %v2327_v41  ;;  %v2346_v19 = vpack.c.bf16 %v2328_v21, %v2326_v25 }
 0xa90   :  { %v2286_v45 = vadd.f32 %v5173_v40, %v2174_v3  ;;  %v2172_v22 = vmul.f32 %v2116_v43, %v4770_v20 }
 0xa91   :  { %v2330_v62 = vmax.f32 %v2298_v12, 0.0  ;;  %v2331_v17 = vmax.f32 %v2299_v34, 0.0  ;;  %v2176_v12 = vmul.f32 %v2126_v38, %v4782_v23  ;;  %v2289_v34 = vadd.f32 %v5183_v9, %v2177_v27 }
 0xa92   :  { %v2268_v44 = vpop.permute.xlu1 %2267  ;;  %v2322_v38 = vmax.f32 %v2290_v13, 0.0  ;;  %v2318_v14 = vmax.f32 %v2286_v45, 0.0  ;;  %v2284_v48 = vadd.f32 %v5179_v54, %v2172_v22  ;;  %v5647_v13 = vld [vmem:[#allocation9_spill] sm:$0xff] }
 0xa93   :  { %v2300_v58 = vadd.f32 %v2268_v44, %v2188_v7  ;;  %v2301_v42 = vadd.f32 %v2268_v44, %v2189_v39  ;;  %v2287_v7 = vadd.f32 %v5173_v40, %v2175_v50  ;;  %v2173_v39 = vmul.f32 %v2116_v43, %v4772_v18  ;;  %v2101_v6 = vpop.permute.xlu0 %2100 }
 0xa94   :  { %v2171_v18 = vmul.f32 %v5175_v53, %v4768_v31  ;;  %v2288_v23 = vadd.f32 %v5183_v9, %v2176_v12  ;;  %v2167_v40 = vmul.f32 %v2101_v6, %v4760_v10  ;;  %v2344_v31 = vpack.c.bf16 %v2324_v2, %v2322_v38  ;;  %v5644_v10 = vld [vmem:[#allocation12_spill] sm:$0xff] }
 0xa95   :  { %v2332_v47 = vmax.f32 %v2300_v58, 0.0  ;;  %v2333_v29 = vmax.f32 %v2301_v42, 0.0  ;;  %v2319_v36 = vmax.f32 %v2287_v7, 0.0  ;;  %v2285_v44 = vadd.f32 %v5179_v54, %v2173_v39  ;;  %v5642_v42 = vld [vmem:[#allocation13_spill] sm:$0xff] }
 0xa96   :  { %v2283_v26 = vadd.f32 %v5177_v8, %v2171_v18  ;;  %v2321_v58 = vmax.f32 %v2289_v34, 0.0  ;;  %v2170_v63 = vmul.f32 %v5175_v53, %v5642_v42  ;;  %v2166_v57 = vmul.f32 %v2101_v6, %v5643_v11  ;;  %v5648_v34 = vld [vmem:[#allocation10_spill] sm:$0xff]  ;;  %v5649_v42 = vld [vmem:[#allocation3_spill] sm:$0xff] }
 0xa97   :  { %v2348_v61 = vpack.c.bf16 %v2332_v47, %v2330_v62  ;;  %v2106_v16 = vpop.permute.xlu1 %2105  ;;  %v2349_v52 = vpack.c.bf16 %v2333_v29, %v2331_v17  ;;  %v2317_v50 = vmax.f32 %v2285_v44, 0.0  ;;  %v2320_v29 = vmax.f32 %v2288_v23, 0.0 }
 0xa98   :  { %v2169_v20 = vmul.f32 %v2106_v16, %v4764_v46  ;;  %v2343_v17 = vpack.c.bf16 %v2321_v58, %v2319_v36  ;;  %v2282_v47 = vadd.f32 %v5177_v8, %v2170_v63  ;;  %v2168_v43 = vmul.f32 %v2106_v16, %v5644_v10  ;;  %v5646_v16 = vld [vmem:[#allocation8_spill] sm:$0xff] }
 0xa99   :  { %2374 = vmatprep.subr.bf16.mxu1 %v2349_v52  ;;  %v2315_v46 = vmax.f32 %v2283_v26, 0.0  ;;  %v2279_v30 = vadd.f32 %v5181_v4, %v2167_v40  ;;  %v2342_v53 = vpack.c.bf16 %v2320_v29, %v2318_v14  ;;  %v2096_v52 = vpop.permute.xlu0 %2095  ;;  %v2278_v21 = vadd.f32 %v5181_v4, %v2166_v57 }
 0xa9a   :  { %2375 = vmatpush1.bf16.msra.mxu1 %v2348_v61  ;;  %v2316_v61 = vmax.f32 %v2284_v48, 0.0  ;;  %v2314_v33 = vmax.f32 %v2282_v47, 0.0  ;;  %v2164_v25 = vmul.f32 %v2096_v52, %v5647_v13  ;;  %v2165_v55 = vmul.f32 %v2096_v52, %v5648_v34  ;;  %v3805_v52 = vld [vmem:[%s5596_s3 + $0x80] sm:$0xff]  }
 0xa9b   :  { %2376 = vmatprep.subr.bf16.mxu1 %v2347_v56  ;;  %v2341_v27 = vpack.c.bf16 %v2317_v50, %v2315_v46  ;;  %v2311_v3 = vmax.f32 %v2279_v30, 0.0  ;;  %v2310_v22 = vmax.f32 %v2278_v21, 0.0 }
 0xa9c   :  { %v2218_v51 = vpop.permute.xlu1 %2217  ;;  %v2340_v56 = vpack.c.bf16 %v2316_v61, %v2314_v33  ;;  %v3808_v33 = vld [vmem:[%s5596_s3 + $0x98] sm:$0xff]  }
 0xa9d   :  { %v2281_v62 = vadd.f32 %v2218_v51, %v2169_v20  ;;  %v2280_v54 = vadd.f32 %v2218_v51, %v2168_v43  ;;  %v2081_v6 = vpop.permute.xlu0 %2080 }
 0xa9e   :  { %2377 = vmatpush1.bf16.msra.mxu1 %v2346_v19  ;;  %v2158_v63 = vmul.f32 %v2081_v6, %v5649_v42 }
 0xa9f   :  { %2378 = vmatprep.subr.bf16.mxu1 %v2345_v28  ;;  %v2313_v41 = vmax.f32 %v2281_v62, 0.0  ;;  %v2312_v12 = vmax.f32 %v2280_v54, 0.0  ;;  %v5651_v62 = vld [vmem:[#allocation5_spill] sm:$0xff]  ;;  %v5653_v54 = vmov 0  }
 0xaa1   :  { %v2091_v9 = vpop.permute.xlu1 %2090  ;;  %v2339_v45 = vpack.c.bf16 %v2313_v41, %v2311_v3  ;;  %v2338_v36 = vpack.c.bf16 %v2312_v12, %v2310_v22  ;;  %v2193_v20 = vpop.permute.xlu0 %2192  ;;  %v3806_v41 = vld [vmem:[%s5596_s3 + $0x88] sm:$0xff]  }
 0xaa2   :  { %2379 = vmatpush1.bf16.msra.mxu1 %v2344_v31  ;;  %v2162_v7 = vmul.f32 %v2091_v9, %v5645_v35  ;;  %v2163_v39 = vmul.f32 %v2091_v9, %v5646_v16  ;;  %v5650_v31 = vld [vmem:[#allocation4_spill] sm:$0xff]  ;;  %v2270_v48 = vadd.f32 %v2193_v20, %v2158_v63 }
 0xaa3   :  { %2380 = vmatprep.subr.bf16.mxu1 %v2343_v17  ;;  %v2159_v14 = vmul.f32 %v2081_v6, %v5650_v31  ;;  %v5652_v17 = vld [vmem:[#allocation6_spill] sm:$0xff] }
 0xaa4   :  { %v2302_v10 = vmax.f32 %v2270_v48, 0.0 }
 0xaa5   :  { %v2271_v50 = vadd.f32 %v2193_v20, %v2159_v14 }
 0xaa6   :  { %v2203_v8 = vpop.permute.xlu1 %2202  ;;  %2381 = vmatpush1.bf16.msra.mxu1 %v2342_v53 }
 0xaa7   :  { %2382 = vmatprep.subr.bf16.mxu1 %v2341_v27  ;;  %v2274_v2 = vadd.f32 %v2203_v8, %v2162_v7  ;;  %v2275_v19 = vadd.f32 %v2203_v8, %v2163_v39  ;;  %v2303_v43 = vmax.f32 %v2271_v50, 0.0  ;;  %v3807_v27 = vld [vmem:[%s5596_s3 + $0x90] sm:$0xff]  }
 0xaa9   :  { %v2306_v44 = vmax.f32 %v2274_v2, 0.0  ;;  %v2307_v28 = vmax.f32 %v2275_v19, 0.0 }
 0xaaa   :  { %v2208_v4 = vpop.permute.xlu1 %2207  ;;  %2383 = vmatpush1.bf16.msra.mxu1 %v2340_v56 }
 0xaab   :  { %v2276_v51 = vadd.f32 %v2208_v4, %v2164_v25  ;;  %v2277_v18 = vadd.f32 %v2208_v4, %v2165_v55  ;;  %2384 = vmatprep.subr.bf16.mxu1 %v2339_v45 }
 0xaad   :  { %v2308_v23 = vmax.f32 %v2276_v51, 0.0  ;;  %v2309_v38 = vmax.f32 %v2277_v18, 0.0 }
 0xaae   :  { %2385 = vmatpush1.bf16.msra.mxu1 %v2338_v36 }
 0xaaf   :  { %v2336_v26 = vpack.c.bf16 %v2308_v23, %v2306_v44  ;;  %v2086_v58 = vpop.permute.xlu1 %2085  ;;  %v2337_v40 = vpack.c.bf16 %v2309_v38, %v2307_v28 }
 0xab0   :  { %v2160_v9 = vmul.f32 %v2086_v58, %v5651_v62  ;;  %v2161_v47 = vmul.f32 %v2086_v58, %v5652_v17 }
 0xab1   :  { %2386 = vmatprep.subr.bf16.mxu1 %v2337_v40 }
 0xab2   :  { %2387 = vmatpush1.bf16.msra.mxu1 %v2336_v26 }
 0xab4   :  { %v2198_v29 = vpop.permute.xlu1 %2197 }
 0xab5   :  { %v2272_v11 = vadd.f32 %v2198_v29, %v2160_v9  ;;  %v2273_v57 = vadd.f32 %v2198_v29, %v2161_v47 }
 0xab7   :  { %v2304_v46 = vmax.f32 %v2272_v11, 0.0  ;;  %v2305_v30 = vmax.f32 %v2273_v57, 0.0 }
 0xab9   :  { %v2334_v53 = vpack.c.bf16 %v2304_v46, %v2302_v10  ;;  %v2335_v61 = vpack.c.bf16 %v2305_v30, %v2303_v43 }
 0xabb   :  { %2388 = vmatprep.subr.bf16.mxu1 %v2335_v61  ;;  %v3951_v61 = vmov 8  }
 0xabc   :  { %2389 = vmatpush1.bf16.msra.mxu1 %v2334_v53  ;;  %3767 = vset.pattern.permute.xlu0 %v3951_v61 }
 0xabd   :  { %3766 = vset.pattern.permute.xlu1 %v3951_v61 }
 0xabf   :  { %2407 = vmatmul.mubr.bf16.vlgmr.msra.gmra.mxu1 %v3805_v52 }
 0xac0   :  { %2416 = vmatprep.mubr.bf16.mxu1 %v5653_v54 }
 0xac7   :  { %2417 = vmatmul.mubr.bf16.gmra.mxu1 %v3806_v41 }
 0xac8   :  { %2426 = vmatprep.mubr.bf16.mxu1 %v5653_v54 }
 0xacf   :  { %2427 = vmatmul.mubr.bf16.gmra.mxu1 %v3807_v27 }
 0xad0   :  { %2436 = vmatprep.mubr.bf16.mxu1 %v5653_v54 }
 0xad7   :  { %2437 = vmatmul.mubr.bf16.gmra.mxu1 %v3808_v33 }
 0xb7f   :  { %v5244_v21 = vpop.f32.mrf.mxu1 }
 0xb80   :  { %v2479_v57 = vmul.f32 %v5244_v21, %v5244_v21 }
 0xb81   :  { %v5246_v8 = vpop.f32.mrf.mxu1 }
 0xb82   :  { %v2447_v47 = vadd.f32 %v5246_v8, %v5244_v21  ;;  %v2480_v29 = vmul.f32 %v5246_v8, %v5246_v8 }
 0xb83   :  { %v5248_v3 = vpop.f32.mrf.mxu1 }
 0xb84   :  { %v2481_v46 = vmul.f32 %v5248_v3, %v5248_v3  ;;  %v2495_v30 = vadd.f32 %v2480_v29, %v2479_v57 }
 0xb85   :  { %v5250_v35 = vpop.f32.mrf.mxu1 }
 0xb86   :  { %v2450_v50 = vadd.f32 %v5250_v35, %v5248_v3  ;;  %v2482_v10 = vmul.f32 %v5250_v35, %v5250_v35 }
 0xb87   :  { %v5252_v7 = vpop.f32.mrf.mxu1 }
 0xb88   :  { %v2483_v11 = vmul.f32 %v5252_v7, %v5252_v7  ;;  %v2498_v53 = vadd.f32 %v2482_v10, %v2481_v46 }
 0xb89   :  { %v5254_v16 = vpop.f32.mrf.mxu1 }
 0xb8a   :  { %v2453_v63 = vadd.f32 %v5254_v16, %v5252_v7  ;;  %v2484_v9 = vmul.f32 %v5254_v16, %v5254_v16 }
 0xb8b   :  { %v5256_v39 = vpop.f32.mrf.mxu1 }
 0xb8c   :  { %v2485_v62 = vmul.f32 %v5256_v39, %v5256_v39  ;;  %v2501_v43 = vadd.f32 %v2484_v9, %v2483_v11 }
 0xb8d   :  { %v5258_v56 = vpop.f32.mrf.mxu1 }
 0xb8e   :  { %v2456_v13 = vadd.f32 %v5258_v56, %v5256_v39  ;;  %v2486_v14 = vmul.f32 %v5258_v56, %v5258_v56 }
 0xb8f   :  { %v5262_v25 = vpop.f32.mrf.mxu1 }
 0xb90   :  { %2457 = vadd.xlane.f32.xlu1 %v2456_v13  ;;  %v2487_v34 = vmul.f32 %v5262_v25, %v5262_v25  ;;  %v2504_v17 = vadd.f32 %v2486_v14, %v2485_v62 }
 0xb91   :  { %v5264_v12 = vpop.f32.mrf.mxu1 }
 0xb92   :  { %v2459_v55 = vadd.f32 %v5264_v12, %v5262_v25  ;;  %v2488_v2 = vmul.f32 %v5264_v12, %v5264_v12 }
 0xb93   :  { %v5272_v19 = vpop.f32.mrf.mxu1 }
 0xb94   :  { %2460 = vadd.xlane.f32.xlu1 %v2459_v55  ;;  %v2507_v45 = vadd.f32 %v2488_v2, %v2487_v34  ;;  %v2489_v6 = vmul.f32 %v5272_v19, %v5272_v19 }
 0xb95   :  { %v5274_v22 = vpop.f32.mrf.mxu1 }
 0xb96   :  { %v2462_v4 = vadd.f32 %v5274_v22, %v5272_v19  ;;  %v2490_v51 = vmul.f32 %v5274_v22, %v5274_v22  ;;  %2508 = vadd.xlane.f32.xlu0 %v2507_v45 }
 0xb97   :  { %v5282_v18 = vpop.f32.mrf.mxu1 }
 0xb98   :  { %2463 = vadd.xlane.f32.xlu1 %v2462_v4  ;;  %v2510_v36 = vadd.f32 %v2490_v51, %v2489_v6  ;;  %v2491_v23 = vmul.f32 %v5282_v18, %v5282_v18 }
 0xb99   :  { %v5284_v44 = vpop.f32.mrf.mxu1 }
 0xb9a   :  { %2511 = vadd.xlane.f32.xlu0 %v2510_v36  ;;  %v2465_v38 = vadd.f32 %v5284_v44, %v5282_v18  ;;  %v2492_v26 = vmul.f32 %v5284_v44, %v5284_v44 }
 0xb9b   :  { %v5286_v28 = vpop.f32.mrf.mxu1 }
 0xb9c   :  { %v2513_v42 = vadd.f32 %v2492_v26, %v2491_v23  ;;  %v2493_v31 = vmul.f32 %v5286_v28, %v5286_v28 }
 0xb9d   :  { %v5294_v58 = vpop.f32.mrf.mxu1 }
 0xb9e   :  { %v2468_v40 = vadd.f32 %v5294_v58, %v5286_v28  ;;  %2466 = vadd.xlane.f32.xlu0 %v2465_v38  ;;  %v2494_v20 = vmul.f32 %v5294_v58, %v5294_v58 }
 0xba0   :  { %2469 = vadd.xlane.f32.xlu1 %v2468_v40  ;;  %v2516_v48 = vadd.f32 %v2494_v20, %v2493_v31 }
 0xba2   :  { %2514 = vadd.xlane.f32.xlu0 %v2513_v42 }
 0xba4   :  { %2454 = vadd.xlane.f32.xlu1 %v2453_v63 }
 0xba6   :  { %2517 = vadd.xlane.f32.xlu0 %v2516_v48 }
 0xba8   :  { %2451 = vadd.xlane.f32.xlu1 %v2450_v50 }
 0xbaa   :  { %2505 = vadd.xlane.f32.xlu0 %v2504_v17 }
 0xbac   :  { %2448 = vadd.xlane.f32.xlu1 %v2447_v47 }
 0xbae   :  { %2502 = vadd.xlane.f32.xlu0 %v2501_v43 }
 0xbb0   :  { %2496 = vadd.xlane.f32.xlu1 %v2495_v30 }
 0xbb2   :  { %2499 = vadd.xlane.f32.xlu0 %v2498_v53 }
 0xc19   :  { %v2458_v52 = vpop.xlane.xlu1 %2457 }
 0xc1a   :  { %v5340_v50 = vmul.f32 0.00390625, %v2458_v52 }
 0xc1c   :  { %v2530_v46 = vmul.f32 %v5340_v50, %v5340_v50 }
 0xc1d   :  { %v2461_v41 = vpop.xlane.xlu1 %2460 }
 0xc1e   :  { %v5328_v34 = vmul.f32 0.00390625, %v2461_v41 }
 0xc1f   :  { %v2509_v27 = vpop.xlane.xlu0 %2508 }
 0xc20   :  { %v2531_v6 = vmul.f32 %v5328_v34, %v5328_v34  ;;  %v2523_v4 = vmul.f32 0.00390625, %v2509_v27 }
 0xc21   :  { %v2464_v33 = vpop.xlane.xlu1 %2463 }
 0xc22   :  { %v5326_v13 = vmul.f32 0.00390625, %v2464_v33  ;;  %v2539_v26 = vsub.f32 %v2523_v4, %v2531_v6 }
 0xc23   :  { %v2512_v55 = vpop.xlane.xlu0 %2511 }
 0xc24   :  { %v2532_v2 = vmul.f32 %v5326_v13, %v5326_v13  ;;  %v2524_v45 = vmul.f32 0.00390625, %v2512_v55  ;;  %v2547_v62 = vmax.f32 %v2539_v26, 0.0 }
 0xc26   :  { %v2540_v51 = vsub.f32 %v2524_v45, %v2532_v2  ;;  %v2555_v30 = vadd.f32 1e-05, %v2547_v62 }
 0xc27   :  { %v2467_v36 = vpop.xlane.xlu0 %2466 }
 0xc28   :  { %v5334_v23 = vmul.f32 0.00390625, %v2467_v36  ;;  %v2548_v40 = vmax.f32 %v2540_v51, 0.0 }
 0xc29   :  { %v2470_v38 = vpop.xlane.xlu1 %2469 }
 0xc2a   :  { %v2533_v42 = vmul.f32 %v5334_v23, %v5334_v23  ;;  %v5338_v63 = vmul.f32 0.00390625, %v2470_v38  ;;  %v2556_v9 = vadd.f32 1e-05, %v2548_v40 }
 0xc2b   :  { %v2515_v20 = vpop.xlane.xlu0 %2514 }
 0xc2c   :  { %v2525_v31 = vmul.f32 0.00390625, %v2515_v20  ;;  %v2534_v47 = vmul.f32 %v5338_v63, %v5338_v63  ;;  %3889 = vrsqrt.f32 %v2556_v9 }
 0xc2d   :  { %v2455_v14 = vpop.xlane.xlu1 %2454 }
 0xc2e   :  { %v2541_v48 = vsub.f32 %v2525_v31, %v2533_v42  ;;  %v2473_v52 = vmul.f32 0.00390625, %v2455_v14 }
 0xc2f   :  { %v2518_v17 = vpop.xlane.xlu0 %2517 }
 0xc30   :  { %v2549_v29 = vmax.f32 %v2541_v48, 0.0  ;;  %v2526_v11 = vmul.f32 0.00390625, %v2518_v17  ;;  %v2529_v51 = vmul.f32 %v2473_v52, %v2473_v52 }
 0xc31   :  { %v2452_v57 = vpop.xlane.xlu1 %2451 }
 0xc32   :  { %v2557_v10 = vadd.f32 1e-05, %v2549_v29  ;;  %v2542_v43 = vsub.f32 %v2526_v11, %v2534_v47  ;;  %v2472_v6 = vmul.f32 0.00390625, %v2452_v57 }
 0xc33   :  { %v2506_v53 = vpop.xlane.xlu0 %2505 }
 0xc34   :  { %3891 = vrsqrt.f32 %v2557_v10  ;;  %v2550_v41 = vmax.f32 %v2542_v43, 0.0  ;;  %v2522_v27 = vmul.f32 0.00390625, %v2506_v53  ;;  %v2528_v48 = vmul.f32 %v2472_v6, %v2472_v6 }
 0xc35   :  { %v2449_v33 = vpop.xlane.xlu1 %2448  ;;  %3893 = vrsqrt.f32 %v2555_v30 }
 0xc36   :  { %v2558_v55 = vadd.f32 1e-05, %v2550_v41  ;;  %v2538_v2 = vsub.f32 %v2522_v27, %v2530_v46  ;;  %v2471_v45 = vmul.f32 0.00390625, %v2449_v33 }
 0xc37   :  { %v2503_v4 = vpop.xlane.xlu0 %2502 }
 0xc38   :  { %3895 = vrsqrt.f32 %v2558_v55  ;;  %v2546_v36 = vmax.f32 %v2538_v2, 0.0  ;;  %v2521_v38 = vmul.f32 0.00390625, %v2503_v4  ;;  %v2527_v20 = vmul.f32 %v2471_v45, %v2471_v45 }
 0xc39   :  { %v2497_v26 = vpop.xlane.xlu1 %2496  ;;  %v3890_v57 = vpop.eup %3889 }
 0xc3a   :  { %v2554_v40 = vadd.f32 1e-05, %v2546_v36  ;;  %v2537_v42 = vsub.f32 %v2521_v38, %v2529_v51  ;;  %v2519_v31 = vmul.f32 0.00390625, %v2497_v26  ;;  %v2572_v33 = vmul.f32 %v5085_v59, %v3890_v57 }
 0xc3b   :  { %v2500_v14 = vpop.xlane.xlu0 %2499 }
 0xc3c   :  { %3897 = vrsqrt.f32 %v2554_v40  ;;  %v2545_v62 = vmax.f32 %v2537_v42, 0.0  ;;  %v2535_v9 = vsub.f32 %v2519_v31, %v2527_v20  ;;  %v2520_v17 = vmul.f32 0.00390625, %v2500_v14 }
 0xc3d   :  { %v2580_v4 = vmul.f32 %v2572_v33, %v5326_v13 }
 0xc3e   :  { %v2553_v47 = vadd.f32 1e-05, %v2545_v62  ;;  %v2543_v29 = vmax.f32 %v2535_v9, 0.0  ;;  %v2536_v11 = vsub.f32 %v2520_v17, %v2528_v48 }
 0xc40   :  { %3899 = vrsqrt.f32 %v2553_v47  ;;  %v2551_v10 = vadd.f32 1e-05, %v2543_v29  ;;  %v2544_v43 = vmax.f32 %v2536_v11, 0.0 }
 0xc41   :  { %v3892_v46 = vpop.eup %3891 }
 0xc42   :  { %3901 = vrsqrt.f32 %v2551_v10  ;;  %v2552_v30 = vadd.f32 1e-05, %v2544_v43  ;;  %v2573_v53 = vmul.f32 %v5037_v0, %v3892_v46  ;;  %v3894_v41 = vpop.eup %3893 }
 0xc43   :  { %v2571_v36 = vmul.f32 %v5072_v15, %v3894_v41 }
 0xc44   :  { %3903 = vrsqrt.f32 %v2552_v30  ;;  %v2581_v27 = vmul.f32 %v2573_v53, %v5334_v23 }
 0xc45   :  { %v3896_v55 = vpop.eup %3895  ;;  %v2579_v40 = vmul.f32 %v2571_v36, %v5328_v34  ;;  %v3952_v34 = vmov 9  }
 0xc46   :  { %2603 = vrot.lane.b32.xlu1 %v2581_v27, %s3943_s0  ;;  %v2574_v2 = vmul.f32 %v5056_v37, %v3896_v55 }
 0xc48   :  { %v2582_v51 = vmul.f32 %v2574_v2, %v5338_v63 }
 0xc49   :  { %v3898_v38 = vpop.eup %3897 }
 0xc4a   :  { %2601 = vrot.lane.b32.xlu1 %v2580_v4, %s3943_s0  ;;  %2605 = vrot.lane.b32.xlu0 %v2582_v51, %s3943_s0  ;;  %v2570_v23 = vmul.f32 %v5110_v1, %v3898_v38 }
 0xc4c   :  { %v2578_v26 = vmul.f32 %v2570_v23, %v5340_v50 }
 0xc4d   :  { %v3900_v20 = vpop.eup %3899 }
 0xc4e   :  { %2597 = vrot.lane.b32.xlu1 %v2578_v26, %s3943_s0  ;;  %2599 = vrot.lane.b32.xlu0 %v2579_v40, %s3943_s0  ;;  %v2569_v13 = vmul.f32 %v5100_v49, %v3900_v20 }
 0xc4f   :  { %v3902_v63 = vpop.eup %3901 }
 0xc50   :  { %v2577_v42 = vmul.f32 %v2569_v13, %v2473_v52  ;;  %v2567_v31 = vmul.f32 %v5119_v24, %v3902_v63 }
 0xc51   :  { %v3904_v48 = vpop.eup %3903 }
 0xc52   :  { %2595 = vrot.lane.b32.xlu0 %v2577_v42, %s3943_s0  ;;  %v2568_v14 = vmul.f32 %v5126_v32, %v3904_v48  ;;  %v2575_v50 = vmul.f32 %v2567_v31, %v2471_v45 }
 0xc54   :  { %v2576_v62 = vmul.f32 %v2568_v14, %v2472_v6 }
 0xc56   :  { %2593 = vrot.lane.b32.xlu1 %v2576_v62, %s3943_s0  ;;  %2591 = vrot.lane.b32.xlu0 %v2575_v50, %s3943_s0 }
 0xc5a   :  { %2660 = vperm.xlu1 %3766, %v2574_v2   ;;  %2655 = vperm.xlu0 %3767, %v2573_v53  }
 0xc5e   :  { %2650 = vperm.xlu1 %3766, %v2572_v33   ;;  %2640 = vperm.xlu0 %3767, %v2570_v23  }
 0xc62   :  { %2645 = vperm.xlu1 %3766, %v2571_v36   ;;  %3768 = vset.pattern.permute.xlu0 %v3952_v34 }
 0xc66   :  { %2635 = vperm.xlu1 %3766, %v2569_v13  }
 0xc6a   :  { %3769 = vset.pattern.permute.xlu1 %v3952_v34 }
 0xcb8   :  { %v2604_v52 = vpop.permute.xlu1 %2603 }
 0xcb9   :  { %v2621_v11 = vsub.f32 %v5037_v0, %v2604_v52 }
 0xcbc   :  { %v2606_v9 = vpop.permute.xlu0 %2605  ;;  %v2602_v17 = vpop.permute.xlu1 %2601 }
 0xcbd   :  { %v2620_v57 = vsub.f32 %v5085_v59, %v2602_v17  ;;  %v2622_v10 = vsub.f32 %v5056_v37, %v2606_v9 }
 0xcc0   :  { %v2600_v6 = vpop.permute.xlu0 %2599  ;;  %v2598_v45 = vpop.permute.xlu1 %2597 }
 0xcc1   :  { %v2619_v47 = vsub.f32 %v5072_v15, %v2600_v6  ;;  %v2618_v29 = vsub.f32 %v5110_v1, %v2598_v45 }
 0xcc3   :  { %2701 = vperm.xlu1 %3769, %v2619_v47   ;;  %2696 = vperm.xlu0 %3768, %v2618_v29   ;;  %v2824_v47 = vld [vmem:[%s5597_s5 + $0x38] sm:$0xff] }
 0xcc4   :  { %v2596_v43 = vpop.permute.xlu0 %2595  ;;  %2833 = vst.msk [vmem:[#allocation2 + $0x78] sm:$0xff] %vm2825_vm1, %v2824_v47 }
 0xcc5   :  { %v2617_v15 = vsub.f32 %v5100_v49, %v2596_v43 }
 0xcc7   :  { %2706 = vperm.xlu1 %3769, %v2620_v57   ;;  %2711 = vperm.xlu0 %3768, %v2621_v11   ;;  %v2823_v57 = vld [vmem:[%s5597_s5 + $0x30] sm:$0xff] }
 0xcc8   :  { %v2594_v1 = vpop.permute.xlu1 %2593  ;;  %v2592_v59 = vpop.permute.xlu0 %2591  ;;  %2832 = vst.msk [vmem:[#allocation2 + $0x70] sm:$0xff] %vm2825_vm1, %v2823_v57 }
 0xcc9   :  { %v2616_v0 = vsub.f32 %v5126_v32, %v2594_v1  ;;  %v2615_v37 = vsub.f32 %v5119_v24, %v2592_v59  ;;  %v2822_v1 = vld [vmem:[%s5597_s5 + $0x28] sm:$0xff] }
 0xcca   :  { %2831 = vst.msk [vmem:[#allocation2 + $0x68] sm:$0xff] %vm2825_vm1, %v2822_v1 }
 0xccb   :  { %2716 = vperm.xlu1 %3769, %v2622_v10   ;;  %3772 = vset.pattern.permute.xlu0 %v3951_v61 }
 0xccc   :  { %2625 = vperm.xlu0 %3772, %v2567_v31  }
 0xccf   :  { %3770 = vset.pattern.permute.xlu1 %v3951_v61 }
 0xcd0   :  { %2630 = vperm.xlu1 %3770, %v2568_v14   ;;  %3774 = vset.pattern.permute.xlu0 %v5653_v54 }
 0xcd4   :  { %3771 = vset.pattern.permute.xlu1 %v3952_v34 }
 0xcd5   :  { %2691 = vperm.xlu1 %3771, %v2617_v15   ;;  %v2661_v46 = vpop.permute.xlu1 %2660  ;;  %v2656_v53 = vpop.permute.xlu0 %2655 }
 0xcd6   :  { %v2675_v40 = vmul.f32 %v2656_v53, %v5282_v18  ;;  %v2677_v52 = vmul.f32 %v2661_v46, %v5286_v28 }
 0xcd9   :  { %2686 = vperm.xlu1 %3771, %v2616_v0   ;;  %v2651_v30 = vpop.permute.xlu1 %2650  ;;  %v2641_v27 = vpop.permute.xlu0 %2640 }
 0xcda   :  { %v2673_v36 = vmul.f32 %v2651_v30, %v5272_v19  ;;  %v2674_v24 = vmul.f32 %v2651_v30, %v5274_v22  ;;  %v2676_v19 = vmul.f32 %v2656_v53, %v5284_v44  ;;  %v2669_v22 = vmul.f32 %v2641_v27, %v5256_v39 }
 0xcdb   :  { %v2670_v45 = vmul.f32 %v2641_v27, %v5258_v56  ;;  %v2820_v27 = vld [vmem:[%s5597_s5 + $0x18] sm:$0xff] }
 0xcdc   :  { %2829 = vst.msk [vmem:[#allocation2 + $0x58] sm:$0xff] %vm2825_vm1, %v2820_v27 }
 0xcdd   :  { %2681 = vperm.xlu1 %3771, %v2615_v37   ;;  %v2646_v41 = vpop.permute.xlu1 %2645 }
 0xcde   :  { %v2671_v49 = vmul.f32 %v2646_v41, %v5262_v25  ;;  %v2672_v55 = vmul.f32 %v2646_v41, %v5264_v12  ;;  %v2678_v25 = vmul.f32 %v2661_v46, %v5294_v58  ;;  %v2849_v41 = vld [vmem:[#allocation2 + $0x78] sm:$0xff] }
 0xcdf   :  { %3633 = vmatprep.subr.mxu1 %v2849_v41 }
 0xce0   :  { %3634 = vmatpush3.msra.mxu1 %v2849_v41 }
 0xce1   :  { %3773 = vset.pattern.permute.xlu1 %v5653_v54  ;;  %v2636_v33 = vpop.permute.xlu1 %2635 }
 0xce2   :  { %v2667_v44 = vmul.f32 %v2636_v33, %v5252_v7  ;;  %v2668_v56 = vmul.f32 %v2636_v33, %v5254_v16 }
 0xd3e   :  { %v2697_v2 = vpop.permute.xlu0 %2696  ;;  %v2702_v4 = vpop.permute.xlu1 %2701 }
 0xd3f   :  { %v2727_v32 = vadd.f32 %v2702_v4, %v2671_v49  ;;  %v2728_v51 = vadd.f32 %v2702_v4, %v2672_v55  ;;  %v2725_v50 = vadd.f32 %v2697_v2, %v2669_v22  ;;  %v2726_v29 = vadd.f32 %v2697_v2, %v2670_v45 }
 0xd41   :  { %v2743_v38 = vmax.f32 %v2727_v32, 0.0  ;;  %v2744_v54 = vmax.f32 %v2728_v51, 0.0  ;;  %v2741_v6 = vmax.f32 %v2725_v50, 0.0  ;;  %v2742_v0 = vmax.f32 %v2726_v29, 0.0  ;;  %v2847_v32 = vld [vmem:[#allocation2 + $0x68] sm:$0xff] }
 0xd42   :  { %v2712_v23 = vpop.permute.xlu0 %2711  ;;  %v2707_v26 = vpop.permute.xlu1 %2706  ;;  %v2818_v51 = vld [vmem:[%s5597_s5 + $0x8] sm:$0xff] }
 0xd43   :  { %v2729_v20 = vadd.f32 %v2707_v26, %v2673_v36  ;;  %v2730_v13 = vadd.f32 %v2707_v26, %v2674_v24  ;;  %2792 = vmax.xlane.f32.xlu0 %v2744_v54  ;;  %2759 = vmax.xlane.f32.xlu1 %v2743_v38  ;;  %v2731_v12 = vadd.f32 %v2712_v23, %v2675_v40  ;;  %v2845_v54 = vld [vmem:[#allocation2 + $0x58] sm:$0xff] }
 0xd44   :  { %v2732_v14 = vadd.f32 %v2712_v23, %v2676_v19  ;;  %2827 = vst.msk [vmem:[#allocation2 + $0x48] sm:$0xff] %vm2825_vm1, %v2818_v51 }
 0xd45   :  { %v2745_v63 = vmax.f32 %v2729_v20, 0.0  ;;  %v2746_v42 = vmax.f32 %v2730_v13, 0.0  ;;  %v2747_v62 = vmax.f32 %v2731_v12, 0.0  ;;  %v2850_v13 = vld [vmem:[%s5598_s6] sm:$0xff]  ;;  %v5442_v12 = vld [vmem:[%s5599_s7 + $0x10] sm:$0xff] }
 0xd46   :  { %v2717_v31 = vpop.permute.xlu1 %2716  ;;  %v2748_v58 = vmax.f32 %v2732_v14, 0.0  ;;  %3665 = vmatprep.mubr.f32.mxu1 %v2850_v13 }
 0xd47   :  { %v2734_v48 = vadd.f32 %v2717_v31, %v2678_v25  ;;  %2794 = vmax.xlane.f32.xlu0 %v2746_v42  ;;  %2761 = vmax.xlane.f32.xlu1 %v2745_v63  ;;  %v2733_v17 = vadd.f32 %v2717_v31, %v2677_v52  ;;  %v2626_v43 = vpop.permute.xlu0 %2625  ;;  %v5436_v25 = vld [vmem:[%s5599_s7 + $0x18] sm:$0xff]  ;;  %v5447_v63 = vld [vmem:[%s5599_s7 + $0x8] sm:$0xff]  ;;  %v5454_v42 = vld [vmem:[%s5599_s7] sm:$0xff]  ;;  %v5654_v31 = vmov 1  }
 0xd48   :  { %v2663_v16 = vmul.f32 %v2626_v43, %v5244_v21  ;;  %v2848_v21 = vld [vmem:[#allocation2 + $0x70] sm:$0xff]  ;;  %v2664_v2 = vmul.f32 %v2626_v43, %v5246_v8  ;;  %v2817_v8 = vld [vmem:[%s5597_s5] sm:$0xff] }
 0xd49   :  { %v2750_v18 = vmax.f32 %v2734_v48, 0.0  ;;  %v2749_v28 = vmax.f32 %v2733_v17, 0.0  ;;  %3635 = vmatprep.subr.mxu1 %v2848_v21  ;;  %2826 = vst.msk [vmem:[#allocation2 + $0x40] sm:$0xff] %vm2825_vm1, %v2817_v8 }
 0xd4a   :  { %3636 = vmatpush3.msra.mxu1 %v2848_v21 }
 0xd4b   :  { %2763 = vmax.xlane.f32.xlu0 %v2747_v62  ;;  %v2631_v9 = vpop.permute.xlu1 %2630  ;;  %2798 = vmax.xlane.f32.xlu1 %v2750_v18  ;;  %v2843_v40 = vld [vmem:[#allocation2 + $0x48] sm:$0xff] }
 0xd4c   :  { %v2665_v7 = vmul.f32 %v2631_v9, %v5248_v3  ;;  %v2821_v3 = vld [vmem:[%s5597_s5 + $0x20] sm:$0xff]  ;;  %v2666_v46 = vmul.f32 %v2631_v9, %v5250_v35  ;;  %v2819_v35 = vld [vmem:[%s5597_s5 + $0x10] sm:$0xff]  ;;  %3637 = vmatprep.subr.mxu1 %v2847_v32 }
 0xd4d   :  { %2830 = vst.msk [vmem:[#allocation2 + $0x60] sm:$0xff] %vm2825_vm1, %v2821_v3  ;;  %2828 = vst.msk [vmem:[#allocation2 + $0x50] sm:$0xff] %vm2825_vm1, %v2819_v35  ;;  %3638 = vmatpush3.msra.mxu1 %v2847_v32  ;;  %v2852_v35 = vld [vmem:[%s5598_s6 + $0x10] sm:$0xff] }
 0xd4f   :  { %2796 = vmax.xlane.f32.xlu0 %v2748_v58  ;;  %2757 = vmax.xlane.f32.xlu1 %v2741_v6 }
 0xd50   :  { %v2692_v39 = vpop.permute.xlu1 %2691  ;;  %v2842_v20 = vld [vmem:[#allocation2 + $0x40] sm:$0xff] }
 0xd51   :  { %v2723_v11 = vadd.f32 %v2692_v39, %v2667_v44  ;;  %v2724_v59 = vadd.f32 %v2692_v39, %v2668_v56 }
 0xd53   :  { %v2739_v10 = vmax.f32 %v2723_v11, 0.0  ;;  %2765 = vmax.xlane.f32.xlu0 %v2749_v28  ;;  %v2740_v33 = vmax.f32 %v2724_v59, 0.0 }
 0xd54   :  { %v2687_v15 = vpop.permute.xlu1 %2686  ;;  %v2846_v38 = vld [vmem:[#allocation2 + $0x60] sm:$0xff]  ;;  %v2844_v26 = vld [vmem:[#allocation2 + $0x50] sm:$0xff] }
 0xd55   :  { %v2721_v37 = vadd.f32 %v2687_v15, %v2665_v7  ;;  %2755 = vmax.xlane.f32.xlu1 %v2739_v10  ;;  %v2722_v49 = vadd.f32 %v2687_v15, %v2666_v46  ;;  %3639 = vmatprep.subr.mxu1 %v2846_v38 }
 0xd56   :  { %3640 = vmatpush3.msra.mxu1 %v2846_v38 }
 0xd57   :  { %v2737_v30 = vmax.f32 %v2721_v37, 0.0  ;;  %2790 = vmax.xlane.f32.xlu0 %v2742_v0  ;;  %v2738_v36 = vmax.f32 %v2722_v49, 0.0  ;;  %3641 = vmatprep.subr.mxu1 %v2845_v54 }
 0xd58   :  { %v2682_v53 = vpop.permute.xlu1 %2681  ;;  %3642 = vmatpush3.msra.mxu1 %v2845_v54 }
 0xd59   :  { %v2719_v55 = vadd.f32 %v2682_v53, %v2663_v16  ;;  %2753 = vmax.xlane.f32.xlu1 %v2737_v30  ;;  %v2720_v24 = vadd.f32 %v2682_v53, %v2664_v2  ;;  %3643 = vmatprep.subr.mxu1 %v2844_v26  ;;  %v2854_v2 = vld [vmem:[%s5598_s6 + $0x20] sm:$0xff] }
 0xd5a   :  { %3644 = vmatpush3.msra.mxu1 %v2844_v26 }
 0xd5b   :  { %v2735_v4 = vmax.f32 %v2719_v55, 0.0  ;;  %2788 = vmax.xlane.f32.xlu0 %v2740_v33  ;;  %v2736_v23 = vmax.f32 %v2720_v24, 0.0  ;;  %3645 = vmatprep.subr.mxu1 %v2843_v40 }
 0xd5c   :  { %3646 = vmatpush3.msra.mxu1 %v2843_v40 }
 0xd5d   :  { %2751 = vmax.xlane.f32.xlu1 %v2735_v4  ;;  %3647 = vmatprep.subr.mxu1 %v2842_v20  ;;  %v2855_v4 = vld [vmem:[%s5598_s6 + $0x30] sm:$0xff] }
 0xd5e   :  { %3648 = vmatpush3.msra.mxu1 %v2842_v20 }
 0xd5f   :  { %2786 = vmax.xlane.f32.xlu0 %v2738_v36 }
 0xd63   :  { %2784 = vmax.xlane.f32.xlu0 %v2736_v23 }
 0xd6e   :  { %2877 = vperm.xlu1 %3773, %v5436_v25  }
 0xd72   :  { %2867 = vperm.xlu1 %3773, %v5447_v63  }
 0xd76   :  { %2862 = vperm.xlu1 %3773, %v5454_v42  }
 0xd79   :  { %2872 = vperm.xlu0 %3774, %v5442_v12  }
 0xd7a   :  { %3776 = vset.pattern.permute.xlu1 %v5654_v31 }
 0xd7d   :  { %3775 = vset.pattern.permute.xlu0 %v5654_v31 }
 0xdcc   :  { %v2793_v19 = vpop.xlane.xlu0 %2792  ;;  %v2760_v22 = vpop.xlane.xlu1 %2759 }
 0xdcd   :  { %v2804_v48 = vmul.f32 2.0, %v2793_v19  ;;  %v2771_v14 = vmul.f32 2.0, %v2760_v22 }
 0xdcf   :  { %2780 = vst.msk [vmem:[#allocation2 + $0x20] sm:$0xff] %vm2775_vm2, %v2771_v14 }
 0xdd0   :  { %v2795_v62 = vpop.xlane.xlu0 %2794  ;;  %2813 = vst.msk [vmem:[#allocation2 + $0x20] sm:$0xff] %vm2808_vm3, %v2804_v48  ;;  %v2762_v50 = vpop.xlane.xlu1 %2761 }
 0xdd1   :  { %v2805_v18 = vmul.f32 2.0, %v2795_v62  ;;  %v2772_v52 = vmul.f32 2.0, %v2762_v50 }
 0xdd3   :  { %2781 = vst.msk [vmem:[#allocation2 + $0x28] sm:$0xff] %vm2775_vm2, %v2772_v52 }
 0xdd4   :  { %v2764_v9 = vpop.xlane.xlu0 %2763  ;;  %2814 = vst.msk [vmem:[#allocation2 + $0x28] sm:$0xff] %vm2808_vm3, %v2805_v18  ;;  %v2799_v17 = vpop.xlane.xlu1 %2798 }
 0xdd5   :  { %v2773_v58 = vmul.f32 2.0, %v2764_v9  ;;  %v2807_v28 = vmul.f32 2.0, %v2799_v17 }
 0xdd7   :  { %2782 = vst.msk [vmem:[#allocation2 + $0x30] sm:$0xff] %vm2775_vm2, %v2773_v58  ;;  %v2838_v27 = vld [vmem:[#allocation2 + $0x20] sm:$0xff] }
 0xdd8   :  { %v2797_v6 = vpop.xlane.xlu0 %2796  ;;  %v2758_v44 = vpop.xlane.xlu1 %2757 }
 0xdd9   :  { %v2806_v45 = vmul.f32 2.0, %v2797_v6  ;;  %v2770_v39 = vmul.f32 2.0, %v2758_v44 }
 0xddb   :  { %2815 = vst.msk [vmem:[#allocation2 + $0x30] sm:$0xff] %vm2808_vm3, %v2806_v45  ;;  %v2839_v30 = vld [vmem:[#allocation2 + $0x28] sm:$0xff] }
 0xddc   :  { %2779 = vst.msk [vmem:[#allocation2 + $0x18] sm:$0xff] %vm2775_vm2, %v2770_v39  ;;  %v2766_v47 = vpop.xlane.xlu0 %2765 }
 0xddd   :  { %v2774_v29 = vmul.f32 2.0, %v2766_v47 }
 0xdde   :  { %v2756_v11 = vpop.xlane.xlu1 %2755 }
 0xddf   :  { %2783 = vst.msk [vmem:[#allocation2 + $0x38] sm:$0xff] %vm2775_vm2, %v2774_v29  ;;  %v2769_v57 = vmul.f32 2.0, %v2756_v11 }
 0xde0   :  { %2816 = vst.msk [vmem:[#allocation2 + $0x38] sm:$0xff] %vm2808_vm3, %v2807_v28  ;;  %v2791_v56 = vpop.xlane.xlu0 %2790 }
 0xde1   :  { %2778 = vst.msk [vmem:[#allocation2 + $0x10] sm:$0xff] %vm2775_vm2, %v2769_v57  ;;  %v2803_v7 = vmul.f32 2.0, %v2791_v56 }
 0xde2   :  { %v2754_v10 = vpop.xlane.xlu1 %2753  ;;  %v2840_v46 = vld [vmem:[#allocation2 + $0x30] sm:$0xff] }
 0xde3   :  { %2812 = vst.msk [vmem:[#allocation2 + $0x18] sm:$0xff] %vm2808_vm3, %v2803_v7  ;;  %v2768_v43 = vmul.f32 2.0, %v2754_v10 }
 0xde4   :  { %v2789_v15 = vpop.xlane.xlu0 %2788 }
 0xde5   :  { %2777 = vst.msk [vmem:[#allocation2 + $0x8] sm:$0xff] %vm2775_vm2, %v2768_v43  ;;  %v2802_v1 = vmul.f32 2.0, %v2789_v15 }
 0xde6   :  { %v2752_v0 = vpop.xlane.xlu1 %2751 }
 0xde7   :  { %2811 = vst.msk [vmem:[#allocation2 + $0x10] sm:$0xff] %vm2808_vm3, %v2802_v1  ;;  %v2767_v59 = vmul.f32 2.0, %v2752_v0  ;;  %v2841_v37 = vld [vmem:[#allocation2 + $0x38] sm:$0xff] }
 0xde8   :  { %v2787_v3 = vpop.xlane.xlu0 %2786  ;;  %3649 = vmatprep.subr.mxu1 %v2841_v37 }
 0xde9   :  { %2776 = vst.msk [vmem:[#allocation2] sm:$0xff] %vm2775_vm2, %v2767_v59  ;;  %v2801_v16 = vmul.f32 2.0, %v2787_v3  ;;  %3650 = vmatpush3.msra.mxu1 %v2841_v37 }
 0xdea   :  { %3651 = vmatprep.subr.mxu1 %v2840_v46  ;;  %v2837_v33 = vld [vmem:[#allocation2 + $0x18] sm:$0xff]  ;;  %v2878_v32 = vpop.permute.xlu1 %2877 }
 0xdeb   :  { %2810 = vst.msk [vmem:[#allocation2 + $0x8] sm:$0xff] %vm2808_vm3, %v2801_v16  ;;  %3652 = vmatpush3.msra.mxu1 %v2840_v46 }
 0xdec   :  { %v2785_v53 = vpop.xlane.xlu0 %2784  ;;  %3653 = vmatprep.subr.mxu1 %v2839_v30 }
 0xded   :  { %v2800_v41 = vmul.f32 2.0, %v2785_v53  ;;  %3654 = vmatpush3.msra.mxu1 %v2839_v30 }
 0xdee   :  { %3655 = vmatprep.subr.mxu1 %v2838_v27  ;;  %v2836_v49 = vld [vmem:[#allocation2 + $0x10] sm:$0xff]  ;;  %v2868_v51 = vpop.permute.xlu1 %2867 }
 0xdef   :  { %2809 = vst.msk [vmem:[#allocation2] sm:$0xff] %vm2808_vm3, %v2800_v41  ;;  %3656 = vmatpush3.msra.mxu1 %v2838_v27 }
 0xdf0   :  { %3657 = vmatprep.subr.mxu1 %v2837_v33 }
 0xdf1   :  { %3658 = vmatpush3.msra.mxu1 %v2837_v33 }
 0xdf2   :  { %3659 = vmatprep.subr.mxu1 %v2836_v49  ;;  %v2835_v55 = vld [vmem:[#allocation2 + $0x8] sm:$0xff]  ;;  %v2863_v38 = vpop.permute.xlu1 %2862 }
 0xdf3   :  { %3660 = vmatpush3.msra.mxu1 %v2836_v49 }
 0xdf4   :  { %3661 = vmatprep.subr.mxu1 %v2835_v55  ;;  %v2873_v54 = vpop.permute.xlu0 %2872 }
 0xdf5   :  { %3662 = vmatpush3.msra.mxu1 %v2835_v55 }
 0xdf6   :  { %v2834_v21 = vld [vmem:[#allocation2] sm:$0xff] }
 0xdf7   :  { %3663 = vmatprep.subr.mxu1 %v2834_v21 }
 0xdf8   :  { %3664 = vmatpush3.msra.mxu1 %v2834_v21 }
 0xdf9   :  { %3666 = vmatmul.mubr.f32.vlgmr.msra.gmra.mxu1 %v2852_v35 }
 0xdfa   :  { %3668 = vmatprep.mubr.f32.mxu1 %v2854_v2 }
 0xdfd   :  { %3669 = vmatmul.mubr.f32.gmra.mxu1 %v2855_v4 }
 0xeb9   :  { %v3667_v36 = vpop.f32.mrf.mxu1 }
 0xeba   :  { %v5490_v13 = vadd.f32 %v3667_v36, %v2868_v51 }
 0xebb   :  { %v2946_v24 = vpop.f32.mrf.mxu1 }
 0xebc   :  { %v5486_v26 = vadd.f32 %v2946_v24, %v2863_v38  ;;  %v2968_v22 = vsel %vm2825_vm1, %v5490_v13, 0.0  ;;  %v2982_v58 = vmul.f32 %v5490_v13, %v5490_v13 }
 0xebd   :  { %v3670_v8 = vpop.f32.mrf.mxu1 }
 0xebe   :  { %v5484_v23 = vadd.f32 %v3670_v8, %v2878_v32  ;;  %v2981_v48 = vmul.f32 %v5486_v26, %v5486_v26  ;;  %v2965_v62 = vsel %vm2825_vm1, %v5486_v26, 0.0  ;;  %v2988_v17 = vsel %vm2825_vm1, %v2982_v58, 0.0 }
 0xebf   :  { %v2956_v40 = vpop.f32.mrf.mxu1 }
 0xec0   :  { %v2974_v20 = vsel %vm2825_vm1, %v5484_v23, 0.0  ;;  %v5492_v31 = vadd.f32 %v2956_v40, %v2873_v54  ;;  %v2985_v14 = vsel %vm2825_vm1, %v2981_v48, 0.0  ;;  %v2984_v18 = vmul.f32 %v5484_v23, %v5484_v23 }
 0xec1   :  { %2975 = vadd.xlane.f32.xlu1 %v2974_v20 }
 0xec2   :  { %v2971_v19 = vsel %vm2825_vm1, %v5492_v31, 0.0  ;;  %v2994_v50 = vsel %vm2825_vm1, %v2984_v18, 0.0  ;;  %v2983_v52 = vmul.f32 %v5492_v31, %v5492_v31 }
 0xec3   :  { %2972 = vadd.xlane.f32.xlu0 %v2971_v19 }
 0xec4   :  { %v2991_v9 = vsel %vm2825_vm1, %v2983_v52, 0.0 }
 0xec5   :  { %2969 = vadd.xlane.f32.xlu1 %v2968_v22 }
 0xec7   :  { %2986 = vadd.xlane.f32.xlu0 %v2985_v14  ;;  %v5655_v14 = vmov 2  }
 0xec9   :  { %2966 = vadd.xlane.f32.xlu1 %v2965_v62 }
 0xecd   :  { %2995 = vadd.xlane.f32.xlu1 %v2994_v50 }
 0xed1   :  { %2992 = vadd.xlane.f32.xlu1 %v2991_v9 }
 0xed5   :  { %2989 = vadd.xlane.f32.xlu1 %v2988_v17 }
 0xf4a   :  { %v2976_v6 = vpop.xlane.xlu1 %2975 }
 0xf4b   :  { %v2980_v47 = vmul.f32 0.5, %v2976_v6 }
 0xf4c   :  { %v2973_v44 = vpop.xlane.xlu0 %2972 }
 0xf4d   :  { %v3004_v56 = vmul.f32 %v2980_v47, %v2980_v47  ;;  %v2979_v7 = vmul.f32 0.5, %v2973_v44  ;;  %v5530_v44 = vld [vmem:[%s5598_s6 + $0x8] sm:$0xff] }
 0xf4e   :  { %v2970_v45 = vpop.xlane.xlu1 %2969  ;;  %3679 = vmatprep.mubr.msk.f32.mxu1 %vm3109_vm4, %v5530_v44 }
 0xf4f   :  { %v2978_v59 = vmul.f32 0.5, %v2970_v45  ;;  %v3003_v37 = vmul.f32 %v2979_v7, %v2979_v7  ;;  %v5656_v45 = vmov 3  }
 0xf50   :  { %v2987_v28 = vpop.xlane.xlu0 %2986 }
 0xf51   :  { %v2997_v43 = vmul.f32 0.5, %v2987_v28  ;;  %v3002_v27 = vmul.f32 %v2978_v59, %v2978_v59 }
 0xf52   :  { %v2967_v39 = vpop.xlane.xlu1 %2966 }
 0xf53   :  { %v2977_v29 = vmul.f32 0.5, %v2967_v39 }
 0xf55   :  { %v3001_v11 = vmul.f32 %v2977_v29, %v2977_v29 }
 0xf56   :  { %v2996_v57 = vpop.xlane.xlu1 %2995 }
 0xf57   :  { %v3000_v10 = vmul.f32 0.5, %v2996_v57  ;;  %v3005_v1 = vsub.f32 %v2997_v43, %v3001_v11 }
 0xf59   :  { %v3008_v15 = vsub.f32 %v3000_v10, %v3004_v56  ;;  %v3009_v53 = vmax.f32 %v3005_v1, 0.0 }
 0xf5a   :  { %v2993_v0 = vpop.xlane.xlu1 %2992 }
 0xf5b   :  { %v3012_v3 = vmax.f32 %v3008_v15, 0.0  ;;  %v2999_v16 = vmul.f32 0.5, %v2993_v0  ;;  %v3013_v35 = vadd.f32 1e-05, %v3009_v53 }
 0xf5d   :  { %v3016_v46 = vadd.f32 1e-05, %v3012_v3  ;;  %v3007_v30 = vsub.f32 %v2999_v16, %v3003_v37 }
 0xf5e   :  { %v2990_v41 = vpop.xlane.xlu1 %2989 }
 0xf5f   :  { %3905 = vrsqrt.f32 %v3016_v46  ;;  %v3011_v33 = vmax.f32 %v3007_v30, 0.0  ;;  %v2998_v49 = vmul.f32 0.5, %v2990_v41  ;;  %v2853_v30 = vld [vmem:[%s5598_s6 + $0x18] sm:$0xff]  ;;  %s3955_s6 = smov 96  }
 0xf61   :  { %v3015_v55 = vadd.f32 1e-05, %v3011_v33  ;;  %v3006_v21 = vsub.f32 %v2998_v49, %v3002_v27 }
 0xf63   :  { %3907 = vrsqrt.f32 %v3015_v55  ;;  %v3010_v2 = vmax.f32 %v3006_v21, 0.0 }
 0xf64   :  { %3909 = vrsqrt.f32 %v3013_v35 }
 0xf65   :  { %v3014_v4 = vadd.f32 1e-05, %v3010_v2 }
 0xf67   :  { %3911 = vrsqrt.f32 %v3014_v4 }
 0xf6c   :  { %v3906_v32 = vpop.eup %3905 }
 0xf6d   :  { %v3024_v51 = vmul.f32 %v3906_v32, %v5436_v25 }
 0xf6f   :  { %v3028_v36 = vmul.f32 %v3024_v51, %v2980_v47 }
 0xf70   :  { %v3908_v24 = vpop.eup %3907 }
 0xf71   :  { %3039 = vrot.lane.b32.xlu1 %v3028_v36, %s3943_s0  ;;  %v3023_v38 = vmul.f32 %v3908_v24, %v5442_v12  ;;  %v3910_v8 = vpop.eup %3909 }
 0xf72   :  { %v3021_v48 = vmul.f32 %v3910_v8, %v5454_v42 }
 0xf73   :  { %v3027_v54 = vmul.f32 %v3023_v38, %v2979_v7 }
 0xf74   :  { %v3912_v40 = vpop.eup %3911  ;;  %v3025_v22 = vmul.f32 %v3021_v48, %v2977_v29 }
 0xf75   :  { %3037 = vrot.lane.b32.xlu0 %v3027_v54, %s3943_s0  ;;  %v3022_v20 = vmul.f32 %v3912_v40, %v5447_v63 }
 0xf77   :  { %v3026_v19 = vmul.f32 %v3022_v20, %v2978_v59 }
 0xf79   :  { %3066 = vperm.xlu0 %3775, %v3024_v51   ;;  %3035 = vrot.lane.b32.xlu1 %v3026_v19, %s3943_s0 }
 0xf7d   :  { %3056 = vperm.xlu0 %3775, %v3022_v20   ;;  %3033 = vrot.lane.b32.xlu1 %v3025_v22, %s3943_s0 }
 0xf81   :  { %3051 = vperm.xlu0 %3775, %v3021_v48   ;;  %3061 = vperm.xlu1 %3776, %v3023_v38  }
 0xf85   :  { %3777 = vset.pattern.permute.xlu1 %v5655_v14  ;;  %3778 = vset.pattern.permute.xlu0 %v5655_v14 }
 0xfe3   :  { %v3040_v62 = vpop.permute.xlu1 %3039 }
 0xfe4   :  { %v3048_v18 = vsub.f32 %v5436_v25, %v3040_v62  ;;  %v5657_v25 = vmov 5  }
 0xfe6   :  { %3090 = vperm.xlu1 %3777, %v3048_v18  }
 0xfe7   :  { %v3038_v50 = vpop.permute.xlu0 %3037 }
 0xfe8   :  { %v3047_v52 = vsub.f32 %v5442_v12, %v3038_v50  ;;  %v5658_v12 = vmov 4  }
 0xfea   :  { %3085 = vperm.xlu1 %3777, %v3047_v52  }
 0xfeb   :  { %v3036_v9 = vpop.permute.xlu1 %3035 }
 0xfec   :  { %v3046_v58 = vsub.f32 %v5447_v63, %v3036_v9 }
 0xfee   :  { %3080 = vperm.xlu1 %3777, %v3046_v58  }
 0xfef   :  { %v3034_v17 = vpop.permute.xlu1 %3033 }
 0xff0   :  { %v3045_v6 = vsub.f32 %v5454_v42, %v3034_v17 }
 0xff2   :  { %3075 = vperm.xlu0 %3778, %v3045_v6   ;;  %3779 = vset.pattern.permute.xlu1 %v5656_v45 }
 0xff3   :  { %3106 = vperm.xlu1 %3779, %v5447_v63  }
 0xff4   :  { %v3067_v39 = vpop.permute.xlu0 %3066 }
 0xff5   :  { %v3072_v29 = vmul.f32 %v3067_v39, %v5484_v23 }
 0xff6   :  { %3781 = vset.pattern.permute.xlu0 %v5657_v25 }
 0xff7   :  { %3102 = vperm.xlu1 %3779, %v5454_v42  }
 0xff8   :  { %v3057_v57 = vpop.permute.xlu0 %3056 }
 0xff9   :  { %v3070_v15 = vmul.f32 %v3057_v57, %v5490_v13 }
 0xffb   :  { %3780 = vset.pattern.permute.xlu1 %v5658_v12 }
 0xffc   :  { %v3062_v47 = vpop.permute.xlu1 %3061  ;;  %v3052_v0 = vpop.permute.xlu0 %3051 }
 0xffd   :  { %v3071_v56 = vmul.f32 %v3062_v47, %v5492_v31  ;;  %v3069_v23 = vmul.f32 %v3052_v0, %v5486_v26  ;;  %v3953_v47 = vmov 0.0  }
0x1061   :  { %v3091_v28 = vpop.permute.xlu1 %3090 }
0x1062   :  { %v3096_v11 = vadd.f32 %v3091_v28, %v3072_v29 }
0x1064   :  { %v3100_v7 = vmax.f32 %v3096_v11, 0.0 }
0x1065   :  { %v3086_v10 = vpop.permute.xlu1 %3085 }
0x1066   :  { %v3095_v43 = vadd.f32 %v3086_v10, %v3071_v56  ;;  %3671 = vmatprep.subr.mxu1 %v3100_v7 }
0x1067   :  { %3672 = vmatpush3.msra.mxu1 %v3100_v7 }
0x1068   :  { %v3099_v1 = vmax.f32 %v3095_v43, 0.0 }
0x1069   :  { %v3081_v59 = vpop.permute.xlu1 %3080 }
0x106a   :  { %v3094_v37 = vadd.f32 %v3081_v59, %v3070_v15  ;;  %3673 = vmatprep.subr.mxu1 %v3099_v1 }
0x106b   :  { %3674 = vmatpush3.msra.mxu1 %v3099_v1 }
0x106c   :  { %v3098_v3 = vmax.f32 %v3094_v37, 0.0 }
0x106d   :  { %v3076_v16 = vpop.permute.xlu0 %3075 }
0x106e   :  { %v3093_v46 = vadd.f32 %v3076_v16, %v3069_v23  ;;  %3675 = vmatprep.subr.mxu1 %v3098_v3  ;;  %v3107_v13 = vpop.permute.xlu1 %3106 }
0x106f   :  { %3676 = vmatpush3.msra.mxu1 %v3098_v3 }
0x1070   :  { %v3097_v31 = vmax.f32 %v3093_v46, 0.0 }
0x1072   :  { %3677 = vmatprep.subr.mxu1 %v3097_v31  ;;  %v3103_v33 = vpop.permute.xlu1 %3102 }
0x1073   :  { %3678 = vmatpush3.msra.mxu1 %v3097_v31 }
0x1074   :  { %3680 = vmatmul.mubr.msk.f32.vlgmr.msra.gmra.mxu1 %vm3109_vm4, %v2853_v30  ;;  %3682 = vmatprep.subr.mxu1 %v3953_v47 }
0x1075   :  { %3686 = vmatprep.mubr.msk.f32.mxu1 %vm3954_vm5, %v3953_v47 }
0x1134   :  { %v3681_v53 = vpop.f32.mrf.mxu1 }
0x1135   :  { %v3188_v41 = vadd.f32 %v3681_v53, %v3107_v13 }
0x1136   :  { %v3182_v27 = vpop.f32.mrf.mxu1 }
0x1137   :  { %v3194_v26 = vsel %vm2825_vm1, %v3188_v41, 0.0  ;;  %v3183_v49 = vadd.f32 %v3182_v27, %v3103_v33  ;;  %v3200_v55 = vmul.f32 %v3188_v41, %v3188_v41 }
0x1138   :  { %3195 = vadd.xlane.f32.xlu0 %v3194_v26 }
0x1139   :  { %v3191_v21 = vsel %vm2825_vm1, %v3183_v49, 0.0  ;;  %v3204_v35 = vsel %vm2825_vm1, %v3200_v55, 0.0  ;;  %v3199_v2 = vmul.f32 %v3183_v49, %v3183_v49  ;;  %v5659_v55 = vmov 10  }
0x113a   :  { %3192 = vadd.xlane.f32.xlu1 %v3191_v21 }
0x113b   :  { %v3201_v4 = vsel %vm2825_vm1, %v3199_v2, 0.0 }
0x113c   :  { %3205 = vadd.xlane.f32.xlu0 %v3204_v35 }
0x1140   :  { %3202 = vadd.xlane.f32.xlu0 %v3201_v4 }
0x11c1   :  { %v3196_v32 = vpop.xlane.xlu0 %3195 }
0x11c2   :  { %v3198_v51 = vmul.f32 0.5, %v3196_v32 }
0x11c3   :  { %v3193_v36 = vpop.xlane.xlu1 %3192 }
0x11c4   :  { %v3210_v38 = vmul.f32 %v3198_v51, %v3198_v51  ;;  %v3197_v54 = vmul.f32 0.5, %v3193_v36 }
0x11c5   :  { %v3206_v24 = vpop.xlane.xlu0 %3205 }
0x11c6   :  { %v3208_v8 = vmul.f32 0.5, %v3206_v24  ;;  %v3209_v48 = vmul.f32 %v3197_v54, %v3197_v54 }
0x11c8   :  { %v3212_v40 = vsub.f32 %v3208_v8, %v3210_v38 }
0x11c9   :  { %v3203_v20 = vpop.xlane.xlu0 %3202 }
0x11ca   :  { %v3214_v19 = vmax.f32 %v3212_v40, 0.0  ;;  %v3207_v22 = vmul.f32 0.5, %v3203_v20 }
0x11cc   :  { %v3216_v14 = vadd.f32 1e-05, %v3214_v19  ;;  %v3211_v62 = vsub.f32 %v3207_v22, %v3209_v48 }
0x11ce   :  { %3913 = vrsqrt.f32 %v3216_v14  ;;  %v3213_v18 = vmax.f32 %v3211_v62, 0.0 }
0x11d0   :  { %v3215_v50 = vadd.f32 1e-05, %v3213_v18 }
0x11d2   :  { %3915 = vrsqrt.f32 %v3215_v50 }
0x11db   :  { %v3914_v52 = vpop.eup %3913 }
0x11dc   :  { %v3220_v9 = vmul.f32 %v3914_v52, %v5447_v63 }
0x11de   :  { %v3222_v58 = vmul.f32 %v3220_v9, %v3198_v51 }
0x11df   :  { %v3916_v17 = vpop.eup %3915 }
0x11e0   :  { %3227 = vrot.lane.b32.xlu1 %v3222_v58, %s3943_s0  ;;  %v3219_v6 = vmul.f32 %v3916_v17, %v5454_v42 }
0x11e2   :  { %v3221_v45 = vmul.f32 %v3219_v6, %v3197_v54 }
0x11e4   :  { %3240 = vperm.xlu1 %3780, %v3220_v9   ;;  %3225 = vrot.lane.b32.xlu0 %v3221_v45, %s3943_s0 }
0x11e8   :  { %3235 = vperm.xlu1 %3780, %v3219_v6  }
0x11ec   :  { %3782 = vset.pattern.permute.xlu1 %v5657_v25 }
0x1252   :  { %v3228_v12 = vpop.permute.xlu1 %3227 }
0x1253   :  { %v3232_v39 = vsub.f32 %v5447_v63, %v3228_v12 }
0x1255   :  { %3252 = vperm.xlu0 %3781, %v3232_v39  }
0x1256   :  { %v3226_v29 = vpop.permute.xlu0 %3225 }
0x1257   :  { %v3231_v28 = vsub.f32 %v5454_v42, %v3226_v29 }
0x1259   :  { %3247 = vperm.xlu1 %3782, %v3231_v28   ;;  %3783 = vset.pattern.permute.xlu0 %v5641_v5 }
0x125a   :  { %3260 = vperm.xlu0 %3783, %v5454_v42  }
0x125d   :  { %3263 = vrot.lane.b32.xlu1 %v5530_v44, %s3955_s6 }
0x125e   :  { %3784 = vset.pattern.permute.xlu0 %v5640_v60  ;;  %3785 = vset.pattern.permute.xlu1 %v3951_v61 }
0x125f   :  { %v3241_v63 = vpop.permute.xlu1 %3240 }
0x1260   :  { %v3244_v25 = vmul.f32 %v3241_v63, %v3188_v41 }
0x1263   :  { %v3236_v11 = vpop.permute.xlu1 %3235 }
0x1264   :  { %v3243_v7 = vmul.f32 %v3236_v11, %v3183_v49 }
0x12d0   :  { %v3253_v57 = vpop.permute.xlu0 %3252 }
0x12d1   :  { %v3256_v56 = vadd.f32 %v3253_v57, %v3244_v25 }
0x12d3   :  { %v3258_v5 = vmax.f32 %v3256_v56, 0.0 }
0x12d4   :  { %v3248_v10 = vpop.permute.xlu1 %3247 }
0x12d5   :  { %v3255_v43 = vadd.f32 %v3248_v10, %v3243_v7  ;;  %3683 = vmatpush3.msra.mxu1 %v3258_v5  ;;  %v3261_v60 = vpop.permute.xlu0 %3260 }
0x12d6   :  { %3684 = vmatprep.subr.mxu1 %v3953_v47 }
0x12d7   :  { %v3257_v15 = vmax.f32 %v3255_v43, 0.0 }
0x12d8   :  { %v3264_v1 = vpop.permute.xlu1 %3263 }
0x12d9   :  { %3685 = vmatpush3.msra.mxu1 %v3257_v15 }
0x12da   :  { %3687 = vmatmul.mubr.msk.f32.vlgmr.msra.gmra.mxu1 %vm3265_vm6, %v3264_v1  ;;  %3689 = vmatprep.subr.mxu1 %v3953_v47 }
0x12db   :  { %3691 = vmatprep.mubr.msk.f32.mxu1 %vm3954_vm5, %v3953_v47 }
0x139a   :  { %v3334_v61 = vpop.f32.mrf.mxu1 }
0x139b   :  { %v3335_v0 = vadd.f32 %v3334_v61, %v3261_v60 }
0x139c   :  { %v3688_v59 = vpop.f32.mrf.mxu1 }
0x139d   :  { %v3338_v37 = vsel %vm2825_vm1, %v3335_v0, 0.0  ;;  %v3342_v23 = vmul.f32 %v3335_v0, %v3335_v0 }
0x139e   :  { %3339 = vadd.xlane.f32.xlu1 %v3338_v37 }
0x139f   :  { %v3343_v3 = vsel %vm2825_vm1, %v3342_v23, 0.0 }
0x13a0   :  { %3344 = vadd.xlane.f32.xlu0 %v3343_v3 }
0x1427   :  { %v3340_v16 = vpop.xlane.xlu1 %3339 }
0x1428   :  { %v3341_v46 = vmul.f32 0.5, %v3340_v16 }
0x1429   :  { %v3345_v31 = vpop.xlane.xlu0 %3344 }
0x142a   :  { %v3347_v30 = vmul.f32 %v3341_v46, %v3341_v46  ;;  %v3346_v13 = vmul.f32 0.5, %v3345_v31 }
0x142c   :  { %v3348_v53 = vsub.f32 %v3346_v13, %v3347_v30 }
0x142e   :  { %v3349_v41 = vmax.f32 %v3348_v53, 0.0 }
0x1430   :  { %v3350_v27 = vadd.f32 1e-05, %v3349_v41 }
0x1432   :  { %3917 = vrsqrt.f32 %v3350_v27 }
0x143f   :  { %v3918_v33 = vpop.eup %3917 }
0x1440   :  { %v3352_v26 = vmul.f32 %v3918_v33, %v5454_v42 }
0x1442   :  { %3361 = vperm.xlu0 %3784, %v3352_v26   ;;  %v3353_v49 = vmul.f32 %v3352_v26, %v3341_v46 }
0x1444   :  { %3355 = vrot.lane.b32.xlu1 %v3353_v49, %s3943_s0 }
0x1446   :  { %3788 = vset.pattern.permute.xlu0 %v5659_v55 }
0x14b6   :  { %v3356_v21 = vpop.permute.xlu1 %3355 }
0x14b7   :  { %v3358_v35 = vsub.f32 %v5454_v42, %v3356_v21 }
0x14b9   :  { %3367 = vperm.xlu1 %3785, %v3358_v35  }
0x14bd   :  { %3376 = vrot.lane.b32.xlu1 %v5530_v44, %s3956_s17  ;;  %v3362_v2 = vpop.permute.xlu0 %3361 }
0x14be   :  { %3786 = vset.pattern.permute.xlu1 %v3952_v34  ;;  %v3364_v4 = vmul.f32 %v3362_v2, %v3335_v0 }
0x14c1   :  { %3475 = vrot.lane.b32.xlu1 %v5530_v44, %s3957_s18 }
0x14c5   :  { %3373 = vperm.xlu1 %3786, %v5454_v42  }
0x14c9   :  { %3787 = vset.pattern.permute.xlu1 %v5659_v55 }
0x14ca   :  { %3472 = vperm.xlu1 %3787, %v5454_v42  }
0x1534   :  { %v3368_v32 = vpop.permute.xlu1 %3367 }
0x1535   :  { %v3370_v51 = vadd.f32 %v3368_v32, %v3364_v4 }
0x1537   :  { %v3371_v36 = vmax.f32 %v3370_v51, 0.0 }
0x1538   :  { %v3377_v24 = vpop.permute.xlu1 %3376 }
0x1539   :  { %3690 = vmatpush3.msra.mxu1 %v3371_v36 }
0x153a   :  { %3692 = vmatmul.mubr.msk.f32.vlgmr.msra.gmra.mxu1 %vm3378_vm7, %v3377_v24  ;;  %3694 = vmatprep.subr.mxu1 %v3953_v47 }
0x153b   :  { %3695 = vmatpush3.msra.mxu1 %v3371_v36  ;;  %3696 = vmatprep.mubr.msk.f32.mxu1 %vm3954_vm5, %v3953_v47 }
0x153c   :  { %v3476_v34 = vpop.permute.xlu1 %3475 }
0x153e   :  { %3697 = vmatmul.mubr.msk.f32.vlgmr.msra.gmra.mxu1 %vm3378_vm7, %v3476_v34 }
0x1540   :  { %v3374_v44 = vpop.permute.xlu1 %3373 }
0x1545   :  { %v3473_v54 = vpop.permute.xlu1 %3472 }
0x15fa   :  { %v3447_v38 = vpop.f32.mrf.mxu1 }
0x15fb   :  { %v3448_v42 = vadd.f32 %v3447_v38, %v3374_v44 }
0x15fc   :  { %v3693_v8 = vpop.f32.mrf.mxu1 }
0x15fd   :  { %v3451_v40 = vmul.f32 %v3448_v42, %v3448_v42 }
0x15fe   :  { %v3545_v20 = vpop.f32.mrf.mxu1 }
0x15ff   :  { %v3453_v19 = vsel %vm3452_vm8, %v3451_v40, 0.0  ;;  %v3546_v48 = vadd.f32 %v3545_v20, %v3473_v54 }
0x1600   :  { %v3454_v22 = vrot.slane %v3453_v19, 4  ;;  %v3698_v14 = vpop.f32.mrf.mxu1 }
0x1601   :  { %3550 = vst.msk [vmem:[%s5600_s9] sm:$0x7] %vm3549_vm9, %v3546_v48 }
0x1602   :  { %v3455_v62 = vadd.f32 %v3454_v22, %v3453_v19 }
0x1604   :  { %v3456_v18 = vrot.slane %v3455_v62, 2 }
0x1606   :  { %v3457_v50 = vadd.f32 %v3456_v18, %v3455_v62 }
0x1608   :  { %v3458_v52 = vrot.slane %v3457_v50, 1 }
0x160a   :  { %v3459_v9 = vadd.f32 %v3458_v52, %v3457_v50 }
0x160c   :  { %3919 = vrsqrt.f32 %v3459_v9  ;;  %vm3462_vm10 = vcmp.eq.f32.partialorder %v3459_v9, inf  ;;  %v3465_v6 = vand.u32 2147483648, %v3459_v9  ;;  %vm3464_vm11 = vcmp.eq.f32.partialorder %v3459_v9, 0.0 }
0x1619   :  { %v3920_v58 = vpop.eup %3919 }
0x161a   :  { %v3461_v17 = vmul.f32 %v3920_v58, %v3459_v9 }
0x161c   :  { %v3463_v45 = vsel %vm3462_vm10, %v3459_v9, %v3461_v17 }
0x161d   :  { %v3466_v12 = vsel %vm3464_vm11, %v3465_v6, %v3463_v45 }
0x161e   :  { %v3467_v39 = vmax.f32 %v3466_v12, 1e-12 }
0x1620   :  { %3921 = vrcp.f32 %v3467_v39 }
0x162d   :  { %v3922_v47 = vpop.eup %3921 }
0x162e   :  { %v3469_v29 = vmul.f32 %v3922_v47, %v3448_v42 }
0x1630   :  { %3470 = vst.msk [vmem:[%s5601_s8] sm:$0xf] %vm3452_vm8, %v3469_v29 }

</bundles_post_ra>
